<compile_context>
chip_gen: v7x
topology: tpu7x:2x2x1
jax: 0.10.0
libtpu: 0.0.40
codegen_flags: <defaults>
</compile_context>

<pallas_src>
import functools
import math

import jax
import jax.numpy as jnp
from jax.experimental import pallas as pl
from jax.experimental.pallas import tpu as pltpu

_VMEM = pl.BlockSpec(memory_space=pltpu.MemorySpace.VMEM)

# Small synthetic config (stand-in for 768-hidden / 12-layer bert-base-chinese).
# hidden=256 with num_heads=2 gives Dh=128, so every per-head slice is
# lane-aligned (no 64-lane slicing / relayouts — review item).
CFG = dict(hidden=256, num_heads=2, num_layers=2, ffn=512,
           vocab=100, type_vocab=2, max_pos=32, seq=8, seg_len=2)

LN_EPS_BERT = 1e-12   # BertLayerNorm eps
LN_EPS_HEAD = 1e-5    # torch nn.LayerNorm default
D3_PAD = 128          # pad the 1-wide regression output to a full lane tile

PER_LAYER = 12        # params per encoder layer in the flat argument list
N_HEAD_PARAMS = 10    # params of the regression head


# ---------------------------- in-kernel helpers ----------------------------

def _layernorm(h, gamma, beta, eps):
    mean = jnp.mean(h, axis=-1, keepdims=True)
    c = h - mean
    var = jnp.mean(c * c, axis=-1, keepdims=True)
    return c * jax.lax.rsqrt(var + eps) * gamma + beta


def _gelu(x):
    # TODO(synk): HF BERT default is exact erf GELU; tanh approximation kept to
    # stay on primitives guaranteed to lower in Mosaic (still EUP-resident).
    return 0.5 * x * (1.0 + jnp.tanh(
        0.7978845608028654 * (x + 0.044715 * x * x * x)))


# ---------------------------- fused forward kernel ----------------------------

def _fused_forward_kernel(*refs, num_layers, num_heads, batch, seg_len, seq, hidden):
    """Embedding-LN + all encoder layers + CLS gather + regression head, in VMEM."""
    o_ref = refs[-1]
    in_refs = refs[:-1]
    x_ref, mask_ref, eg_ref, eb_ref = in_refs[:4]
    lref = in_refs[4:4 + num_layers * PER_LAYER]
    (d1w_r, d1b_r, hg1_r, hb1_r, d2w_r, d2b_r,
     hg2_r, hb2_r, d3w_r, d3b_r) = in_refs[4 + num_layers * PER_LAYER:]

    B, SG, S, H, nH = batch, seg_len, seq, hidden, num_heads
    BSG = B * SG
    T = BSG * S
    Dh = H // nH

    # ---- embedding LayerNorm over all tokens at once ([T, H] token-parallel) ----
    x = _layernorm(x_ref[...].reshape(T, H), eg_ref[...], eb_ref[...], LN_EPS_BERT)

    # Compact additive mask; broadcast ONCE (hoisted out of the head loop).
    mask_b = jnp.broadcast_to(mask_ref[...], (BSG, S, S))

    # ---- encoder layers (static unroll; both layers' weights are resident) ----
    for li in range(num_layers):
        (wqkv_r, bqkv_r, wo_r, bo_r, g1_r, be1_r,
         wff1_r, bff1_r, wff2_r, bff2_r, g2_r, be2_r) = \
            lref[li * PER_LAYER:(li + 1) * PER_LAYER]

        # Fused QKV projection over ALL BSG*S tokens: one [T,H] @ [H,3H] matmul.
        # (1/sqrt(Dh) scale is folded into the Q columns/bias at init.)
        qkv = jnp.dot(x.astype(jnp.bfloat16), wqkv_r[...],
                      preferred_element_type=jnp.float32) + bqkv_r[...]   # [T,3H] f32
        # Single bf16 cast; all per-head q/k/v slices come from this copy.
        qkv_bf = qkv.reshape(BSG, S, 3 * H).astype(jnp.bfloat16)

        wo = wo_r[...]
        attn = None
        for h in range(nH):                       # static unroll, Dh=128-aligned slices
            qc = (0 * nH + h) * Dh
            kc = (1 * nH + h) * Dh
            vc = (2 * nH + h) * Dh
            q = qkv_bf[:, :, qc:qc + Dh]          # [BSG, S, Dh] bf16
            k = qkv_bf[:, :, kc:kc + Dh]
            v = qkv_bf[:, :, vc:vc + Dh]
            s = jnp.einsum('bqd,bkd->bqk', q, k,
                           preferred_element_type=jnp.float32)            # [BSG,S,S]
            s = s + mask_b
            s = s - jnp.max(s, axis=-1, keepdims=True)
            p = jnp.exp(s)
            p = p * pl.reciprocal(jnp.sum(p, axis=-1, keepdims=True), approx=True)
            ctx = jnp.einsum('bqk,bkd->bqd', p.astype(jnp.bfloat16), v,
                             preferred_element_type=jnp.float32)          # [BSG,S,Dh]
            # Fold this head directly through its row block of Wo (no concat).
            contrib = jnp.dot(ctx.reshape(T, Dh).astype(jnp.bfloat16),
                              wo[h * Dh:(h + 1) * Dh, :],
                              preferred_element_type=jnp.float32)          # [T, H]
            attn = contrib if attn is None else attn + contrib
        attn = attn + bo_r[...]
        h1 = _layernorm(attn + x, g1_r[...], be1_r[...], LN_EPS_BERT)

        ff = _gelu(jnp.dot(h1.astype(jnp.bfloat16), wff1_r[...],
                           preferred_element_type=jnp.float32) + bff1_r[...])
        ff2 = jnp.dot(ff.astype(jnp.bfloat16), wff2_r[...],
                      preferred_element_type=jnp.float32) + bff2_r[...]
        x = _layernorm(ff2 + h1, g2_r[...], be2_r[...], LN_EPS_BERT)

    # ---- CLS extraction + regression head (fused; no extra pallas_call) ----
    # Rows are batch-major (row = b*SG + seg), so per-segment CLS row-blocks of
    # d1w reproduce torch.cat(out_l, 1).view(B, -1) @ W1 without a sublane->lane
    # relayout of the CLS matrix.
    x4 = x.reshape(B, SG, S, H)
    d1w = d1w_r[...]
    hacc = None
    for j in range(SG):                           # static unroll over segments
        cls_j = x4[:, j, 0, :]                    # [B, H] CLS hidden state of segment j
        c = jnp.dot(cls_j.astype(jnp.bfloat16), d1w[j * H:(j + 1) * H, :],
                    preferred_element_type=jnp.float32)
        hacc = c if hacc is None else hacc + c
    hh = jnp.maximum(hacc + d1b_r[...], 0.0)
    hh = _layernorm(hh, hg1_r[...], hb1_r[...], LN_EPS_HEAD)
    hh = jnp.maximum(jnp.dot(hh.astype(jnp.bfloat16), d2w_r[...],
                             preferred_element_type=jnp.float32) + d2b_r[...], 0.0)
    hh = _layernorm(hh, hg2_r[...], hb2_r[...], LN_EPS_HEAD)
    o_ref[...] = jnp.dot(hh.astype(jnp.bfloat16), d3w_r[...],
                         preferred_element_type=jnp.float32) + d3b_r[...]   # [B,128]


# ---------------------------- parameters ----------------------------

def init_params(key, cfg):
    H, FF, SG, nH = cfg["hidden"], cfg["ffn"], cfg["seg_len"], cfg["num_heads"]
    Dh = H // nH
    std = 0.02
    keys = iter(jax.random.split(key, 64))

    def wf(din, dout):
        return jax.random.normal(next(keys), (din, dout), jnp.float32) * std

    def b(dout):
        return jnp.zeros((1, dout), jnp.float32)

    def ln(d=H):
        return (jnp.ones((1, d), jnp.float32), jnp.zeros((1, d), jnp.float32))

    p = {}
    p["word_emb"] = jax.random.normal(next(keys), (cfg["vocab"], H), jnp.float32) * std
    p["pos_emb"] = jax.random.normal(next(keys), (cfg["max_pos"], H), jnp.float32) * std
    p["type_emb"] = jax.random.normal(next(keys), (cfg["type_vocab"], H), jnp.float32) * std
    p["emb_ln"] = ln()

    scale = 1.0 / math.sqrt(Dh)
    layers = []
    for _ in range(cfg["num_layers"]):
        # fused QKV: columns [0:H]=Q (head-major), [H:2H]=K, [2H:3H]=V.
        wqkv = wf(H, 3 * H).at[:, :H].multiply(scale)      # fold 1/sqrt(Dh) into Q
        bqkv = b(3 * H).at[:, :H].multiply(scale)
        layers.append((
            wqkv.astype(jnp.bfloat16), bqkv,               # fused QKV
            wf(H, H).astype(jnp.bfloat16), b(H),           # attention output proj
            *ln(),                                         # post-attention LN
            wf(H, FF).astype(jnp.bfloat16), b(FF),         # FFN intermediate
            wf(FF, H).astype(jnp.bfloat16), b(H),          # FFN output
            *ln(),                                         # post-FFN LN
        ))
    p["layers"] = layers

    # regression head: Linear(H*SG, H) -> ReLU -> LN -> Linear(H,H) -> ReLU -> LN -> Linear(H,1)
    p["d1"] = (wf(H * SG, H).astype(jnp.bfloat16), b(H))   # row blocks = segments
    p["hln1"] = ln()
    p["d2"] = (wf(H, H).astype(jnp.bfloat16), b(H))
    p["hln2"] = ln()
    # final Linear(H, 1): pad output to 128 lanes for a lane-dense store, slice in JAX.
    w3 = jnp.zeros((H, D3_PAD), jnp.float32).at[:, :1].set(wf(H, 1))
    p["d3"] = (w3.astype(jnp.bfloat16), jnp.zeros((1, D3_PAD), jnp.float32))
    return p


# ---------------------------- model forward ----------------------------

def bert_regression_forward(params, cfg, input_ids, token_type_ids, attention_mask):
    B, SG, S = input_ids.shape
    H = cfg["hidden"]
    BSG = B * SG

    # Batch-major flatten (row = b*SG + seg): encoder math is per-sequence so
    # the ordering is free, and it makes the final CLS concat (torch.cat over
    # segments then .view(batch, -1)) a plain per-segment row-block layout.
    ids = input_ids.reshape(BSG, S)
    tts = token_type_ids.reshape(BSG, S)
    am = attention_mask.reshape(BSG, S)

    # embeddings (gathers stay in plain JAX)
    we = jnp.take(params["word_emb"], ids, axis=0)            # [BSG,S,H]
    pe = params["pos_emb"][:S][None]                          # [1,S,H]
    te = jnp.take(params["type_emb"], tts, axis=0)            # [BSG,S,H]
    x = we + pe + te                                          # LN happens in-kernel

    # compact additive mask, broadcast to [S,S] inside the kernel
    mask = ((1.0 - am.astype(jnp.float32)) * -10000.0).reshape(BSG, 1, S)

    flat = [x, mask, *params["emb_ln"]]
    for lp in params["layers"]:
        flat.extend(lp)
    flat.extend([*params["d1"], *params["hln1"],
                 *params["d2"], *params["hln2"], *params["d3"]])

    # Single fused pallas_call; no grid (everything fits in VMEM), so there is
    # no double-buffering concern for the constant weights either.
    out = pl.pallas_call(
        functools.partial(
            _fused_forward_kernel,
            num_layers=cfg["num_layers"], num_heads=cfg["num_heads"],
            batch=B, seg_len=SG, seq=S, hidden=H),
        out_shape=jax.ShapeDtypeStruct((B, D3_PAD), jnp.float32),
        in_specs=[_VMEM] * len(flat),
        out_specs=_VMEM,
    )(*flat)
    return out[:, :1]                                         # only lane 0 is real


# ---------------------------- main ----------------------------

if __name__ == "__main__":
    cfg = CFG
    key = jax.random.PRNGKey(0)
    pkey, ikey, tkey = jax.random.split(key, 3)
    params = init_params(pkey, cfg)

    B, SG, S = 2, cfg["seg_len"], cfg["seq"]
    input_ids = jax.random.randint(ikey, (B, SG, S), 0, cfg["vocab"], dtype=jnp.int32)
    token_type_ids = jax.random.randint(tkey, (B, SG, S), 0, cfg["type_vocab"],
                                        dtype=jnp.int32)
    attention_mask = jnp.ones((B, SG, S), jnp.int32).at[:, :, -2:].set(0)

    fwd = jax.jit(lambda p, a, b, c: bert_regression_forward(p, cfg, a, b, c))
    out = fwd(params, input_ids, token_type_ids, attention_mask)
    out = jax.block_until_ready(out)
    assert out.shape == (B, 1), out.shape
    assert bool(jnp.isfinite(out).all()), "non-finite output"
    print("KERNEL_OK")
</pallas_src>

<mosaic_0001>
module attributes {stable_mosaic.version = 11 : i64} {
  func.func @_fused_forward_kernel(%arg0: memref<4x8x256xf32, #tpu.memory_space<vmem>>, %arg1: memref<4x1x8xf32, #tpu.memory_space<vmem>>, %arg2: memref<1x256xf32, #tpu.memory_space<vmem>>, %arg3: memref<1x256xf32, #tpu.memory_space<vmem>>, %arg4: memref<256x768xbf16, #tpu.memory_space<vmem>>, %arg5: memref<1x768xf32, #tpu.memory_space<vmem>>, %arg6: memref<256x256xbf16, #tpu.memory_space<vmem>>, %arg7: memref<1x256xf32, #tpu.memory_space<vmem>>, %arg8: memref<1x256xf32, #tpu.memory_space<vmem>>, %arg9: memref<1x256xf32, #tpu.memory_space<vmem>>, %arg10: memref<256x512xbf16, #tpu.memory_space<vmem>>, %arg11: memref<1x512xf32, #tpu.memory_space<vmem>>, %arg12: memref<512x256xbf16, #tpu.memory_space<vmem>>, %arg13: memref<1x256xf32, #tpu.memory_space<vmem>>, %arg14: memref<1x256xf32, #tpu.memory_space<vmem>>, %arg15: memref<1x256xf32, #tpu.memory_space<vmem>>, %arg16: memref<256x768xbf16, #tpu.memory_space<vmem>>, %arg17: memref<1x768xf32, #tpu.memory_space<vmem>>, %arg18: memref<256x256xbf16, #tpu.memory_space<vmem>>, %arg19: memref<1x256xf32, #tpu.memory_space<vmem>>, %arg20: memref<1x256xf32, #tpu.memory_space<vmem>>, %arg21: memref<1x256xf32, #tpu.memory_space<vmem>>, %arg22: memref<256x512xbf16, #tpu.memory_space<vmem>>, %arg23: memref<1x512xf32, #tpu.memory_space<vmem>>, %arg24: memref<512x256xbf16, #tpu.memory_space<vmem>>, %arg25: memref<1x256xf32, #tpu.memory_space<vmem>>, %arg26: memref<1x256xf32, #tpu.memory_space<vmem>>, %arg27: memref<1x256xf32, #tpu.memory_space<vmem>>, %arg28: memref<512x256xbf16, #tpu.memory_space<vmem>>, %arg29: memref<1x256xf32, #tpu.memory_space<vmem>>, %arg30: memref<1x256xf32, #tpu.memory_space<vmem>>, %arg31: memref<1x256xf32, #tpu.memory_space<vmem>>, %arg32: memref<256x256xbf16, #tpu.memory_space<vmem>>, %arg33: memref<1x256xf32, #tpu.memory_space<vmem>>, %arg34: memref<1x256xf32, #tpu.memory_space<vmem>>, %arg35: memref<1x256xf32, #tpu.memory_space<vmem>>, %arg36: memref<256x128xbf16, #tpu.memory_space<vmem>>, %arg37: memref<1x128xf32, #tpu.memory_space<vmem>>, %arg38: memref<2x128xf32, #tpu.memory_space<vmem>>) attributes {dimension_semantics = [], scalar_prefetch = 0 : i64, scratch_operands = 0 : i64, tpu.core_type = #tpu.core_type<tc>} {
    %c0 = arith.constant 0 : index
    %c0_0 = arith.constant 0 : index
    %c0_1 = arith.constant 0 : index
    %0 = vector.load %arg0[%c0, %c0_0, %c0_1] : memref<4x8x256xf32, #tpu.memory_space<vmem>>, vector<4x8x256xf32>
    %1 = vector.shape_cast %0 : vector<4x8x256xf32> to vector<32x256xf32>
    %c0_2 = arith.constant 0 : index
    %c0_3 = arith.constant 0 : index
    %2 = vector.load %arg2[%c0_2, %c0_3] : memref<1x256xf32, #tpu.memory_space<vmem>>, vector<1x256xf32>
    %c0_4 = arith.constant 0 : index
    %c0_5 = arith.constant 0 : index
    %3 = vector.load %arg3[%c0_4, %c0_5] : memref<1x256xf32, #tpu.memory_space<vmem>>, vector<1x256xf32>
    %cst = arith.constant dense<0.000000e+00> : vector<32xf32>
    %4 = vector.multi_reduction <add>, %1, %cst [1] : vector<32x256xf32> to vector<32xf32>
    %5 = vector.shape_cast %4 : vector<32xf32> to vector<32x1xf32>
    %cst_6 = arith.constant 2.560000e+02 : f32
    %6 = vector.broadcast %cst_6 : f32 to vector<32x1xf32>
    %7 = arith.divf %5, %6 : vector<32x1xf32>
    %8 = vector.broadcast %7 : vector<32x1xf32> to vector<32x256xf32>
    %9 = arith.subf %1, %8 : vector<32x256xf32>
    %10 = arith.mulf %9, %9 : vector<32x256xf32>
    %cst_7 = arith.constant dense<0.000000e+00> : vector<32xf32>
    %11 = vector.multi_reduction <add>, %10, %cst_7 [1] : vector<32x256xf32> to vector<32xf32>
    %12 = vector.shape_cast %11 : vector<32xf32> to vector<32x1xf32>
    %cst_8 = arith.constant 2.560000e+02 : f32
    %13 = vector.broadcast %cst_8 : f32 to vector<32x1xf32>
    %14 = arith.divf %12, %13 : vector<32x1xf32>
    %cst_9 = arith.constant 9.99999996E-13 : f32
    %15 = vector.broadcast %cst_9 : f32 to vector<32x1xf32>
    %16 = arith.addf %14, %15 : vector<32x1xf32>
    %17 = math.rsqrt %16 : vector<32x1xf32>
    %18 = vector.broadcast %17 : vector<32x1xf32> to vector<32x256xf32>
    %19 = arith.mulf %9, %18 : vector<32x256xf32>
    %20 = vector.broadcast %2 : vector<1x256xf32> to vector<32x256xf32>
    %21 = arith.mulf %19, %20 : vector<32x256xf32>
    %22 = vector.broadcast %3 : vector<1x256xf32> to vector<32x256xf32>
    %23 = arith.addf %21, %22 : vector<32x256xf32>
    %c0_10 = arith.constant 0 : index
    %c0_11 = arith.constant 0 : index
    %c0_12 = arith.constant 0 : index
    %24 = vector.load %arg1[%c0_10, %c0_11, %c0_12] : memref<4x1x8xf32, #tpu.memory_space<vmem>>, vector<4x1x8xf32>
    %25 = vector.shape_cast %24 : vector<4x1x8xf32> to vector<4x1x8xf32>
    %26 = vector.broadcast %25 : vector<4x1x8xf32> to vector<4x8x8xf32>
    %27 = arith.truncf %23 : vector<32x256xf32> to vector<32x256xbf16>
    %c0_13 = arith.constant 0 : index
    %c0_14 = arith.constant 0 : index
    %28 = vector.load %arg4[%c0_13, %c0_14] : memref<256x768xbf16, #tpu.memory_space<vmem>>, vector<256x768xbf16>
    %cst_15 = arith.constant dense<0.000000e+00> : vector<32x768xf32>
    %29 = tpu.matmul %27, %28, %cst_15 {dimension_numbers = #tpu.dot_dimension_numbers<[1], [0], [0], [1], [0, 0, 1, 1], [], []>} : vector<32x256xbf16>, vector<256x768xbf16>, vector<32x768xf32> -> vector<32x768xf32>
    %c0_16 = arith.constant 0 : index
    %c0_17 = arith.constant 0 : index
    %30 = vector.load %arg5[%c0_16, %c0_17] : memref<1x768xf32, #tpu.memory_space<vmem>>, vector<1x768xf32>
    %31 = vector.broadcast %30 : vector<1x768xf32> to vector<32x768xf32>
    %32 = arith.addf %29, %31 : vector<32x768xf32>
    %33 = vector.shape_cast %32 : vector<32x768xf32> to vector<4x8x768xf32>
    %34 = arith.truncf %33 : vector<4x8x768xf32> to vector<4x8x768xbf16>
    %c0_18 = arith.constant 0 : index
    %c0_19 = arith.constant 0 : index
    %35 = vector.load %arg6[%c0_18, %c0_19] : memref<256x256xbf16, #tpu.memory_space<vmem>>, vector<256x256xbf16>
    %36 = vector.extract_strided_slice %34 {offsets = [0, 0, 0], sizes = [4, 8, 128], strides = [1, 1, 1]} : vector<4x8x768xbf16> to vector<4x8x128xbf16>
    %37 = vector.extract_strided_slice %34 {offsets = [0, 0, 256], sizes = [4, 8, 128], strides = [1, 1, 1]} : vector<4x8x768xbf16> to vector<4x8x128xbf16>
    %38 = vector.extract_strided_slice %34 {offsets = [0, 0, 512], sizes = [4, 8, 128], strides = [1, 1, 1]} : vector<4x8x768xbf16> to vector<4x8x128xbf16>
    "tpu.trace_start"() <{level = 10 : i32, message = "bqd,bkd->bqk"}> : () -> ()
    %cst_20 = arith.constant dense<0.000000e+00> : vector<4x8x8xf32>
    %39 = tpu.matmul %36, %37, %cst_20 {dimension_numbers = #tpu.dot_dimension_numbers<[2], [2], [1], [1], [0, 0, 0, 1, 1, 1], [0], [0]>} : vector<4x8x128xbf16>, vector<4x8x128xbf16>, vector<4x8x8xf32> -> vector<4x8x8xf32>
    "tpu.trace_stop"() : () -> ()
    %40 = arith.addf %39, %26 : vector<4x8x8xf32>
    %cst_21 = arith.constant dense<0xFF800000> : vector<4x8xf32>
    %41 = vector.multi_reduction <maximumf>, %40, %cst_21 [2] : vector<4x8x8xf32> to vector<4x8xf32>
    %42 = vector.shape_cast %41 : vector<4x8xf32> to vector<4x8x1xf32>
    %43 = vector.broadcast %42 : vector<4x8x1xf32> to vector<4x8x8xf32>
    %44 = arith.subf %40, %43 : vector<4x8x8xf32>
    %45 = math.exp %44 : vector<4x8x8xf32>
    %cst_22 = arith.constant dense<0.000000e+00> : vector<4x8xf32>
    %46 = vector.multi_reduction <add>, %45, %cst_22 [2] : vector<4x8x8xf32> to vector<4x8xf32>
    %47 = vector.shape_cast %46 : vector<4x8xf32> to vector<4x8x1xf32>
    %48 = tpu.reciprocal %47 {approx = true} : vector<4x8x1xf32> -> vector<4x8x1xf32>
    %49 = vector.broadcast %48 : vector<4x8x1xf32> to vector<4x8x8xf32>
    %50 = arith.mulf %45, %49 : vector<4x8x8xf32>
    %51 = arith.truncf %50 : vector<4x8x8xf32> to vector<4x8x8xbf16>
    "tpu.trace_start"() <{level = 10 : i32, message = "bqk,bkd->bqd"}> : () -> ()
    %cst_23 = arith.constant dense<0.000000e+00> : vector<4x8x128xf32>
    %52 = tpu.matmul %51, %38, %cst_23 {dimension_numbers = #tpu.dot_dimension_numbers<[2], [1], [1], [2], [0, 0, 0, 1, 1, 2], [0], [0]>} : vector<4x8x8xbf16>, vector<4x8x128xbf16>, vector<4x8x128xf32> -> vector<4x8x128xf32>
    "tpu.trace_stop"() : () -> ()
    %53 = vector.shape_cast %52 : vector<4x8x128xf32> to vector<32x128xf32>
    %54 = arith.truncf %53 : vector<32x128xf32> to vector<32x128xbf16>
    %55 = vector.extract_strided_slice %35 {offsets = [0, 0], sizes = [128, 256], strides = [1, 1]} : vector<256x256xbf16> to vector<128x256xbf16>
    %cst_24 = arith.constant dense<0.000000e+00> : vector<32x256xf32>
    %56 = tpu.matmul %54, %55, %cst_24 {dimension_numbers = #tpu.dot_dimension_numbers<[1], [0], [0], [1], [0, 0, 1, 1], [], []>} : vector<32x128xbf16>, vector<128x256xbf16>, vector<32x256xf32> -> vector<32x256xf32>
    %57 = vector.extract_strided_slice %34 {offsets = [0, 0, 128], sizes = [4, 8, 128], strides = [1, 1, 1]} : vector<4x8x768xbf16> to vector<4x8x128xbf16>
    %58 = vector.extract_strided_slice %34 {offsets = [0, 0, 384], sizes = [4, 8, 128], strides = [1, 1, 1]} : vector<4x8x768xbf16> to vector<4x8x128xbf16>
    %59 = vector.extract_strided_slice %34 {offsets = [0, 0, 640], sizes = [4, 8, 128], strides = [1, 1, 1]} : vector<4x8x768xbf16> to vector<4x8x128xbf16>
    "tpu.trace_start"() <{level = 10 : i32, message = "bqd,bkd->bqk"}> : () -> ()
    %cst_25 = arith.constant dense<0.000000e+00> : vector<4x8x8xf32>
    %60 = tpu.matmul %57, %58, %cst_25 {dimension_numbers = #tpu.dot_dimension_numbers<[2], [2], [1], [1], [0, 0, 0, 1, 1, 1], [0], [0]>} : vector<4x8x128xbf16>, vector<4x8x128xbf16>, vector<4x8x8xf32> -> vector<4x8x8xf32>
    "tpu.trace_stop"() : () -> ()
    %61 = arith.addf %60, %26 : vector<4x8x8xf32>
    %cst_26 = arith.constant dense<0xFF800000> : vector<4x8xf32>
    %62 = vector.multi_reduction <maximumf>, %61, %cst_26 [2] : vector<4x8x8xf32> to vector<4x8xf32>
    %63 = vector.shape_cast %62 : vector<4x8xf32> to vector<4x8x1xf32>
    %64 = vector.broadcast %63 : vector<4x8x1xf32> to vector<4x8x8xf32>
    %65 = arith.subf %61, %64 : vector<4x8x8xf32>
    %66 = math.exp %65 : vector<4x8x8xf32>
    %cst_27 = arith.constant dense<0.000000e+00> : vector<4x8xf32>
    %67 = vector.multi_reduction <add>, %66, %cst_27 [2] : vector<4x8x8xf32> to vector<4x8xf32>
    %68 = vector.shape_cast %67 : vector<4x8xf32> to vector<4x8x1xf32>
    %69 = tpu.reciprocal %68 {approx = true} : vector<4x8x1xf32> -> vector<4x8x1xf32>
    %70 = vector.broadcast %69 : vector<4x8x1xf32> to vector<4x8x8xf32>
    %71 = arith.mulf %66, %70 : vector<4x8x8xf32>
    %72 = arith.truncf %71 : vector<4x8x8xf32> to vector<4x8x8xbf16>
    "tpu.trace_start"() <{level = 10 : i32, message = "bqk,bkd->bqd"}> : () -> ()
    %cst_28 = arith.constant dense<0.000000e+00> : vector<4x8x128xf32>
    %73 = tpu.matmul %72, %59, %cst_28 {dimension_numbers = #tpu.dot_dimension_numbers<[2], [1], [1], [2], [0, 0, 0, 1, 1, 2], [0], [0]>} : vector<4x8x8xbf16>, vector<4x8x128xbf16>, vector<4x8x128xf32> -> vector<4x8x128xf32>
    "tpu.trace_stop"() : () -> ()
    %74 = vector.shape_cast %73 : vector<4x8x128xf32> to vector<32x128xf32>
    %75 = arith.truncf %74 : vector<32x128xf32> to vector<32x128xbf16>
    %76 = vector.extract_strided_slice %35 {offsets = [128, 0], sizes = [128, 256], strides = [1, 1]} : vector<256x256xbf16> to vector<128x256xbf16>
    %cst_29 = arith.constant dense<0.000000e+00> : vector<32x256xf32>
    %77 = tpu.matmul %75, %76, %cst_29 {dimension_numbers = #tpu.dot_dimension_numbers<[1], [0], [0], [1], [0, 0, 1, 1], [], []>} : vector<32x128xbf16>, vector<128x256xbf16>, vector<32x256xf32> -> vector<32x256xf32>
    %78 = arith.addf %56, %77 : vector<32x256xf32>
    %c0_30 = arith.constant 0 : index
    %c0_31 = arith.constant 0 : index
    %79 = vector.load %arg7[%c0_30, %c0_31] : memref<1x256xf32, #tpu.memory_space<vmem>>, vector<1x256xf32>
    %80 = vector.broadcast %79 : vector<1x256xf32> to vector<32x256xf32>
    %81 = arith.addf %78, %80 : vector<32x256xf32>
    %82 = arith.addf %81, %23 : vector<32x256xf32>
    %c0_32 = arith.constant 0 : index
    %c0_33 = arith.constant 0 : index
    %83 = vector.load %arg8[%c0_32, %c0_33] : memref<1x256xf32, #tpu.memory_space<vmem>>, vector<1x256xf32>
    %c0_34 = arith.constant 0 : index
    %c0_35 = arith.constant 0 : index
    %84 = vector.load %arg9[%c0_34, %c0_35] : memref<1x256xf32, #tpu.memory_space<vmem>>, vector<1x256xf32>
    %cst_36 = arith.constant dense<0.000000e+00> : vector<32xf32>
    %85 = vector.multi_reduction <add>, %82, %cst_36 [1] : vector<32x256xf32> to vector<32xf32>
    %86 = vector.shape_cast %85 : vector<32xf32> to vector<32x1xf32>
    %cst_37 = arith.constant 2.560000e+02 : f32
    %87 = vector.broadcast %cst_37 : f32 to vector<32x1xf32>
    %88 = arith.divf %86, %87 : vector<32x1xf32>
    %89 = vector.broadcast %88 : vector<32x1xf32> to vector<32x256xf32>
    %90 = arith.subf %82, %89 : vector<32x256xf32>
    %91 = arith.mulf %90, %90 : vector<32x256xf32>
    %cst_38 = arith.constant dense<0.000000e+00> : vector<32xf32>
    %92 = vector.multi_reduction <add>, %91, %cst_38 [1] : vector<32x256xf32> to vector<32xf32>
    %93 = vector.shape_cast %92 : vector<32xf32> to vector<32x1xf32>
    %cst_39 = arith.constant 2.560000e+02 : f32
    %94 = vector.broadcast %cst_39 : f32 to vector<32x1xf32>
    %95 = arith.divf %93, %94 : vector<32x1xf32>
    %cst_40 = arith.constant 9.99999996E-13 : f32
    %96 = vector.broadcast %cst_40 : f32 to vector<32x1xf32>
    %97 = arith.addf %95, %96 : vector<32x1xf32>
    %98 = math.rsqrt %97 : vector<32x1xf32>
    %99 = vector.broadcast %98 : vector<32x1xf32> to vector<32x256xf32>
    %100 = arith.mulf %90, %99 : vector<32x256xf32>
    %101 = vector.broadcast %83 : vector<1x256xf32> to vector<32x256xf32>
    %102 = arith.mulf %100, %101 : vector<32x256xf32>
    %103 = vector.broadcast %84 : vector<1x256xf32> to vector<32x256xf32>
    %104 = arith.addf %102, %103 : vector<32x256xf32>
    %105 = arith.truncf %104 : vector<32x256xf32> to vector<32x256xbf16>
    %c0_41 = arith.constant 0 : index
    %c0_42 = arith.constant 0 : index
    %106 = vector.load %arg10[%c0_41, %c0_42] : memref<256x512xbf16, #tpu.memory_space<vmem>>, vector<256x512xbf16>
    %cst_43 = arith.constant dense<0.000000e+00> : vector<32x512xf32>
    %107 = tpu.matmul %105, %106, %cst_43 {dimension_numbers = #tpu.dot_dimension_numbers<[1], [0], [0], [1], [0, 0, 1, 1], [], []>} : vector<32x256xbf16>, vector<256x512xbf16>, vector<32x512xf32> -> vector<32x512xf32>
    %c0_44 = arith.constant 0 : index
    %c0_45 = arith.constant 0 : index
    %108 = vector.load %arg11[%c0_44, %c0_45] : memref<1x512xf32, #tpu.memory_space<vmem>>, vector<1x512xf32>
    %109 = vector.broadcast %108 : vector<1x512xf32> to vector<32x512xf32>
    %110 = arith.addf %107, %109 : vector<32x512xf32>
    %cst_46 = arith.constant 5.000000e-01 : f32
    %111 = vector.broadcast %cst_46 : f32 to vector<32x512xf32>
    %112 = arith.mulf %111, %110 : vector<32x512xf32>
    %cst_47 = arith.constant 4.471500e-02 : f32
    %113 = vector.broadcast %cst_47 : f32 to vector<32x512xf32>
    %114 = arith.mulf %113, %110 : vector<32x512xf32>
    %115 = arith.mulf %114, %110 : vector<32x512xf32>
    %116 = arith.mulf %115, %110 : vector<32x512xf32>
    %117 = arith.addf %110, %116 : vector<32x512xf32>
    %cst_48 = arith.constant 0.797884583 : f32
    %118 = vector.broadcast %cst_48 : f32 to vector<32x512xf32>
    %119 = arith.mulf %118, %117 : vector<32x512xf32>
    %120 = math.tanh %119 : vector<32x512xf32>
    %cst_49 = arith.constant 1.000000e+00 : f32
    %121 = vector.broadcast %cst_49 : f32 to vector<32x512xf32>
    %122 = arith.addf %121, %120 : vector<32x512xf32>
    %123 = arith.mulf %112, %122 : vector<32x512xf32>
    %124 = arith.truncf %123 : vector<32x512xf32> to vector<32x512xbf16>
    %c0_50 = arith.constant 0 : index
    %c0_51 = arith.constant 0 : index
    %125 = vector.load %arg12[%c0_50, %c0_51] : memref<512x256xbf16, #tpu.memory_space<vmem>>, vector<512x256xbf16>
    %cst_52 = arith.constant dense<0.000000e+00> : vector<32x256xf32>
    %126 = tpu.matmul %124, %125, %cst_52 {dimension_numbers = #tpu.dot_dimension_numbers<[1], [0], [0], [1], [0, 0, 1, 1], [], []>} : vector<32x512xbf16>, vector<512x256xbf16>, vector<32x256xf32> -> vector<32x256xf32>
    %c0_53 = arith.constant 0 : index
    %c0_54 = arith.constant 0 : index
    %127 = vector.load %arg13[%c0_53, %c0_54] : memref<1x256xf32, #tpu.memory_space<vmem>>, vector<1x256xf32>
    %128 = vector.broadcast %127 : vector<1x256xf32> to vector<32x256xf32>
    %129 = arith.addf %126, %128 : vector<32x256xf32>
    %130 = arith.addf %129, %104 : vector<32x256xf32>
    %c0_55 = arith.constant 0 : index
    %c0_56 = arith.constant 0 : index
    %131 = vector.load %arg14[%c0_55, %c0_56] : memref<1x256xf32, #tpu.memory_space<vmem>>, vector<1x256xf32>
    %c0_57 = arith.constant 0 : index
    %c0_58 = arith.constant 0 : index
    %132 = vector.load %arg15[%c0_57, %c0_58] : memref<1x256xf32, #tpu.memory_space<vmem>>, vector<1x256xf32>
    %cst_59 = arith.constant dense<0.000000e+00> : vector<32xf32>
    %133 = vector.multi_reduction <add>, %130, %cst_59 [1] : vector<32x256xf32> to vector<32xf32>
    %134 = vector.shape_cast %133 : vector<32xf32> to vector<32x1xf32>
    %cst_60 = arith.constant 2.560000e+02 : f32
    %135 = vector.broadcast %cst_60 : f32 to vector<32x1xf32>
    %136 = arith.divf %134, %135 : vector<32x1xf32>
    %137 = vector.broadcast %136 : vector<32x1xf32> to vector<32x256xf32>
    %138 = arith.subf %130, %137 : vector<32x256xf32>
    %139 = arith.mulf %138, %138 : vector<32x256xf32>
    %cst_61 = arith.constant dense<0.000000e+00> : vector<32xf32>
    %140 = vector.multi_reduction <add>, %139, %cst_61 [1] : vector<32x256xf32> to vector<32xf32>
    %141 = vector.shape_cast %140 : vector<32xf32> to vector<32x1xf32>
    %cst_62 = arith.constant 2.560000e+02 : f32
    %142 = vector.broadcast %cst_62 : f32 to vector<32x1xf32>
    %143 = arith.divf %141, %142 : vector<32x1xf32>
    %cst_63 = arith.constant 9.99999996E-13 : f32
    %144 = vector.broadcast %cst_63 : f32 to vector<32x1xf32>
    %145 = arith.addf %143, %144 : vector<32x1xf32>
    %146 = math.rsqrt %145 : vector<32x1xf32>
    %147 = vector.broadcast %146 : vector<32x1xf32> to vector<32x256xf32>
    %148 = arith.mulf %138, %147 : vector<32x256xf32>
    %149 = vector.broadcast %131 : vector<1x256xf32> to vector<32x256xf32>
    %150 = arith.mulf %148, %149 : vector<32x256xf32>
    %151 = vector.broadcast %132 : vector<1x256xf32> to vector<32x256xf32>
    %152 = arith.addf %150, %151 : vector<32x256xf32>
    %153 = arith.truncf %152 : vector<32x256xf32> to vector<32x256xbf16>
    %c0_64 = arith.constant 0 : index
    %c0_65 = arith.constant 0 : index
    %154 = vector.load %arg16[%c0_64, %c0_65] : memref<256x768xbf16, #tpu.memory_space<vmem>>, vector<256x768xbf16>
    %cst_66 = arith.constant dense<0.000000e+00> : vector<32x768xf32>
    %155 = tpu.matmul %153, %154, %cst_66 {dimension_numbers = #tpu.dot_dimension_numbers<[1], [0], [0], [1], [0, 0, 1, 1], [], []>} : vector<32x256xbf16>, vector<256x768xbf16>, vector<32x768xf32> -> vector<32x768xf32>
    %c0_67 = arith.constant 0 : index
    %c0_68 = arith.constant 0 : index
    %156 = vector.load %arg17[%c0_67, %c0_68] : memref<1x768xf32, #tpu.memory_space<vmem>>, vector<1x768xf32>
    %157 = vector.broadcast %156 : vector<1x768xf32> to vector<32x768xf32>
    %158 = arith.addf %155, %157 : vector<32x768xf32>
    %159 = vector.shape_cast %158 : vector<32x768xf32> to vector<4x8x768xf32>
    %160 = arith.truncf %159 : vector<4x8x768xf32> to vector<4x8x768xbf16>
    %c0_69 = arith.constant 0 : index
    %c0_70 = arith.constant 0 : index
    %161 = vector.load %arg18[%c0_69, %c0_70] : memref<256x256xbf16, #tpu.memory_space<vmem>>, vector<256x256xbf16>
    %162 = vector.extract_strided_slice %160 {offsets = [0, 0, 0], sizes = [4, 8, 128], strides = [1, 1, 1]} : vector<4x8x768xbf16> to vector<4x8x128xbf16>
    %163 = vector.extract_strided_slice %160 {offsets = [0, 0, 256], sizes = [4, 8, 128], strides = [1, 1, 1]} : vector<4x8x768xbf16> to vector<4x8x128xbf16>
    %164 = vector.extract_strided_slice %160 {offsets = [0, 0, 512], sizes = [4, 8, 128], strides = [1, 1, 1]} : vector<4x8x768xbf16> to vector<4x8x128xbf16>
    "tpu.trace_start"() <{level = 10 : i32, message = "bqd,bkd->bqk"}> : () -> ()
    %cst_71 = arith.constant dense<0.000000e+00> : vector<4x8x8xf32>
    %165 = tpu.matmul %162, %163, %cst_71 {dimension_numbers = #tpu.dot_dimension_numbers<[2], [2], [1], [1], [0, 0, 0, 1, 1, 1], [0], [0]>} : vector<4x8x128xbf16>, vector<4x8x128xbf16>, vector<4x8x8xf32> -> vector<4x8x8xf32>
    "tpu.trace_stop"() : () -> ()
    %166 = arith.addf %165, %26 : vector<4x8x8xf32>
    %cst_72 = arith.constant dense<0xFF800000> : vector<4x8xf32>
    %167 = vector.multi_reduction <maximumf>, %166, %cst_72 [2] : vector<4x8x8xf32> to vector<4x8xf32>
    %168 = vector.shape_cast %167 : vector<4x8xf32> to vector<4x8x1xf32>
    %169 = vector.broadcast %168 : vector<4x8x1xf32> to vector<4x8x8xf32>
    %170 = arith.subf %166, %169 : vector<4x8x8xf32>
    %171 = math.exp %170 : vector<4x8x8xf32>
    %cst_73 = arith.constant dense<0.000000e+00> : vector<4x8xf32>
    %172 = vector.multi_reduction <add>, %171, %cst_73 [2] : vector<4x8x8xf32> to vector<4x8xf32>
    %173 = vector.shape_cast %172 : vector<4x8xf32> to vector<4x8x1xf32>
    %174 = tpu.reciprocal %173 {approx = true} : vector<4x8x1xf32> -> vector<4x8x1xf32>
    %175 = vector.broadcast %174 : vector<4x8x1xf32> to vector<4x8x8xf32>
    %176 = arith.mulf %171, %175 : vector<4x8x8xf32>
    %177 = arith.truncf %176 : vector<4x8x8xf32> to vector<4x8x8xbf16>
    "tpu.trace_start"() <{level = 10 : i32, message = "bqk,bkd->bqd"}> : () -> ()
    %cst_74 = arith.constant dense<0.000000e+00> : vector<4x8x128xf32>
    %178 = tpu.matmul %177, %164, %cst_74 {dimension_numbers = #tpu.dot_dimension_numbers<[2], [1], [1], [2], [0, 0, 0, 1, 1, 2], [0], [0]>} : vector<4x8x8xbf16>, vector<4x8x128xbf16>, vector<4x8x128xf32> -> vector<4x8x128xf32>
    "tpu.trace_stop"() : () -> ()
    %179 = vector.shape_cast %178 : vector<4x8x128xf32> to vector<32x128xf32>
    %180 = arith.truncf %179 : vector<32x128xf32> to vector<32x128xbf16>
    %181 = vector.extract_strided_slice %161 {offsets = [0, 0], sizes = [128, 256], strides = [1, 1]} : vector<256x256xbf16> to vector<128x256xbf16>
    %cst_75 = arith.constant dense<0.000000e+00> : vector<32x256xf32>
    %182 = tpu.matmul %180, %181, %cst_75 {dimension_numbers = #tpu.dot_dimension_numbers<[1], [0], [0], [1], [0, 0, 1, 1], [], []>} : vector<32x128xbf16>, vector<128x256xbf16>, vector<32x256xf32> -> vector<32x256xf32>
    %183 = vector.extract_strided_slice %160 {offsets = [0, 0, 128], sizes = [4, 8, 128], strides = [1, 1, 1]} : vector<4x8x768xbf16> to vector<4x8x128xbf16>
    %184 = vector.extract_strided_slice %160 {offsets = [0, 0, 384], sizes = [4, 8, 128], strides = [1, 1, 1]} : vector<4x8x768xbf16> to vector<4x8x128xbf16>
    %185 = vector.extract_strided_slice %160 {offsets = [0, 0, 640], sizes = [4, 8, 128], strides = [1, 1, 1]} : vector<4x8x768xbf16> to vector<4x8x128xbf16>
    "tpu.trace_start"() <{level = 10 : i32, message = "bqd,bkd->bqk"}> : () -> ()
    %cst_76 = arith.constant dense<0.000000e+00> : vector<4x8x8xf32>
    %186 = tpu.matmul %183, %184, %cst_76 {dimension_numbers = #tpu.dot_dimension_numbers<[2], [2], [1], [1], [0, 0, 0, 1, 1, 1], [0], [0]>} : vector<4x8x128xbf16>, vector<4x8x128xbf16>, vector<4x8x8xf32> -> vector<4x8x8xf32>
    "tpu.trace_stop"() : () -> ()
    %187 = arith.addf %186, %26 : vector<4x8x8xf32>
    %cst_77 = arith.constant dense<0xFF800000> : vector<4x8xf32>
    %188 = vector.multi_reduction <maximumf>, %187, %cst_77 [2] : vector<4x8x8xf32> to vector<4x8xf32>
    %189 = vector.shape_cast %188 : vector<4x8xf32> to vector<4x8x1xf32>
    %190 = vector.broadcast %189 : vector<4x8x1xf32> to vector<4x8x8xf32>
    %191 = arith.subf %187, %190 : vector<4x8x8xf32>
    %192 = math.exp %191 : vector<4x8x8xf32>
    %cst_78 = arith.constant dense<0.000000e+00> : vector<4x8xf32>
    %193 = vector.multi_reduction <add>, %192, %cst_78 [2] : vector<4x8x8xf32> to vector<4x8xf32>
    %194 = vector.shape_cast %193 : vector<4x8xf32> to vector<4x8x1xf32>
    %195 = tpu.reciprocal %194 {approx = true} : vector<4x8x1xf32> -> vector<4x8x1xf32>
    %196 = vector.broadcast %195 : vector<4x8x1xf32> to vector<4x8x8xf32>
    %197 = arith.mulf %192, %196 : vector<4x8x8xf32>
    %198 = arith.truncf %197 : vector<4x8x8xf32> to vector<4x8x8xbf16>
    "tpu.trace_start"() <{level = 10 : i32, message = "bqk,bkd->bqd"}> : () -> ()
    %cst_79 = arith.constant dense<0.000000e+00> : vector<4x8x128xf32>
    %199 = tpu.matmul %198, %185, %cst_79 {dimension_numbers = #tpu.dot_dimension_numbers<[2], [1], [1], [2], [0, 0, 0, 1, 1, 2], [0], [0]>} : vector<4x8x8xbf16>, vector<4x8x128xbf16>, vector<4x8x128xf32> -> vector<4x8x128xf32>
    "tpu.trace_stop"() : () -> ()
    %200 = vector.shape_cast %199 : vector<4x8x128xf32> to vector<32x128xf32>
    %201 = arith.truncf %200 : vector<32x128xf32> to vector<32x128xbf16>
    %202 = vector.extract_strided_slice %161 {offsets = [128, 0], sizes = [128, 256], strides = [1, 1]} : vector<256x256xbf16> to vector<128x256xbf16>
    %cst_80 = arith.constant dense<0.000000e+00> : vector<32x256xf32>
    %203 = tpu.matmul %201, %202, %cst_80 {dimension_numbers = #tpu.dot_dimension_numbers<[1], [0], [0], [1], [0, 0, 1, 1], [], []>} : vector<32x128xbf16>, vector<128x256xbf16>, vector<32x256xf32> -> vector<32x256xf32>
    %204 = arith.addf %182, %203 : vector<32x256xf32>
    %c0_81 = arith.constant 0 : index
    %c0_82 = arith.constant 0 : index
    %205 = vector.load %arg19[%c0_81, %c0_82] : memref<1x256xf32, #tpu.memory_space<vmem>>, vector<1x256xf32>
    %206 = vector.broadcast %205 : vector<1x256xf32> to vector<32x256xf32>
    %207 = arith.addf %204, %206 : vector<32x256xf32>
    %208 = arith.addf %207, %152 : vector<32x256xf32>
    %c0_83 = arith.constant 0 : index
    %c0_84 = arith.constant 0 : index
    %209 = vector.load %arg20[%c0_83, %c0_84] : memref<1x256xf32, #tpu.memory_space<vmem>>, vector<1x256xf32>
    %c0_85 = arith.constant 0 : index
    %c0_86 = arith.constant 0 : index
    %210 = vector.load %arg21[%c0_85, %c0_86] : memref<1x256xf32, #tpu.memory_space<vmem>>, vector<1x256xf32>
    %cst_87 = arith.constant dense<0.000000e+00> : vector<32xf32>
    %211 = vector.multi_reduction <add>, %208, %cst_87 [1] : vector<32x256xf32> to vector<32xf32>
    %212 = vector.shape_cast %211 : vector<32xf32> to vector<32x1xf32>
    %cst_88 = arith.constant 2.560000e+02 : f32
    %213 = vector.broadcast %cst_88 : f32 to vector<32x1xf32>
    %214 = arith.divf %212, %213 : vector<32x1xf32>
    %215 = vector.broadcast %214 : vector<32x1xf32> to vector<32x256xf32>
    %216 = arith.subf %208, %215 : vector<32x256xf32>
    %217 = arith.mulf %216, %216 : vector<32x256xf32>
    %cst_89 = arith.constant dense<0.000000e+00> : vector<32xf32>
    %218 = vector.multi_reduction <add>, %217, %cst_89 [1] : vector<32x256xf32> to vector<32xf32>
    %219 = vector.shape_cast %218 : vector<32xf32> to vector<32x1xf32>
    %cst_90 = arith.constant 2.560000e+02 : f32
    %220 = vector.broadcast %cst_90 : f32 to vector<32x1xf32>
    %221 = arith.divf %219, %220 : vector<32x1xf32>
    %cst_91 = arith.constant 9.99999996E-13 : f32
    %222 = vector.broadcast %cst_91 : f32 to vector<32x1xf32>
    %223 = arith.addf %221, %222 : vector<32x1xf32>
    %224 = math.rsqrt %223 : vector<32x1xf32>
    %225 = vector.broadcast %224 : vector<32x1xf32> to vector<32x256xf32>
    %226 = arith.mulf %216, %225 : vector<32x256xf32>
    %227 = vector.broadcast %209 : vector<1x256xf32> to vector<32x256xf32>
    %228 = arith.mulf %226, %227 : vector<32x256xf32>
    %229 = vector.broadcast %210 : vector<1x256xf32> to vector<32x256xf32>
    %230 = arith.addf %228, %229 : vector<32x256xf32>
    %231 = arith.truncf %230 : vector<32x256xf32> to vector<32x256xbf16>
    %c0_92 = arith.constant 0 : index
    %c0_93 = arith.constant 0 : index
    %232 = vector.load %arg22[%c0_92, %c0_93] : memref<256x512xbf16, #tpu.memory_space<vmem>>, vector<256x512xbf16>
    %cst_94 = arith.constant dense<0.000000e+00> : vector<32x512xf32>
    %233 = tpu.matmul %231, %232, %cst_94 {dimension_numbers = #tpu.dot_dimension_numbers<[1], [0], [0], [1], [0, 0, 1, 1], [], []>} : vector<32x256xbf16>, vector<256x512xbf16>, vector<32x512xf32> -> vector<32x512xf32>
    %c0_95 = arith.constant 0 : index
    %c0_96 = arith.constant 0 : index
    %234 = vector.load %arg23[%c0_95, %c0_96] : memref<1x512xf32, #tpu.memory_space<vmem>>, vector<1x512xf32>
    %235 = vector.broadcast %234 : vector<1x512xf32> to vector<32x512xf32>
    %236 = arith.addf %233, %235 : vector<32x512xf32>
    %cst_97 = arith.constant 5.000000e-01 : f32
    %237 = vector.broadcast %cst_97 : f32 to vector<32x512xf32>
    %238 = arith.mulf %237, %236 : vector<32x512xf32>
    %cst_98 = arith.constant 4.471500e-02 : f32
    %239 = vector.broadcast %cst_98 : f32 to vector<32x512xf32>
    %240 = arith.mulf %239, %236 : vector<32x512xf32>
    %241 = arith.mulf %240, %236 : vector<32x512xf32>
    %242 = arith.mulf %241, %236 : vector<32x512xf32>
    %243 = arith.addf %236, %242 : vector<32x512xf32>
    %cst_99 = arith.constant 0.797884583 : f32
    %244 = vector.broadcast %cst_99 : f32 to vector<32x512xf32>
    %245 = arith.mulf %244, %243 : vector<32x512xf32>
    %246 = math.tanh %245 : vector<32x512xf32>
    %cst_100 = arith.constant 1.000000e+00 : f32
    %247 = vector.broadcast %cst_100 : f32 to vector<32x512xf32>
    %248 = arith.addf %247, %246 : vector<32x512xf32>
    %249 = arith.mulf %238, %248 : vector<32x512xf32>
    %250 = arith.truncf %249 : vector<32x512xf32> to vector<32x512xbf16>
    %c0_101 = arith.constant 0 : index
    %c0_102 = arith.constant 0 : index
    %251 = vector.load %arg24[%c0_101, %c0_102] : memref<512x256xbf16, #tpu.memory_space<vmem>>, vector<512x256xbf16>
    %cst_103 = arith.constant dense<0.000000e+00> : vector<32x256xf32>
    %252 = tpu.matmul %250, %251, %cst_103 {dimension_numbers = #tpu.dot_dimension_numbers<[1], [0], [0], [1], [0, 0, 1, 1], [], []>} : vector<32x512xbf16>, vector<512x256xbf16>, vector<32x256xf32> -> vector<32x256xf32>
    %c0_104 = arith.constant 0 : index
    %c0_105 = arith.constant 0 : index
    %253 = vector.load %arg25[%c0_104, %c0_105] : memref<1x256xf32, #tpu.memory_space<vmem>>, vector<1x256xf32>
    %254 = vector.broadcast %253 : vector<1x256xf32> to vector<32x256xf32>
    %255 = arith.addf %252, %254 : vector<32x256xf32>
    %256 = arith.addf %255, %230 : vector<32x256xf32>
    %c0_106 = arith.constant 0 : index
    %c0_107 = arith.constant 0 : index
    %257 = vector.load %arg26[%c0_106, %c0_107] : memref<1x256xf32, #tpu.memory_space<vmem>>, vector<1x256xf32>
    %c0_108 = arith.constant 0 : index
    %c0_109 = arith.constant 0 : index
    %258 = vector.load %arg27[%c0_108, %c0_109] : memref<1x256xf32, #tpu.memory_space<vmem>>, vector<1x256xf32>
    %cst_110 = arith.constant dense<0.000000e+00> : vector<32xf32>
    %259 = vector.multi_reduction <add>, %256, %cst_110 [1] : vector<32x256xf32> to vector<32xf32>
    %260 = vector.shape_cast %259 : vector<32xf32> to vector<32x1xf32>
    %cst_111 = arith.constant 2.560000e+02 : f32
    %261 = vector.broadcast %cst_111 : f32 to vector<32x1xf32>
    %262 = arith.divf %260, %261 : vector<32x1xf32>
    %263 = vector.broadcast %262 : vector<32x1xf32> to vector<32x256xf32>
    %264 = arith.subf %256, %263 : vector<32x256xf32>
    %265 = arith.mulf %264, %264 : vector<32x256xf32>
    %cst_112 = arith.constant dense<0.000000e+00> : vector<32xf32>
    %266 = vector.multi_reduction <add>, %265, %cst_112 [1] : vector<32x256xf32> to vector<32xf32>
    %267 = vector.shape_cast %266 : vector<32xf32> to vector<32x1xf32>
    %cst_113 = arith.constant 2.560000e+02 : f32
    %268 = vector.broadcast %cst_113 : f32 to vector<32x1xf32>
    %269 = arith.divf %267, %268 : vector<32x1xf32>
    %cst_114 = arith.constant 9.99999996E-13 : f32
    %270 = vector.broadcast %cst_114 : f32 to vector<32x1xf32>
    %271 = arith.addf %269, %270 : vector<32x1xf32>
    %272 = math.rsqrt %271 : vector<32x1xf32>
    %273 = vector.broadcast %272 : vector<32x1xf32> to vector<32x256xf32>
    %274 = arith.mulf %264, %273 : vector<32x256xf32>
    %275 = vector.broadcast %257 : vector<1x256xf32> to vector<32x256xf32>
    %276 = arith.mulf %274, %275 : vector<32x256xf32>
    %277 = vector.broadcast %258 : vector<1x256xf32> to vector<32x256xf32>
    %278 = arith.addf %276, %277 : vector<32x256xf32>
    %279 = vector.shape_cast %278 : vector<32x256xf32> to vector<2x2x8x256xf32>
    %c0_115 = arith.constant 0 : index
    %c0_116 = arith.constant 0 : index
    %280 = vector.load %arg28[%c0_115, %c0_116] : memref<512x256xbf16, #tpu.memory_space<vmem>>, vector<512x256xbf16>
    %281 = vector.extract_strided_slice %279 {offsets = [0, 0, 0, 0], sizes = [2, 1, 1, 256], strides = [1, 1, 1, 1]} : vector<2x2x8x256xf32> to vector<2x1x1x256xf32>
    %282 = vector.shape_cast %281 : vector<2x1x1x256xf32> to vector<2x256xf32>
    %283 = arith.truncf %282 : vector<2x256xf32> to vector<2x256xbf16>
    %284 = vector.extract_strided_slice %280 {offsets = [0, 0], sizes = [256, 256], strides = [1, 1]} : vector<512x256xbf16> to vector<256x256xbf16>
    %cst_117 = arith.constant dense<0.000000e+00> : vector<2x256xf32>
    %285 = tpu.matmul %283, %284, %cst_117 {dimension_numbers = #tpu.dot_dimension_numbers<[1], [0], [0], [1], [0, 0, 1, 1], [], []>} : vector<2x256xbf16>, vector<256x256xbf16>, vector<2x256xf32> -> vector<2x256xf32>
    %286 = vector.extract_strided_slice %279 {offsets = [0, 1, 0, 0], sizes = [2, 1, 1, 256], strides = [1, 1, 1, 1]} : vector<2x2x8x256xf32> to vector<2x1x1x256xf32>
    %287 = vector.shape_cast %286 : vector<2x1x1x256xf32> to vector<2x256xf32>
    %288 = arith.truncf %287 : vector<2x256xf32> to vector<2x256xbf16>
    %289 = vector.extract_strided_slice %280 {offsets = [256, 0], sizes = [256, 256], strides = [1, 1]} : vector<512x256xbf16> to vector<256x256xbf16>
    %cst_118 = arith.constant dense<0.000000e+00> : vector<2x256xf32>
    %290 = tpu.matmul %288, %289, %cst_118 {dimension_numbers = #tpu.dot_dimension_numbers<[1], [0], [0], [1], [0, 0, 1, 1], [], []>} : vector<2x256xbf16>, vector<256x256xbf16>, vector<2x256xf32> -> vector<2x256xf32>
    %291 = arith.addf %285, %290 : vector<2x256xf32>
    %c0_119 = arith.constant 0 : index
    %c0_120 = arith.constant 0 : index
    %292 = vector.load %arg29[%c0_119, %c0_120] : memref<1x256xf32, #tpu.memory_space<vmem>>, vector<1x256xf32>
    %293 = vector.broadcast %292 : vector<1x256xf32> to vector<2x256xf32>
    %294 = arith.addf %291, %293 : vector<2x256xf32>
    %cst_121 = arith.constant 0.000000e+00 : f32
    %295 = vector.broadcast %cst_121 : f32 to vector<2x256xf32>
    %296 = arith.maximumf %294, %295 : vector<2x256xf32>
    %c0_122 = arith.constant 0 : index
    %c0_123 = arith.constant 0 : index
    %297 = vector.load %arg30[%c0_122, %c0_123] : memref<1x256xf32, #tpu.memory_space<vmem>>, vector<1x256xf32>
    %c0_124 = arith.constant 0 : index
    %c0_125 = arith.constant 0 : index
    %298 = vector.load %arg31[%c0_124, %c0_125] : memref<1x256xf32, #tpu.memory_space<vmem>>, vector<1x256xf32>
    %cst_126 = arith.constant dense<0.000000e+00> : vector<2xf32>
    %299 = vector.multi_reduction <add>, %296, %cst_126 [1] : vector<2x256xf32> to vector<2xf32>
    %300 = vector.shape_cast %299 : vector<2xf32> to vector<2x1xf32>
    %cst_127 = arith.constant 2.560000e+02 : f32
    %301 = vector.broadcast %cst_127 : f32 to vector<2x1xf32>
    %302 = arith.divf %300, %301 : vector<2x1xf32>
    %303 = vector.broadcast %302 : vector<2x1xf32> to vector<2x256xf32>
    %304 = arith.subf %296, %303 : vector<2x256xf32>
    %305 = arith.mulf %304, %304 : vector<2x256xf32>
    %cst_128 = arith.constant dense<0.000000e+00> : vector<2xf32>
    %306 = vector.multi_reduction <add>, %305, %cst_128 [1] : vector<2x256xf32> to vector<2xf32>
    %307 = vector.shape_cast %306 : vector<2xf32> to vector<2x1xf32>
    %cst_129 = arith.constant 2.560000e+02 : f32
    %308 = vector.broadcast %cst_129 : f32 to vector<2x1xf32>
    %309 = arith.divf %307, %308 : vector<2x1xf32>
    %cst_130 = arith.constant 9.99999974E-6 : f32
    %310 = vector.broadcast %cst_130 : f32 to vector<2x1xf32>
    %311 = arith.addf %309, %310 : vector<2x1xf32>
    %312 = math.rsqrt %311 : vector<2x1xf32>
    %313 = vector.broadcast %312 : vector<2x1xf32> to vector<2x256xf32>
    %314 = arith.mulf %304, %313 : vector<2x256xf32>
    %315 = vector.broadcast %297 : vector<1x256xf32> to vector<2x256xf32>
    %316 = arith.mulf %314, %315 : vector<2x256xf32>
    %317 = vector.broadcast %298 : vector<1x256xf32> to vector<2x256xf32>
    %318 = arith.addf %316, %317 : vector<2x256xf32>
    %319 = arith.truncf %318 : vector<2x256xf32> to vector<2x256xbf16>
    %c0_131 = arith.constant 0 : index
    %c0_132 = arith.constant 0 : index
    %320 = vector.load %arg32[%c0_131, %c0_132] : memref<256x256xbf16, #tpu.memory_space<vmem>>, vector<256x256xbf16>
    %cst_133 = arith.constant dense<0.000000e+00> : vector<2x256xf32>
    %321 = tpu.matmul %319, %320, %cst_133 {dimension_numbers = #tpu.dot_dimension_numbers<[1], [0], [0], [1], [0, 0, 1, 1], [], []>} : vector<2x256xbf16>, vector<256x256xbf16>, vector<2x256xf32> -> vector<2x256xf32>
    %c0_134 = arith.constant 0 : index
    %c0_135 = arith.constant 0 : index
    %322 = vector.load %arg33[%c0_134, %c0_135] : memref<1x256xf32, #tpu.memory_space<vmem>>, vector<1x256xf32>
    %323 = vector.broadcast %322 : vector<1x256xf32> to vector<2x256xf32>
    %324 = arith.addf %321, %323 : vector<2x256xf32>
    %cst_136 = arith.constant 0.000000e+00 : f32
    %325 = vector.broadcast %cst_136 : f32 to vector<2x256xf32>
    %326 = arith.maximumf %324, %325 : vector<2x256xf32>
    %c0_137 = arith.constant 0 : index
    %c0_138 = arith.constant 0 : index
    %327 = vector.load %arg34[%c0_137, %c0_138] : memref<1x256xf32, #tpu.memory_space<vmem>>, vector<1x256xf32>
    %c0_139 = arith.constant 0 : index
    %c0_140 = arith.constant 0 : index
    %328 = vector.load %arg35[%c0_139, %c0_140] : memref<1x256xf32, #tpu.memory_space<vmem>>, vector<1x256xf32>
    %cst_141 = arith.constant dense<0.000000e+00> : vector<2xf32>
    %329 = vector.multi_reduction <add>, %326, %cst_141 [1] : vector<2x256xf32> to vector<2xf32>
    %330 = vector.shape_cast %329 : vector<2xf32> to vector<2x1xf32>
    %cst_142 = arith.constant 2.560000e+02 : f32
    %331 = vector.broadcast %cst_142 : f32 to vector<2x1xf32>
    %332 = arith.divf %330, %331 : vector<2x1xf32>
    %333 = vector.broadcast %332 : vector<2x1xf32> to vector<2x256xf32>
    %334 = arith.subf %326, %333 : vector<2x256xf32>
    %335 = arith.mulf %334, %334 : vector<2x256xf32>
    %cst_143 = arith.constant dense<0.000000e+00> : vector<2xf32>
    %336 = vector.multi_reduction <add>, %335, %cst_143 [1] : vector<2x256xf32> to vector<2xf32>
    %337 = vector.shape_cast %336 : vector<2xf32> to vector<2x1xf32>
    %cst_144 = arith.constant 2.560000e+02 : f32
    %338 = vector.broadcast %cst_144 : f32 to vector<2x1xf32>
    %339 = arith.divf %337, %338 : vector<2x1xf32>
    %cst_145 = arith.constant 9.99999974E-6 : f32
    %340 = vector.broadcast %cst_145 : f32 to vector<2x1xf32>
    %341 = arith.addf %339, %340 : vector<2x1xf32>
    %342 = math.rsqrt %341 : vector<2x1xf32>
    %343 = vector.broadcast %342 : vector<2x1xf32> to vector<2x256xf32>
    %344 = arith.mulf %334, %343 : vector<2x256xf32>
    %345 = vector.broadcast %327 : vector<1x256xf32> to vector<2x256xf32>
    %346 = arith.mulf %344, %345 : vector<2x256xf32>
    %347 = vector.broadcast %328 : vector<1x256xf32> to vector<2x256xf32>
    %348 = arith.addf %346, %347 : vector<2x256xf32>
    %349 = arith.truncf %348 : vector<2x256xf32> to vector<2x256xbf16>
    %c0_146 = arith.constant 0 : index
    %c0_147 = arith.constant 0 : index
    %350 = vector.load %arg36[%c0_146, %c0_147] : memref<256x128xbf16, #tpu.memory_space<vmem>>, vector<256x128xbf16>
    %cst_148 = arith.constant dense<0.000000e+00> : vector<2x128xf32>
    %351 = tpu.matmul %349, %350, %cst_148 {dimension_numbers = #tpu.dot_dimension_numbers<[1], [0], [0], [1], [0, 0, 1, 1], [], []>} : vector<2x256xbf16>, vector<256x128xbf16>, vector<2x128xf32> -> vector<2x128xf32>
    %c0_149 = arith.constant 0 : index
    %c0_150 = arith.constant 0 : index
    %352 = vector.load %arg37[%c0_149, %c0_150] : memref<1x128xf32, #tpu.memory_space<vmem>>, vector<1x128xf32>
    %353 = vector.broadcast %352 : vector<1x128xf32> to vector<2x128xf32>
    %354 = arith.addf %351, %353 : vector<2x128xf32>
    %c0_151 = arith.constant 0 : index
    %c0_152 = arith.constant 0 : index
    %355 = vector.load %arg38[%c0_151, %c0_152] : memref<2x128xf32, #tpu.memory_space<vmem>>, vector<2x128xf32>
    tpu.vector_store %arg38[%c0_151, %c0_152], %354 {strides = array<i32>} : memref<2x128xf32, #tpu.memory_space<vmem>>, vector<2x128xf32>,
    return
  }
}

</mosaic_0001>

<bundles_post_ra>
// kernel: _lambda_.1
= control target key start
LH: loop header
LB: loop body
LE: loop exit
PB: predicated region body
PF: predicated region fallthrough
CT: control target
= control target key end

     0   :  { %s10415_s6 = smov 1   ;;  %s10416_s10 = smov 2   ;;  %s12163_s0 = inlined_call_operand.smem [shape: u32[39], index: -1, kind: input, shape index: {}] }
   0x1   :  { %s10480_s5 = sld [smem:[%s12163_s0]]   ;;  %s10417_s14 = smov 3  }
   0x2   :  { %s10485_s9 = sld [smem:[%s12163_s0 + %s10415_s6]]   ;;  %s10418_s18 = smov 4  }
   0x3   :  { %s10490_s13 = sld [smem:[%s12163_s0 + %s10416_s10]]   ;;  %s10419_s22 = smov 5  }
   0x4   :  { %s10495_s17 = sld [smem:[%s12163_s0 + %s10417_s14]]   ;;  %s10420_s26 = smov 6  }
   0x5   :  { %s10500_s21 = sld [smem:[%s12163_s0 + %s10418_s18]]   ;;  %s10421_s30 = smov 7  }
   0x6   :  { %s10505_s25 = sld [smem:[%s12163_s0 + %s10419_s22]]   ;;  %s10422_s4 = smov 8  }
   0x7   :  { %s10510_s29 = sld [smem:[%s12163_s0 + %s10420_s26]]   ;;  %s10423_s10 = smov 9  }
   0x8   :  { %s10515_s3 = sld [smem:[%s12163_s0 + %s10421_s30]]   ;;  %s10424_s15 = smov 10  }
   0x9   :  { %s10520_s8 = sld [smem:[%s12163_s0 + %s10422_s4]]   ;;  %s10425_s20 = smov 11  }
   0xa   :  { %s10525_s14 = sld [smem:[%s12163_s0 + %s10423_s10]]   ;;  %s10426_s26 = smov 12  }
   0xb   :  { %s10530_s19 = sld [smem:[%s12163_s0 + %s10424_s15]]   ;;  %s10427_s1 = smov 13  }
   0xc   :  { %s10535_s24 = sld [smem:[%s12163_s0 + %s10425_s20]]   ;;  %s10428_s7 = smov 14  }
   0xd   :  { %s10540_s30 = sld [smem:[%s12163_s0 + %s10426_s26]]   ;;  %s10429_s15 = smov 15  }
   0xe   :  { %s10545_s6 = sld [smem:[%s12163_s0 + %s10427_s1]]   ;;  %s10430_s22 = smov 16  }
   0xf   :  { %12166 = sst [smem:[#allocation20_spill]] %s10520_s8  ;;  %s10431_s28 = smov 17  }
  0x10   :  { %12167 = sst [smem:[#allocation21_spill]] %s10525_s14 }
  0x11   :  { %12168 = sst [smem:[#allocation22_spill]] %s10530_s19 }
  0x12   :  { %12169 = sst [smem:[#allocation23_spill]] %s10535_s24 }
  0x13   :  { %s10550_s12 = sld [smem:[%s12163_s0 + %s10428_s7]]   ;;  %s10432_s7 = smov 18  }
  0x14   :  { %12170 = sst [smem:[#allocation24_spill]] %s10545_s6 }
  0x15   :  { %s10555_s20 = sld [smem:[%s12163_s0 + %s10429_s15]]   ;;  %s10433_s15 = smov 19  }
  0x16   :  { %s10560_s27 = sld [smem:[%s12163_s0 + %s10430_s22]]   ;;  %s10434_s22 = smov 20  }
  0x17   :  { %s10565_s4 = sld [smem:[%s12163_s0 + %s10431_s28]]   ;;  %s10435_s28 = smov 21  }
  0x18   :  { %s10580_s6 = sld [smem:[%s12163_s0 + %s10434_s22]]   ;;  %s10438_s22 = smov 24  }
  0x19   :  { %12171 = sst [smem:[#allocation25_spill]] %s10550_s12 }
  0x1a   :  { %s10570_s12 = sld [smem:[%s12163_s0 + %s10432_s7]]   ;;  %s10436_s7 = smov 22  }
  0x1b   :  { %12172 = sst [smem:[#allocation26_spill]] %s10555_s20 }
  0x1c   :  { %s10575_s20 = sld [smem:[%s12163_s0 + %s10433_s15]]   ;;  %s10437_s15 = smov 23  }
  0x1d   :  { %12173 = sst [smem:[#allocation27_spill]] %s10565_s4 }
  0x1e   :  { %12175 = sst [smem:[#allocation29_spill]] %s10580_s6 }
  0x1f   :  { %s10585_s4 = sld [smem:[%s12163_s0 + %s10435_s28]]   ;;  %s10439_s28 = smov 25  }
  0x20   :  { %s10590_s24 = sld [smem:[%s12163_s0 + %s10436_s7]]   ;;  %s10440_s7 = smov 26  }
  0x21   :  { %s10600_s6 = sld [smem:[%s12163_s0 + %s10438_s22]]   ;;  %s10442_s22 = smov 28  }
  0x22   :  { %12174 = sst [smem:[#allocation28_spill]] %s10575_s20 }
  0x23   :  { %s10595_s20 = sld [smem:[%s12163_s0 + %s10437_s15]]   ;;  %s10441_s15 = smov 27  }
  0x24   :  { %s10610_s14 = sld [smem:[%s12163_s0 + %s10440_s7]]   ;;  %s10444_s7 = smov 30  }
  0x25   :  { %12176 = sst [smem:[#allocation30_spill]] %s10585_s4 }
  0x26   :  { %s10605_s4 = sld [smem:[%s12163_s0 + %s10439_s28]]   ;;  %s10443_s28 = smov 29  }
  0x27   :  { %s10620_s8 = sld [smem:[%s12163_s0 + %s10442_s22]]   ;;  %s10446_s22 = smov 32  }
  0x28   :  { %s10640_s19 = sld [smem:[%s12163_s0 + %s10446_s22]]   ;;  %s10450_s22 = smov 36  }
  0x29   :  { %12177 = sst [smem:[#allocation31_spill]] %s10595_s20 }
  0x2a   :  { %12179 = sst [smem:[#allocation33_spill]] %s10610_s14 }
  0x2b   :  { %s10615_s20 = sld [smem:[%s12163_s0 + %s10441_s15]]   ;;  %s10445_s15 = smov 31  }
  0x2c   :  { %12178 = sst [smem:[#allocation32_spill]] %s10605_s4 }
  0x2d   :  { %s10625_s4 = sld [smem:[%s12163_s0 + %s10443_s28]]   ;;  %s10447_s28 = smov 33  }
  0x2e   :  { %s10630_s14 = sld [smem:[%s12163_s0 + %s10444_s7]]   ;;  %s10448_s7 = smov 34  }
  0x2f   :  { %12184 = sst [smem:[#allocation38_spill]] %s10640_s19 }
  0x30   :  { %s10660_s19 = sld [smem:[%s12163_s0 + %s10450_s22]]  }
  0x31   :  { %12180 = sst [smem:[#allocation34_spill]] %s10615_s20 }
  0x32   :  { %s10635_s20 = sld [smem:[%s12163_s0 + %s10445_s15]]   ;;  %s10449_s15 = smov 35  }
  0x33   :  { %12181 = sst [smem:[#allocation35_spill]] %s10625_s4 }
  0x34   :  { %12182 = sst [smem:[#allocation36_spill]] %s10630_s14 }
  0x35   :  { %s10645_s4 = sld [smem:[%s12163_s0 + %s10447_s28]]   ;;  %s10451_s28 = smov 37  }
  0x36   :  { %s10650_s14 = sld [smem:[%s12163_s0 + %s10448_s7]]   ;;  %s10452_s7 = smov 38  }
  0x38   :  { %12183 = sst [smem:[#allocation37_spill]] %s10635_s20 }
  0x39   :  { %s10655_s20 = sld [smem:[%s12163_s0 + %s10449_s15]]  }
  0x3b   :  { %12185 = sst [smem:[#allocation39_spill]] %s10645_s4 }
  0x3c   :  { %12186 = sst [smem:[#allocation40_spill]] %s10650_s14 }
  0x3d   :  { %s10665_s4 = sld [smem:[%s12163_s0 + %s10451_s28]]  }
  0x3e   :  { %s10670_s14 = sld [smem:[%s12163_s0 + %s10452_s7]]  }
  0x3f   :  { %82 = vsyncpa [#allocation3], 0 }
  0x40   :  { %83 = vsyncpa [#allocation5], 0 }
  0x41   :  { %84 = vsyncpa [#allocation8], 0 }
  0x42   :  { %85 = vsyncpa [#allocation11], 0 }
  0x43   :  { %86 = vsyncpa [#allocation14], 0  ;;  %s10453_s15 = smov [#allocation4]   ;;  %s10454_s18 = smov [#allocation7]  }
  0x44   :  { %s126_s16 = sshll.u32 %s10453_s15, 4  ;;  %s158_s22 = sshll.u32 %s10454_s18, 4  ;;  %s127_s16 = int_to_ptr.vmem [resolvable:$true] %s126_s16  ;;  %s10672_s22 = int_to_ptr.vmem [resolvable:$true] %s158_s22 }
  0x45   :  { %s10229_s23 = scalar_lea.hbm %s10540_s30, 8192 }
  0x46   :  { %p10230_p0 = scmp.ne.s32.totalorder %s10540_s30, %s10229_s23  ;;  %p10233_p1 = scmp.lt.u32.totalorder %s10229_s23, %s10540_s30 }
  0x48   :  { %p10235_p2 = pnand %p10233_p1, %p10230_p0 }
  0x4a   :  { %10238 = shalt.err (!%p10235_p2)
}
  0x4b   :  { %s10239_s0 = scalar_lea.vmem %s127_s16, 8192  ;;  %p10244_p4 = scmp.lt.s32.totalorder %s127_s16, %s127_s16 }
  0x4c   :  { %p10240_p3 = scmp.ne.s32.totalorder %s127_s16, %s10239_s0  ;;  %p10245_p5 = scmp.lt.s32.totalorder %s10239_s0, %s10239_s0 }
  0x4e   :  { %p10246_p6 = por %p10245_p5, %p10244_p4 }
  0x50   :  { %p10247_p7 = pnand %p10246_p6, %p10240_p3 }
  0x52   :  { %10250 = shalt.err (!%p10247_p7)
}
  0x53   :  { %s10455_s26 = smov 128   ;;  %s10456_s28 = smov 8  }
  0x54   :  { %132 = dma.hbm_to_vmem [thread:$0]  %s10540_s30, 8192, %s127_s16, [#allocation5], %s10455_s26, %s10455_s26, %s10456_s28  }
  0x55   :  { %s10251_s1 = scalar_lea.hbm %s10570_s12, 4096 }
  0x56   :  { %p10252_p8 = scmp.ne.s32.totalorder %s10570_s12, %s10251_s1  ;;  %p10255_p9 = scmp.lt.u32.totalorder %s10251_s1, %s10570_s12 }
  0x58   :  { %p10257_p10 = pnand %p10255_p9, %p10252_p8 }
  0x5a   :  { %10260 = shalt.err (!%p10257_p10)
}
  0x5b   :  { %s10261_s2 = scalar_lea.vmem %s10672_s22, 4096  ;;  %p10266_p12 = scmp.lt.s32.totalorder %s10672_s22, %s10672_s22 }
  0x5c   :  { %p10262_p11 = scmp.ne.s32.totalorder %s10672_s22, %s10261_s2  ;;  %p10267_p13 = scmp.lt.s32.totalorder %s10261_s2, %s10261_s2 }
  0x5e   :  { %p10268_p0 = por %p10267_p13, %p10266_p12 }
  0x60   :  { %p10269_p1 = pnand %p10268_p0, %p10262_p11 }
  0x62   :  { %10272 = shalt.err (!%p10269_p1)
}
  0x63   :  { %164 = dma.hbm_to_vmem [thread:$0]  %s10570_s12, 4096, %s10672_s22, [#allocation8], %s10455_s26, %s10455_s26, %s10456_s28  }
  0x64   :  { %s10457_s30 = smov [#allocation10]   ;;  %s10458_s10 = smov [#allocation2]  }
  0x65   :  { %s190_s7 = sshll.u32 %s10457_s30, 4  ;;  %s104_s11 = sshll.u32 %s10458_s10, 4  ;;  %s191_s7 = int_to_ptr.vmem [resolvable:$true] %s190_s7  ;;  %s10693_s11 = int_to_ptr.vmem [resolvable:$true] %s104_s11 }
  0x66   :  { %s10273_s15 = scalar_lea.hbm %s10600_s6, 8192 }
  0x67   :  { %p10274_p2 = scmp.ne.s32.totalorder %s10600_s6, %s10273_s15  ;;  %p10277_p3 = scmp.lt.u32.totalorder %s10273_s15, %s10600_s6 }
  0x69   :  { %p10279_p4 = pnand %p10277_p3, %p10274_p2 }
  0x6b   :  { %10282 = shalt.err (!%p10279_p4)
}
  0x6c   :  { %s10283_s16 = scalar_lea.vmem %s191_s7, 8192  ;;  %p10288_p6 = scmp.lt.s32.totalorder %s191_s7, %s191_s7 }
  0x6d   :  { %p10284_p5 = scmp.ne.s32.totalorder %s191_s7, %s10283_s16  ;;  %p10289_p7 = scmp.lt.s32.totalorder %s10283_s16, %s10283_s16 }
  0x6f   :  { %p10290_p8 = por %p10289_p7, %p10288_p6 }
  0x71   :  { %p10291_p9 = pnand %p10290_p8, %p10284_p5 }
  0x73   :  { %10294 = shalt.err (!%p10291_p9)
}
  0x74   :  { %196 = dma.hbm_to_vmem [thread:$0]  %s10600_s6, 8192, %s191_s7, [#allocation11], %s10455_s26, %s10455_s26, %s10456_s28  }
  0x75   :  { %s10295_s12 = scalar_lea.hbm %s10510_s29, 4096 }
  0x76   :  { %p10296_p10 = scmp.ne.s32.totalorder %s10510_s29, %s10295_s12  ;;  %p10299_p11 = scmp.lt.u32.totalorder %s10295_s12, %s10510_s29 }
  0x78   :  { %p10301_p12 = pnand %p10299_p11, %p10296_p10 }
  0x7a   :  { %10304 = shalt.err (!%p10301_p12)
}
  0x7b   :  { %s10305_s18 = scalar_lea.vmem %s10693_s11, 4096  ;;  %p10310_p0 = scmp.lt.s32.totalorder %s10693_s11, %s10693_s11 }
  0x7c   :  { %p10306_p13 = scmp.ne.s32.totalorder %s10693_s11, %s10305_s18  ;;  %p10311_p1 = scmp.lt.s32.totalorder %s10305_s18, %s10305_s18 }
  0x7e   :  { %p10312_p2 = por %p10311_p1, %p10310_p0 }
  0x80   :  { %p10313_p3 = pnand %p10312_p2, %p10306_p13 }
  0x82   :  { %10316 = shalt.err (!%p10313_p3)
}
  0x83   :  { %110 = dma.hbm_to_vmem [thread:$0]  %s10510_s29, 4096, %s10693_s11, [#allocation3], %s10455_s26, %s10455_s26, %s10456_s28  }
  0x84   :  { %s10459_s6 = smov [#allocation6]   ;;  %s10317_s23 = scalar_lea.hbm %s10560_s27, 12288 }
  0x85   :  { %s144_s22 = sshll.u32 %s10459_s6, 4  ;;  %p10318_p4 = scmp.ne.s32.totalorder %s10560_s27, %s10317_s23  ;;  %s145_s22 = int_to_ptr.vmem [resolvable:$true] %s144_s22 }
  0x86   :  { %p10321_p5 = scmp.lt.u32.totalorder %s10317_s23, %s10560_s27 }
  0x88   :  { %p10323_p6 = pnand %p10321_p5, %p10318_p4 }
  0x8a   :  { %10326 = shalt.err (!%p10323_p6)
}
  0x8b   :  { %s10327_s0 = scalar_lea.vmem %s145_s22, 12288  ;;  %p10332_p8 = scmp.lt.s32.totalorder %s145_s22, %s145_s22 }
  0x8c   :  { %p10328_p7 = scmp.ne.s32.totalorder %s145_s22, %s10327_s0  ;;  %p10333_p9 = scmp.lt.s32.totalorder %s10327_s0, %s10327_s0 }
  0x8e   :  { %p10334_p10 = por %p10333_p9, %p10332_p8 }
  0x90   :  { %p10335_p11 = pnand %p10334_p10, %p10328_p7 }
  0x92   :  { %10338 = shalt.err (!%p10335_p11)
}
  0x93   :  { %s10460_s1 = smov 384   ;;  %s10461_s29 = smov 24  }
  0x94   :  { %150 = dma.hbm_to_vmem [thread:$0]  %s10560_s27, 12288, %s145_s22, [#allocation5], %s10460_s1, %s10460_s1, %s10461_s29  }
  0x95   :  { %s10462_s2 = smov [#allocation9]   ;;  %s10339_s7 = scalar_lea.hbm %s10590_s24, 8192 }
  0x96   :  { %s176_s30 = sshll.u32 %s10462_s2, 4  ;;  %p10340_p12 = scmp.ne.s32.totalorder %s10590_s24, %s10339_s7  ;;  %s177_s30 = int_to_ptr.vmem [resolvable:$true] %s176_s30 }
  0x97   :  { %p10343_p13 = scmp.lt.u32.totalorder %s10339_s7, %s10590_s24 }
  0x99   :  { %p10345_p0 = pnand %p10343_p13, %p10340_p12 }
  0x9b   :  { %10348 = shalt.err (!%p10345_p0)
}
  0x9c   :  { %s10349_s10 = scalar_lea.vmem %s177_s30, 8192  ;;  %p10354_p2 = scmp.lt.s32.totalorder %s177_s30, %s177_s30 }
  0x9d   :  { %p10350_p1 = scmp.ne.s32.totalorder %s177_s30, %s10349_s10  ;;  %p10355_p3 = scmp.lt.s32.totalorder %s10349_s10, %s10349_s10 }
  0x9f   :  { %p10356_p4 = por %p10355_p3, %p10354_p2 }
  0xa1   :  { %p10357_p5 = pnand %p10356_p4, %p10350_p1 }
  0xa3   :  { %10360 = shalt.err (!%p10357_p5)
}
  0xa4   :  { %s10463_s11 = smov 256   ;;  %s10464_s27 = smov 16  }
  0xa5   :  { %182 = dma.hbm_to_vmem [thread:$0]  %s10590_s24, 8192, %s177_s30, [#allocation8], %s10463_s11, %s10463_s11, %s10464_s27  }
  0xa6   :  { %s10465_s15 = smov [#allocation12]   ;;  %s10466_s12 = smov [#allocation13]  }
  0xa7   :  { %s208_s16 = sshll.u32 %s10465_s15, 4  ;;  %s234_s18 = sshll.u32 %s10466_s12, 4  ;;  %s209_s16 = int_to_ptr.vmem [resolvable:$true] %s208_s16  ;;  %s10722_s18 = int_to_ptr.vmem [resolvable:$true] %s234_s18 }
  0xa8   :  { %s10361_s6 = scalar_lea.hbm %s10620_s8, 8192 }
  0xa9   :  { %p10362_p6 = scmp.ne.s32.totalorder %s10620_s8, %s10361_s6  ;;  %p10365_p7 = scmp.lt.u32.totalorder %s10361_s6, %s10620_s8 }
  0xab   :  { %p10367_p8 = pnand %p10365_p7, %p10362_p6 }
  0xad   :  { %10370 = shalt.err (!%p10367_p8)
}
  0xae   :  { %s10371_s22 = scalar_lea.vmem %s209_s16, 8192  ;;  %p10376_p10 = scmp.lt.s32.totalorder %s209_s16, %s209_s16 }
  0xaf   :  { %p10372_p9 = scmp.ne.s32.totalorder %s209_s16, %s10371_s22  ;;  %p10377_p11 = scmp.lt.s32.totalorder %s10371_s22, %s10371_s22 }
  0xb1   :  { %p10378_p12 = por %p10377_p11, %p10376_p10 }
  0xb3   :  { %p10379_p13 = pnand %p10378_p12, %p10372_p9 }
  0xb5   :  { %10382 = shalt.err (!%p10379_p13)
}
  0xb6   :  { %214 = dma.hbm_to_vmem [thread:$0]  %s10620_s8, 8192, %s209_s16, [#allocation11], %s10455_s26, %s10455_s26, %s10456_s28  }
  0xb7   :  { %s10383_s24 = scalar_lea.hbm %s10660_s19, 2048 }
  0xb8   :  { %p10384_p0 = scmp.ne.s32.totalorder %s10660_s19, %s10383_s24  ;;  %p10387_p1 = scmp.lt.u32.totalorder %s10383_s24, %s10660_s19 }
  0xba   :  { %p10389_p2 = pnand %p10387_p1, %p10384_p0 }
  0xbc   :  { %10392 = shalt.err (!%p10389_p2)
}
  0xbd   :  { %s10393_s23 = scalar_lea.vmem %s10722_s18, 2048  ;;  %p10398_p4 = scmp.lt.s32.totalorder %s10722_s18, %s10722_s18 }
  0xbe   :  { %p10394_p3 = scmp.ne.s32.totalorder %s10722_s18, %s10393_s23  ;;  %p10399_p5 = scmp.lt.s32.totalorder %s10393_s23, %s10393_s23 }
  0xc0   :  { %p10400_p6 = por %p10399_p5, %p10398_p4 }
  0xc2   :  { %p10401_p7 = pnand %p10400_p6, %p10394_p3 }
  0xc4   :  { %10404 = shalt.err (!%p10401_p7)
}
  0xc5   :  { %s10467_s0 = smov 64   ;;  %s10468_s8 = smov 4  }
  0xc6   :  { %240 = dma.hbm_to_vmem [thread:$0]  %s10660_s19, 2048, %s10722_s18, [#allocation14], %s10467_s0, %s10467_s0, %s10468_s8  }
  0xc7   :  { %10405 = dma.done.wait [#allocation3], 4096  }
  0xc8   :  { %10406 = vsyncadd [#allocation3], 4294963200 }
  0xc9   :  { %10407 = dma.done.wait [#allocation5], 20480  }
  0xca   :  { %10408 = vsyncadd [#allocation5], 4294946816 }
  0xcb   :  { %10409 = dma.done.wait [#allocation8], 12288  }
  0xcc   :  { %10410 = vsyncadd [#allocation8], 4294955008 }
  0xcd   :  { %10411 = dma.done.wait [#allocation11], 16384  }
  0xce   :  { %10412 = vsyncadd [#allocation11], 4294950912 }
  0xcf   :  { %10413 = dma.done.wait [#allocation14], 2048  }
  0xd0   :  { %10414 = vsyncadd [#allocation14], 4294965248  ;;  %v10741_v0 = vld [vmem:[%s10480_s5] sm:$0xff]  ;;  %v10744_v1 = vld [vmem:[%s10480_s5 + $0x8] sm:$0xff]  ;;  %vm10470_vm0 = vmmov 0   ;;  %vm1448_vm1 = vcmask 1043456  }
  0xd1   :  { %v10747_v2 = vld [vmem:[%s10480_s5 + $0x20] sm:$0xff]  ;;  %v278_v3 = vadd.f32 %v10744_v1, %v10741_v0  ;;  %v10752_v4 = vld [vmem:[%s10480_s5 + $0x28] sm:$0xff]  ;;  %v10755_v5 = vld [vmem:[%s10480_s5 + $0x10] sm:$0xff]  ;;  %vm1396_vm2 = vcmask 64512   ;;  %s12193_s19 = sld [smem:[#allocation26_spill]]  ;;  %s12194_s26 = sld [smem:[#allocation27_spill]] }
  0xd2   :  { %v10758_v6 = vld [vmem:[%s10480_s5 + $0x18] sm:$0xff]  ;;  %v284_v7 = vadd.f32 %v10752_v4, %v10747_v2  ;;  %v274_v8 = vld [vmem:[%s10480_s5 + $0x30] sm:$0xff]  ;;  %v9126_v14 = vld [vmem:[%s10500_s21 + $0xc] ss:$24 sps:$4 sm:$0xff]   ;;  %s12196_s28 = sld [smem:[#allocation29_spill]]  ;;  %s12197_s1 = sld [smem:[#allocation30_spill]] }
  0xd3   :  { %v275_v9 = vld [vmem:[%s10480_s5 + $0x38] sm:$0xff]  ;;  %279 = vadd.xlane.f32.xlu0 %v278_v3  ;;  %v281_v10 = vadd.f32 %v10758_v6, %v10755_v5  ;;  %v9128_v15 = vld [vmem:[%s10500_s21 + $0x8] ss:$24 sps:$4 sm:$0xff]   ;;  %v9129_v16 = vld [vmem:[%s10500_s21 + $0x34] ss:$24 sps:$4 sm:$0xff]   ;;  %1074 = vmatprep.subr.bf16.mxu1 %v9126_v14  ;;  %s12198_s29 = sld [smem:[#allocation31_spill]] }
  0xd4   :  { %285 = vadd.xlane.f32.xlu1 %v284_v7  ;;  %v287_v11 = vadd.f32 %v275_v9, %v274_v8  ;;  %v9123_v12 = vld [vmem:[%s10500_s21 + $0x4] ss:$24 sps:$4 sm:$0xff]   ;;  %v9125_v13 = vld [vmem:[%s10500_s21] ss:$24 sps:$4 sm:$0xff]   ;;  %1075 = vmatpush1.bf16.msra.mxu1 %v9128_v15  ;;  %v9131_v18 = vld [vmem:[%s10500_s21 + $0x30] ss:$24 sps:$4 sm:$0xff]  }
  0xd5   :  { %1021 = vmatprep.subr.bf16.mxu0 %v9123_v12  ;;  %v9132_v17 = vld [vmem:[%s10500_s21 + $0x3c] ss:$24 sps:$4 sm:$0xff]   ;;  %v9134_v19 = vld [vmem:[%s10500_s21 + $0x38] ss:$24 sps:$4 sm:$0xff]   ;;  %v9138_v21 = vld [vmem:[%s10500_s21 + $0x6c] ss:$24 sps:$4 sm:$0xff]  }
  0xd6   :  { %1022 = vmatpush1.bf16.msra.mxu0 %v9125_v13  ;;  %1076 = vmatprep.subr.bf16.mxu1 %v9132_v17  ;;  %v9135_v20 = vld [vmem:[%s10500_s21 + $0x64] ss:$24 sps:$4 sm:$0xff]   ;;  %v9137_v22 = vld [vmem:[%s10500_s21 + $0x60] ss:$24 sps:$4 sm:$0xff]   ;;  %v9141_v24 = vld [vmem:[%s10500_s21 + $0x94] ss:$24 sps:$4 sm:$0xff]  }
  0xd7   :  { %282 = vadd.xlane.f32.xlu0 %v281_v10  ;;  %1023 = vmatprep.subr.bf16.mxu0 %v9129_v16  ;;  %v9140_v23 = vld [vmem:[%s10500_s21 + $0x68] ss:$24 sps:$4 sm:$0xff]   ;;  %v9144_v25 = vld [vmem:[%s10500_s21 + $0x9c] ss:$24 sps:$4 sm:$0xff]   ;;  %v9146_v27 = vld [vmem:[%s10500_s21 + $0x98] ss:$24 sps:$4 sm:$0xff]  }
  0xd8   :  { %288 = vadd.xlane.f32.xlu1 %v287_v11  ;;  %1077 = vmatpush1.bf16.msra.mxu1 %v9134_v19  ;;  %v9143_v26 = vld [vmem:[%s10500_s21 + $0x90] ss:$24 sps:$4 sm:$0xff]   ;;  %v9147_v28 = vld [vmem:[%s10500_s21 + $0xc4] ss:$24 sps:$4 sm:$0xff]   ;;  %v9149_v30 = vld [vmem:[%s10500_s21 + $0xc0] ss:$24 sps:$4 sm:$0xff]  }
  0xd9   :  { %1078 = vmatprep.subr.bf16.mxu1 %v9138_v21  ;;  %v9150_v29 = vld [vmem:[%s10500_s21 + $0xcc] ss:$24 sps:$4 sm:$0xff]   ;;  %v9152_v31 = vld [vmem:[%s10500_s21 + $0xc8] ss:$24 sps:$4 sm:$0xff]   ;;  %v9156_v33 = vld [vmem:[%s10500_s21 + $0xfc] ss:$24 sps:$4 sm:$0xff]  }
  0xda   :  { %1024 = vmatpush1.bf16.msra.mxu0 %v9131_v18  ;;  %v9153_v32 = vld [vmem:[%s10500_s21 + $0xf4] ss:$24 sps:$4 sm:$0xff]   ;;  %v9155_v34 = vld [vmem:[%s10500_s21 + $0xf0] ss:$24 sps:$4 sm:$0xff]   ;;  %v9159_v36 = vld [vmem:[%s10500_s21 + $0x124] ss:$24 sps:$4 sm:$0xff]  }
  0xdb   :  { %1025 = vmatprep.subr.bf16.mxu0 %v9135_v20  ;;  %v9158_v35 = vld [vmem:[%s10500_s21 + $0xf8] ss:$24 sps:$4 sm:$0xff]   ;;  %v9162_v37 = vld [vmem:[%s10500_s21 + $0x12c] ss:$24 sps:$4 sm:$0xff]   ;;  %v9164_v39 = vld [vmem:[%s10500_s21 + $0x128] ss:$24 sps:$4 sm:$0xff]  }
  0xdc   :  { %1079 = vmatpush1.bf16.msra.mxu1 %v9140_v23  ;;  %v9161_v38 = vld [vmem:[%s10500_s21 + $0x120] ss:$24 sps:$4 sm:$0xff]   ;;  %v9165_v40 = vld [vmem:[%s10500_s21 + $0x154] ss:$24 sps:$4 sm:$0xff]   ;;  %v9167_v42 = vld [vmem:[%s10500_s21 + $0x150] ss:$24 sps:$4 sm:$0xff]  }
  0xdd   :  { %1080 = vmatprep.subr.bf16.mxu1 %v9144_v25  ;;  %v9168_v41 = vld [vmem:[%s10500_s21 + $0x15c] ss:$24 sps:$4 sm:$0xff]   ;;  %v9170_v43 = vld [vmem:[%s10500_s21 + $0x158] ss:$24 sps:$4 sm:$0xff]   ;;  %v9174_v45 = vld [vmem:[%s10500_s21 + $0x18c] ss:$24 sps:$4 sm:$0xff]  }
  0xde   :  { %1026 = vmatpush1.bf16.msra.mxu0 %v9137_v22  ;;  %v9171_v44 = vld [vmem:[%s10500_s21 + $0x184] ss:$24 sps:$4 sm:$0xff]   ;;  %v9173_v46 = vld [vmem:[%s10500_s21 + $0x180] ss:$24 sps:$4 sm:$0xff]   ;;  %v9177_v48 = vld [vmem:[%s10500_s21 + $0x1b4] ss:$24 sps:$4 sm:$0xff]  }
  0xdf   :  { %1027 = vmatprep.subr.bf16.mxu0 %v9141_v24  ;;  %v9176_v47 = vld [vmem:[%s10500_s21 + $0x188] ss:$24 sps:$4 sm:$0xff]   ;;  %v10224_v8 = vld [vmem:[%s10480_s5 + $0x38] sm:$0xff]  ;;  %v9186_v20 = vld [vmem:[%s10500_s21 + $0x1ec] ss:$24 sps:$4 sm:$0xff]   ;;  %s12199_s2 = sld [smem:[#allocation32_spill]] }
  0xe0   :  { %1081 = vmatpush1.bf16.msra.mxu1 %v9146_v27  ;;  %v9179_v15 = vld [vmem:[%s10500_s21 + $0x1b0] ss:$24 sps:$4 sm:$0xff]   ;;  %v9180_v16 = vld [vmem:[%s10500_s21 + $0x1bc] ss:$24 sps:$4 sm:$0xff]   ;;  %v9185_v19 = vld [vmem:[%s10500_s21 + $0x1e0] ss:$24 sps:$4 sm:$0xff]  }
  0xe1   :  { %1082 = vmatprep.subr.bf16.mxu1 %v9150_v29  ;;  %v9182_v17 = vld [vmem:[%s10500_s21 + $0x1b8] ss:$24 sps:$4 sm:$0xff]   ;;  %v9183_v18 = vld [vmem:[%s10500_s21 + $0x1e4] ss:$24 sps:$4 sm:$0xff]   ;;  %v9188_v21 = vld [vmem:[%s10500_s21 + $0x1e8] ss:$24 sps:$4 sm:$0xff]  }
  0xe2   :  { %1028 = vmatpush1.bf16.msra.mxu0 %v9143_v26  ;;  %v9189_v22 = vld [vmem:[%s10500_s21 + $0x214] ss:$24 sps:$4 sm:$0xff]   ;;  %v9191_v23 = vld [vmem:[%s10500_s21 + $0x210] ss:$24 sps:$4 sm:$0xff]   ;;  %v9195_v26 = vld [vmem:[%s10500_s21 + $0x244] ss:$24 sps:$4 sm:$0xff]  }
  0xe3   :  { %1029 = vmatprep.subr.bf16.mxu0 %v9147_v28  ;;  %v9192_v24 = vld [vmem:[%s10500_s21 + $0x21c] ss:$24 sps:$4 sm:$0xff]   ;;  %v9194_v25 = vld [vmem:[%s10500_s21 + $0x218] ss:$24 sps:$4 sm:$0xff]   ;;  %v9198_v28 = vld [vmem:[%s10500_s21 + $0x24c] ss:$24 sps:$4 sm:$0xff]  }
  0xe4   :  { %1083 = vmatpush1.bf16.msra.mxu1 %v9152_v31  ;;  %v9197_v27 = vld [vmem:[%s10500_s21 + $0x240] ss:$24 sps:$4 sm:$0xff]   ;;  %v9203_v31 = vld [vmem:[%s10500_s21 + $0x270] ss:$24 sps:$4 sm:$0xff]   ;;  %s12200_s30 = sld [smem:[#allocation33_spill]]  ;;  %s12201_s7 = sld [smem:[#allocation34_spill]] }
  0xe5   :  { %1084 = vmatprep.subr.bf16.mxu1 %v9156_v33  ;;  %v9200_v29 = vld [vmem:[%s10500_s21 + $0x248] ss:$24 sps:$4 sm:$0xff]   ;;  %v9206_v33 = vld [vmem:[%s10500_s21 + $0x278] ss:$24 sps:$4 sm:$0xff]   ;;  %vm7082_vm3 = vcmask 1041409   ;;  %s12202_s10 = sld [smem:[#allocation35_spill]] }
  0xe6   :  { %1030 = vmatpush1.bf16.msra.mxu0 %v9149_v30  ;;  %v9201_v30 = vld [vmem:[%s10500_s21 + $0x274] ss:$24 sps:$4 sm:$0xff]   ;;  %s12203_s11 = sld [smem:[#allocation38_spill]]  ;;  %vm7526_vm4 = vcmask 1041408   ;;  %s12204_s27 = sld [smem:[#allocation36_spill]] }
  0xe7   :  { %1031 = vmatprep.subr.bf16.mxu0 %v9153_v32  ;;  %v9204_v32 = vld [vmem:[%s10500_s21 + $0x27c] ss:$24 sps:$4 sm:$0xff]   ;;  %s12205_s15 = sld [smem:[#allocation37_spill]]  ;;  %s12206_s16 = sld [smem:[#allocation39_spill]] }
  0xe8   :  { %1085 = vmatpush1.bf16.msra.mxu1 %v9158_v35  ;;  %v9210_v35 = vld [vmem:[%s10500_s21 + $0x2ac] ss:$24 sps:$4 sm:$0xff]   ;;  %s12207_s12 = sld [smem:[#allocation40_spill]] }
  0xe9   :  { %1086 = vmatprep.subr.bf16.mxu1 %v9162_v37  ;;  %v9212_v37 = vld [vmem:[%s10500_s21 + $0x2a8] ss:$24 sps:$4 sm:$0xff]  }
  0xea   :  { %1032 = vmatpush1.bf16.msra.mxu0 %v9155_v34  ;;  %v9207_v34 = vld [vmem:[%s10500_s21 + $0x2a4] ss:$24 sps:$4 sm:$0xff]  }
  0xeb   :  { %1033 = vmatprep.subr.bf16.mxu0 %v9159_v36  ;;  %v9209_v36 = vld [vmem:[%s10500_s21 + $0x2a0] ss:$24 sps:$4 sm:$0xff]  }
  0xec   :  { %1087 = vmatpush1.bf16.msra.mxu1 %v9164_v39  ;;  %v9216_v39 = vld [vmem:[%s10500_s21 + $0x2dc] ss:$24 sps:$4 sm:$0xff]  }
  0xed   :  { %1088 = vmatprep.subr.bf16.mxu1 %v9168_v41  ;;  %v9218_v41 = vld [vmem:[%s10500_s21 + $0x2d8] ss:$24 sps:$4 sm:$0xff]  }
  0xee   :  { %1034 = vmatpush1.bf16.msra.mxu0 %v9161_v38  ;;  %v9213_v38 = vld [vmem:[%s10500_s21 + $0x2d4] ss:$24 sps:$4 sm:$0xff]  }
  0xef   :  { %1035 = vmatprep.subr.bf16.mxu0 %v9165_v40  ;;  %v9215_v40 = vld [vmem:[%s10500_s21 + $0x2d0] ss:$24 sps:$4 sm:$0xff]  }
  0xf0   :  { %1089 = vmatpush1.bf16.msra.mxu1 %v9170_v43 }
  0xf1   :  { %1090 = vmatprep.subr.bf16.mxu1 %v9174_v45 }
  0xf2   :  { %1036 = vmatpush1.bf16.msra.mxu0 %v9167_v42  ;;  %v9221_v42 = vld [vmem:[%s10500_s21 + $0x14] ss:$24 sps:$4 sm:$0xff]  }
  0xf3   :  { %1037 = vmatprep.subr.bf16.mxu0 %v9171_v44 }
  0xf4   :  { %1091 = vmatpush1.bf16.msra.mxu1 %v9176_v47 }
  0xf5   :  { %1092 = vmatprep.subr.bf16.mxu1 %v9180_v16 }
  0xf6   :  { %1038 = vmatpush1.bf16.msra.mxu0 %v9173_v46  ;;  %v344_v46 = vlaneseq }
  0xf7   :  { %1039 = vmatprep.subr.bf16.mxu0 %v9177_v48 }
  0xf8   :  { %1093 = vmatpush1.bf16.msra.mxu1 %v9182_v17 }
  0xf9   :  { %1094 = vmatprep.subr.bf16.mxu1 %v9186_v20 }
  0xfa   :  { %1040 = vmatpush1.bf16.msra.mxu0 %v9179_v15 }
  0xfb   :  { %1041 = vmatprep.subr.bf16.mxu0 %v9183_v18 }
  0xfc   :  { %1095 = vmatpush1.bf16.msra.mxu1 %v9188_v21 }
  0xfd   :  { %1096 = vmatprep.subr.bf16.mxu1 %v9192_v24 }
  0xfe   :  { %1042 = vmatpush1.bf16.msra.mxu0 %v9185_v19 }
  0xff   :  { %1043 = vmatprep.subr.bf16.mxu0 %v9189_v22 }
 0x100   :  { %1097 = vmatpush1.bf16.msra.mxu1 %v9194_v25 }
 0x101   :  { %1098 = vmatprep.subr.bf16.mxu1 %v9198_v28 }
 0x102   :  { %1044 = vmatpush1.bf16.msra.mxu0 %v9191_v23 }
 0x103   :  { %1045 = vmatprep.subr.bf16.mxu0 %v9195_v26  ;;  %v9219_v26 = vld [vmem:[%s10500_s21 + $0x10] ss:$24 sps:$4 sm:$0xff]  }
 0x104   :  { %1099 = vmatpush1.bf16.msra.mxu1 %v9200_v29  ;;  %v9224_v29 = vld [vmem:[%s10500_s21 + $0x44] ss:$24 sps:$4 sm:$0xff]  }
 0x105   :  { %1100 = vmatprep.subr.bf16.mxu1 %v9204_v32  ;;  %v9222_v32 = vld [vmem:[%s10500_s21 + $0x40] ss:$24 sps:$4 sm:$0xff]  }
 0x106   :  { %1046 = vmatpush1.bf16.msra.mxu0 %v9197_v27 }
 0x107   :  { %1047 = vmatprep.subr.bf16.mxu0 %v9201_v30 }
 0x108   :  { %1101 = vmatpush1.bf16.msra.mxu1 %v9206_v33  ;;  %v9227_v33 = vld [vmem:[%s10500_s21 + $0x74] ss:$24 sps:$4 sm:$0xff]  }
 0x109   :  { %1102 = vmatprep.subr.bf16.mxu1 %v9210_v35 }
 0x10a   :  { %1048 = vmatpush1.bf16.msra.mxu0 %v9203_v31 }
 0x10b   :  { %1049 = vmatprep.subr.bf16.mxu0 %v9207_v34 }
 0x10c   :  { %1103 = vmatpush1.bf16.msra.mxu1 %v9212_v37 }
 0x10d   :  { %1104 = vmatprep.subr.bf16.mxu1 %v9216_v39  ;;  %v9228_v39 = vld [vmem:[%s10500_s21 + $0xa0] ss:$24 sps:$4 sm:$0xff]  }
 0x10e   :  { %1050 = vmatpush1.bf16.msra.mxu0 %v9209_v36  ;;  %v9225_v36 = vld [vmem:[%s10500_s21 + $0x70] ss:$24 sps:$4 sm:$0xff]  }
 0x10f   :  { %1051 = vmatprep.subr.bf16.mxu0 %v9213_v38  ;;  %v9230_v38 = vld [vmem:[%s10500_s21 + $0xa4] ss:$24 sps:$4 sm:$0xff]  }
 0x110   :  { %1105 = vmatpush1.bf16.msra.mxu1 %v9218_v41  ;;  %v9231_v41 = vld [vmem:[%s10500_s21 + $0xd0] ss:$24 sps:$4 sm:$0xff]  }
 0x112   :  { %1052 = vmatpush1.bf16.msra.mxu0 %v9215_v40  ;;  %v9233_v40 = vld [vmem:[%s10500_s21 + $0xd4] ss:$24 sps:$4 sm:$0xff]  }
 0x113   :  { %1127 = vmatprep.subr.bf16.mxu0 %v9221_v42  ;;  %v9236_v42 = vld [vmem:[%s10500_s21 + $0x104] ss:$24 sps:$4 sm:$0xff]  }
 0x160   :  { %v280_v49 = vpop.xlane.xlu0 %279 }
 0x161   :  { %v291_v50 = vmul.f32 0.00390625, %v280_v49  ;;  %v286_v51 = vpop.xlane.xlu1 %285 }
 0x162   :  { %v293_v52 = vmul.f32 0.00390625, %v286_v51 }
 0x163   :  { %v10804_v53 = vsub.f32 %v10741_v0, %v291_v50  ;;  %v10807_v54 = vsub.f32 %v10744_v1, %v291_v50 }
 0x164   :  { %v10810_v55 = vsub.f32 %v10747_v2, %v293_v52  ;;  %v10813_v56 = vsub.f32 %v10752_v4, %v293_v52  ;;  %v283_v57 = vpop.xlane.xlu0 %282  ;;  %v10223_v4 = vld [vmem:[%s10480_s5 + $0x30] sm:$0xff]  ;;  %s12187_s5 = sld [smem:[#allocation22_spill]] }
 0x165   :  { %v292_v58 = vmul.f32 0.00390625, %v283_v57  ;;  %v289_v59 = vpop.xlane.xlu1 %288  ;;  %v303_v60 = vmul.f32 %v10804_v53, %v10804_v53  ;;  %v304_v61 = vmul.f32 %v10807_v54, %v10807_v54  ;;  %v10871_v57 = vshrl.u32 %v344_v46, 7  ;;  %v9242_v46 = vld [vmem:[%s10500_s21 + $0x164] ss:$24 sps:$4 sm:$0xff]  }
 0x166   :  { %v294_v62 = vmul.f32 0.00390625, %v289_v59  ;;  %v307_v63 = vmul.f32 %v10810_v55, %v10810_v55  ;;  %v308_v0 = vmul.f32 %v10813_v56, %v10813_v56 }
 0x167   :  { %v10824_v1 = vsub.f32 %v10755_v5, %v292_v58  ;;  %v10827_v2 = vsub.f32 %v10758_v6, %v292_v58  ;;  %v311_v3 = vadd.f32 %v304_v61, %v303_v60  ;;  %v10874_v61 = vsub.s32 1, %v10871_v57 }
 0x168   :  { %v10830_v7 = vsub.f32 %v10223_v4, %v294_v62  ;;  %v10833_v9 = vsub.f32 %v10224_v8, %v294_v62  ;;  %v317_v10 = vadd.f32 %v308_v0, %v307_v63  ;;  %v10877_v62 = vsub.s32 0, %v10871_v57  ;;  %v276_v63 = vld [vmem:[%s10490_s13] sm:$0x3]  ;;  %s12188_s13 = sld [smem:[#allocation20_spill]] }
 0x169   :  { %312 = vadd.xlane.f32.xlu0 %v311_v3  ;;  %v305_v5 = vmul.f32 %v10824_v1, %v10824_v1  ;;  %v306_v6 = vmul.f32 %v10827_v2, %v10827_v2  ;;  %v351_v3 = vrot.slane %v276_v63, %v10874_v61  ;;  %v277_v8 = vld [vmem:[%s10495_s17] sm:$0x3]  ;;  %s12189_s17 = sld [smem:[#allocation21_spill]] }
 0x16a   :  { %v309_v11 = vmul.f32 %v10830_v7, %v10830_v7  ;;  %v310_v12 = vmul.f32 %v10833_v9, %v10833_v9  ;;  %v347_v4 = vrot.slane %v276_v63, %v10877_v62  ;;  %v9257_v63 = vld [vmem:[%s10500_s21 + $0x254] ss:$24 sps:$4 sm:$0xff]  }
 0x16b   :  { %v314_v13 = vadd.f32 %v306_v6, %v305_v5 }
 0x16c   :  { %v320_v14 = vadd.f32 %v310_v12, %v309_v11  ;;  %v370_v12 = vrot.slane %v277_v8, %v10874_v61 }
 0x16d   :  { %318 = vadd.xlane.f32.xlu0 %v317_v10  ;;  %315 = vadd.xlane.f32.xlu1 %v314_v13 }
 0x171   :  { %321 = vadd.xlane.f32.xlu1 %v320_v14  ;;  %v366_v14 = vrot.slane %v277_v8, %v10877_v62  ;;  %v9263_v8 = vld [vmem:[%s10500_s21 + $0x2b4] ss:$24 sps:$4 sm:$0xff]  }
 0x1f6   :  { %v313_v43 = vpop.xlane.xlu0 %312 }
 0x1f7   :  { %v323_v44 = vmul.f32 0.00390625, %v313_v43  ;;  %v9234_v43 = vld [vmem:[%s10500_s21 + $0x100] ss:$24 sps:$4 sm:$0xff]  }
 0x1f9   :  { %v327_v45 = vadd.f32 1e-12, %v323_v44  ;;  %v9239_v44 = vld [vmem:[%s10500_s21 + $0x134] ss:$24 sps:$4 sm:$0xff]  }
 0x1fa   :  { %v316_v47 = vpop.xlane.xlu1 %315  ;;  %v319_v48 = vpop.xlane.xlu0 %318 }
 0x1fb   :  { %10051 = vrsqrt.f32 %v327_v45  ;;  %v324_v49 = vmul.f32 0.00390625, %v316_v47  ;;  %v325_v50 = vmul.f32 0.00390625, %v319_v48  ;;  %v9237_v45 = vld [vmem:[%s10500_s21 + $0x130] ss:$24 sps:$4 sm:$0xff]   ;;  %v9240_v47 = vld [vmem:[%s10500_s21 + $0x160] ss:$24 sps:$4 sm:$0xff]  }
 0x1fc   :  { %v9245_v48 = vld [vmem:[%s10500_s21 + $0x194] ss:$24 sps:$4 sm:$0xff]  }
 0x1fd   :  { %v328_v51 = vadd.f32 1e-12, %v324_v49  ;;  %v329_v52 = vadd.f32 1e-12, %v325_v50  ;;  %v9243_v49 = vld [vmem:[%s10500_s21 + $0x190] ss:$24 sps:$4 sm:$0xff]  }
 0x1fe   :  { %v322_v58 = vpop.xlane.xlu1 %321  ;;  %v9248_v50 = vld [vmem:[%s10500_s21 + $0x1c4] ss:$24 sps:$4 sm:$0xff]  }
 0x1ff   :  { %10053 = vrsqrt.f32 %v328_v51  ;;  %v326_v59 = vmul.f32 0.00390625, %v322_v58  ;;  %v9246_v51 = vld [vmem:[%s10500_s21 + $0x1c0] ss:$24 sps:$4 sm:$0xff]   ;;  %v9249_v58 = vld [vmem:[%s10500_s21 + $0x1f0] ss:$24 sps:$4 sm:$0xff]  }
 0x200   :  { %10055 = vrsqrt.f32 %v329_v52  ;;  %v9251_v52 = vld [vmem:[%s10500_s21 + $0x1f4] ss:$24 sps:$4 sm:$0xff]  }
 0x201   :  { %v330_v60 = vadd.f32 1e-12, %v326_v59  ;;  %v9254_v59 = vld [vmem:[%s10500_s21 + $0x224] ss:$24 sps:$4 sm:$0xff]  }
 0x203   :  { %10057 = vrsqrt.f32 %v330_v60  ;;  %v9252_v60 = vld [vmem:[%s10500_s21 + $0x220] ss:$24 sps:$4 sm:$0xff]  }
 0x205   :  { %v10052_v0 = vpop.eup %10051 }
 0x206   :  { %v336_v10 = vmul.f32 %v10052_v0, %v10807_v54  ;;  %v335_v5 = vmul.f32 %v10052_v0, %v10804_v53  ;;  %v9255_v0 = vld [vmem:[%s10500_s21 + $0x250] ss:$24 sps:$4 sm:$0xff]  }
 0x208   :  { %v355_v11 = vmul.f32 %v351_v3, %v336_v10  ;;  %v354_v13 = vmul.f32 %v347_v4, %v335_v5  ;;  %v9261_v10 = vld [vmem:[%s10500_s21 + $0x2b0] ss:$24 sps:$4 sm:$0xff]   ;;  %v9266_v5 = vld [vmem:[%s10500_s21 + $0x2e4] ss:$24 sps:$4 sm:$0xff]  }
 0x209   :  { %v10054_v6 = vpop.eup %10053 }
 0x20a   :  { %v10056_v15 = vpop.eup %10055  ;;  %v338_v16 = vmul.f32 %v10054_v6, %v10827_v2  ;;  %v337_v17 = vmul.f32 %v10054_v6, %v10824_v1  ;;  %v10890_v53 = vadd.f32 %v370_v12, %v355_v11  ;;  %v10892_v21 = vadd.f32 %v366_v14, %v354_v13  ;;  %v9264_v6 = vld [vmem:[%s10500_s21 + $0x2e0] ss:$24 sps:$4 sm:$0xff]  }
 0x20b   :  { %v340_v18 = vmul.f32 %v10056_v15, %v10813_v56  ;;  %v339_v1 = vmul.f32 %v10056_v15, %v10810_v55  ;;  %v10469_v11 = vmov 0.0   ;;  %v10968_v13 = vld [vmem:[%s10505_s25] sm:$0x3f]  ;;  %s12191_s25 = sld [smem:[#allocation24_spill]] }
 0x20c   :  { %v357_v19 = vmul.f32 %v351_v3, %v338_v16  ;;  %v356_v54 = vmul.f32 %v347_v4, %v337_v17  ;;  %8826 = vmatprep.subr.bf16.mxu1 %v10469_v11 }
 0x20d   :  { %v10058_v20 = vpop.eup %10057  ;;  %v359_v22 = vmul.f32 %v351_v3, %v340_v18  ;;  %v358_v55 = vmul.f32 %v347_v4, %v339_v1 }
 0x20e   :  { %v10894_v23 = vadd.f32 %v370_v12, %v357_v19  ;;  %v10896_v24 = vadd.f32 %v366_v14, %v356_v54  ;;  %v342_v25 = vmul.f32 %v10058_v20, %v10833_v9  ;;  %v341_v2 = vmul.f32 %v10058_v20, %v10830_v7 }
 0x20f   :  { %v10909_v9 = vadd.f32 %v370_v12, %v359_v22  ;;  %v10925_v35 = vadd.f32 %v366_v14, %v358_v55  ;;  %v514_v54 = vrot.slane %v10968_v13, %v10877_v62 }
 0x210   :  { %v410_v56 = vpack.c.bf16 %v10894_v23, %v10890_v53  ;;  %v10906_v27 = vpack.c.bf16 %v10896_v24, %v10892_v21  ;;  %v361_v28 = vmul.f32 %v351_v3, %v342_v25  ;;  %v360_v30 = vmul.f32 %v347_v4, %v341_v2  ;;  %v9260_v3 = vld [vmem:[%s10500_s21 + $0x284] ss:$24 sps:$4 sm:$0xff]   ;;  %v9258_v4 = vld [vmem:[%s10500_s21 + $0x280] ss:$24 sps:$4 sm:$0xff]   ;;  %s12190_s21 = sld [smem:[#allocation23_spill]] }
 0x212   :  { %1053 = vmatprep.mubr.bf16.mxu0 %v410_v56  ;;  %1106 = vmatprep.mubr.bf16.mxu1 %v410_v56  ;;  %v10911_v7 = vadd.f32 %v370_v12, %v361_v28  ;;  %v10921_v34 = vadd.f32 %v366_v14, %v360_v30  ;;  %v10965_v12 = vsub.s32 2, %v10871_v57 }
 0x213   :  { %1054 = vmatmul.mubr.bf16.vlgmr.msra.gmra.mrb[0].mxu0 %v10906_v27  ;;  %1107 = vmatmul.mubr.bf16.vlgmr.msra.gmra.mrb[0].mxu1 %v10906_v27 }
 0x214   :  { %1128 = vmatpush1.bf16.msra.mxu0 %v9219_v26  ;;  %v10917_v31 = vpack.c.bf16 %v10911_v7, %v10909_v9  ;;  %v411_v37 = vpack.c.bf16 %v10921_v34, %v10925_v35  ;;  %v522_v14 = vrot.slane %v10968_v13, %v10965_v12 }
 0x215   :  { %1129 = vmatprep.subr.bf16.mxu0 %v9224_v29 }
 0x216   :  { %1063 = vmatprep.mubr.bf16.mxu0 %v10917_v31  ;;  %1116 = vmatprep.mubr.bf16.mxu1 %v10917_v31 }
 0x218   :  { %1130 = vmatpush1.bf16.msra.mxu0 %v9222_v32 }
 0x219   :  { %1131 = vmatprep.subr.bf16.mxu0 %v9227_v33 }
 0x21b   :  { %1064 = vmatmul.mubr.bf16.gmra.mrb[4].mxu0 %v411_v37  ;;  %1117 = vmatmul.mubr.bf16.gmra.mrb[4].mxu1 %v411_v37 }
 0x21c   :  { %1132 = vmatpush1.bf16.msra.mxu0 %v9225_v36  ;;  %1159 = vmatprep.mubr.bf16.mxu0 %v410_v56 }
 0x21d   :  { %1133 = vmatprep.subr.bf16.mxu0 %v9230_v38  ;;  %8828 = vmatprep.mubr.msk.bf16.mxu1 %vm10470_vm0, %v10469_v11 }
 0x220   :  { %1134 = vmatpush1.bf16.msra.mxu0 %v9228_v39 }
 0x221   :  { %1135 = vmatprep.subr.bf16.mxu0 %v9233_v40 }
 0x224   :  { %1136 = vmatpush1.bf16.msra.mxu0 %v9231_v41 }
 0x225   :  { %1137 = vmatprep.subr.bf16.mxu0 %v9236_v42 }
 0x228   :  { %1138 = vmatpush1.bf16.msra.mxu0 %v9234_v43 }
 0x229   :  { %1139 = vmatprep.subr.bf16.mxu0 %v9239_v44 }
 0x22c   :  { %1140 = vmatpush1.bf16.msra.mxu0 %v9237_v45 }
 0x22d   :  { %1141 = vmatprep.subr.bf16.mxu0 %v9242_v46 }
 0x230   :  { %1142 = vmatpush1.bf16.msra.mxu0 %v9240_v47 }
 0x231   :  { %1143 = vmatprep.subr.bf16.mxu0 %v9245_v48  ;;  %v529_v48 = vsub.s32 4, %v10871_v57 }
 0x234   :  { %1144 = vmatpush1.bf16.msra.mxu0 %v9243_v49  ;;  %v533_v49 = vsub.s32 5, %v10871_v57 }
 0x235   :  { %1145 = vmatprep.subr.bf16.mxu0 %v9248_v50  ;;  %v530_v50 = vrot.slane %v10968_v13, %v529_v48 }
 0x238   :  { %1146 = vmatpush1.bf16.msra.mxu0 %v9246_v51  ;;  %v534_v51 = vrot.slane %v10968_v13, %v533_v49 }
 0x239   :  { %1147 = vmatprep.subr.bf16.mxu0 %v9251_v52 }
 0x23c   :  { %1148 = vmatpush1.bf16.msra.mxu0 %v9249_v58 }
 0x23d   :  { %1149 = vmatprep.subr.bf16.mxu0 %v9254_v59 }
 0x240   :  { %1150 = vmatpush1.bf16.msra.mxu0 %v9252_v60 }
 0x241   :  { %1151 = vmatprep.subr.bf16.mxu0 %v9257_v63 }
 0x244   :  { %1152 = vmatpush1.bf16.msra.mxu0 %v9255_v0 }
 0x245   :  { %1153 = vmatprep.subr.bf16.mxu0 %v9260_v3 }
 0x248   :  { %1154 = vmatpush1.bf16.msra.mxu0 %v9258_v4 }
 0x249   :  { %1155 = vmatprep.subr.bf16.mxu0 %v9263_v8 }
 0x24c   :  { %1156 = vmatpush1.bf16.msra.mxu0 %v9261_v10 }
 0x24d   :  { %1157 = vmatprep.subr.bf16.mxu0 %v9266_v5 }
 0x250   :  { %1158 = vmatpush1.bf16.msra.mxu0 %v9264_v6 }
 0x251   :  { %8898 = vmatprep.subr.bf16.mxu0 %v10469_v11 }
 0x253   :  { %1160 = vmatmul.mubr.bf16.vlgmr.msra.gmra.mrb[8].mxu0 %v10906_v27 }
 0x254   :  { %1169 = vmatprep.mubr.bf16.mxu0 %v10917_v31 }
 0x25b   :  { %1170 = vmatmul.mubr.bf16.gmra.mrb[12].mxu0 %v411_v37 }
 0x25c   :  { %8900 = vmatprep.mubr.msk.bf16.mxu0 %vm10470_vm0, %v10469_v11 }
 0x2e6   :  { %v1055_v15 = vpop.f32.mrb[0].mxu0  ;;  %v1108_v16 = vpop.f32.mrb[0].mxu1 }
 0x2e7   :  { %v1109_v17 = vadd.f32 %v1108_v16, %v522_v14  ;;  %v10972_v18 = vpop.f32.mrb[1].mxu0  ;;  %v10974_v19 = vpop.f32.mrb[1].mxu1  ;;  %v1056_v56 = vadd.f32 %v1055_v15, %v514_v54 }
 0x2e8   :  { %v1059_v20 = vpop.f32.mrb[2].mxu0  ;;  %v1112_v22 = vpop.f32.mrb[2].mxu1 }
 0x2e9   :  { %v1182_v25 = vpack.c.bf16 %v1109_v17, %v1109_v17  ;;  %v10978_v2 = vpop.f32.mrb[3].mxu0  ;;  %v10980_v1 = vpop.f32.mrb[3].mxu1  ;;  %v1113_v26 = vadd.f32 %v1112_v22, %v522_v14  ;;  %v1180_v55 = vpack.c.bf16 %v1056_v56, %v1056_v56  ;;  %v1060_v38 = vadd.f32 %v1059_v20, %v514_v54  ;;  %v11027_v56 = vld [vmem:[%s10485_s9] ss:$0 sm:$0xff] }
 0x2eb   :  { %8827 = vmatpush3.bf16.xpose.msra.mxu1 %v1182_v25  ;;  %v1188_v33 = vpack.c.bf16 %v1113_v26, %v1113_v26  ;;  %v1186_v40 = vpack.c.bf16 %v1060_v38, %v1060_v38 }
 0x2ec   :  { %8832 = vmatprep.subr.bf16.mxu1 %v10469_v11 }
 0x2ee   :  { %v1065_v27 = vpop.f32.mrb[4].mxu0  ;;  %v1118_v28 = vpop.f32.mrb[4].mxu1 }
 0x2ef   :  { %v10983_v29 = vpop.f32.mrb[5].mxu0  ;;  %v10985_v30 = vpop.f32.mrb[5].mxu1  ;;  %v1119_v39 = vadd.f32 %v1118_v28, %v522_v14  ;;  %v1066_v42 = vadd.f32 %v1065_v27, %v514_v54 }
 0x2f0   :  { %v1069_v31 = vpop.f32.mrb[6].mxu0  ;;  %v1122_v32 = vpop.f32.mrb[6].mxu1 }
 0x2f1   :  { %v10987_v36 = vpop.f32.mrb[7].mxu0  ;;  %v10989_v37 = vpop.f32.mrb[7].mxu1  ;;  %v1194_v41 = vpack.c.bf16 %v1119_v39, %v1119_v39  ;;  %v1123_v43 = vadd.f32 %v1122_v32, %v522_v14  ;;  %v1192_v44 = vpack.c.bf16 %v1066_v42, %v1066_v42  ;;  %v1070_v46 = vadd.f32 %v1069_v31, %v514_v54 }
 0x2f2   :  { %8829 = vmatmul.mubr.bf16.vlgmr.msra.gmra.mrb[8].mxu1 %v1180_v55 }
 0x2f3   :  { %8833 = vmatpush3.bf16.xpose.msra.mxu1 %v1188_v33  ;;  %8834 = vmatprep.mubr.msk.bf16.mxu1 %vm10470_vm0, %v10469_v11  ;;  %v1200_v45 = vpack.c.bf16 %v1123_v43, %v1123_v43  ;;  %v1198_v47 = vpack.c.bf16 %v1070_v46, %v1070_v46  ;;  %v11032_v33 = vld [vmem:[%s10485_s9 + $0x1] ss:$0 sm:$0xff] }
 0x2f4   :  { %8838 = vmatprep.subr.bf16.mxu1 %v10469_v11 }
 0x2fa   :  { %8835 = vmatmul.mubr.bf16.vlgmr.msra.gmra.mrb[12].mxu1 %v1186_v40 }
 0x2fb   :  { %8839 = vmatpush3.bf16.xpose.msra.mxu1 %v1194_v41  ;;  %8840 = vmatprep.mubr.msk.bf16.mxu1 %vm10470_vm0, %v10469_v11 }
 0x2fc   :  { %8844 = vmatprep.subr.bf16.mxu1 %v10469_v11 }
 0x302   :  { %8841 = vmatmul.mubr.bf16.vlgmr.msra.gmra.mrb[16].mxu1 %v1192_v44  ;;  %v11037_v44 = vld [vmem:[%s10485_s9 + $0x2] ss:$0 sm:$0xff] }
 0x303   :  { %8845 = vmatpush3.bf16.xpose.msra.mxu1 %v1200_v45  ;;  %8846 = vmatprep.mubr.msk.bf16.mxu1 %vm10470_vm0, %v10469_v11 }
 0x304   :  { %8850 = vmatprep.subr.bf16.mxu1 %v10469_v11 }
 0x30a   :  { %8847 = vmatmul.mubr.bf16.vlgmr.msra.gmra.mrb[20].mxu1 %v1198_v47 }
 0x30b   :  { %8852 = vmatprep.mubr.msk.bf16.mxu1 %vm10470_vm0, %v10469_v11 }
 0x326   :  { %v1161_v52 = vpop.f32.mrb[8].mxu0 }
 0x327   :  { %v1162_v58 = vadd.f32 %v1161_v52, %v530_v50  ;;  %v1163_v59 = vpop.f32.mrb[9].mxu0 }
 0x328   :  { %v1164_v60 = vadd.f32 %v1163_v59, %v534_v51  ;;  %v1165_v63 = vpop.f32.mrb[10].mxu0 }
 0x329   :  { %v1184_v0 = vpack.c.bf16 %v1162_v58, %v1162_v58  ;;  %v11010_v3 = vadd.f32 %v1165_v63, %v530_v50  ;;  %v1167_v4 = vpop.f32.mrb[11].mxu0  ;;  %v11042_v58 = vld [vmem:[%s10485_s9 + $0x3] ss:$0 sm:$0xff] }
 0x32a   :  { %v1185_v8 = vpack.c.bf16 %v1164_v60, %v1164_v60  ;;  %v11012_v10 = vadd.f32 %v1167_v4, %v534_v51 }
 0x32b   :  { %v1450_v5 = vsel %vm1448_vm1, %v1184_v0, 0 }
 0x32c   :  { %v1844_v6 = vsel %vm1448_vm1, %v1185_v8, 0  ;;  %8851 = vmatpush3.bf16.msra.mxu1 %v1450_v5 }
 0x32d   :  { %8899 = vmatpush3.bf16.msra.mxu0 %v1844_v6  ;;  %8856 = vmatprep.subr.bf16.mxu1 %v10469_v11 }
 0x32e   :  { %v1171_v14 = vpop.f32.mrb[12].mxu0  ;;  %8910 = vmatprep.subr.bf16.mxu0 %v10469_v11 }
 0x32f   :  { %v11018_v15 = vadd.f32 %v1171_v14, %v530_v50  ;;  %v1173_v16 = vpop.f32.mrb[13].mxu0 }
 0x330   :  { %v11020_v17 = vadd.f32 %v1173_v16, %v534_v51  ;;  %v1175_v54 = vpop.f32.mrb[14].mxu0 }
 0x331   :  { %v11022_v20 = vadd.f32 %v1175_v54, %v530_v50  ;;  %v1177_v22 = vpop.f32.mrb[15].mxu0 }
 0x332   :  { %v11024_v25 = vadd.f32 %v1177_v22, %v534_v51 }
 0x3c5   :  { %v1270_v26 = vpop.f32.mrb[8].mxu1 }
 0x3c6   :  { %v1271_v27 = vadd.f32 %v11027_v56, %v1270_v26  ;;  %v8830_v28 = vpop.f32.mrb[9].mxu1 }
 0x3c7   :  { %v1273_v55 = vpop.f32.mrb[10].mxu1 }
 0x3c8   :  { %v8831_v31 = vpop.f32.mrb[11].mxu1  ;;  %v1397_v32 = vsel %vm1396_vm2, %v1271_v27, -inf }
 0x3c9   :  { %1398 = vmax.xlane.f32.xlu0 %v1397_v32 }
 0x3cd   :  { %v1310_v38 = vpop.f32.mrb[12].mxu1 }
 0x3ce   :  { %v1311_v39 = vadd.f32 %v11032_v33, %v1310_v38  ;;  %v8836_v40 = vpop.f32.mrb[13].mxu1 }
 0x3cf   :  { %v1313_v41 = vpop.f32.mrb[14].mxu1 }
 0x3d0   :  { %v8837_v42 = vpop.f32.mrb[15].mxu1  ;;  %v1400_v43 = vsel %vm1396_vm2, %v1311_v39, -inf }
 0x3d1   :  { %1401 = vmax.xlane.f32.xlu1 %v1400_v43 }
 0x3d5   :  { %v1350_v45 = vpop.f32.mrb[16].mxu1 }
 0x3d6   :  { %v1351_v46 = vadd.f32 %v11037_v44, %v1350_v45  ;;  %v8842_v47 = vpop.f32.mrb[17].mxu1 }
 0x3d7   :  { %v1353_v50 = vpop.f32.mrb[18].mxu1 }
 0x3d8   :  { %v8843_v51 = vpop.f32.mrb[19].mxu1  ;;  %v1403_v52 = vsel %vm1396_vm2, %v1351_v46, -inf }
 0x3d9   :  { %1404 = vmax.xlane.f32.xlu0 %v1403_v52  ;;  %v1190_v52 = vpack.c.bf16 %v11010_v3, %v11010_v3 }
 0x3dd   :  { %v1390_v59 = vpop.f32.mrb[20].mxu1 }
 0x3de   :  { %v1391_v60 = vadd.f32 %v11042_v58, %v1390_v59  ;;  %v8848_v63 = vpop.f32.mrb[21].mxu1 }
 0x3df   :  { %v1393_v0 = vpop.f32.mrb[22].mxu1  ;;  %v1496_v63 = vsel %vm1448_vm1, %v1190_v52, 0 }
 0x3e0   :  { %v8849_v4 = vpop.f32.mrb[23].mxu1  ;;  %v1406_v8 = vsel %vm1396_vm2, %v1391_v60, -inf }
 0x3e1   :  { %1407 = vmax.xlane.f32.xlu1 %v1406_v8  ;;  %v1196_v8 = vpack.c.bf16 %v11018_v15, %v11018_v15  ;;  %v1202_v15 = vpack.c.bf16 %v11022_v20, %v11022_v20 }
 0x456   :  { %v1399_v5 = vpop.xlane.xlu0 %1398 }
 0x457   :  { %v1409_v6 = vsub.f32 %v1271_v27, %v1399_v5 }
 0x459   :  { %v1413_v14 = vmul.f32 1.442695, %v1409_v6  ;;  %v1542_v6 = vsel %vm1448_vm1, %v1196_v8, 0 }
 0x45b   :  { %10059 = vpow2.f32 %v1413_v14 }
 0x45e   :  { %v1402_v16 = vpop.xlane.xlu1 %1401 }
 0x45f   :  { %v1410_v54 = vsub.f32 %v1311_v39, %v1402_v16 }
 0x461   :  { %v1415_v22 = vmul.f32 1.442695, %v1410_v54  ;;  %v11065_v54 = vsub.s32 3, %v10871_v57 }
 0x463   :  { %10061 = vpow2.f32 %v1415_v22 }
 0x465   :  { %v10060_v26 = vpop.eup %10059 }
 0x466   :  { %v1405_v28 = vpop.xlane.xlu0 %1404  ;;  %v1421_v55 = vsel %vm1396_vm2, %v10060_v26, 0.0 }
 0x467   :  { %v1411_v31 = vsub.f32 %v1351_v46, %v1405_v28  ;;  %1422 = vadd.xlane.f32.xlu0 %v1421_v55  ;;  %v526_v28 = vrot.slane %v10968_v13, %v11065_v54  ;;  %v1588_v55 = vsel %vm1448_vm1, %v1202_v15, 0 }
 0x469   :  { %v1417_v32 = vmul.f32 1.442695, %v1411_v31 }
 0x46b   :  { %10063 = vpow2.f32 %v1417_v32  ;;  %v1111_v32 = vadd.f32 %v10974_v19, %v526_v28 }
 0x46d   :  { %v10062_v38 = vpop.eup %10061 }
 0x46e   :  { %v1408_v40 = vpop.xlane.xlu1 %1407  ;;  %v1424_v41 = vsel %vm1396_vm2, %v10062_v38, 0.0 }
 0x46f   :  { %v1412_v42 = vsub.f32 %v1391_v60, %v1408_v40  ;;  %1425 = vadd.xlane.f32.xlu1 %v1424_v41  ;;  %v518_v40 = vrot.slane %v10968_v13, %v10874_v61  ;;  %v1183_v41 = vpack.c.bf16 %v1111_v32, %v1111_v32 }
 0x471   :  { %v1419_v27 = vmul.f32 1.442695, %v1412_v42  ;;  %v1058_v42 = vadd.f32 %v10972_v18, %v518_v40  ;;  %v1062_v13 = vadd.f32 %v10978_v2, %v518_v40  ;;  %v1068_v18 = vadd.f32 %v10983_v29, %v518_v40 }
 0x472   :  { %v1072_v2 = vadd.f32 %v10987_v36, %v518_v40 }
 0x473   :  { %10065 = vpow2.f32 %v1419_v27  ;;  %v1115_v27 = vadd.f32 %v10980_v1, %v526_v28  ;;  %v1125_v1 = vadd.f32 %v10989_v37, %v526_v28 }
 0x475   :  { %v10064_v43 = vpop.eup %10063  ;;  %v1189_v19 = vpack.c.bf16 %v1115_v27, %v1115_v27 }
 0x476   :  { %v1427_v39 = vsel %vm1396_vm2, %v10064_v43, 0.0 }
 0x477   :  { %1428 = vadd.xlane.f32.xlu0 %v1427_v39  ;;  %v1121_v39 = vadd.f32 %v10985_v30, %v526_v28  ;;  %v1191_v30 = vpack.c.bf16 %v11012_v10, %v11012_v10 }
 0x479   :  { %v1890_v29 = vsel %vm1448_vm1, %v1191_v30, 0 }
 0x47d   :  { %v10066_v45 = vpop.eup %10065 }
 0x47e   :  { %v1430_v47 = vsel %vm1396_vm2, %v10066_v45, 0.0 }
 0x47f   :  { %1431 = vadd.xlane.f32.xlu1 %v1430_v47  ;;  %v1195_v47 = vpack.c.bf16 %v1121_v39, %v1121_v39 }
 0x4f4   :  { %v1423_v46 = vpop.xlane.xlu0 %1422 }
 0x4f5   :  { %10067 = vrcp.f32 %v1423_v46  ;;  %v1193_v46 = vpack.c.bf16 %v1068_v18, %v1068_v18 }
 0x4fc   :  { %v1426_v50 = vpop.xlane.xlu1 %1425 }
 0x4fd   :  { %10069 = vrcp.f32 %v1426_v50  ;;  %v1201_v50 = vpack.c.bf16 %v1125_v1, %v1125_v1 }
 0x4ff   :  { %v10068_v51 = vpop.eup %10067 }
 0x500   :  { %v1437_v59 = vmul.f32 %v10068_v51, %v10060_v26  ;;  %v1199_v51 = vpack.c.bf16 %v1072_v2, %v1072_v2 }
 0x502   :  { %v1441_v60 = vpack.c.bf16 %v1437_v59, %v1437_v59 }
 0x504   :  { %8853 = vmatmul.mubr.msk.bf16.vlgmr.msra.gmra.mrb[24].mxu1 %vm1396_vm2, %v1441_v60  ;;  %v1429_v0 = vpop.xlane.xlu0 %1428 }
 0x505   :  { %8857 = vmatpush3.bf16.msra.mxu1 %v1496_v63  ;;  %10071 = vrcp.f32 %v1429_v0  ;;  %8858 = vmatprep.mubr.msk.bf16.mxu1 %vm10470_vm0, %v10469_v11 }
 0x506   :  { %8862 = vmatprep.subr.bf16.mxu1 %v10469_v11 }
 0x507   :  { %v10070_v4 = vpop.eup %10069 }
 0x508   :  { %v1438_v5 = vmul.f32 %v10070_v4, %v10062_v38 }
 0x50a   :  { %v1442_v3 = vpack.c.bf16 %v1438_v5, %v1438_v5 }
 0x50c   :  { %8859 = vmatmul.mubr.msk.bf16.vlgmr.msra.gmra.mrb[28].mxu1 %vm1396_vm2, %v1442_v3  ;;  %v1432_v14 = vpop.xlane.xlu1 %1431 }
 0x50d   :  { %8863 = vmatpush3.bf16.msra.mxu1 %v1542_v6  ;;  %10073 = vrcp.f32 %v1432_v14  ;;  %8864 = vmatprep.mubr.msk.bf16.mxu1 %vm10470_vm0, %v10469_v11 }
 0x50e   :  { %8868 = vmatprep.subr.bf16.mxu1 %v10469_v11 }
 0x50f   :  { %v10072_v16 = vpop.eup %10071 }
 0x510   :  { %v1439_v22 = vmul.f32 %v10072_v16, %v10064_v43  ;;  %v1181_v43 = vpack.c.bf16 %v1058_v42, %v1058_v42 }
 0x512   :  { %v1443_v26 = vpack.c.bf16 %v1439_v22, %v1439_v22 }
 0x514   :  { %8865 = vmatmul.mubr.msk.bf16.vlgmr.msra.gmra.mrb[32].mxu1 %vm1396_vm2, %v1443_v26 }
 0x515   :  { %8869 = vmatpush3.bf16.msra.mxu1 %v1588_v55  ;;  %8870 = vmatprep.mubr.msk.bf16.mxu1 %vm10470_vm0, %v10469_v11 }
 0x516   :  { %8874 = vmatprep.subr.bf16.mxu1 %v10469_v11 }
 0x517   :  { %v10074_v31 = vpop.eup %10073 }
 0x518   :  { %v1440_v38 = vmul.f32 %v10074_v31, %v10066_v45  ;;  %v1187_v45 = vpack.c.bf16 %v1062_v13, %v1062_v13 }
 0x51a   :  { %v1444_v20 = vpack.c.bf16 %v1440_v38, %v1440_v38 }
 0x51c   :  { %8871 = vmatmul.mubr.msk.bf16.vlgmr.msra.gmra.mrb[36].mxu1 %vm1396_vm2, %v1444_v20 }
 0x51d   :  { %8876 = vmatprep.mubr.msk.bf16.mxu1 %vm10470_vm0, %v10469_v11 }
 0x51e   :  { %8875 = vmatpush3.bf16.xpose.msra.mxu1 %v1183_v41 }
 0x51f   :  { %8880 = vmatprep.subr.bf16.mxu1 %v10469_v11 }
 0x525   :  { %8877 = vmatmul.mubr.bf16.vlgmr.msra.gmra.mrb[40].mxu1 %v1181_v43 }
 0x526   :  { %8881 = vmatpush3.bf16.xpose.msra.mxu1 %v1189_v19  ;;  %8882 = vmatprep.mubr.msk.bf16.mxu1 %vm10470_vm0, %v10469_v11 }
 0x527   :  { %8886 = vmatprep.subr.bf16.mxu1 %v10469_v11 }
 0x52d   :  { %8883 = vmatmul.mubr.bf16.vlgmr.msra.gmra.mrb[44].mxu1 %v1187_v45 }
 0x52e   :  { %8887 = vmatpush3.bf16.xpose.msra.mxu1 %v1195_v47  ;;  %8888 = vmatprep.mubr.msk.bf16.mxu1 %vm10470_vm0, %v10469_v11 }
 0x52f   :  { %8892 = vmatprep.subr.bf16.mxu1 %v10469_v11 }
 0x535   :  { %8889 = vmatmul.mubr.bf16.vlgmr.msra.gmra.mrb[48].mxu1 %v1193_v46 }
 0x536   :  { %8893 = vmatpush3.bf16.xpose.msra.mxu1 %v1201_v50  ;;  %8894 = vmatprep.mubr.msk.bf16.mxu1 %vm10470_vm0, %v10469_v11 }
 0x537   :  { %8904 = vmatprep.subr.bf16.mxu1 %v10469_v11 }
 0x53d   :  { %8895 = vmatmul.mubr.bf16.vlgmr.msra.gmra.mrb[52].mxu1 %v1199_v51 }
 0x53e   :  { %8905 = vmatpush3.bf16.msra.mxu1 %v1890_v29  ;;  %8906 = vmatprep.mubr.msk.bf16.mxu1 %vm10470_vm0, %v10469_v11 }
 0x53f   :  { %8916 = vmatprep.subr.bf16.mxu1 %v10469_v11 }
 0x5d7   :  { %v11105_v37 = vpop.f32.mrb[24].mxu1 }
 0x5d8   :  { %v8854_v52 = vpop.f32.mrb[25].mxu1 }
 0x5d9   :  { %v1489_v59 = vpop.f32.mrb[26].mxu1 }
 0x5da   :  { %v8855_v36 = vpop.f32.mrb[27].mxu1 }
 0x5df   :  { %v11107_v60 = vpop.f32.mrb[28].mxu1 }
 0x5e0   :  { %v1630_v10 = vpack.c.bf16 %v11107_v60, %v11105_v37  ;;  %v8860_v63 = vpop.f32.mrb[29].mxu1 }
 0x5e1   :  { %v1535_v0 = vpop.f32.mrb[30].mxu1 }
 0x5e2   :  { %v8861_v4 = vpop.f32.mrb[31].mxu1 }
 0x5e7   :  { %v11111_v8 = vpop.f32.mrb[32].mxu1 }
 0x5e8   :  { %v8866_v5 = vpop.f32.mrb[33].mxu1 }
 0x5e9   :  { %v1581_v3 = vpop.f32.mrb[34].mxu1 }
 0x5ea   :  { %v8867_v6 = vpop.f32.mrb[35].mxu1 }
 0x5ef   :  { %v11113_v14 = vpop.f32.mrb[36].mxu1 }
 0x5f0   :  { %v1631_v16 = vpack.c.bf16 %v11113_v14, %v11111_v8  ;;  %v8872_v15 = vpop.f32.mrb[37].mxu1 }
 0x5f1   :  { %v1627_v22 = vpop.f32.mrb[38].mxu1 }
 0x5f2   :  { %v8873_v26 = vpop.f32.mrb[39].mxu1 }
 0x5f8   :  { %v1666_v28 = vpop.f32.mrb[40].mxu1 }
 0x5f9   :  { %v1667_v55 = vadd.f32 %v11027_v56, %v1666_v28  ;;  %v8878_v31 = vpop.f32.mrb[41].mxu1 }
 0x5fa   :  { %v1669_v32 = vpop.f32.mrb[42].mxu1 }
 0x5fb   :  { %v8879_v38 = vpop.f32.mrb[43].mxu1  ;;  %v1792_v20 = vsel %vm1396_vm2, %v1667_v55, -inf }
 0x5fc   :  { %1793 = vmax.xlane.f32.xlu0 %v1792_v20 }
 0x600   :  { %v1706_v40 = vpop.f32.mrb[44].mxu1 }
 0x601   :  { %v1707_v41 = vadd.f32 %v11032_v33, %v1706_v40  ;;  %v8884_v42 = vpop.f32.mrb[45].mxu1 }
 0x602   :  { %v1709_v27 = vpop.f32.mrb[46].mxu1 }
 0x603   :  { %v8885_v43 = vpop.f32.mrb[47].mxu1  ;;  %v1795_v19 = vsel %vm1396_vm2, %v1707_v41, -inf }
 0x604   :  { %1796 = vmax.xlane.f32.xlu1 %v1795_v19  ;;  %v9269_v43 = vld [vmem:[#allocation2 + $0x84] ss:$8 sps:$4 sm:$0xff]  }
 0x608   :  { %v1746_v13 = vpop.f32.mrb[48].mxu1 }
 0x609   :  { %v1747_v39 = vadd.f32 %v11037_v44, %v1746_v13  ;;  %v8890_v45 = vpop.f32.mrb[49].mxu1 }
 0x60a   :  { %v1749_v56 = vpop.f32.mrb[50].mxu1  ;;  %v1203_v45 = vpack.c.bf16 %v11024_v25, %v11024_v25  ;;  %v9270_v25 = vld [vmem:[#allocation2 + $0x90] ss:$8 sps:$4 sm:$0xff]  }
 0x60b   :  { %v8891_v47 = vpop.f32.mrb[51].mxu1  ;;  %v1798_v18 = vsel %vm1396_vm2, %v1747_v39, -inf }
 0x60c   :  { %1799 = vmax.xlane.f32.xlu0 %v1798_v18  ;;  %v1982_v47 = vsel %vm1448_vm1, %v1203_v45, 0  ;;  %v9297_v45 = vld [vmem:[#allocation2 + $0x20] ss:$8 sps:$4 sm:$0xff]  }
 0x610   :  { %v1786_v1 = vpop.f32.mrb[52].mxu1 }
 0x611   :  { %v1787_v46 = vadd.f32 %v11042_v58, %v1786_v1  ;;  %v8896_v50 = vpop.f32.mrb[53].mxu1 }
 0x612   :  { %v1789_v33 = vpop.f32.mrb[54].mxu1  ;;  %v9267_v50 = vld [vmem:[#allocation2 + $0x80] ss:$8 sps:$4 sm:$0xff]  }
 0x613   :  { %v8897_v2 = vpop.f32.mrb[55].mxu1  ;;  %v1801_v30 = vsel %vm1396_vm2, %v1787_v46, -inf }
 0x614   :  { %1802 = vmax.xlane.f32.xlu1 %v1801_v30  ;;  %v9272_v2 = vld [vmem:[#allocation2 + $0x94] ss:$8 sps:$4 sm:$0xff]   ;;  %v9275_v30 = vld [vmem:[#allocation2 + $0xa4] ss:$8 sps:$4 sm:$0xff]  }
 0x689   :  { %v1794_v51 = vpop.xlane.xlu0 %1793 }
 0x68a   :  { %v1804_v29 = vsub.f32 %v1667_v55, %v1794_v51 }
 0x68c   :  { %v1808_v52 = vmul.f32 1.442695, %v1804_v29 }
 0x68e   :  { %10075 = vpow2.f32 %v1808_v52  ;;  %v9273_v52 = vld [vmem:[#allocation2 + $0xa0] ss:$8 sps:$4 sm:$0xff]  }
 0x691   :  { %v1797_v44 = vpop.xlane.xlu1 %1796 }
 0x692   :  { %v1805_v59 = vsub.f32 %v1707_v41, %v1797_v44  ;;  %v1197_v41 = vpack.c.bf16 %v11020_v17, %v11020_v17 }
 0x694   :  { %v1810_v36 = vmul.f32 1.442695, %v1805_v59  ;;  %v1936_v19 = vsel %vm1448_vm1, %v1197_v41, 0  ;;  %v9278_v59 = vld [vmem:[#allocation2 + $0xb4] ss:$8 sps:$4 sm:$0xff]  }
 0x696   :  { %10077 = vpow2.f32 %v1810_v36  ;;  %v9276_v36 = vld [vmem:[#allocation2 + $0xb0] ss:$8 sps:$4 sm:$0xff]  }
 0x698   :  { %v10076_v63 = vpop.eup %10075 }
 0x699   :  { %v1800_v0 = vpop.xlane.xlu0 %1799  ;;  %v1816_v4 = vsel %vm1396_vm2, %v10076_v63, 0.0 }
 0x69a   :  { %v1806_v5 = vsub.f32 %v1747_v39, %v1800_v0  ;;  %1817 = vadd.xlane.f32.xlu0 %v1816_v4  ;;  %v9279_v0 = vld [vmem:[#allocation2 + $0xc0] ss:$8 sps:$4 sm:$0xff]   ;;  %v9284_v4 = vld [vmem:[#allocation2 + $0xd4] ss:$8 sps:$4 sm:$0xff]  }
 0x69c   :  { %v1812_v58 = vmul.f32 1.442695, %v1806_v5  ;;  %v9282_v5 = vld [vmem:[#allocation2 + $0xd0] ss:$8 sps:$4 sm:$0xff]  }
 0x69e   :  { %10079 = vpow2.f32 %v1812_v58  ;;  %v9287_v58 = vld [vmem:[#allocation2 + $0xe4] ss:$8 sps:$4 sm:$0xff]  }
 0x6a0   :  { %v10078_v3 = vpop.eup %10077 }
 0x6a1   :  { %v1803_v6 = vpop.xlane.xlu1 %1802  ;;  %v1819_v15 = vsel %vm1396_vm2, %v10078_v3, 0.0 }
 0x6a2   :  { %v1807_v22 = vsub.f32 %v1787_v46, %v1803_v6  ;;  %1820 = vadd.xlane.f32.xlu1 %v1819_v15  ;;  %v9290_v6 = vld [vmem:[#allocation2 + $0xf4] ss:$8 sps:$4 sm:$0xff]   ;;  %v9288_v15 = vld [vmem:[#allocation2 + $0xf0] ss:$8 sps:$4 sm:$0xff]  }
 0x6a4   :  { %v1814_v26 = vmul.f32 1.442695, %v1807_v22  ;;  %v9293_v22 = vld [vmem:[#allocation2 + $0x4] ss:$8 sps:$4 sm:$0xff]  }
 0x6a6   :  { %10081 = vpow2.f32 %v1814_v26  ;;  %v10471_v26 = vmov 0  }
 0x6a8   :  { %v10080_v28 = vpop.eup %10079 }
 0x6a9   :  { %v1822_v55 = vsel %vm1396_vm2, %v10080_v28, 0.0 }
 0x6aa   :  { %1823 = vadd.xlane.f32.xlu0 %v1822_v55 }
 0x6b0   :  { %v10082_v31 = vpop.eup %10081 }
 0x6b1   :  { %v1825_v32 = vsel %vm1396_vm2, %v10082_v31, 0.0 }
 0x6b2   :  { %1826 = vadd.xlane.f32.xlu1 %v1825_v32 }
 0x727   :  { %v1818_v38 = vpop.xlane.xlu0 %1817 }
 0x728   :  { %10083 = vrcp.f32 %v1818_v38 }
 0x72f   :  { %v1821_v20 = vpop.xlane.xlu1 %1820 }
 0x730   :  { %10085 = vrcp.f32 %v1821_v20  ;;  %v9291_v20 = vld [vmem:[#allocation2] ss:$8 sps:$4 sm:$0xff]  }
 0x732   :  { %v10084_v40 = vpop.eup %10083 }
 0x733   :  { %v1832_v42 = vmul.f32 %v10084_v40, %v10076_v63  ;;  %v9281_v63 = vld [vmem:[#allocation2 + $0xc4] ss:$8 sps:$4 sm:$0xff]  }
 0x735   :  { %v1836_v27 = vpack.c.bf16 %v1832_v42, %v1832_v42  ;;  %v9296_v42 = vld [vmem:[#allocation2 + $0x14] ss:$8 sps:$4 sm:$0xff]  }
 0x737   :  { %8901 = vmatmul.mubr.msk.bf16.vlgmr.msra.gmra.mrb[16].mxu0 %vm1396_vm2, %v1836_v27  ;;  %v1824_v13 = vpop.xlane.xlu0 %1823 }
 0x738   :  { %8911 = vmatpush3.bf16.msra.mxu0 %v1936_v19  ;;  %10087 = vrcp.f32 %v1824_v13  ;;  %8912 = vmatprep.mubr.msk.bf16.mxu0 %vm10470_vm0, %v10469_v11  ;;  %v9294_v19 = vld [vmem:[#allocation2 + $0x10] ss:$8 sps:$4 sm:$0xff]   ;;  %v9299_v13 = vld [vmem:[#allocation2 + $0x24] ss:$8 sps:$4 sm:$0xff]  }
 0x739   :  { %2106 = vmatprep.subr.bf16.mxu0 %v9269_v43 }
 0x73a   :  { %v10086_v39 = vpop.eup %10085 }
 0x73b   :  { %v1833_v56 = vmul.f32 %v10086_v39, %v10078_v3  ;;  %v9285_v3 = vld [vmem:[#allocation2 + $0xe0] ss:$8 sps:$4 sm:$0xff]  }
 0x73d   :  { %v1837_v17 = vpack.c.bf16 %v1833_v56, %v1833_v56 }
 0x73f   :  { %8907 = vmatmul.mubr.msk.bf16.vlgmr.msra.gmra.mrb[56].mxu1 %vm1396_vm2, %v1837_v17  ;;  %v1827_v18 = vpop.xlane.xlu1 %1826  ;;  %v9302_v17 = vld [vmem:[#allocation2 + $0x34] ss:$8 sps:$4 sm:$0xff]  }
 0x740   :  { %8917 = vmatpush3.bf16.msra.mxu1 %v1982_v47  ;;  %10089 = vrcp.f32 %v1827_v18  ;;  %8918 = vmatprep.mubr.msk.bf16.mxu1 %vm10470_vm0, %v10469_v11 }
 0x742   :  { %v10088_v1 = vpop.eup %10087 }
 0x743   :  { %v1834_v46 = vmul.f32 %v10088_v1, %v10080_v28  ;;  %v9300_v1 = vld [vmem:[#allocation2 + $0x30] ss:$8 sps:$4 sm:$0xff]  }
 0x745   :  { %v1838_v33 = vpack.c.bf16 %v1834_v46, %v1834_v46  ;;  %v9305_v46 = vld [vmem:[#allocation2 + $0x44] ss:$8 sps:$4 sm:$0xff]  }
 0x747   :  { %8913 = vmatmul.mubr.msk.bf16.vlgmr.msra.gmra.mrb[20].mxu0 %vm1396_vm2, %v1838_v33  ;;  %v9303_v33 = vld [vmem:[#allocation2 + $0x40] ss:$8 sps:$4 sm:$0xff]  }
 0x748   :  { %2107 = vmatpush1.bf16.msra.mxu0 %v9267_v50  ;;  %2138 = vmatprep.mubr.bf16.mxu0 %v10471_v26 }
 0x749   :  { %2108 = vmatprep.subr.bf16.mxu0 %v9272_v2 }
 0x74a   :  { %v10090_v51 = vpop.eup %10089 }
 0x74b   :  { %v1835_v29 = vmul.f32 %v10090_v51, %v10082_v31 }
 0x74c   :  { %2109 = vmatpush1.bf16.msra.mxu0 %v9270_v25 }
 0x74d   :  { %v1839_v44 = vpack.c.bf16 %v1835_v29, %v1835_v29  ;;  %2110 = vmatprep.subr.bf16.mxu0 %v9275_v30  ;;  %v9308_v30 = vld [vmem:[#allocation2 + $0x54] ss:$8 sps:$4 sm:$0xff]  }
 0x74f   :  { %8919 = vmatmul.mubr.msk.bf16.vlgmr.msra.gmra.mrb[60].mxu1 %vm1396_vm2, %v1839_v44  ;;  %v9311_v44 = vld [vmem:[#allocation2 + $0x64] ss:$8 sps:$4 sm:$0xff]  }
 0x750   :  { %2111 = vmatpush1.bf16.msra.mxu0 %v9273_v52  ;;  %v9306_v52 = vld [vmem:[#allocation2 + $0x50] ss:$8 sps:$4 sm:$0xff]  }
 0x751   :  { %2112 = vmatprep.subr.bf16.mxu0 %v9278_v59  ;;  %v9309_v59 = vld [vmem:[#allocation2 + $0x60] ss:$8 sps:$4 sm:$0xff]  }
 0x754   :  { %2113 = vmatpush1.bf16.msra.mxu0 %v9276_v36  ;;  %v9314_v36 = vld [vmem:[#allocation2 + $0x74] ss:$8 sps:$4 sm:$0xff]  }
 0x755   :  { %2114 = vmatprep.subr.bf16.mxu0 %v9281_v63  ;;  %v9312_v63 = vld [vmem:[#allocation2 + $0x70] ss:$8 sps:$4 sm:$0xff]  }
 0x758   :  { %2115 = vmatpush1.bf16.msra.mxu0 %v9279_v0  ;;  %v2292_v0 = vld [vmem:[%s10515_s3] sm:$0x3]  ;;  %s12192_s3 = sld [smem:[#allocation25_spill]] }
 0x759   :  { %2116 = vmatprep.subr.bf16.mxu0 %v9284_v4  ;;  %v2297_v4 = vrot.slane %v2292_v0, %v10877_v62 }
 0x75c   :  { %2117 = vmatpush1.bf16.msra.mxu0 %v9282_v5  ;;  %v2301_v5 = vrot.slane %v2292_v0, %v10874_v61  ;;  %v9353_v0 = vld [vmem:[%s12187_s5 + $0xc4] ss:$16 sps:$4 sm:$0xff]  }
 0x75d   :  { %2118 = vmatprep.subr.bf16.mxu0 %v9287_v58 }
 0x760   :  { %2119 = vmatpush1.bf16.msra.mxu0 %v9285_v3 }
 0x761   :  { %2120 = vmatprep.subr.bf16.mxu0 %v9290_v6 }
 0x764   :  { %2121 = vmatpush1.bf16.msra.mxu0 %v9288_v15 }
 0x765   :  { %2239 = vmatprep.subr.bf16.mxu0 %v9293_v22 }
 0x80a   :  { %v1880_v28 = vpop.f32.mrb[16].mxu0 }
 0x80b   :  { %v8902_v55 = vpop.f32.mrb[17].mxu0 }
 0x80c   :  { %v1883_v31 = vpop.f32.mrb[18].mxu0 }
 0x80d   :  { %v8903_v32 = vpop.f32.mrb[19].mxu0 }
 0x812   :  { %v1926_v38 = vpop.f32.mrb[56].mxu1 }
 0x813   :  { %v2024_v40 = vpack.c.bf16 %v1926_v38, %v1880_v28  ;;  %v8908_v41 = vpop.f32.mrb[57].mxu1 }
 0x814   :  { %v1929_v27 = vpop.f32.mrb[58].mxu1 }
 0x815   :  { %v8909_v43 = vpop.f32.mrb[59].mxu1  ;;  %2139 = vmatmul.mubr.bf16.vlgmr.msra.gmra.mrb[24].mxu0 %v2024_v40 }
 0x816   :  { %2240 = vmatpush1.bf16.msra.mxu0 %v9291_v20  ;;  %2148 = vmatprep.mubr.bf16.mxu0 %v10471_v26 }
 0x817   :  { %2241 = vmatprep.subr.bf16.mxu0 %v9296_v42 }
 0x81a   :  { %2242 = vmatpush1.bf16.msra.mxu0 %v9294_v19  ;;  %v1972_v39 = vpop.f32.mrb[20].mxu0 }
 0x81b   :  { %v8914_v56 = vpop.f32.mrb[21].mxu0  ;;  %2243 = vmatprep.subr.bf16.mxu0 %v9299_v13  ;;  %v9317_v13 = vld [vmem:[%s12187_s5 + $0x4] ss:$16 sps:$4 sm:$0xff]  }
 0x81c   :  { %v1975_v47 = vpop.f32.mrb[22].mxu0  ;;  %2834 = vmatprep.subr.bf16.mxu1 %v9317_v13  ;;  %v9321_v56 = vld [vmem:[%s12187_s5 + $0x20] ss:$16 sps:$4 sm:$0xff]  }
 0x81d   :  { %v8915_v18 = vpop.f32.mrb[23].mxu0  ;;  %v9329_v47 = vld [vmem:[%s12187_s5 + $0x44] ss:$16 sps:$4 sm:$0xff]  }
 0x81e   :  { %2244 = vmatpush1.bf16.msra.mxu0 %v9297_v45  ;;  %v9323_v45 = vld [vmem:[%s12187_s5 + $0x24] ss:$16 sps:$4 sm:$0xff]   ;;  %v9332_v18 = vld [vmem:[%s12187_s5 + $0x4c] ss:$16 sps:$4 sm:$0xff]  }
 0x81f   :  { %2245 = vmatprep.subr.bf16.mxu0 %v9302_v17  ;;  %v9324_v17 = vld [vmem:[%s12187_s5 + $0x28] ss:$16 sps:$4 sm:$0xff]  }
 0x822   :  { %2246 = vmatpush1.bf16.msra.mxu0 %v9300_v1  ;;  %v2018_v50 = vpop.f32.mrb[60].mxu1  ;;  %v9327_v1 = vld [vmem:[%s12187_s5 + $0x40] ss:$16 sps:$4 sm:$0xff]  }
 0x823   :  { %v2025_v2 = vpack.c.bf16 %v2018_v50, %v1972_v39  ;;  %v8920_v25 = vpop.f32.mrb[61].mxu1  ;;  %2247 = vmatprep.subr.bf16.mxu0 %v9305_v46  ;;  %v9318_v39 = vld [vmem:[%s12187_s5 + $0x8] ss:$16 sps:$4 sm:$0xff]   ;;  %v9335_v50 = vld [vmem:[%s12187_s5 + $0x64] ss:$16 sps:$4 sm:$0xff]  }
 0x824   :  { %v2021_v51 = vpop.f32.mrb[62].mxu1  ;;  %v9330_v46 = vld [vmem:[%s12187_s5 + $0x48] ss:$16 sps:$4 sm:$0xff]  }
 0x825   :  { %v8921_v29 = vpop.f32.mrb[63].mxu1  ;;  %2149 = vmatmul.mubr.bf16.gmra.mrb[28].mxu0 %v2025_v2  ;;  %v9333_v2 = vld [vmem:[%s12187_s5 + $0x60] ss:$16 sps:$4 sm:$0xff]   ;;  %v9336_v25 = vld [vmem:[%s12187_s5 + $0x68] ss:$16 sps:$4 sm:$0xff]  }
 0x826   :  { %2248 = vmatpush1.bf16.msra.mxu0 %v9303_v33  ;;  %2271 = vmatprep.mubr.bf16.mxu0 %v10471_v26  ;;  %v9338_v33 = vld [vmem:[%s12187_s5 + $0x6c] ss:$16 sps:$4 sm:$0xff]   ;;  %v9339_v29 = vld [vmem:[%s12187_s5 + $0x80] ss:$16 sps:$4 sm:$0xff]  }
 0x827   :  { %2249 = vmatprep.subr.bf16.mxu0 %v9308_v30  ;;  %v9341_v30 = vld [vmem:[%s12187_s5 + $0x84] ss:$16 sps:$4 sm:$0xff]   ;;  %v9344_v51 = vld [vmem:[%s12187_s5 + $0x8c] ss:$16 sps:$4 sm:$0xff]  }
 0x82a   :  { %2250 = vmatpush1.bf16.msra.mxu0 %v9306_v52  ;;  %v9342_v52 = vld [vmem:[%s12187_s5 + $0x88] ss:$16 sps:$4 sm:$0xff]  }
 0x82b   :  { %2251 = vmatprep.subr.bf16.mxu0 %v9311_v44  ;;  %v9347_v44 = vld [vmem:[%s12187_s5 + $0xa4] ss:$16 sps:$4 sm:$0xff]  }
 0x82e   :  { %2252 = vmatpush1.bf16.msra.mxu0 %v9309_v59  ;;  %v9350_v59 = vld [vmem:[%s12187_s5 + $0xac] ss:$16 sps:$4 sm:$0xff]  }
 0x82f   :  { %2253 = vmatprep.subr.bf16.mxu0 %v9314_v36  ;;  %v9345_v36 = vld [vmem:[%s12187_s5 + $0xa0] ss:$16 sps:$4 sm:$0xff]  }
 0x832   :  { %2254 = vmatpush1.bf16.msra.mxu0 %v9312_v63  ;;  %v9348_v63 = vld [vmem:[%s12187_s5 + $0xa8] ss:$16 sps:$4 sm:$0xff]  }
 0x835   :  { %2272 = vmatmul.mubr.bf16.vlgmr.msra.gmra.mrb[24].mxu0 %v1630_v10 }
 0x836   :  { %2281 = vmatprep.mubr.bf16.mxu0 %v10471_v26 }
 0x83d   :  { %2282 = vmatmul.mubr.bf16.gmra.mrb[28].mxu0 %v1631_v16 }
 0x908   :  { %v2273_v58 = vpop.f32.mrb[24].mxu0 }
 0x909   :  { %v2304_v3 = vadd.f32 %v2297_v4, %v2273_v58  ;;  %v2275_v6 = vpop.f32.mrb[25].mxu0  ;;  %v9354_v58 = vld [vmem:[%s12187_s5 + $0xc8] ss:$16 sps:$4 sm:$0xff]  }
 0x90a   :  { %v2305_v15 = vadd.f32 %v2301_v5, %v2275_v6  ;;  %v2277_v22 = vpop.f32.mrb[26].mxu0  ;;  %v9362_v6 = vld [vmem:[%s12187_s5 + $0xec] ss:$16 sps:$4 sm:$0xff]  }
 0x90b   :  { %v11157_v28 = vadd.f32 %v2304_v3, %v10892_v21  ;;  %v2306_v37 = vadd.f32 %v2297_v4, %v2277_v22  ;;  %v2279_v60 = vpop.f32.mrb[27].mxu0  ;;  %v9359_v3 = vld [vmem:[%s12187_s5 + $0xe4] ss:$16 sps:$4 sm:$0xff]   ;;  %v9360_v22 = vld [vmem:[%s12187_s5 + $0xe8] ss:$16 sps:$4 sm:$0xff]  }
 0x90c   :  { %v11160_v10 = vadd.f32 %v2305_v15, %v10890_v53  ;;  %v2307_v8 = vadd.f32 %v2301_v5, %v2279_v60  ;;  %v9357_v15 = vld [vmem:[%s12187_s5 + $0xe0] ss:$16 sps:$4 sm:$0xff]   ;;  %v9368_v60 = vld [vmem:[%s12187_s5 + $0x10c] ss:$16 sps:$4 sm:$0xff]  }
 0x90d   :  { %v11163_v14 = vadd.f32 %v2306_v37, %v10896_v24  ;;  %v9365_v37 = vld [vmem:[%s12187_s5 + $0x104] ss:$16 sps:$4 sm:$0xff]  }
 0x90e   :  { %v11166_v16 = vadd.f32 %v2307_v8, %v10894_v23  ;;  %v2322_v55 = vadd.f32 %v11160_v10, %v11157_v28  ;;  %v9363_v8 = vld [vmem:[%s12187_s5 + $0x100] ss:$16 sps:$4 sm:$0xff]  }
 0x910   :  { %2323 = vadd.xlane.f32.xlu0 %v2322_v55  ;;  %v2283_v31 = vpop.f32.mrb[28].mxu0  ;;  %v2325_v21 = vadd.f32 %v11166_v16, %v11163_v14  ;;  %v9366_v55 = vld [vmem:[%s12187_s5 + $0x108] ss:$16 sps:$4 sm:$0xff]  }
 0x911   :  { %v2308_v32 = vadd.f32 %v2297_v4, %v2283_v31  ;;  %v2285_v38 = vpop.f32.mrb[29].mxu0  ;;  %v9371_v31 = vld [vmem:[%s12187_s5 + $0x124] ss:$16 sps:$4 sm:$0xff]  }
 0x912   :  { %v2309_v53 = vadd.f32 %v2301_v5, %v2285_v38  ;;  %2326 = vadd.xlane.f32.xlu1 %v2325_v21  ;;  %v2287_v24 = vpop.f32.mrb[30].mxu0  ;;  %v9374_v21 = vld [vmem:[%s12187_s5 + $0x12c] ss:$16 sps:$4 sm:$0xff]   ;;  %v9372_v38 = vld [vmem:[%s12187_s5 + $0x128] ss:$16 sps:$4 sm:$0xff]  }
 0x913   :  { %v11173_v23 = vadd.f32 %v2308_v32, %v10925_v35  ;;  %v2310_v20 = vadd.f32 %v2297_v4, %v2287_v24  ;;  %v2289_v40 = vpop.f32.mrb[31].mxu0  ;;  %v9356_v4 = vld [vmem:[%s12187_s5 + $0xcc] ss:$16 sps:$4 sm:$0xff]   ;;  %v9369_v32 = vld [vmem:[%s12187_s5 + $0x120] ss:$16 sps:$4 sm:$0xff]  }
 0x914   :  { %v11176_v41 = vadd.f32 %v2309_v53, %v10909_v9  ;;  %v2311_v42 = vadd.f32 %v2301_v5, %v2289_v40  ;;  %v9315_v9 = vld [vmem:[%s12187_s5] ss:$16 sps:$4 sm:$0xff]  }
 0x915   :  { %v11179_v27 = vadd.f32 %v2310_v20, %v10921_v34  ;;  %v9320_v34 = vld [vmem:[%s12187_s5 + $0xc] ss:$16 sps:$4 sm:$0xff]   ;;  %2835 = vmatpush1.bf16.msra.mxu1 %v9315_v9  ;;  %v9351_v5 = vld [vmem:[%s12187_s5 + $0xc0] ss:$16 sps:$4 sm:$0xff]  }
 0x916   :  { %v11182_v43 = vadd.f32 %v2311_v42, %v10911_v7  ;;  %v2328_v19 = vadd.f32 %v11176_v41, %v11173_v23  ;;  %v9326_v7 = vld [vmem:[%s12187_s5 + $0x2c] ss:$16 sps:$4 sm:$0xff]   ;;  %2887 = vmatprep.subr.bf16.mxu0 %v9320_v34  ;;  %2836 = vmatprep.subr.bf16.mxu1 %v9323_v45 }
 0x917   :  { %2888 = vmatpush1.bf16.msra.mxu0 %v9318_v39 }
 0x918   :  { %2329 = vadd.xlane.f32.xlu0 %v2328_v19  ;;  %v2331_v35 = vadd.f32 %v11182_v43, %v11179_v27  ;;  %2889 = vmatprep.subr.bf16.mxu0 %v9326_v7 }
 0x919   :  { %2837 = vmatpush1.bf16.msra.mxu1 %v9321_v56 }
 0x91a   :  { %2332 = vadd.xlane.f32.xlu1 %v2331_v35  ;;  %2838 = vmatprep.subr.bf16.mxu1 %v9329_v47 }
 0x91b   :  { %2890 = vmatpush1.bf16.msra.mxu0 %v9324_v17 }
 0x91c   :  { %2891 = vmatprep.subr.bf16.mxu0 %v9332_v18 }
 0x91d   :  { %2839 = vmatpush1.bf16.msra.mxu1 %v9327_v1 }
 0x91e   :  { %2840 = vmatprep.subr.bf16.mxu1 %v9335_v50 }
 0x91f   :  { %2892 = vmatpush1.bf16.msra.mxu0 %v9330_v46 }
 0x920   :  { %2893 = vmatprep.subr.bf16.mxu0 %v9338_v33  ;;  %v9377_v33 = vld [vmem:[%s12187_s5 + $0x144] ss:$16 sps:$4 sm:$0xff]  }
 0x921   :  { %2841 = vmatpush1.bf16.msra.mxu1 %v9333_v2  ;;  %v9380_v2 = vld [vmem:[%s12187_s5 + $0x14c] ss:$16 sps:$4 sm:$0xff]  }
 0x922   :  { %2842 = vmatprep.subr.bf16.mxu1 %v9341_v30  ;;  %v9378_v30 = vld [vmem:[%s12187_s5 + $0x148] ss:$16 sps:$4 sm:$0xff]  }
 0x923   :  { %2894 = vmatpush1.bf16.msra.mxu0 %v9336_v25  ;;  %v9375_v25 = vld [vmem:[%s12187_s5 + $0x140] ss:$16 sps:$4 sm:$0xff]  }
 0x924   :  { %2895 = vmatprep.subr.bf16.mxu0 %v9344_v51  ;;  %v9383_v51 = vld [vmem:[%s12187_s5 + $0x164] ss:$16 sps:$4 sm:$0xff]  }
 0x925   :  { %2843 = vmatpush1.bf16.msra.mxu1 %v9339_v29  ;;  %v9386_v29 = vld [vmem:[%s12187_s5 + $0x16c] ss:$16 sps:$4 sm:$0xff]  }
 0x926   :  { %2844 = vmatprep.subr.bf16.mxu1 %v9347_v44  ;;  %v9384_v44 = vld [vmem:[%s12187_s5 + $0x168] ss:$16 sps:$4 sm:$0xff]  }
 0x927   :  { %2896 = vmatpush1.bf16.msra.mxu0 %v9342_v52  ;;  %v9381_v52 = vld [vmem:[%s12187_s5 + $0x160] ss:$16 sps:$4 sm:$0xff]  }
 0x928   :  { %2897 = vmatprep.subr.bf16.mxu0 %v9350_v59  ;;  %v9389_v59 = vld [vmem:[%s12187_s5 + $0x184] ss:$16 sps:$4 sm:$0xff]  }
 0x929   :  { %2845 = vmatpush1.bf16.msra.mxu1 %v9345_v36  ;;  %v9392_v36 = vld [vmem:[%s12187_s5 + $0x18c] ss:$16 sps:$4 sm:$0xff]  }
 0x92a   :  { %2846 = vmatprep.subr.bf16.mxu1 %v9353_v0  ;;  %v9390_v0 = vld [vmem:[%s12187_s5 + $0x188] ss:$16 sps:$4 sm:$0xff]  }
 0x92b   :  { %2898 = vmatpush1.bf16.msra.mxu0 %v9348_v63  ;;  %v9387_v63 = vld [vmem:[%s12187_s5 + $0x180] ss:$16 sps:$4 sm:$0xff]  }
 0x92c   :  { %2899 = vmatprep.subr.bf16.mxu0 %v9356_v4  ;;  %v9395_v4 = vld [vmem:[%s12187_s5 + $0x1a4] ss:$16 sps:$4 sm:$0xff]  }
 0x92d   :  { %2847 = vmatpush1.bf16.msra.mxu1 %v9351_v5  ;;  %v9398_v5 = vld [vmem:[%s12187_s5 + $0x1ac] ss:$16 sps:$4 sm:$0xff]  }
 0x92e   :  { %2848 = vmatprep.subr.bf16.mxu1 %v9359_v3  ;;  %v9396_v3 = vld [vmem:[%s12187_s5 + $0x1a8] ss:$16 sps:$4 sm:$0xff]  }
 0x92f   :  { %2900 = vmatpush1.bf16.msra.mxu0 %v9354_v58  ;;  %v9393_v58 = vld [vmem:[%s12187_s5 + $0x1a0] ss:$16 sps:$4 sm:$0xff]  }
 0x930   :  { %2901 = vmatprep.subr.bf16.mxu0 %v9362_v6  ;;  %v9401_v6 = vld [vmem:[%s12187_s5 + $0x1c4] ss:$16 sps:$4 sm:$0xff]  }
 0x931   :  { %2849 = vmatpush1.bf16.msra.mxu1 %v9357_v15  ;;  %v9404_v15 = vld [vmem:[%s12187_s5 + $0x1cc] ss:$16 sps:$4 sm:$0xff]  }
 0x932   :  { %2850 = vmatprep.subr.bf16.mxu1 %v9365_v37  ;;  %v9402_v37 = vld [vmem:[%s12187_s5 + $0x1c8] ss:$16 sps:$4 sm:$0xff]  }
 0x933   :  { %2902 = vmatpush1.bf16.msra.mxu0 %v9360_v22  ;;  %v9399_v22 = vld [vmem:[%s12187_s5 + $0x1c0] ss:$16 sps:$4 sm:$0xff]  }
 0x934   :  { %2903 = vmatprep.subr.bf16.mxu0 %v9368_v60  ;;  %v9407_v60 = vld [vmem:[%s12187_s5 + $0x1e4] ss:$16 sps:$4 sm:$0xff]  }
 0x935   :  { %2851 = vmatpush1.bf16.msra.mxu1 %v9363_v8  ;;  %v9410_v8 = vld [vmem:[%s12187_s5 + $0x1ec] ss:$16 sps:$4 sm:$0xff]  }
 0x936   :  { %2852 = vmatprep.subr.bf16.mxu1 %v9371_v31  ;;  %v9408_v31 = vld [vmem:[%s12187_s5 + $0x1e8] ss:$16 sps:$4 sm:$0xff]  }
 0x937   :  { %2904 = vmatpush1.bf16.msra.mxu0 %v9366_v55  ;;  %v9405_v55 = vld [vmem:[%s12187_s5 + $0x1e0] ss:$16 sps:$4 sm:$0xff]  }
 0x938   :  { %2905 = vmatprep.subr.bf16.mxu0 %v9374_v21  ;;  %v9413_v21 = vld [vmem:[#allocation4 + $0x4] ss:$8 sps:$4 sm:$0xff]  }
 0x939   :  { %2853 = vmatpush1.bf16.msra.mxu1 %v9369_v32 }
 0x93a   :  { %2854 = vmatprep.subr.bf16.mxu1 %v9377_v33 }
 0x93b   :  { %2906 = vmatpush1.bf16.msra.mxu0 %v9372_v38 }
 0x93c   :  { %2907 = vmatprep.subr.bf16.mxu0 %v9380_v2 }
 0x93d   :  { %2855 = vmatpush1.bf16.msra.mxu1 %v9375_v25 }
 0x93e   :  { %2856 = vmatprep.subr.bf16.mxu1 %v9383_v51 }
 0x93f   :  { %2908 = vmatpush1.bf16.msra.mxu0 %v9378_v30 }
 0x940   :  { %2909 = vmatprep.subr.bf16.mxu0 %v9386_v29 }
 0x941   :  { %2857 = vmatpush1.bf16.msra.mxu1 %v9381_v52 }
 0x942   :  { %2858 = vmatprep.subr.bf16.mxu1 %v9389_v59 }
 0x943   :  { %2910 = vmatpush1.bf16.msra.mxu0 %v9384_v44 }
 0x944   :  { %2911 = vmatprep.subr.bf16.mxu0 %v9392_v36 }
 0x945   :  { %2859 = vmatpush1.bf16.msra.mxu1 %v9387_v63 }
 0x946   :  { %2860 = vmatprep.subr.bf16.mxu1 %v9395_v4 }
 0x947   :  { %2912 = vmatpush1.bf16.msra.mxu0 %v9390_v0  ;;  %v9411_v0 = vld [vmem:[#allocation4] ss:$8 sps:$4 sm:$0xff]  }
 0x948   :  { %2913 = vmatprep.subr.bf16.mxu0 %v9398_v5  ;;  %v9416_v5 = vld [vmem:[#allocation4 + $0x14] ss:$8 sps:$4 sm:$0xff]  }
 0x949   :  { %2861 = vmatpush1.bf16.msra.mxu1 %v9393_v58 }
 0x94a   :  { %2862 = vmatprep.subr.bf16.mxu1 %v9401_v6 }
 0x94b   :  { %2914 = vmatpush1.bf16.msra.mxu0 %v9396_v3 }
 0x94c   :  { %2915 = vmatprep.subr.bf16.mxu0 %v9404_v15 }
 0x94d   :  { %2863 = vmatpush1.bf16.msra.mxu1 %v9399_v22 }
 0x94e   :  { %2864 = vmatprep.subr.bf16.mxu1 %v9407_v60  ;;  %v9414_v60 = vld [vmem:[#allocation4 + $0x10] ss:$8 sps:$4 sm:$0xff]  }
 0x94f   :  { %2916 = vmatpush1.bf16.msra.mxu0 %v9402_v37 }
 0x950   :  { %2917 = vmatprep.subr.bf16.mxu0 %v9410_v8 }
 0x951   :  { %2865 = vmatpush1.bf16.msra.mxu1 %v9405_v55 }
 0x952   :  { %3488 = vmatprep.subr.bf16.mxu1 %v9413_v21  ;;  %v9417_v21 = vld [vmem:[#allocation4 + $0x20] ss:$8 sps:$4 sm:$0xff]  }
 0x953   :  { %2918 = vmatpush1.bf16.msra.mxu0 %v9408_v31 }
 0x99d   :  { %v2324_v53 = vpop.xlane.xlu0 %2323 }
 0x99e   :  { %v2334_v24 = vmul.f32 0.00390625, %v2324_v53 }
 0x99f   :  { %v2327_v20 = vpop.xlane.xlu1 %2326 }
 0x9a0   :  { %v11229_v40 = vsub.f32 %v11157_v28, %v2334_v24  ;;  %v11232_v42 = vsub.f32 %v11160_v10, %v2334_v24  ;;  %v2335_v19 = vmul.f32 0.00390625, %v2327_v20 }
 0x9a2   :  { %v11235_v35 = vsub.f32 %v11163_v14, %v2335_v19  ;;  %v11238_v9 = vsub.f32 %v11166_v16, %v2335_v19  ;;  %v2346_v13 = vmul.f32 %v11229_v40, %v11229_v40  ;;  %v2347_v39 = vmul.f32 %v11232_v42, %v11232_v42 }
 0x9a4   :  { %v2354_v34 = vadd.f32 %v2347_v39, %v2346_v13  ;;  %v2348_v28 = vmul.f32 %v11235_v35, %v11235_v35  ;;  %v2349_v10 = vmul.f32 %v11238_v9, %v11238_v9 }
 0x9a5   :  { %v2330_v45 = vpop.xlane.xlu0 %2329 }
 0x9a6   :  { %v2336_v7 = vmul.f32 0.00390625, %v2330_v45  ;;  %2355 = vadd.xlane.f32.xlu0 %v2354_v34  ;;  %v2357_v14 = vadd.f32 %v2349_v10, %v2348_v28  ;;  %v2320_v45 = vld [vmem:[%s12188_s13] sm:$0x3] }
 0x9a7   :  { %v2333_v16 = vpop.xlane.xlu1 %2332 }
 0x9a8   :  { %v11249_v56 = vsub.f32 %v11173_v23, %v2336_v7  ;;  %v11252_v17 = vsub.f32 %v11176_v41, %v2336_v7  ;;  %v2337_v47 = vmul.f32 0.00390625, %v2333_v16  ;;  %2358 = vadd.xlane.f32.xlu1 %v2357_v14  ;;  %v2321_v14 = vld [vmem:[%s12189_s17] sm:$0x3]  ;;  %v2390_v16 = vrot.slane %v2320_v45, %v10877_v62 }
 0x9aa   :  { %v11255_v18 = vsub.f32 %v11179_v27, %v2337_v47  ;;  %v11258_v1 = vsub.f32 %v11182_v43, %v2337_v47  ;;  %v2350_v46 = vmul.f32 %v11249_v56, %v11249_v56  ;;  %v2351_v23 = vmul.f32 %v11252_v17, %v11252_v17 }
 0x9ab   :  { %v2394_v47 = vrot.slane %v2320_v45, %v10874_v61  ;;  %v9435_v45 = vld [vmem:[#allocation4 + $0x80] ss:$8 sps:$4 sm:$0xff]  }
 0x9ac   :  { %v2360_v50 = vadd.f32 %v2351_v23, %v2350_v46  ;;  %v2352_v41 = vmul.f32 %v11255_v18, %v11255_v18  ;;  %v2353_v27 = vmul.f32 %v11258_v1, %v11258_v1 }
 0x9ae   :  { %2361 = vadd.xlane.f32.xlu0 %v2360_v50  ;;  %v2363_v43 = vadd.f32 %v2353_v27, %v2352_v41  ;;  %v2409_v27 = vrot.slane %v2321_v14, %v10877_v62 }
 0x9b0   :  { %2364 = vadd.xlane.f32.xlu1 %v2363_v43  ;;  %v2413_v43 = vrot.slane %v2321_v14, %v10874_v61  ;;  %v9438_v14 = vld [vmem:[#allocation4 + $0x90] ss:$8 sps:$4 sm:$0xff]  }
 0xa33   :  { %v2356_v32 = vpop.xlane.xlu0 %2355 }
 0xa34   :  { %v2366_v38 = vmul.f32 0.00390625, %v2356_v32  ;;  %v9422_v32 = vld [vmem:[#allocation4 + $0x34] ss:$8 sps:$4 sm:$0xff]  }
 0xa35   :  { %v2359_v53 = vpop.xlane.xlu1 %2358 }
 0xa36   :  { %v2370_v24 = vadd.f32 1e-12, %v2366_v38  ;;  %v2367_v20 = vmul.f32 0.00390625, %v2359_v53  ;;  %v9420_v38 = vld [vmem:[#allocation4 + $0x30] ss:$8 sps:$4 sm:$0xff]  }
 0xa37   :  { %v9425_v53 = vld [vmem:[#allocation4 + $0x44] ss:$8 sps:$4 sm:$0xff]  }
 0xa38   :  { %10091 = vrsqrt.f32 %v2370_v24  ;;  %v2371_v19 = vadd.f32 1e-12, %v2367_v20  ;;  %v9423_v24 = vld [vmem:[#allocation4 + $0x40] ss:$8 sps:$4 sm:$0xff]   ;;  %v9428_v20 = vld [vmem:[#allocation4 + $0x54] ss:$8 sps:$4 sm:$0xff]  }
 0xa3a   :  { %10093 = vrsqrt.f32 %v2371_v19  ;;  %v9426_v19 = vld [vmem:[#allocation4 + $0x50] ss:$8 sps:$4 sm:$0xff]  }
 0xa3b   :  { %v2362_v13 = vpop.xlane.xlu0 %2361 }
 0xa3c   :  { %v2368_v39 = vmul.f32 0.00390625, %v2362_v13  ;;  %v9431_v13 = vld [vmem:[#allocation4 + $0x64] ss:$8 sps:$4 sm:$0xff]  }
 0xa3d   :  { %v2365_v34 = vpop.xlane.xlu1 %2364 }
 0xa3e   :  { %v2372_v28 = vadd.f32 1e-12, %v2368_v39  ;;  %v2369_v10 = vmul.f32 0.00390625, %v2365_v34  ;;  %v9429_v39 = vld [vmem:[#allocation4 + $0x60] ss:$8 sps:$4 sm:$0xff]  }
 0xa3f   :  { %v9434_v34 = vld [vmem:[#allocation4 + $0x74] ss:$8 sps:$4 sm:$0xff]  }
 0xa40   :  { %10095 = vrsqrt.f32 %v2372_v28  ;;  %v2373_v7 = vadd.f32 1e-12, %v2369_v10  ;;  %v9432_v28 = vld [vmem:[#allocation4 + $0x70] ss:$8 sps:$4 sm:$0xff]   ;;  %v9437_v10 = vld [vmem:[#allocation4 + $0x84] ss:$8 sps:$4 sm:$0xff]  }
 0xa42   :  { %v10092_v46 = vpop.eup %10091  ;;  %10097 = vrsqrt.f32 %v2373_v7  ;;  %v9440_v7 = vld [vmem:[#allocation4 + $0x94] ss:$8 sps:$4 sm:$0xff]  }
 0xa43   :  { %v2378_v23 = vmul.f32 %v10092_v46, %v11229_v40  ;;  %v2379_v50 = vmul.f32 %v10092_v46, %v11232_v42  ;;  %v9446_v46 = vld [vmem:[#allocation4 + $0xb4] ss:$8 sps:$4 sm:$0xff]  }
 0xa44   :  { %v10094_v41 = vpop.eup %10093 }
 0xa45   :  { %v2380_v33 = vmul.f32 %v10094_v41, %v11235_v35  ;;  %v2381_v2 = vmul.f32 %v10094_v41, %v11238_v9  ;;  %v2398_v25 = vmul.f32 %v2394_v47, %v2379_v50  ;;  %v2397_v30 = vmul.f32 %v2390_v16, %v2378_v23  ;;  %v9444_v23 = vld [vmem:[#allocation4 + $0xb0] ss:$8 sps:$4 sm:$0xff]   ;;  %v9449_v50 = vld [vmem:[#allocation4 + $0xc4] ss:$8 sps:$4 sm:$0xff]   ;;  %v9447_v41 = vld [vmem:[#allocation4 + $0xc0] ss:$8 sps:$4 sm:$0xff]  }
 0xa47   :  { %v2400_v51 = vmul.f32 %v2394_v47, %v2381_v2  ;;  %v2399_v29 = vmul.f32 %v2390_v16, %v2380_v33  ;;  %v11302_v52 = vadd.f32 %v2413_v43, %v2398_v25  ;;  %v11306_v40 = vadd.f32 %v2409_v27, %v2397_v30  ;;  %v9455_v33 = vld [vmem:[#allocation4 + $0xe4] ss:$8 sps:$4 sm:$0xff]   ;;  %v9453_v2 = vld [vmem:[#allocation4 + $0xe0] ss:$8 sps:$4 sm:$0xff]   ;;  %v9458_v25 = vld [vmem:[#allocation4 + $0xf4] ss:$8 sps:$4 sm:$0xff]  }
 0xa48   :  { %v9456_v30 = vld [vmem:[#allocation4 + $0xf0] ss:$8 sps:$4 sm:$0xff]  }
 0xa49   :  { %v11304_v44 = vadd.f32 %v2413_v43, %v2400_v51  ;;  %v11308_v42 = vadd.f32 %v2409_v27, %v2399_v29  ;;  %v9461_v51 = vld [vmem:[#allocation4 + $0x104] ss:$8 sps:$4 sm:$0xff]   ;;  %v2492_v29 = vld [vmem:[%s12190_s21] sm:$0xf] }
 0xa4a   :  { %v10096_v59 = vpop.eup %10095 }
 0xa4b   :  { %v2425_v36 = vpack.c.bf16 %v11304_v44, %v11302_v52  ;;  %v2424_v35 = vpack.c.bf16 %v11308_v42, %v11306_v40  ;;  %v2383_v9 = vmul.f32 %v10096_v59, %v11252_v17  ;;  %v2382_v63 = vmul.f32 %v10096_v59, %v11249_v56  ;;  %v9419_v17 = vld [vmem:[#allocation4 + $0x24] ss:$8 sps:$4 sm:$0xff]  }
 0xa4c   :  { %v10098_v4 = vpop.eup %10097  ;;  %v11332_v59 = vrot.slane %v2492_v29, %v10877_v62 }
 0xa4d   :  { %2866 = vmatprep.mubr.bf16.mxu1 %v2425_v36  ;;  %2919 = vmatprep.mubr.bf16.mxu0 %v2425_v36  ;;  %v2385_v58 = vmul.f32 %v10098_v4, %v11258_v1  ;;  %v2402_v3 = vmul.f32 %v2394_v47, %v2383_v9  ;;  %v2384_v6 = vmul.f32 %v10098_v4, %v11255_v18 }
 0xa4e   :  { %2867 = vmatmul.mubr.bf16.vlgmr.msra.gmra.mrb[64].mxu1 %v2424_v35  ;;  %2920 = vmatmul.mubr.bf16.vlgmr.msra.gmra.mrb[32].mxu0 %v2424_v35  ;;  %v2401_v15 = vmul.f32 %v2390_v16, %v2382_v63  ;;  %v11335_v36 = vrot.slane %v2492_v29, %v10965_v12  ;;  %v11338_v35 = vrot.slane %v2492_v29, %v10874_v61 }
 0xa4f   :  { %v2404_v22 = vmul.f32 %v2394_v47, %v2385_v58  ;;  %v2403_v37 = vmul.f32 %v2390_v16, %v2384_v6  ;;  %3489 = vmatpush1.bf16.msra.mxu1 %v9411_v0  ;;  %v11318_v56 = vadd.f32 %v2413_v43, %v2402_v3  ;;  %v9443_v16 = vld [vmem:[#allocation4 + $0xa4] ss:$8 sps:$4 sm:$0xff]   ;;  %v9441_v47 = vld [vmem:[#allocation4 + $0xa0] ss:$8 sps:$4 sm:$0xff]  }
 0xa50   :  { %3490 = vmatprep.subr.bf16.mxu1 %v9416_v5  ;;  %v11322_v55 = vadd.f32 %v2409_v27, %v2401_v15 }
 0xa51   :  { %v11320_v8 = vadd.f32 %v2413_v43, %v2404_v22  ;;  %v11324_v31 = vadd.f32 %v2409_v27, %v2403_v37  ;;  %v9450_v27 = vld [vmem:[#allocation4 + $0xd0] ss:$8 sps:$4 sm:$0xff]   ;;  %v9452_v43 = vld [vmem:[#allocation4 + $0xd4] ss:$8 sps:$4 sm:$0xff]  }
 0xa53   :  { %v2427_v18 = vpack.c.bf16 %v11320_v8, %v11318_v56  ;;  %v2426_v1 = vpack.c.bf16 %v11324_v31, %v11322_v55  ;;  %3491 = vmatpush1.bf16.msra.mxu1 %v9414_v60  ;;  %v11346_v60 = vrot.slane %v2492_v29, %v11065_v54 }
 0xa54   :  { %3492 = vmatprep.subr.bf16.mxu1 %v9419_v17 }
 0xa55   :  { %2876 = vmatprep.mubr.bf16.mxu1 %v2427_v18  ;;  %2929 = vmatprep.mubr.bf16.mxu0 %v2427_v18 }
 0xa56   :  { %2877 = vmatmul.mubr.bf16.gmra.mrb[68].mxu1 %v2426_v1  ;;  %2930 = vmatmul.mubr.bf16.gmra.mrb[36].mxu0 %v2426_v1 }
 0xa57   :  { %3493 = vmatpush1.bf16.msra.mxu1 %v9417_v21 }
 0xa58   :  { %3494 = vmatprep.subr.bf16.mxu1 %v9422_v32 }
 0xa5b   :  { %3495 = vmatpush1.bf16.msra.mxu1 %v9420_v38 }
 0xa5c   :  { %3496 = vmatprep.subr.bf16.mxu1 %v9425_v53 }
 0xa5f   :  { %3497 = vmatpush1.bf16.msra.mxu1 %v9423_v24 }
 0xa60   :  { %3498 = vmatprep.subr.bf16.mxu1 %v9428_v20 }
 0xa63   :  { %3499 = vmatpush1.bf16.msra.mxu1 %v9426_v19 }
 0xa64   :  { %3500 = vmatprep.subr.bf16.mxu1 %v9431_v13 }
 0xa67   :  { %3501 = vmatpush1.bf16.msra.mxu1 %v9429_v39 }
 0xa68   :  { %3502 = vmatprep.subr.bf16.mxu1 %v9434_v34 }
 0xa6b   :  { %3503 = vmatpush1.bf16.msra.mxu1 %v9432_v28 }
 0xa6c   :  { %3504 = vmatprep.subr.bf16.mxu1 %v9437_v10 }
 0xa6f   :  { %3505 = vmatpush1.bf16.msra.mxu1 %v9435_v45 }
 0xa70   :  { %3506 = vmatprep.subr.bf16.mxu1 %v9440_v7 }
 0xa73   :  { %3507 = vmatpush1.bf16.msra.mxu1 %v9438_v14 }
 0xa74   :  { %3508 = vmatprep.subr.bf16.mxu1 %v9443_v16 }
 0xa77   :  { %3509 = vmatpush1.bf16.msra.mxu1 %v9441_v47 }
 0xa78   :  { %3510 = vmatprep.subr.bf16.mxu1 %v9446_v46 }
 0xa7b   :  { %3511 = vmatpush1.bf16.msra.mxu1 %v9444_v23 }
 0xa7c   :  { %3512 = vmatprep.subr.bf16.mxu1 %v9449_v50 }
 0xa7f   :  { %3513 = vmatpush1.bf16.msra.mxu1 %v9447_v41 }
 0xa80   :  { %3514 = vmatprep.subr.bf16.mxu1 %v9452_v43 }
 0xa83   :  { %3515 = vmatpush1.bf16.msra.mxu1 %v9450_v27 }
 0xa84   :  { %3516 = vmatprep.subr.bf16.mxu1 %v9455_v33 }
 0xa87   :  { %3517 = vmatpush1.bf16.msra.mxu1 %v9453_v2 }
 0xa88   :  { %3518 = vmatprep.subr.bf16.mxu1 %v9458_v25 }
 0xa8b   :  { %3519 = vmatpush1.bf16.msra.mxu1 %v9456_v30 }
 0xa8c   :  { %3541 = vmatprep.subr.bf16.mxu1 %v9461_v51 }
 0xb21   :  { %v2868_v9 = vpop.f32.mrb[64].mxu1  ;;  %v2921_v63 = vpop.f32.mrb[32].mxu0 }
 0xb22   :  { %v2869_v0 = vadd.f32 %v2868_v9, %v11332_v59  ;;  %v2922_v4 = vadd.f32 %v2921_v63, %v11335_v36  ;;  %v2870_v5 = vpop.f32.mrb[65].mxu1  ;;  %v2923_v58 = vpop.f32.mrb[33].mxu0 }
 0xb23   :  { %v11343_v3 = vadd.f32 %v2870_v5, %v11338_v35  ;;  %v2872_v6 = vpop.f32.mrb[66].mxu1  ;;  %v2925_v15 = vpop.f32.mrb[34].mxu0  ;;  %v11357_v39 = vadd.f32 %v2923_v58, %v11346_v60 }
 0xb24   :  { %v2956_v22 = vmul.f32 0.044715, %v2869_v0  ;;  %v2958_v37 = vmul.f32 0.044715, %v2922_v4  ;;  %v2873_v17 = vadd.f32 %v2872_v6, %v11332_v59  ;;  %v11350_v18 = vadd.f32 %v2925_v15, %v11335_v36  ;;  %v2874_v1 = vpop.f32.mrb[67].mxu1  ;;  %v2927_v21 = vpop.f32.mrb[35].mxu0 }
 0xb25   :  { %v2957_v53 = vmul.f32 0.044715, %v11343_v3  ;;  %v11354_v24 = vadd.f32 %v2874_v1, %v11338_v35  ;;  %v11360_v28 = vmul.f32 0.5, %v2869_v0  ;;  %v11362_v10 = vmul.f32 0.5, %v2922_v4 }
 0xb26   :  { %v2972_v32 = vmul.f32 %v2956_v22, %v2869_v0  ;;  %v2974_v38 = vmul.f32 %v2958_v37, %v2922_v4  ;;  %v2960_v20 = vmul.f32 0.044715, %v2873_v17  ;;  %v2962_v34 = vmul.f32 0.044715, %v11350_v18 }
 0xb27   :  { %v2961_v7 = vmul.f32 0.044715, %v11354_v24  ;;  %v2973_v23 = vmul.f32 %v2957_v53, %v11343_v3  ;;  %v11369_v2 = vadd.f32 %v2927_v21, %v11346_v60  ;;  %v2959_v5 = vmul.f32 0.044715, %v11357_v39 }
 0xb28   :  { %v2988_v19 = vmul.f32 %v2972_v32, %v2869_v0  ;;  %v2990_v13 = vmul.f32 %v2974_v38, %v2922_v4  ;;  %v2976_v45 = vmul.f32 %v2960_v20, %v2873_v17  ;;  %v2978_v50 = vmul.f32 %v2962_v34, %v11350_v18 }
 0xb29   :  { %v2878_v14 = vpop.f32.mrb[68].mxu1  ;;  %v2931_v16 = vpop.f32.mrb[36].mxu0  ;;  %v2977_v33 = vmul.f32 %v2961_v7, %v11354_v24  ;;  %v2989_v22 = vmul.f32 %v2973_v23, %v11343_v3  ;;  %v2963_v38 = vmul.f32 0.044715, %v11369_v2  ;;  %v2944_v23 = vmul.f32 0.5, %v2873_v17 }
 0xb2a   :  { %v3004_v47 = vadd.f32 %v2988_v19, %v2869_v0  ;;  %v3006_v46 = vadd.f32 %v2990_v13, %v2922_v4  ;;  %v2880_v41 = vpop.f32.mrb[69].mxu1  ;;  %v2933_v27 = vpop.f32.mrb[37].mxu0  ;;  %v2992_v43 = vmul.f32 %v2976_v45, %v2873_v17  ;;  %v11372_v25 = vadd.f32 %v2878_v14, %v11332_v59 }
 0xb2b   :  { %v2882_v30 = vpop.f32.mrb[70].mxu1  ;;  %v2935_v51 = vpop.f32.mrb[38].mxu0  ;;  %v2994_v63 = vmul.f32 %v2978_v50, %v11350_v18  ;;  %v11378_v15 = vadd.f32 %v2931_v16, %v11335_v36  ;;  %v11383_v1 = vadd.f32 %v2880_v41, %v11338_v35  ;;  %v2993_v32 = vmul.f32 %v2977_v33, %v11354_v24 }
 0xb2c   :  { %v3020_v29 = vmul.f32 0.7978846, %v3004_v47  ;;  %v3022_v9 = vmul.f32 0.7978846, %v3006_v46  ;;  %v2884_v0 = vpop.f32.mrb[71].mxu1  ;;  %v2937_v4 = vpop.f32.mrb[39].mxu0  ;;  %v3008_v58 = vadd.f32 %v2992_v43, %v2873_v17  ;;  %v11389_v19 = vadd.f32 %v2933_v27, %v11346_v60 }
 0xb2d   :  { %v2964_v6 = vmul.f32 0.044715, %v11372_v25  ;;  %v3010_v37 = vadd.f32 %v2994_v63, %v11350_v18  ;;  %v2965_v20 = vmul.f32 0.044715, %v11383_v1  ;;  %v11392_v13 = vadd.f32 %v2882_v30, %v11332_v59 }
 0xb2e   :  { %10099 = vtanh.f32 %v3020_v29  ;;  %v3024_v21 = vmul.f32 0.7978846, %v3008_v58  ;;  %v2966_v45 = vmul.f32 0.044715, %v11378_v15  ;;  %v11397_v7 = vadd.f32 %v2935_v51, %v11335_v36 }
 0xb2f   :  { %10101 = vtanh.f32 %v3022_v9  ;;  %v3026_v53 = vmul.f32 0.7978846, %v3010_v37  ;;  %v2980_v34 = vmul.f32 %v2964_v6, %v11372_v25  ;;  %v2981_v14 = vmul.f32 %v2965_v20, %v11383_v1 }
 0xb30   :  { %10103 = vtanh.f32 %v3024_v21  ;;  %v2967_v16 = vmul.f32 0.044715, %v11389_v19  ;;  %v2968_v47 = vmul.f32 0.044715, %v11392_v13  ;;  %v2975_v46 = vmul.f32 %v2959_v5, %v11357_v39 }
 0xb31   :  { %10105 = vtanh.f32 %v3026_v53  ;;  %v11404_v59 = vadd.f32 %v2884_v0, %v11338_v35  ;;  %v11407_v50 = vadd.f32 %v2937_v4, %v11346_v60  ;;  %v2946_v41 = vmul.f32 0.5, %v11350_v18 }
 0xb32   :  { %v2979_v36 = vmul.f32 %v2963_v38, %v11369_v2  ;;  %v2997_v27 = vmul.f32 %v2981_v14, %v11383_v1  ;;  %v2984_v43 = vmul.f32 %v2968_v47, %v11392_v13  ;;  %v2982_v33 = vmul.f32 %v2966_v45, %v11378_v15 }
 0xb33   :  { %v2969_v30 = vmul.f32 0.044715, %v11404_v59  ;;  %v2971_v17 = vmul.f32 0.044715, %v11407_v50  ;;  %v3005_v35 = vadd.f32 %v2989_v22, %v11343_v3  ;;  %v2996_v51 = vmul.f32 %v2980_v34, %v11372_v25 }
 0xb34   :  { %v2983_v60 = vmul.f32 %v2967_v16, %v11389_v19  ;;  %v2970_v18 = vmul.f32 0.044715, %v11397_v7  ;;  %v3009_v29 = vadd.f32 %v2993_v32, %v11354_v24  ;;  %v3000_v9 = vmul.f32 %v2984_v43, %v11392_v13 }
 0xb35   :  { %v2985_v63 = vmul.f32 %v2969_v30, %v11404_v59  ;;  %v2987_v0 = vmul.f32 %v2971_v17, %v11407_v50  ;;  %v3021_v4 = vmul.f32 0.7978846, %v3005_v35  ;;  %v2991_v58 = vmul.f32 %v2975_v46, %v11357_v39 }
 0xb36   :  { %v2995_v6 = vmul.f32 %v2979_v36, %v11369_v2  ;;  %v3025_v22 = vmul.f32 0.7978846, %v3009_v29  ;;  %v3013_v37 = vadd.f32 %v2997_v27, %v11383_v1  ;;  %v2998_v38 = vmul.f32 %v2982_v33, %v11378_v15 }
 0xb37   :  { %v3001_v32 = vmul.f32 %v2985_v63, %v11404_v59  ;;  %10107 = vtanh.f32 %v3021_v4  ;;  %v2986_v20 = vmul.f32 %v2970_v18, %v11397_v7  ;;  %v3012_v45 = vadd.f32 %v2996_v51, %v11372_v25 }
 0xb38   :  { %v10100_v5 = vpop.eup %10099  ;;  %10109 = vtanh.f32 %v3025_v22  ;;  %v3029_v34 = vmul.f32 0.7978846, %v3013_v37  ;;  %v2999_v16 = vmul.f32 %v2983_v60, %v11389_v19  ;;  %v3003_v47 = vmul.f32 %v2987_v0, %v11407_v50 }
 0xb39   :  { %v10102_v21 = vpop.eup %10101  ;;  %v3052_v53 = vadd.f32 1.0, %v10100_v5  ;;  %v3017_v46 = vadd.f32 %v3001_v32, %v11404_v59  ;;  %v3016_v36 = vadd.f32 %v3000_v9, %v11392_v13  ;;  %v3028_v30 = vmul.f32 0.7978846, %v3012_v45 }
 0xb3a   :  { %v10104_v14 = vpop.eup %10103  ;;  %10111 = vtanh.f32 %v3029_v34  ;;  %v3007_v18 = vadd.f32 %v2991_v58, %v11357_v39  ;;  %v3011_v51 = vadd.f32 %v2995_v6, %v11369_v2  ;;  %v3054_v60 = vadd.f32 1.0, %v10102_v21 }
 0xb3b   :  { %v10106_v27 = vpop.eup %10105  ;;  %v3056_v43 = vadd.f32 1.0, %v10104_v14  ;;  %v3068_v33 = vmul.f32 %v3052_v53, %v11360_v28  ;;  %v3033_v17 = vmul.f32 0.7978846, %v3017_v46  ;;  %v3032_v35 = vmul.f32 0.7978846, %v3016_v36 }
 0xb3c   :  { %10113 = vtanh.f32 %v3028_v30  ;;  %v3058_v63 = vadd.f32 1.0, %v10106_v27  ;;  %v3002_v0 = vmul.f32 %v2986_v20, %v11397_v7  ;;  %v3023_v9 = vmul.f32 0.7978846, %v3007_v18  ;;  %v9464_v18 = vld [vmem:[#allocation4 + $0x114] ss:$8 sps:$4 sm:$0xff]  }
 0xb3d   :  { %v3072_v29 = vmul.f32 %v3056_v43, %v2944_v23  ;;  %10115 = vtanh.f32 %v3033_v17  ;;  %v3027_v4 = vmul.f32 0.7978846, %v3011_v51  ;;  %v11440_v28 = vmul.f32 %v3054_v60, %v11362_v10  ;;  %v9459_v17 = vld [vmem:[#allocation4 + $0x100] ss:$8 sps:$4 sm:$0xff]  }
 0xb3e   :  { %10117 = vtanh.f32 %v3032_v35  ;;  %v11442_v22 = vmul.f32 %v3058_v63, %v2946_v41  ;;  %v3015_v58 = vadd.f32 %v2999_v16, %v11389_v19  ;;  %v3019_v23 = vadd.f32 %v3003_v47, %v11407_v50 }
 0xb3f   :  { %v3084_v5 = vpack.c.bf16 %v3072_v29, %v3068_v33  ;;  %10119 = vtanh.f32 %v3023_v9  ;;  %v3014_v53 = vadd.f32 %v2998_v38, %v11378_v15  ;;  %v3018_v20 = vadd.f32 %v3002_v0, %v11397_v7 }
 0xb40   :  { %10121 = vtanh.f32 %v3027_v4  ;;  %v3086_v6 = vpack.c.bf16 %v11442_v22, %v11440_v28  ;;  %v3031_v21 = vmul.f32 0.7978846, %v3015_v58  ;;  %v3035_v32 = vmul.f32 0.7978846, %v3019_v23 }
 0xb41   :  { %v10108_v37 = vpop.eup %10107  ;;  %v2941_v41 = vmul.f32 0.5, %v11343_v3  ;;  %v2945_v34 = vmul.f32 0.5, %v11354_v24  ;;  %v3030_v16 = vmul.f32 0.7978846, %v3014_v53  ;;  %v3034_v47 = vmul.f32 0.7978846, %v3018_v20 }
 0xb42   :  { %v10110_v10 = vpop.eup %10109  ;;  %v3053_v45 = vadd.f32 1.0, %v10108_v37  ;;  %10123 = vtanh.f32 %v3031_v21  ;;  %v2949_v24 = vmul.f32 0.5, %v11383_v1  ;;  %v2953_v51 = vmul.f32 0.5, %v11404_v59 }
 0xb43   :  { %v3057_v14 = vadd.f32 1.0, %v10110_v10  ;;  %10125 = vtanh.f32 %v3035_v32  ;;  %v2948_v63 = vmul.f32 0.5, %v11372_v25  ;;  %v2952_v0 = vmul.f32 0.5, %v11392_v13  ;;  %v9462_v32 = vld [vmem:[#allocation4 + $0x110] ss:$8 sps:$4 sm:$0xff]  }
 0xb44   :  { %v10112_v46 = vpop.eup %10111  ;;  %v3069_v36 = vmul.f32 %v3053_v45, %v2941_v41  ;;  %10127 = vtanh.f32 %v3030_v16  ;;  %v2943_v37 = vmul.f32 0.5, %v11357_v39  ;;  %v2947_v59 = vmul.f32 0.5, %v11369_v2  ;;  %v9467_v25 = vld [vmem:[#allocation4 + $0x124] ss:$8 sps:$4 sm:$0xff]   ;;  %v9465_v39 = vld [vmem:[#allocation4 + $0x120] ss:$8 sps:$4 sm:$0xff]  }
 0xb45   :  { %v3073_v27 = vmul.f32 %v3057_v14, %v2945_v34  ;;  %v3061_v33 = vadd.f32 1.0, %v10112_v46  ;;  %10129 = vtanh.f32 %v3034_v47  ;;  %v2951_v46 = vmul.f32 0.5, %v11389_v19 }
 0xb46   :  { %v10114_v43 = vpop.eup %10113 }
 0xb47   :  { %v10116_v38 = vpop.eup %10115  ;;  %v3085_v30 = vpack.c.bf16 %v3073_v27, %v3069_v36  ;;  %v3060_v35 = vadd.f32 1.0, %v10114_v43  ;;  %v3077_v58 = vmul.f32 %v3061_v33, %v2949_v24  ;;  %v2955_v36 = vmul.f32 0.5, %v11407_v50  ;;  %v9470_v43 = vld [vmem:[#allocation4 + $0x134] ss:$8 sps:$4 sm:$0xff]  }
 0xb48   :  { %v10118_v3 = vpop.eup %10117  ;;  %v3065_v29 = vadd.f32 1.0, %v10116_v38  ;;  %v2950_v33 = vmul.f32 0.5, %v11378_v15  ;;  %v9471_v15 = vld [vmem:[#allocation4 + $0x140] ss:$8 sps:$4 sm:$0xff]  }
 0xb49   :  { %v10120_v60 = vpop.eup %10119  ;;  %3520 = vmatprep.mubr.bf16.mxu1 %v3085_v30  ;;  %v3064_v9 = vadd.f32 1.0, %v10118_v3  ;;  %v3076_v1 = vmul.f32 %v3060_v35, %v2948_v63  ;;  %v2954_v35 = vmul.f32 0.5, %v11397_v7  ;;  %v9474_v63 = vld [vmem:[#allocation4 + $0x150] ss:$8 sps:$4 sm:$0xff]   ;;  %v9479_v7 = vld [vmem:[#allocation4 + $0x164] ss:$8 sps:$4 sm:$0xff]  }
 0xb4a   :  { %v10122_v4 = vpop.eup %10121  ;;  %3521 = vmatmul.mubr.bf16.vlgmr.msra.gmra.mrb[72].mxu1 %v3084_v5  ;;  %v3081_v23 = vmul.f32 %v3065_v29, %v2953_v51  ;;  %v3055_v21 = vadd.f32 1.0, %v10120_v60  ;;  %v9473_v51 = vld [vmem:[#allocation4 + $0x144] ss:$8 sps:$4 sm:$0xff]   ;;  %v9476_v60 = vld [vmem:[#allocation4 + $0x154] ss:$8 sps:$4 sm:$0xff]  }
 0xb4b   :  { %3542 = vmatpush1.bf16.msra.mxu1 %v9459_v17  ;;  %v3080_v53 = vmul.f32 %v3064_v9, %v2952_v0  ;;  %v3059_v20 = vadd.f32 1.0, %v10122_v4  ;;  %v9477_v0 = vld [vmem:[#allocation4 + $0x160] ss:$8 sps:$4 sm:$0xff]   ;;  %v9482_v9 = vld [vmem:[#allocation4 + $0x174] ss:$8 sps:$4 sm:$0xff]  }
 0xb4c   :  { %3543 = vmatprep.subr.bf16.mxu1 %v9464_v18  ;;  %v3089_v10 = vpack.c.bf16 %v3081_v23, %v3077_v58  ;;  %v10124_v41 = vpop.eup %10123  ;;  %v3071_v34 = vmul.f32 %v3055_v21, %v2943_v37  ;;  %v9468_v18 = vld [vmem:[#allocation4 + $0x130] ss:$8 sps:$4 sm:$0xff]   ;;  %v9485_v58 = vld [vmem:[#allocation4 + $0x184] ss:$8 sps:$4 sm:$0xff]   ;;  %v9483_v23 = vld [vmem:[#allocation4 + $0x180] ss:$8 sps:$4 sm:$0xff]  }
 0xb4d   :  { %v3088_v13 = vpack.c.bf16 %v3080_v53, %v3076_v1  ;;  %v3075_v45 = vmul.f32 %v3059_v20, %v2947_v59  ;;  %v10126_v5 = vpop.eup %10125  ;;  %v3063_v14 = vadd.f32 1.0, %v10124_v41  ;;  %v9480_v4 = vld [vmem:[#allocation4 + $0x170] ss:$8 sps:$4 sm:$0xff]   ;;  %v9488_v37 = vld [vmem:[#allocation4 + $0x194] ss:$8 sps:$4 sm:$0xff]  }
 0xb4e   :  { %3530 = vmatprep.mubr.bf16.mxu1 %v3089_v10  ;;  %v10128_v16 = vpop.eup %10127  ;;  %v3067_v2 = vadd.f32 1.0, %v10126_v5  ;;  %v9486_v21 = vld [vmem:[#allocation4 + $0x190] ss:$8 sps:$4 sm:$0xff]   ;;  %v9489_v1 = vld [vmem:[#allocation4 + $0x1a0] ss:$8 sps:$4 sm:$0xff]  }
 0xb4f   :  { %3544 = vmatpush1.bf16.msra.mxu1 %v9462_v32  ;;  %v3087_v47 = vpack.c.bf16 %v3075_v45, %v3071_v34  ;;  %v10130_v27 = vpop.eup %10129  ;;  %v3062_v38 = vadd.f32 1.0, %v10128_v16  ;;  %v11461_v30 = vmul.f32 %v3063_v14, %v2951_v46  ;;  %v9491_v32 = vld [vmem:[#allocation4 + $0x1a4] ss:$8 sps:$4 sm:$0xff]   ;;  %v9494_v53 = vld [vmem:[#allocation4 + $0x1b4] ss:$8 sps:$4 sm:$0xff]  }
 0xb50   :  { %3545 = vmatprep.subr.bf16.mxu1 %v9467_v25  ;;  %v3083_v17 = vmul.f32 %v3067_v2, %v2955_v36  ;;  %v3066_v3 = vadd.f32 1.0, %v10130_v27  ;;  %v9492_v59 = vld [vmem:[#allocation4 + $0x1b0] ss:$8 sps:$4 sm:$0xff]   ;;  %v9497_v20 = vld [vmem:[#allocation4 + $0x1c4] ss:$8 sps:$4 sm:$0xff]  }
 0xb51   :  { %v3078_v50 = vmul.f32 %v3062_v38, %v2950_v33  ;;  %v9495_v10 = vld [vmem:[#allocation4 + $0x1c0] ss:$8 sps:$4 sm:$0xff]   ;;  %v9500_v25 = vld [vmem:[#allocation4 + $0x1d4] ss:$8 sps:$4 sm:$0xff]   ;;  %v9498_v41 = vld [vmem:[#allocation4 + $0x1d0] ss:$8 sps:$4 sm:$0xff]  }
 0xb52   :  { %3531 = vmatmul.mubr.bf16.gmra.mrb[76].mxu1 %v3088_v13  ;;  %v3091_v19 = vpack.c.bf16 %v3083_v17, %v11461_v30  ;;  %v3082_v24 = vmul.f32 %v3066_v3, %v2954_v35  ;;  %v9503_v13 = vld [vmem:[#allocation4 + $0x1e4] ss:$8 sps:$4 sm:$0xff]   ;;  %v9501_v34 = vld [vmem:[#allocation4 + $0x1e0] ss:$8 sps:$4 sm:$0xff]   ;;  %v9506_v45 = vld [vmem:[#allocation4 + $0x1f4] ss:$8 sps:$4 sm:$0xff]  }
 0xb53   :  { %3546 = vmatpush1.bf16.msra.mxu1 %v9465_v39  ;;  %3573 = vmatprep.mubr.bf16.mxu1 %v3087_v47  ;;  %v9504_v5 = vld [vmem:[#allocation4 + $0x1f0] ss:$8 sps:$4 sm:$0xff]   ;;  %v3156_v14 = vld [vmem:[%s12191_s25] sm:$0x3] }
 0xb54   :  { %3547 = vmatprep.subr.bf16.mxu1 %v9470_v43  ;;  %v3090_v29 = vpack.c.bf16 %v3082_v24, %v3078_v50  ;;  %v3161_v16 = vrot.slane %v3156_v14, %v10877_v62  ;;  %v3165_v39 = vrot.slane %v3156_v14, %v10874_v61  ;;  %v9545_v14 = vld [vmem:[#allocation6 + $0x124] ss:$24 sps:$4 sm:$0xff]  }
 0xb57   :  { %3548 = vmatpush1.bf16.msra.mxu1 %v9468_v18 }
 0xb58   :  { %3549 = vmatprep.subr.bf16.mxu1 %v9473_v51 }
 0xb5b   :  { %3550 = vmatpush1.bf16.msra.mxu1 %v9471_v15 }
 0xb5c   :  { %3551 = vmatprep.subr.bf16.mxu1 %v9476_v60 }
 0xb5f   :  { %3552 = vmatpush1.bf16.msra.mxu1 %v9474_v63  ;;  %v9507_v63 = vld [vmem:[#allocation6] ss:$24 sps:$4 sm:$0xff]  }
 0xb60   :  { %3553 = vmatprep.subr.bf16.mxu1 %v9479_v7  ;;  %v9509_v7 = vld [vmem:[#allocation6 + $0x4] ss:$24 sps:$4 sm:$0xff]  }
 0xb61   :  { %4318 = vmatprep.subr.bf16.mxu0 %v9509_v7 }
 0xb62   :  { %4319 = vmatpush1.bf16.msra.mxu0 %v9507_v63 }
 0xb63   :  { %3554 = vmatpush1.bf16.msra.mxu1 %v9477_v0  ;;  %v9510_v0 = vld [vmem:[#allocation6 + $0x10] ss:$24 sps:$4 sm:$0xff]  }
 0xb64   :  { %3555 = vmatprep.subr.bf16.mxu1 %v9482_v9  ;;  %v9515_v9 = vld [vmem:[#allocation6 + $0x34] ss:$24 sps:$4 sm:$0xff]  }
 0xb65   :  { %4320 = vmatprep.subr.bf16.mxu0 %v9515_v9 }
 0xb67   :  { %3556 = vmatpush1.bf16.msra.mxu1 %v9480_v4  ;;  %v9518_v4 = vld [vmem:[#allocation6 + $0x44] ss:$24 sps:$4 sm:$0xff]  }
 0xb68   :  { %3557 = vmatprep.subr.bf16.mxu1 %v9485_v58  ;;  %v9521_v58 = vld [vmem:[#allocation6 + $0x64] ss:$24 sps:$4 sm:$0xff]  }
 0xb6b   :  { %3558 = vmatpush1.bf16.msra.mxu1 %v9483_v23  ;;  %v9524_v23 = vld [vmem:[#allocation6 + $0x74] ss:$24 sps:$4 sm:$0xff]  }
 0xb6c   :  { %3559 = vmatprep.subr.bf16.mxu1 %v9488_v37  ;;  %v9519_v37 = vld [vmem:[#allocation6 + $0x60] ss:$24 sps:$4 sm:$0xff]  }
 0xb6f   :  { %3560 = vmatpush1.bf16.msra.mxu1 %v9486_v21  ;;  %v9522_v21 = vld [vmem:[#allocation6 + $0x70] ss:$24 sps:$4 sm:$0xff]  }
 0xb70   :  { %3561 = vmatprep.subr.bf16.mxu1 %v9491_v32  ;;  %v9527_v32 = vld [vmem:[#allocation6 + $0x94] ss:$24 sps:$4 sm:$0xff]  }
 0xb73   :  { %3562 = vmatpush1.bf16.msra.mxu1 %v9489_v1  ;;  %v9530_v1 = vld [vmem:[#allocation6 + $0xa4] ss:$24 sps:$4 sm:$0xff]  }
 0xb74   :  { %3563 = vmatprep.subr.bf16.mxu1 %v9494_v53  ;;  %v9525_v53 = vld [vmem:[#allocation6 + $0x90] ss:$24 sps:$4 sm:$0xff]  }
 0xb77   :  { %3564 = vmatpush1.bf16.msra.mxu1 %v9492_v59  ;;  %v9528_v59 = vld [vmem:[#allocation6 + $0xa0] ss:$24 sps:$4 sm:$0xff]  }
 0xb78   :  { %3565 = vmatprep.subr.bf16.mxu1 %v9497_v20  ;;  %v9533_v20 = vld [vmem:[#allocation6 + $0xc4] ss:$24 sps:$4 sm:$0xff]  }
 0xb7b   :  { %3566 = vmatpush1.bf16.msra.mxu1 %v9495_v10  ;;  %v9536_v10 = vld [vmem:[#allocation6 + $0xd4] ss:$24 sps:$4 sm:$0xff]  }
 0xb7c   :  { %3567 = vmatprep.subr.bf16.mxu1 %v9500_v25  ;;  %v9531_v25 = vld [vmem:[#allocation6 + $0xc0] ss:$24 sps:$4 sm:$0xff]  }
 0xb7f   :  { %3568 = vmatpush1.bf16.msra.mxu1 %v9498_v41  ;;  %v9534_v41 = vld [vmem:[#allocation6 + $0xd0] ss:$24 sps:$4 sm:$0xff]  }
 0xb80   :  { %3569 = vmatprep.subr.bf16.mxu1 %v9503_v13  ;;  %v9539_v13 = vld [vmem:[#allocation6 + $0xf4] ss:$24 sps:$4 sm:$0xff]  }
 0xb83   :  { %3570 = vmatpush1.bf16.msra.mxu1 %v9501_v34  ;;  %v9542_v34 = vld [vmem:[#allocation6 + $0x104] ss:$24 sps:$4 sm:$0xff]  }
 0xb84   :  { %3571 = vmatprep.subr.bf16.mxu1 %v9506_v45  ;;  %v9537_v45 = vld [vmem:[#allocation6 + $0xf0] ss:$24 sps:$4 sm:$0xff]  }
 0xb87   :  { %3572 = vmatpush1.bf16.msra.mxu1 %v9504_v5  ;;  %v9540_v5 = vld [vmem:[#allocation6 + $0x100] ss:$24 sps:$4 sm:$0xff]  }
 0xb8a   :  { %3574 = vmatmul.mubr.bf16.vlgmr.msra.gmra.mrb[72].mxu1 %v3086_v6 }
 0xb8b   :  { %3583 = vmatprep.mubr.bf16.mxu1 %v3091_v19 }
 0xb92   :  { %3584 = vmatmul.mubr.bf16.gmra.mrb[76].mxu1 %v3090_v29 }
 0xc5d   :  { %v3575_v47 = vpop.f32.mrb[72].mxu1 }
 0xc5e   :  { %v9018_v46 = vadd.f32 %v3575_v47, %v3161_v16  ;;  %v3577_v36 = vpop.f32.mrb[73].mxu1  ;;  %v9546_v47 = vld [vmem:[#allocation6 + $0x130] ss:$24 sps:$4 sm:$0xff]  }
 0xc5f   :  { %v9019_v2 = vadd.f32 %v3577_v36, %v3165_v39  ;;  %v3579_v27 = vpop.f32.mrb[74].mxu1  ;;  %v9554_v36 = vld [vmem:[#allocation6 + $0x164] ss:$24 sps:$4 sm:$0xff]  }
 0xc60   :  { %v11472_v43 = vadd.f32 %v9018_v46, %v11306_v40  ;;  %v9020_v33 = vadd.f32 %v3579_v27, %v3161_v16  ;;  %v3581_v38 = vpop.f32.mrb[75].mxu1  ;;  %v9551_v46 = vld [vmem:[#allocation6 + $0x154] ss:$24 sps:$4 sm:$0xff]   ;;  %v9552_v27 = vld [vmem:[#allocation6 + $0x160] ss:$24 sps:$4 sm:$0xff]  }
 0xc61   :  { %v11475_v28 = vadd.f32 %v9019_v2, %v11302_v52  ;;  %v9021_v22 = vadd.f32 %v3581_v38, %v3165_v39  ;;  %v9549_v2 = vld [vmem:[#allocation6 + $0x150] ss:$24 sps:$4 sm:$0xff]   ;;  %v9560_v38 = vld [vmem:[#allocation6 + $0x194] ss:$24 sps:$4 sm:$0xff]  }
 0xc62   :  { %v11478_v6 = vadd.f32 %v9020_v33, %v11308_v42  ;;  %v9557_v33 = vld [vmem:[#allocation6 + $0x184] ss:$24 sps:$4 sm:$0xff]  }
 0xc63   :  { %v11481_v30 = vadd.f32 %v9021_v22, %v11304_v44  ;;  %v3604_v17 = vadd.f32 %v11475_v28, %v11472_v43  ;;  %v9555_v22 = vld [vmem:[#allocation6 + $0x180] ss:$24 sps:$4 sm:$0xff]  }
 0xc65   :  { %v3585_v35 = vpop.f32.mrb[76].mxu1  ;;  %3605 = vadd.xlane.f32.xlu0 %v3604_v17  ;;  %v3607_v40 = vadd.f32 %v11481_v30, %v11478_v6  ;;  %v9558_v17 = vld [vmem:[#allocation6 + $0x190] ss:$24 sps:$4 sm:$0xff]  }
 0xc66   :  { %v9022_v3 = vadd.f32 %v3585_v35, %v3161_v16  ;;  %v3587_v18 = vpop.f32.mrb[77].mxu1  ;;  %v9563_v35 = vld [vmem:[#allocation6 + $0x1b4] ss:$24 sps:$4 sm:$0xff]  }
 0xc67   :  { %v9023_v19 = vadd.f32 %v3587_v18, %v3165_v39  ;;  %v3589_v52 = vpop.f32.mrb[78].mxu1  ;;  %3608 = vadd.xlane.f32.xlu1 %v3607_v40  ;;  %v9566_v40 = vld [vmem:[#allocation6 + $0x1c4] ss:$24 sps:$4 sm:$0xff]   ;;  %v9564_v18 = vld [vmem:[#allocation6 + $0x1c0] ss:$24 sps:$4 sm:$0xff]  }
 0xc68   :  { %v11488_v50 = vadd.f32 %v9022_v3, %v11322_v55  ;;  %v9024_v42 = vadd.f32 %v3589_v52, %v3161_v16  ;;  %v3591_v24 = vpop.f32.mrb[79].mxu1  ;;  %v9548_v16 = vld [vmem:[#allocation6 + $0x134] ss:$24 sps:$4 sm:$0xff]   ;;  %v9561_v3 = vld [vmem:[#allocation6 + $0x1b0] ss:$24 sps:$4 sm:$0xff]  }
 0xc69   :  { %v11491_v44 = vadd.f32 %v9023_v19, %v11318_v56  ;;  %v9025_v51 = vadd.f32 %v3591_v24, %v3165_v39  ;;  %v9512_v56 = vld [vmem:[#allocation6 + $0x14] ss:$24 sps:$4 sm:$0xff]   ;;  %v9543_v39 = vld [vmem:[#allocation6 + $0x120] ss:$24 sps:$4 sm:$0xff]  }
 0xc6a   :  { %v11494_v29 = vadd.f32 %v9024_v42, %v11324_v31  ;;  %4424 = vmatprep.subr.bf16.mxu1 %v9512_v56  ;;  %v9513_v31 = vld [vmem:[#allocation6 + $0x30] ss:$24 sps:$4 sm:$0xff]  }
 0xc6b   :  { %v11497_v15 = vadd.f32 %v9025_v51, %v11320_v8  ;;  %v3610_v60 = vadd.f32 %v11491_v44, %v11488_v50  ;;  %4425 = vmatpush1.bf16.msra.mxu1 %v9510_v0  ;;  %v9516_v8 = vld [vmem:[#allocation6 + $0x40] ss:$24 sps:$4 sm:$0xff]   ;;  %4321 = vmatpush1.bf16.msra.mxu0 %v9513_v31 }
 0xc6c   :  { %4426 = vmatprep.subr.bf16.mxu1 %v9518_v4  ;;  %4322 = vmatprep.subr.bf16.mxu0 %v9521_v58 }
 0xc6d   :  { %3611 = vadd.xlane.f32.xlu0 %v3610_v60  ;;  %v3613_v55 = vadd.f32 %v11497_v15, %v11494_v29 }
 0xc6f   :  { %3614 = vadd.xlane.f32.xlu1 %v3613_v55  ;;  %4427 = vmatpush1.bf16.msra.mxu1 %v9516_v8 }
 0xc70   :  { %4428 = vmatprep.subr.bf16.mxu1 %v9524_v23  ;;  %4323 = vmatpush1.bf16.msra.mxu0 %v9519_v37 }
 0xc71   :  { %4324 = vmatprep.subr.bf16.mxu0 %v9527_v32 }
 0xc73   :  { %4429 = vmatpush1.bf16.msra.mxu1 %v9522_v21 }
 0xc74   :  { %4430 = vmatprep.subr.bf16.mxu1 %v9530_v1  ;;  %4325 = vmatpush1.bf16.msra.mxu0 %v9525_v53 }
 0xc75   :  { %4326 = vmatprep.subr.bf16.mxu0 %v9533_v20  ;;  %v9570_v20 = vld [vmem:[#allocation6 + $0x1f0] ss:$24 sps:$4 sm:$0xff]  }
 0xc77   :  { %4431 = vmatpush1.bf16.msra.mxu1 %v9528_v59  ;;  %v9567_v59 = vld [vmem:[#allocation6 + $0x1e0] ss:$24 sps:$4 sm:$0xff]  }
 0xc78   :  { %4432 = vmatprep.subr.bf16.mxu1 %v9536_v10  ;;  %4327 = vmatpush1.bf16.msra.mxu0 %v9531_v25  ;;  %v9575_v10 = vld [vmem:[#allocation6 + $0x214] ss:$24 sps:$4 sm:$0xff]   ;;  %v9573_v25 = vld [vmem:[#allocation6 + $0x210] ss:$24 sps:$4 sm:$0xff]  }
 0xc79   :  { %4328 = vmatprep.subr.bf16.mxu0 %v9539_v13  ;;  %v9576_v13 = vld [vmem:[#allocation6 + $0x220] ss:$24 sps:$4 sm:$0xff]  }
 0xc7b   :  { %4433 = vmatpush1.bf16.msra.mxu1 %v9534_v41  ;;  %v9578_v41 = vld [vmem:[#allocation6 + $0x224] ss:$24 sps:$4 sm:$0xff]  }
 0xc7c   :  { %4434 = vmatprep.subr.bf16.mxu1 %v9542_v34  ;;  %4329 = vmatpush1.bf16.msra.mxu0 %v9537_v45  ;;  %v9579_v34 = vld [vmem:[#allocation6 + $0x240] ss:$24 sps:$4 sm:$0xff]   ;;  %v9581_v45 = vld [vmem:[#allocation6 + $0x244] ss:$24 sps:$4 sm:$0xff]  }
 0xc7d   :  { %4330 = vmatprep.subr.bf16.mxu0 %v9545_v14  ;;  %v9584_v14 = vld [vmem:[#allocation6 + $0x254] ss:$24 sps:$4 sm:$0xff]  }
 0xc7f   :  { %4435 = vmatpush1.bf16.msra.mxu1 %v9540_v5  ;;  %v9582_v5 = vld [vmem:[#allocation6 + $0x250] ss:$24 sps:$4 sm:$0xff]  }
 0xc80   :  { %4436 = vmatprep.subr.bf16.mxu1 %v9548_v16  ;;  %4331 = vmatpush1.bf16.msra.mxu0 %v9543_v39  ;;  %v9587_v16 = vld [vmem:[#allocation6 + $0x274] ss:$24 sps:$4 sm:$0xff]   ;;  %v9590_v39 = vld [vmem:[#allocation6 + $0x284] ss:$24 sps:$4 sm:$0xff]  }
 0xc81   :  { %4332 = vmatprep.subr.bf16.mxu0 %v9551_v46  ;;  %v9588_v46 = vld [vmem:[#allocation6 + $0x280] ss:$24 sps:$4 sm:$0xff]  }
 0xc83   :  { %4437 = vmatpush1.bf16.msra.mxu1 %v9546_v47  ;;  %v9585_v47 = vld [vmem:[#allocation6 + $0x270] ss:$24 sps:$4 sm:$0xff]  }
 0xc84   :  { %4438 = vmatprep.subr.bf16.mxu1 %v9554_v36  ;;  %4333 = vmatpush1.bf16.msra.mxu0 %v9549_v2  ;;  %v9593_v36 = vld [vmem:[#allocation6 + $0x2a4] ss:$24 sps:$4 sm:$0xff]   ;;  %v9596_v2 = vld [vmem:[#allocation6 + $0x2b4] ss:$24 sps:$4 sm:$0xff]  }
 0xc85   :  { %4334 = vmatprep.subr.bf16.mxu0 %v9557_v33  ;;  %v9594_v33 = vld [vmem:[#allocation6 + $0x2b0] ss:$24 sps:$4 sm:$0xff]  }
 0xc87   :  { %4439 = vmatpush1.bf16.msra.mxu1 %v9552_v27  ;;  %v9591_v27 = vld [vmem:[#allocation6 + $0x2a0] ss:$24 sps:$4 sm:$0xff]  }
 0xc88   :  { %4440 = vmatprep.subr.bf16.mxu1 %v9560_v38  ;;  %4335 = vmatpush1.bf16.msra.mxu0 %v9555_v22  ;;  %v9599_v38 = vld [vmem:[#allocation6 + $0x2d4] ss:$24 sps:$4 sm:$0xff]   ;;  %v9602_v22 = vld [vmem:[#allocation6 + $0x2e4] ss:$24 sps:$4 sm:$0xff]  }
 0xc89   :  { %4336 = vmatprep.subr.bf16.mxu0 %v9563_v35  ;;  %v9600_v35 = vld [vmem:[#allocation6 + $0x2e0] ss:$24 sps:$4 sm:$0xff]  }
 0xc8b   :  { %4441 = vmatpush1.bf16.msra.mxu1 %v9558_v17  ;;  %v9597_v17 = vld [vmem:[#allocation6 + $0x2d0] ss:$24 sps:$4 sm:$0xff]  }
 0xc8c   :  { %4442 = vmatprep.subr.bf16.mxu1 %v9566_v40  ;;  %4337 = vmatpush1.bf16.msra.mxu0 %v9561_v3  ;;  %v9605_v40 = vld [vmem:[#allocation6 + $0xc] ss:$24 sps:$4 sm:$0xff]  }
 0xc8f   :  { %4443 = vmatpush1.bf16.msra.mxu1 %v9564_v18 }
 0xcf2   :  { %v3606_v19 = vpop.xlane.xlu0 %3605 }
 0xcf3   :  { %v3616_v52 = vmul.f32 0.00390625, %v3606_v19 }
 0xcf4   :  { %v3609_v42 = vpop.xlane.xlu1 %3608 }
 0xcf5   :  { %v11504_v24 = vsub.f32 %v11472_v43, %v3616_v52  ;;  %v11507_v51 = vsub.f32 %v11475_v28, %v3616_v52  ;;  %v3617_v60 = vmul.f32 0.00390625, %v3609_v42 }
 0xcf7   :  { %v11510_v55 = vsub.f32 %v11478_v6, %v3617_v60  ;;  %v11513_v63 = vsub.f32 %v11481_v30, %v3617_v60  ;;  %v3628_v7 = vmul.f32 %v11504_v24, %v11504_v24  ;;  %v3629_v0 = vmul.f32 %v11507_v51, %v11507_v51 }
 0xcf9   :  { %v3636_v56 = vadd.f32 %v3629_v0, %v3628_v7  ;;  %v3630_v43 = vmul.f32 %v11510_v55, %v11510_v55  ;;  %v3631_v28 = vmul.f32 %v11513_v63, %v11513_v63 }
 0xcfa   :  { %v3612_v9 = vpop.xlane.xlu0 %3611 }
 0xcfb   :  { %v3618_v4 = vmul.f32 0.00390625, %v3612_v9  ;;  %3637 = vadd.xlane.f32.xlu0 %v3636_v56  ;;  %v3639_v6 = vadd.f32 %v3631_v28, %v3630_v43  ;;  %v3602_v43 = vld [vmem:[%s12192_s3] sm:$0x3] }
 0xcfc   :  { %v3615_v31 = vpop.xlane.xlu1 %3614 }
 0xcfd   :  { %v11524_v30 = vsub.f32 %v11488_v50, %v3618_v4  ;;  %v11527_v8 = vsub.f32 %v11491_v44, %v3618_v4  ;;  %v3619_v58 = vmul.f32 0.00390625, %v3615_v31  ;;  %3640 = vadd.xlane.f32.xlu1 %v3639_v6  ;;  %v3672_v6 = vrot.slane %v3602_v43, %v10877_v62  ;;  %v3603_v31 = vld [vmem:[%s12193_s19] sm:$0x3] }
 0xcff   :  { %v11530_v23 = vsub.f32 %v11494_v29, %v3619_v58  ;;  %v11533_v37 = vsub.f32 %v11497_v15, %v3619_v58  ;;  %v3632_v21 = vmul.f32 %v11524_v30, %v11524_v30  ;;  %v3633_v32 = vmul.f32 %v11527_v8, %v11527_v8  ;;  %v9569_v29 = vld [vmem:[#allocation6 + $0x1e4] ss:$24 sps:$4 sm:$0xff]   ;;  %v9572_v15 = vld [vmem:[#allocation6 + $0x1f4] ss:$24 sps:$4 sm:$0xff]  }
 0xd00   :  { %4338 = vmatprep.subr.bf16.mxu0 %v9569_v29  ;;  %4444 = vmatprep.subr.bf16.mxu1 %v9572_v15  ;;  %v3676_v58 = vrot.slane %v3602_v43, %v10874_v61  ;;  %v9624_v43 = vld [vmem:[#allocation6 + $0x158] ss:$24 sps:$4 sm:$0xff]  }
 0xd01   :  { %v3642_v1 = vadd.f32 %v3633_v32, %v3632_v21  ;;  %v3634_v50 = vmul.f32 %v11530_v23, %v11530_v23  ;;  %v3635_v44 = vmul.f32 %v11533_v37, %v11533_v37  ;;  %4339 = vmatpush1.bf16.msra.mxu0 %v9567_v59  ;;  %4445 = vmatpush1.bf16.msra.mxu1 %v9570_v20 }
 0xd02   :  { %4340 = vmatprep.subr.bf16.mxu0 %v9575_v10  ;;  %4446 = vmatprep.subr.bf16.mxu1 %v9578_v41 }
 0xd03   :  { %3643 = vadd.xlane.f32.xlu0 %v3642_v1  ;;  %v3645_v53 = vadd.f32 %v3635_v44, %v3634_v50  ;;  %v3691_v44 = vrot.slane %v3603_v31, %v10877_v62 }
 0xd05   :  { %3646 = vadd.xlane.f32.xlu1 %v3645_v53  ;;  %4341 = vmatpush1.bf16.msra.mxu0 %v9573_v25  ;;  %v3695_v53 = vrot.slane %v3603_v31, %v10874_v61  ;;  %v9635_v31 = vld [vmem:[#allocation6 + $0x1ec] ss:$24 sps:$4 sm:$0xff]  }
 0xd06   :  { %4447 = vmatpush1.bf16.msra.mxu1 %v9576_v13  ;;  %4342 = vmatprep.subr.bf16.mxu0 %v9581_v45 }
 0xd07   :  { %4448 = vmatprep.subr.bf16.mxu1 %v9584_v14 }
 0xd09   :  { %4343 = vmatpush1.bf16.msra.mxu0 %v9579_v34 }
 0xd0a   :  { %4449 = vmatpush1.bf16.msra.mxu1 %v9582_v5  ;;  %4344 = vmatprep.subr.bf16.mxu0 %v9587_v16  ;;  %v9603_v5 = vld [vmem:[#allocation6 + $0x8] ss:$24 sps:$4 sm:$0xff]  }
 0xd0b   :  { %4450 = vmatprep.subr.bf16.mxu1 %v9590_v39  ;;  %v9608_v39 = vld [vmem:[#allocation6 + $0x3c] ss:$24 sps:$4 sm:$0xff]  }
 0xd0d   :  { %4345 = vmatpush1.bf16.msra.mxu0 %v9585_v47 }
 0xd0e   :  { %4451 = vmatpush1.bf16.msra.mxu1 %v9588_v46  ;;  %4346 = vmatprep.subr.bf16.mxu0 %v9593_v36 }
 0xd0f   :  { %4452 = vmatprep.subr.bf16.mxu1 %v9596_v2 }
 0xd11   :  { %4347 = vmatpush1.bf16.msra.mxu0 %v9591_v27  ;;  %v9606_v27 = vld [vmem:[#allocation6 + $0x38] ss:$24 sps:$4 sm:$0xff]  }
 0xd12   :  { %4453 = vmatpush1.bf16.msra.mxu1 %v9594_v33  ;;  %4348 = vmatprep.subr.bf16.mxu0 %v9599_v38 }
 0xd13   :  { %4454 = vmatprep.subr.bf16.mxu1 %v9602_v22 }
 0xd15   :  { %4349 = vmatpush1.bf16.msra.mxu0 %v9597_v17 }
 0xd16   :  { %4455 = vmatpush1.bf16.msra.mxu1 %v9600_v35  ;;  %4371 = vmatprep.subr.bf16.mxu0 %v9605_v40  ;;  %v9609_v35 = vld [vmem:[#allocation6 + $0x68] ss:$24 sps:$4 sm:$0xff]  }
 0xd17   :  { %8928 = vmatprep.subr.bf16.mxu1 %v10469_v11 }
 0xd88   :  { %v3638_v3 = vpop.xlane.xlu0 %3637 }
 0xd89   :  { %v3648_v18 = vmul.f32 0.00390625, %v3638_v3  ;;  %v9614_v3 = vld [vmem:[#allocation6 + $0x9c] ss:$24 sps:$4 sm:$0xff]  }
 0xd8a   :  { %v3641_v19 = vpop.xlane.xlu1 %3640 }
 0xd8b   :  { %v3652_v52 = vadd.f32 1e-12, %v3648_v18  ;;  %v3649_v42 = vmul.f32 0.00390625, %v3641_v19  ;;  %v9612_v18 = vld [vmem:[#allocation6 + $0x98] ss:$24 sps:$4 sm:$0xff]  }
 0xd8c   :  { %v9617_v19 = vld [vmem:[#allocation6 + $0xcc] ss:$24 sps:$4 sm:$0xff]  }
 0xd8d   :  { %10131 = vrsqrt.f32 %v3652_v52  ;;  %v3653_v60 = vadd.f32 1e-12, %v3649_v42  ;;  %v9615_v52 = vld [vmem:[#allocation6 + $0xc8] ss:$24 sps:$4 sm:$0xff]   ;;  %v9620_v42 = vld [vmem:[#allocation6 + $0xfc] ss:$24 sps:$4 sm:$0xff]  }
 0xd8f   :  { %10133 = vrsqrt.f32 %v3653_v60  ;;  %v9618_v60 = vld [vmem:[#allocation6 + $0xf8] ss:$24 sps:$4 sm:$0xff]  }
 0xd90   :  { %v3644_v7 = vpop.xlane.xlu0 %3643 }
 0xd91   :  { %v3650_v0 = vmul.f32 0.00390625, %v3644_v7  ;;  %v9623_v7 = vld [vmem:[#allocation6 + $0x12c] ss:$24 sps:$4 sm:$0xff]  }
 0xd92   :  { %v3647_v56 = vpop.xlane.xlu1 %3646 }
 0xd93   :  { %v3654_v28 = vadd.f32 1e-12, %v3650_v0  ;;  %v3651_v9 = vmul.f32 0.00390625, %v3647_v56  ;;  %v9621_v0 = vld [vmem:[#allocation6 + $0x128] ss:$24 sps:$4 sm:$0xff]  }
 0xd94   :  { %v9626_v56 = vld [vmem:[#allocation6 + $0x15c] ss:$24 sps:$4 sm:$0xff]  }
 0xd95   :  { %10135 = vrsqrt.f32 %v3654_v28  ;;  %v3655_v4 = vadd.f32 1e-12, %v3651_v9  ;;  %v9629_v28 = vld [vmem:[#allocation6 + $0x18c] ss:$24 sps:$4 sm:$0xff]   ;;  %v9627_v9 = vld [vmem:[#allocation6 + $0x188] ss:$24 sps:$4 sm:$0xff]  }
 0xd97   :  { %v10132_v21 = vpop.eup %10131  ;;  %10137 = vrsqrt.f32 %v3655_v4  ;;  %v9632_v4 = vld [vmem:[#allocation6 + $0x1bc] ss:$24 sps:$4 sm:$0xff]  }
 0xd98   :  { %v3660_v32 = vmul.f32 %v10132_v21, %v11504_v24  ;;  %v3661_v1 = vmul.f32 %v10132_v21, %v11507_v51  ;;  %v9638_v21 = vld [vmem:[#allocation6 + $0x21c] ss:$24 sps:$4 sm:$0xff]  }
 0xd99   :  { %v10134_v50 = vpop.eup %10133 }
 0xd9a   :  { %v3679_v29 = vmul.f32 %v3672_v6, %v3660_v32  ;;  %v3662_v59 = vmul.f32 %v10134_v50, %v11510_v55  ;;  %v3663_v15 = vmul.f32 %v10134_v50, %v11513_v63  ;;  %v3680_v20 = vmul.f32 %v3676_v58, %v3661_v1  ;;  %v9636_v32 = vld [vmem:[#allocation6 + $0x218] ss:$24 sps:$4 sm:$0xff]   ;;  %v9641_v1 = vld [vmem:[#allocation6 + $0x24c] ss:$24 sps:$4 sm:$0xff]   ;;  %v9639_v50 = vld [vmem:[#allocation6 + $0x248] ss:$24 sps:$4 sm:$0xff]  }
 0xd9c   :  { %v3681_v10 = vmul.f32 %v3672_v6, %v3662_v59  ;;  %v3682_v25 = vmul.f32 %v3676_v58, %v3663_v15  ;;  %v11554_v41 = vadd.f32 %v3695_v53, %v3680_v20  ;;  %v11558_v24 = vadd.f32 %v3691_v44, %v3679_v29  ;;  %v9647_v29 = vld [vmem:[#allocation6 + $0x2ac] ss:$24 sps:$4 sm:$0xff]   ;;  %v9645_v59 = vld [vmem:[#allocation6 + $0x2a8] ss:$24 sps:$4 sm:$0xff]   ;;  %v9650_v15 = vld [vmem:[#allocation6 + $0x2dc] ss:$24 sps:$4 sm:$0xff]  }
 0xd9d   :  { %v9648_v20 = vld [vmem:[#allocation6 + $0x2d8] ss:$24 sps:$4 sm:$0xff]  }
 0xd9e   :  { %v11556_v13 = vadd.f32 %v3695_v53, %v3682_v25  ;;  %v11560_v51 = vadd.f32 %v3691_v44, %v3681_v10 }
 0xd9f   :  { %v10136_v34 = vpop.eup %10135 }
 0xda0   :  { %v3707_v45 = vpack.c.bf16 %v11556_v13, %v11554_v41  ;;  %v11566_v55 = vpack.c.bf16 %v11560_v51, %v11558_v24  ;;  %v3665_v63 = vmul.f32 %v10136_v34, %v11527_v8  ;;  %v3664_v14 = vmul.f32 %v10136_v34, %v11524_v30  ;;  %v9611_v30 = vld [vmem:[#allocation6 + $0x6c] ss:$24 sps:$4 sm:$0xff]  }
 0xda1   :  { %v10138_v16 = vpop.eup %10137 }
 0xda2   :  { %4350 = vmatprep.mubr.bf16.mxu0 %v3707_v45  ;;  %4456 = vmatprep.mubr.bf16.mxu1 %v3707_v45  ;;  %v3667_v47 = vmul.f32 %v10138_v16, %v11533_v37  ;;  %v3684_v46 = vmul.f32 %v3676_v58, %v3665_v63  ;;  %v3666_v36 = vmul.f32 %v10138_v16, %v11530_v23 }
 0xda3   :  { %4351 = vmatmul.mubr.bf16.vlgmr.msra.gmra.mrb[40].mxu0 %v11566_v55  ;;  %4457 = vmatmul.mubr.bf16.vlgmr.msra.gmra.mrb[80].mxu1 %v11566_v55  ;;  %v3683_v2 = vmul.f32 %v3672_v6, %v3664_v14 }
 0xda4   :  { %4372 = vmatpush1.bf16.msra.mxu0 %v9603_v5  ;;  %v3686_v33 = vmul.f32 %v3676_v58, %v3667_v47  ;;  %v3685_v8 = vmul.f32 %v3672_v6, %v3666_v36  ;;  %v11574_v38 = vadd.f32 %v3695_v53, %v3684_v46  ;;  %v9630_v6 = vld [vmem:[#allocation6 + $0x1b8] ss:$24 sps:$4 sm:$0xff]   ;;  %v9633_v58 = vld [vmem:[#allocation6 + $0x1e8] ss:$24 sps:$4 sm:$0xff]  }
 0xda5   :  { %4373 = vmatprep.subr.bf16.mxu0 %v9608_v39  ;;  %v11578_v17 = vadd.f32 %v3691_v44, %v3683_v2 }
 0xda6   :  { %v11576_v22 = vadd.f32 %v3695_v53, %v3686_v33  ;;  %v11580_v37 = vadd.f32 %v3691_v44, %v3685_v8  ;;  %v9644_v44 = vld [vmem:[#allocation6 + $0x27c] ss:$24 sps:$4 sm:$0xff]   ;;  %v9642_v53 = vld [vmem:[#allocation6 + $0x278] ss:$24 sps:$4 sm:$0xff]  }
 0xda8   :  { %4374 = vmatpush1.bf16.msra.mxu0 %v9606_v27  ;;  %v11584_v23 = vpack.c.bf16 %v11576_v22, %v11574_v38  ;;  %v11588_v40 = vpack.c.bf16 %v11580_v37, %v11578_v17 }
 0xda9   :  { %4375 = vmatprep.subr.bf16.mxu0 %v9611_v30 }
 0xdaa   :  { %4360 = vmatprep.mubr.bf16.mxu0 %v11584_v23  ;;  %4466 = vmatprep.mubr.bf16.mxu1 %v11584_v23 }
 0xdab   :  { %4361 = vmatmul.mubr.bf16.gmra.mrb[44].mxu0 %v11588_v40  ;;  %4467 = vmatmul.mubr.bf16.gmra.mrb[84].mxu1 %v11588_v40 }
 0xdac   :  { %4376 = vmatpush1.bf16.msra.mxu0 %v9609_v35  ;;  %4403 = vmatprep.mubr.bf16.mxu0 %v3707_v45 }
 0xdad   :  { %4377 = vmatprep.subr.bf16.mxu0 %v9614_v3  ;;  %8930 = vmatprep.mubr.msk.bf16.mxu1 %vm10470_vm0, %v10469_v11 }
 0xdb0   :  { %4378 = vmatpush1.bf16.msra.mxu0 %v9612_v18 }
 0xdb1   :  { %4379 = vmatprep.subr.bf16.mxu0 %v9617_v19 }
 0xdb4   :  { %4380 = vmatpush1.bf16.msra.mxu0 %v9615_v52 }
 0xdb5   :  { %4381 = vmatprep.subr.bf16.mxu0 %v9620_v42 }
 0xdb8   :  { %4382 = vmatpush1.bf16.msra.mxu0 %v9618_v60 }
 0xdb9   :  { %4383 = vmatprep.subr.bf16.mxu0 %v9623_v7 }
 0xdbc   :  { %4384 = vmatpush1.bf16.msra.mxu0 %v9621_v0 }
 0xdbd   :  { %4385 = vmatprep.subr.bf16.mxu0 %v9626_v56 }
 0xdc0   :  { %4386 = vmatpush1.bf16.msra.mxu0 %v9624_v43 }
 0xdc1   :  { %4387 = vmatprep.subr.bf16.mxu0 %v9629_v28 }
 0xdc4   :  { %4388 = vmatpush1.bf16.msra.mxu0 %v9627_v9 }
 0xdc5   :  { %4389 = vmatprep.subr.bf16.mxu0 %v9632_v4 }
 0xdc8   :  { %4390 = vmatpush1.bf16.msra.mxu0 %v9630_v6 }
 0xdc9   :  { %4391 = vmatprep.subr.bf16.mxu0 %v9635_v31 }
 0xdcc   :  { %4392 = vmatpush1.bf16.msra.mxu0 %v9633_v58 }
 0xdcd   :  { %4393 = vmatprep.subr.bf16.mxu0 %v9638_v21 }
 0xdd0   :  { %4394 = vmatpush1.bf16.msra.mxu0 %v9636_v32 }
 0xdd1   :  { %4395 = vmatprep.subr.bf16.mxu0 %v9641_v1 }
 0xdd4   :  { %4396 = vmatpush1.bf16.msra.mxu0 %v9639_v50 }
 0xdd5   :  { %4397 = vmatprep.subr.bf16.mxu0 %v9644_v44 }
 0xdd8   :  { %4398 = vmatpush1.bf16.msra.mxu0 %v9642_v53 }
 0xdd9   :  { %4399 = vmatprep.subr.bf16.mxu0 %v9647_v29 }
 0xddc   :  { %4400 = vmatpush1.bf16.msra.mxu0 %v9645_v59 }
 0xddd   :  { %4401 = vmatprep.subr.bf16.mxu0 %v9650_v15 }
 0xde0   :  { %4402 = vmatpush1.bf16.msra.mxu0 %v9648_v20 }
 0xde1   :  { %8922 = vmatprep.subr.bf16.mxu0 %v10469_v11 }
 0xde3   :  { %4404 = vmatmul.mubr.bf16.vlgmr.msra.gmra.mrb[48].mxu0 %v11566_v55  ;;  %v11611_v55 = vld [vmem:[%s12194_s26] sm:$0x3f] }
 0xde4   :  { %4413 = vmatprep.mubr.bf16.mxu0 %v11584_v23  ;;  %v3827_v39 = vrot.slane %v11611_v55, %v529_v48  ;;  %v11619_v47 = vrot.slane %v11611_v55, %v533_v49  ;;  %v3811_v52 = vrot.slane %v11611_v55, %v10877_v62 }
 0xdeb   :  { %4414 = vmatmul.mubr.bf16.gmra.mrb[52].mxu0 %v11588_v40  ;;  %v3819_v40 = vrot.slane %v11611_v55, %v10965_v12 }
 0xdec   :  { %8924 = vmatprep.mubr.msk.bf16.mxu0 %vm10470_vm0, %v10469_v11 }
 0xe76   :  { %v4352_v10 = vpop.f32.mrb[40].mxu0  ;;  %v4458_v25 = vpop.f32.mrb[80].mxu1 }
 0xe77   :  { %v11602_v34 = vpop.f32.mrb[41].mxu0  ;;  %v11604_v45 = vpop.f32.mrb[81].mxu1  ;;  %v4353_v43 = vadd.f32 %v4352_v10, %v3811_v52  ;;  %v4459_v50 = vadd.f32 %v4458_v25, %v3827_v39 }
 0xe78   :  { %v4356_v5 = vpop.f32.mrb[42].mxu0  ;;  %v4462_v63 = vpop.f32.mrb[82].mxu1 }
 0xe79   :  { %v11606_v14 = vpop.f32.mrb[43].mxu0  ;;  %v11608_v16 = vpop.f32.mrb[83].mxu1  ;;  %v4357_v28 = vadd.f32 %v4356_v5, %v3811_v52  ;;  %v4477_v31 = vpack.c.bf16 %v4353_v43, %v4353_v43  ;;  %v4463_v29 = vadd.f32 %v4462_v63, %v3827_v39  ;;  %v4481_v15 = vpack.c.bf16 %v4459_v50, %v4459_v50 }
 0xe7b   :  { %v4483_v44 = vpack.c.bf16 %v4357_v28, %v4357_v28  ;;  %v4487_v10 = vpack.c.bf16 %v4463_v29, %v4463_v29  ;;  %v4745_v5 = vsel %vm1448_vm1, %v4481_v15, 0  ;;  %v11674_v28 = vld [vmem:[%s10485_s9 + $0x2] ss:$0 sm:$0xff] }
 0xe7d   :  { %v4791_v63 = vsel %vm1448_vm1, %v4487_v10, 0 }
 0xe7e   :  { %v4362_v46 = vpop.f32.mrb[44].mxu0  ;;  %v4468_v36 = vpop.f32.mrb[84].mxu1 }
 0xe7f   :  { %v11621_v2 = vadd.f32 %v4468_v36, %v3827_v39  ;;  %v11623_v27 = vpop.f32.mrb[45].mxu0  ;;  %v4470_v33 = vpop.f32.mrb[85].mxu1  ;;  %v4363_v59 = vadd.f32 %v4362_v46, %v3811_v52  ;;  %v11664_v46 = vld [vmem:[%s10485_s9] ss:$0 sm:$0xff] }
 0xe80   :  { %v11626_v8 = vadd.f32 %v4470_v33, %v11619_v47  ;;  %v4366_v30 = vpop.f32.mrb[46].mxu0  ;;  %v4472_v23 = vpop.f32.mrb[86].mxu1 }
 0xe81   :  { %v11628_v35 = vadd.f32 %v4472_v23, %v3827_v39  ;;  %v11630_v48 = vpop.f32.mrb[47].mxu0  ;;  %v4474_v57 = vpop.f32.mrb[87].mxu1  ;;  %v4367_v20 = vadd.f32 %v4366_v30, %v3811_v52  ;;  %v4489_v25 = vpack.c.bf16 %v4363_v59, %v4363_v59 }
 0xe82   :  { %v11633_v49 = vadd.f32 %v4474_v57, %v11619_v47 }
 0xe83   :  { %v4495_v36 = vpack.c.bf16 %v4367_v20, %v4367_v20 }
 0xeb6   :  { %v4405_v3 = vpop.f32.mrb[48].mxu0 }
 0xeb7   :  { %v4406_v18 = vadd.f32 %v4405_v3, %v3819_v40  ;;  %v11637_v19 = vpop.f32.mrb[49].mxu0 }
 0xeb8   :  { %v4409_v42 = vpop.f32.mrb[50].mxu0 }
 0xeb9   :  { %v4479_v60 = vpack.c.bf16 %v4406_v18, %v4406_v18  ;;  %v4410_v7 = vadd.f32 %v4409_v42, %v3819_v40  ;;  %v11641_v0 = vpop.f32.mrb[51].mxu0 }
 0xebb   :  { %v4485_v56 = vpack.c.bf16 %v4410_v7, %v4410_v7  ;;  %8923 = vmatpush3.bf16.xpose.msra.mxu0 %v4479_v60 }
 0xebc   :  { %8934 = vmatprep.subr.bf16.mxu0 %v10469_v11 }
 0xebd   :  { %8929 = vmatpush3.bf16.xpose.msra.mxu1 %v4485_v56 }
 0xebe   :  { %v4415_v9 = vpop.f32.mrb[52].mxu0  ;;  %8940 = vmatprep.subr.bf16.mxu1 %v10469_v11 }
 0xebf   :  { %v4416_v4 = vadd.f32 %v4415_v9, %v3819_v40  ;;  %v11645_v6 = vpop.f32.mrb[53].mxu0 }
 0xec0   :  { %v4419_v58 = vpop.f32.mrb[54].mxu0 }
 0xec1   :  { %v4491_v21 = vpack.c.bf16 %v4416_v4, %v4416_v4  ;;  %v4420_v32 = vadd.f32 %v4419_v58, %v3819_v40  ;;  %v11647_v1 = vpop.f32.mrb[55].mxu0  ;;  %v11668_v40 = vld [vmem:[%s10485_s9 + $0x1] ss:$0 sm:$0xff] }
 0xec2   :  { %8925 = vmatmul.mubr.bf16.vlgmr.msra.gmra.mrb[56].mxu0 %v4477_v31 }
 0xec3   :  { %v4497_v53 = vpack.c.bf16 %v4420_v32, %v4420_v32  ;;  %8935 = vmatpush3.bf16.xpose.msra.mxu0 %v4491_v21  ;;  %8936 = vmatprep.mubr.msk.bf16.mxu0 %vm10470_vm0, %v10469_v11  ;;  %v11678_v21 = vld [vmem:[%s10485_s9 + $0x3] ss:$0 sm:$0xff]  ;;  %s12195_s9 = sld [smem:[#allocation28_spill]] }
 0xec4   :  { %8931 = vmatmul.mubr.bf16.vlgmr.msra.gmra.mrb[88].mxu1 %v4483_v44  ;;  %8946 = vmatprep.subr.bf16.mxu0 %v10469_v11 }
 0xec5   :  { %8941 = vmatpush3.bf16.xpose.msra.mxu1 %v4497_v53  ;;  %8942 = vmatprep.mubr.msk.bf16.mxu1 %vm10470_vm0, %v10469_v11 }
 0xec6   :  { %8952 = vmatprep.subr.bf16.mxu1 %v10469_v11 }
 0xeca   :  { %8937 = vmatmul.mubr.bf16.vlgmr.msra.gmra.mrb[60].mxu0 %v4489_v25 }
 0xecb   :  { %8947 = vmatpush3.bf16.msra.mxu0 %v4745_v5  ;;  %8948 = vmatprep.mubr.msk.bf16.mxu0 %vm10470_vm0, %v10469_v11 }
 0xecc   :  { %8943 = vmatmul.mubr.bf16.vlgmr.msra.gmra.mrb[92].mxu1 %v4495_v36  ;;  %8958 = vmatprep.subr.bf16.mxu0 %v10469_v11 }
 0xecd   :  { %8953 = vmatpush3.bf16.msra.mxu1 %v4791_v63  ;;  %8954 = vmatprep.mubr.msk.bf16.mxu1 %vm10470_vm0, %v10469_v11 }
 0xece   :  { %8964 = vmatprep.subr.bf16.mxu1 %v10469_v11 }
 0xf95   :  { %v4567_v39 = vpop.f32.mrb[56].mxu0 }
 0xf96   :  { %v4568_v33 = vadd.f32 %v11664_v46, %v4567_v39  ;;  %v8926_v30 = vpop.f32.mrb[57].mxu0 }
 0xf97   :  { %v4570_v23 = vpop.f32.mrb[58].mxu0  ;;  %v4607_v57 = vpop.f32.mrb[88].mxu1 }
 0xf98   :  { %v4608_v3 = vadd.f32 %v11668_v40, %v4607_v57  ;;  %v8927_v18 = vpop.f32.mrb[59].mxu0  ;;  %v8932_v52 = vpop.f32.mrb[89].mxu1  ;;  %v4693_v42 = vsel %vm1396_vm2, %v4568_v33, -inf }
 0xf99   :  { %v4610_v60 = vpop.f32.mrb[90].mxu1  ;;  %4694 = vmax.xlane.f32.xlu0 %v4693_v42 }
 0xf9a   :  { %v8933_v7 = vpop.f32.mrb[91].mxu1  ;;  %v4696_v56 = vsel %vm1396_vm2, %v4608_v3, -inf }
 0xf9b   :  { %4697 = vmax.xlane.f32.xlu1 %v4696_v56 }
 0xf9d   :  { %v4647_v43 = vpop.f32.mrb[60].mxu0 }
 0xf9e   :  { %v4648_v9 = vadd.f32 %v11674_v28, %v4647_v43  ;;  %v8938_v4 = vpop.f32.mrb[61].mxu0 }
 0xf9f   :  { %v4650_v31 = vpop.f32.mrb[62].mxu0  ;;  %v4687_v58 = vpop.f32.mrb[92].mxu1 }
 0xfa0   :  { %v4688_v32 = vadd.f32 %v11678_v21, %v4687_v58  ;;  %v8939_v50 = vpop.f32.mrb[63].mxu0  ;;  %v8944_v44 = vpop.f32.mrb[93].mxu1  ;;  %v4699_v53 = vsel %vm1396_vm2, %v4648_v9, -inf }
 0xfa1   :  { %v4690_v29 = vpop.f32.mrb[94].mxu1  ;;  %4700 = vmax.xlane.f32.xlu0 %v4699_v53  ;;  %v4493_v44 = vpack.c.bf16 %v11621_v2, %v11621_v2 }
 0xfa2   :  { %v8945_v59 = vpop.f32.mrb[95].mxu1  ;;  %v4702_v15 = vsel %vm1396_vm2, %v4688_v32, -inf }
 0xfa3   :  { %4703 = vmax.xlane.f32.xlu1 %v4702_v15  ;;  %v4499_v59 = vpack.c.bf16 %v11628_v35, %v11628_v35 }
 0xfa5   :  { %v4883_v2 = vsel %vm1448_vm1, %v4499_v59, 0 }
0x1026   :  { %v4695_v20 = vpop.xlane.xlu0 %4694 }
0x1027   :  { %v4705_v10 = vsub.f32 %v4568_v33, %v4695_v20 }
0x1028   :  { %v4698_v25 = vpop.xlane.xlu1 %4697 }
0x1029   :  { %v4709_v5 = vmul.f32 1.442695, %v4705_v10  ;;  %v4706_v36 = vsub.f32 %v4608_v3, %v4698_v25  ;;  %v4837_v10 = vsel %vm1448_vm1, %v4493_v44, 0  ;;  %v3823_v25 = vrot.slane %v11611_v55, %v11065_v54 }
0x102b   :  { %10139 = vpow2.f32 %v4709_v5  ;;  %v4711_v63 = vmul.f32 1.442695, %v4706_v36  ;;  %v4408_v36 = vadd.f32 %v11637_v19, %v3823_v25 }
0x102d   :  { %10141 = vpow2.f32 %v4711_v63 }
0x102e   :  { %v4701_v39 = vpop.xlane.xlu0 %4700 }
0x102f   :  { %v4707_v30 = vsub.f32 %v4648_v9, %v4701_v39 }
0x1030   :  { %v4704_v23 = vpop.xlane.xlu1 %4703 }
0x1031   :  { %v4713_v57 = vmul.f32 1.442695, %v4707_v30  ;;  %v4708_v18 = vsub.f32 %v4688_v32, %v4704_v23  ;;  %v4412_v30 = vadd.f32 %v11641_v0, %v3823_v25 }
0x1033   :  { %10143 = vpow2.f32 %v4713_v57  ;;  %v4715_v52 = vmul.f32 1.442695, %v4708_v18  ;;  %v3815_v18 = vrot.slane %v11611_v55, %v10874_v61  ;;  %v4418_v55 = vadd.f32 %v11645_v6, %v3823_v25 }
0x1034   :  { %v4465_v6 = vadd.f32 %v11608_v16, %v11619_v47 }
0x1035   :  { %v10140_v42 = vpop.eup %10139  ;;  %10145 = vpow2.f32 %v4715_v52  ;;  %v4480_v52 = vpack.c.bf16 %v4408_v36, %v4408_v36  ;;  %v4355_v19 = vadd.f32 %v11602_v34, %v3815_v18  ;;  %v4359_v0 = vadd.f32 %v11606_v14, %v3815_v18 }
0x1036   :  { %v4717_v60 = vsel %vm1396_vm2, %v10140_v42, 0.0  ;;  %v4365_v14 = vadd.f32 %v11623_v27, %v3815_v18 }
0x1037   :  { %v10142_v7 = vpop.eup %10141  ;;  %4718 = vadd.xlane.f32.xlu0 %v4717_v60  ;;  %v4486_v60 = vpack.c.bf16 %v4412_v30, %v4412_v30  ;;  %v4484_v34 = vpack.c.bf16 %v4359_v0, %v4359_v0 }
0x1038   :  { %v4720_v33 = vsel %vm1396_vm2, %v10142_v7, 0.0 }
0x1039   :  { %4721 = vadd.xlane.f32.xlu1 %v4720_v33  ;;  %v4478_v33 = vpack.c.bf16 %v4355_v19, %v4355_v19 }
0x103d   :  { %v10144_v3 = vpop.eup %10143 }
0x103e   :  { %v4723_v56 = vsel %vm1396_vm2, %v10144_v3, 0.0 }
0x103f   :  { %v10146_v43 = vpop.eup %10145  ;;  %4724 = vadd.xlane.f32.xlu0 %v4723_v56  ;;  %v4461_v56 = vadd.f32 %v11604_v45, %v11619_v47 }
0x1040   :  { %v4726_v9 = vsel %vm1396_vm2, %v10146_v43, 0.0 }
0x1041   :  { %4727 = vadd.xlane.f32.xlu1 %v4726_v9  ;;  %v4482_v45 = vpack.c.bf16 %v4461_v56, %v4461_v56  ;;  %v4488_v9 = vpack.c.bf16 %v4465_v6, %v4465_v6 }
0x1043   :  { %v5185_v16 = vsel %vm1448_vm1, %v4488_v9, 0 }
0x10c4   :  { %v4719_v4 = vpop.xlane.xlu0 %4718 }
0x10c5   :  { %10147 = vrcp.f32 %v4719_v4  ;;  %v4490_v4 = vpack.c.bf16 %v4365_v14, %v4365_v14 }
0x10c6   :  { %v4722_v31 = vpop.xlane.xlu1 %4721 }
0x10c7   :  { %10149 = vrcp.f32 %v4722_v31  ;;  %v5139_v31 = vsel %vm1448_vm1, %v4482_v45, 0 }
0x10cc   :  { %v4725_v58 = vpop.xlane.xlu0 %4724 }
0x10cd   :  { %10151 = vrcp.f32 %v4725_v58 }
0x10ce   :  { %v4728_v32 = vpop.xlane.xlu1 %4727 }
0x10cf   :  { %v10148_v50 = vpop.eup %10147  ;;  %10153 = vrcp.f32 %v4728_v32 }
0x10d0   :  { %v4733_v53 = vmul.f32 %v10148_v50, %v10140_v42 }
0x10d1   :  { %v10150_v29 = vpop.eup %10149 }
0x10d2   :  { %v4734_v15 = vmul.f32 %v10150_v29, %v10142_v7  ;;  %v4737_v20 = vpack.c.bf16 %v4733_v53, %v4733_v53  ;;  %v4422_v7 = vadd.f32 %v11647_v1, %v3823_v25  ;;  %v4369_v1 = vadd.f32 %v11630_v48, %v3815_v18 }
0x10d4   :  { %8949 = vmatmul.mubr.msk.bf16.vlgmr.msra.gmra.mrb[64].mxu0 %vm1396_vm2, %v4737_v20  ;;  %v4738_v5 = vpack.c.bf16 %v4734_v15, %v4734_v15  ;;  %v4496_v58 = vpack.c.bf16 %v4369_v1, %v4369_v1 }
0x10d5   :  { %8959 = vmatpush3.bf16.msra.mxu0 %v4837_v10  ;;  %8960 = vmatprep.mubr.msk.bf16.mxu0 %vm10470_vm0, %v10469_v11 }
0x10d6   :  { %8955 = vmatmul.mubr.msk.bf16.vlgmr.msra.gmra.mrb[96].mxu1 %vm1396_vm2, %v4738_v5  ;;  %8970 = vmatprep.subr.bf16.mxu0 %v10469_v11 }
0x10d7   :  { %v10152_v35 = vpop.eup %10151  ;;  %8965 = vmatpush3.bf16.msra.mxu1 %v4883_v2  ;;  %8966 = vmatprep.mubr.msk.bf16.mxu1 %vm10470_vm0, %v10469_v11 }
0x10d8   :  { %v4735_v63 = vmul.f32 %v10152_v35, %v10144_v3  ;;  %8976 = vmatprep.subr.bf16.mxu1 %v10469_v11  ;;  %v4492_v3 = vpack.c.bf16 %v4418_v55, %v4418_v55 }
0x10d9   :  { %v10154_v39 = vpop.eup %10153 }
0x10da   :  { %v4736_v23 = vmul.f32 %v10154_v39, %v10146_v43  ;;  %v4739_v57 = vpack.c.bf16 %v4735_v63, %v4735_v63  ;;  %v4498_v43 = vpack.c.bf16 %v4422_v7, %v4422_v7 }
0x10dc   :  { %8961 = vmatmul.mubr.msk.bf16.vlgmr.msra.gmra.mrb[68].mxu0 %vm1396_vm2, %v4739_v57  ;;  %v4740_v42 = vpack.c.bf16 %v4736_v23, %v4736_v23 }
0x10dd   :  { %8972 = vmatprep.mubr.msk.bf16.mxu0 %vm10470_vm0, %v10469_v11 }
0x10de   :  { %8971 = vmatpush3.bf16.xpose.msra.mxu0 %v4480_v52  ;;  %8967 = vmatmul.mubr.msk.bf16.vlgmr.msra.gmra.mrb[100].mxu1 %vm1396_vm2, %v4740_v42 }
0x10df   :  { %8982 = vmatprep.subr.bf16.mxu0 %v10469_v11  ;;  %8978 = vmatprep.mubr.msk.bf16.mxu1 %vm10470_vm0, %v10469_v11 }
0x10e0   :  { %8977 = vmatpush3.bf16.xpose.msra.mxu1 %v4486_v60 }
0x10e1   :  { %8988 = vmatprep.subr.bf16.mxu1 %v10469_v11 }
0x10e5   :  { %8973 = vmatmul.mubr.bf16.vlgmr.msra.gmra.mrb[72].mxu0 %v4478_v33 }
0x10e6   :  { %8983 = vmatpush3.bf16.xpose.msra.mxu0 %v4492_v3  ;;  %8984 = vmatprep.mubr.msk.bf16.mxu0 %vm10470_vm0, %v10469_v11 }
0x10e7   :  { %8979 = vmatmul.mubr.bf16.vlgmr.msra.gmra.mrb[104].mxu1 %v4484_v34  ;;  %8994 = vmatprep.subr.bf16.mxu0 %v10469_v11 }
0x10e8   :  { %8989 = vmatpush3.bf16.xpose.msra.mxu1 %v4498_v43  ;;  %8990 = vmatprep.mubr.msk.bf16.mxu1 %vm10470_vm0, %v10469_v11 }
0x10e9   :  { %9000 = vmatprep.subr.bf16.mxu1 %v10469_v11 }
0x10ed   :  { %8985 = vmatmul.mubr.bf16.vlgmr.msra.gmra.mrb[76].mxu0 %v4490_v4 }
0x10ee   :  { %8995 = vmatpush3.bf16.msra.mxu0 %v5139_v31  ;;  %8996 = vmatprep.mubr.msk.bf16.mxu0 %vm10470_vm0, %v10469_v11 }
0x10ef   :  { %8991 = vmatmul.mubr.bf16.vlgmr.msra.gmra.mrb[108].mxu1 %v4496_v58  ;;  %9006 = vmatprep.subr.bf16.mxu0 %v10469_v11 }
0x10f0   :  { %9001 = vmatpush3.bf16.msra.mxu1 %v5185_v16  ;;  %9002 = vmatprep.mubr.msk.bf16.mxu1 %vm10470_vm0, %v10469_v11 }
0x10f1   :  { %9012 = vmatprep.subr.bf16.mxu1 %v10469_v11 }
0x11a7   :  { %v11739_v47 = vpop.f32.mrb[64].mxu0 }
0x11a8   :  { %v8950_v27 = vpop.f32.mrb[65].mxu0 }
0x11a9   :  { %v4784_v48 = vpop.f32.mrb[66].mxu0  ;;  %v11741_v32 = vpop.f32.mrb[96].mxu1 }
0x11aa   :  { %v4925_v50 = vpack.c.bf16 %v11741_v32, %v11739_v47  ;;  %v8951_v44 = vpop.f32.mrb[67].mxu0  ;;  %v8956_v53 = vpop.f32.mrb[97].mxu1 }
0x11ab   :  { %v4830_v29 = vpop.f32.mrb[98].mxu1 }
0x11ac   :  { %v8957_v59 = vpop.f32.mrb[99].mxu1 }
0x11af   :  { %v11745_v15 = vpop.f32.mrb[68].mxu0 }
0x11b0   :  { %v8962_v20 = vpop.f32.mrb[69].mxu0 }
0x11b1   :  { %v4876_v10 = vpop.f32.mrb[70].mxu0  ;;  %v11747_v25 = vpop.f32.mrb[100].mxu1 }
0x11b2   :  { %v4926_v5 = vpack.c.bf16 %v11747_v25, %v11745_v15  ;;  %v8963_v2 = vpop.f32.mrb[71].mxu0  ;;  %v8968_v35 = vpop.f32.mrb[101].mxu1 }
0x11b3   :  { %v4922_v36 = vpop.f32.mrb[102].mxu1 }
0x11b4   :  { %v8969_v63 = vpop.f32.mrb[103].mxu1 }
0x11b8   :  { %v4961_v39 = vpop.f32.mrb[72].mxu0 }
0x11b9   :  { %v4962_v30 = vadd.f32 %v11664_v46, %v4961_v39  ;;  %v8974_v23 = vpop.f32.mrb[73].mxu0 }
0x11ba   :  { %v4964_v57 = vpop.f32.mrb[74].mxu0  ;;  %v5001_v18 = vpop.f32.mrb[104].mxu1 }
0x11bb   :  { %v5002_v52 = vadd.f32 %v11668_v40, %v5001_v18  ;;  %v8975_v42 = vpop.f32.mrb[75].mxu0  ;;  %v8980_v60 = vpop.f32.mrb[105].mxu1  ;;  %v5087_v19 = vsel %vm1396_vm2, %v4962_v30, -inf }
0x11bc   :  { %v5004_v55 = vpop.f32.mrb[106].mxu1  ;;  %5088 = vmax.xlane.f32.xlu0 %v5087_v19  ;;  %v4494_v60 = vpack.c.bf16 %v11626_v8, %v11626_v8 }
0x11bd   :  { %v8981_v0 = vpop.f32.mrb[107].mxu1  ;;  %v5090_v7 = vsel %vm1396_vm2, %v5002_v52, -inf }
0x11be   :  { %5091 = vmax.xlane.f32.xlu1 %v5090_v7  ;;  %v4500_v0 = vpack.c.bf16 %v11633_v49, %v11633_v49 }
0x11c0   :  { %v5041_v33 = vpop.f32.mrb[76].mxu0 }
0x11c1   :  { %v5042_v3 = vadd.f32 %v11674_v28, %v5041_v33  ;;  %v8986_v56 = vpop.f32.mrb[77].mxu0 }
0x11c2   :  { %v5044_v46 = vpop.f32.mrb[78].mxu0  ;;  %v5081_v34 = vpop.f32.mrb[108].mxu1  ;;  %v5231_v56 = vsel %vm1448_vm1, %v4494_v60, 0 }
0x11c3   :  { %v5082_v43 = vadd.f32 %v11678_v21, %v5081_v34  ;;  %v8987_v6 = vpop.f32.mrb[79].mxu0  ;;  %v8992_v40 = vpop.f32.mrb[109].mxu1  ;;  %v5093_v14 = vsel %vm1396_vm2, %v5042_v3, -inf  ;;  %v5277_v34 = vsel %vm1448_vm1, %v4500_v0, 0 }
0x11c4   :  { %v5084_v45 = vpop.f32.mrb[110].mxu1  ;;  %5094 = vmax.xlane.f32.xlu0 %v5093_v14  ;;  %v9651_v6 = vld [vmem:[#allocation7 + $0x80] ss:$8 sps:$4 sm:$0xff]  }
0x11c5   :  { %v8993_v1 = vpop.f32.mrb[111].mxu1  ;;  %v5096_v9 = vsel %vm1396_vm2, %v5082_v43, -inf  ;;  %v9656_v45 = vld [vmem:[#allocation7 + $0x94] ss:$8 sps:$4 sm:$0xff]  }
0x11c6   :  { %5097 = vmax.xlane.f32.xlu1 %v5096_v9  ;;  %v9654_v9 = vld [vmem:[#allocation7 + $0x90] ss:$8 sps:$4 sm:$0xff]  }
0x1249   :  { %v5089_v4 = vpop.xlane.xlu0 %5088 }
0x124a   :  { %v5099_v31 = vsub.f32 %v4962_v30, %v5089_v4  ;;  %v9659_v4 = vld [vmem:[#allocation7 + $0xa4] ss:$8 sps:$4 sm:$0xff]  }
0x124b   :  { %v5092_v58 = vpop.xlane.xlu1 %5091 }
0x124c   :  { %v5103_v16 = vmul.f32 1.442695, %v5099_v31  ;;  %v5100_v28 = vsub.f32 %v5002_v52, %v5092_v58  ;;  %v9657_v31 = vld [vmem:[#allocation7 + $0xa0] ss:$8 sps:$4 sm:$0xff]   ;;  %v9660_v58 = vld [vmem:[#allocation7 + $0xb0] ss:$8 sps:$4 sm:$0xff]  }
0x124e   :  { %10155 = vpow2.f32 %v5103_v16  ;;  %v5105_v27 = vmul.f32 1.442695, %v5100_v28  ;;  %v9665_v16 = vld [vmem:[#allocation7 + $0xc4] ss:$8 sps:$4 sm:$0xff]   ;;  %v9663_v28 = vld [vmem:[#allocation7 + $0xc0] ss:$8 sps:$4 sm:$0xff]  }
0x1250   :  { %10157 = vpow2.f32 %v5105_v27  ;;  %v9668_v27 = vld [vmem:[#allocation7 + $0xd4] ss:$8 sps:$4 sm:$0xff]  }
0x1251   :  { %v5095_v48 = vpop.xlane.xlu0 %5094 }
0x1252   :  { %v5101_v21 = vsub.f32 %v5042_v3, %v5095_v48  ;;  %v9653_v3 = vld [vmem:[#allocation7 + $0x84] ss:$8 sps:$4 sm:$0xff]   ;;  %v9666_v48 = vld [vmem:[#allocation7 + $0xd0] ss:$8 sps:$4 sm:$0xff]  }
0x1253   :  { %v5098_v44 = vpop.xlane.xlu1 %5097 }
0x1254   :  { %v5107_v53 = vmul.f32 1.442695, %v5101_v21  ;;  %v5102_v29 = vsub.f32 %v5082_v43, %v5098_v44  ;;  %v9671_v21 = vld [vmem:[#allocation7 + $0xe4] ss:$8 sps:$4 sm:$0xff]   ;;  %v9669_v44 = vld [vmem:[#allocation7 + $0xe0] ss:$8 sps:$4 sm:$0xff]  }
0x1256   :  { %10159 = vpow2.f32 %v5107_v53  ;;  %v5109_v59 = vmul.f32 1.442695, %v5102_v29  ;;  %v9672_v53 = vld [vmem:[#allocation7 + $0xf0] ss:$8 sps:$4 sm:$0xff]   ;;  %v9674_v29 = vld [vmem:[#allocation7 + $0xf4] ss:$8 sps:$4 sm:$0xff]  }
0x1258   :  { %v10156_v20 = vpop.eup %10155  ;;  %10161 = vpow2.f32 %v5109_v59  ;;  %v9677_v59 = vld [vmem:[#allocation7 + $0x4] ss:$8 sps:$4 sm:$0xff]  }
0x1259   :  { %v5111_v10 = vsel %vm1396_vm2, %v10156_v20, 0.0 }
0x125a   :  { %v10158_v2 = vpop.eup %10157  ;;  %5112 = vadd.xlane.f32.xlu0 %v5111_v10 }
0x125b   :  { %v5114_v35 = vsel %vm1396_vm2, %v10158_v2, 0.0 }
0x125c   :  { %5115 = vadd.xlane.f32.xlu1 %v5114_v35 }
0x1260   :  { %v10160_v36 = vpop.eup %10159 }
0x1261   :  { %v5117_v63 = vsel %vm1396_vm2, %v10160_v36, 0.0 }
0x1262   :  { %v10162_v39 = vpop.eup %10161  ;;  %5118 = vadd.xlane.f32.xlu0 %v5117_v63 }
0x1263   :  { %v5120_v30 = vsel %vm1396_vm2, %v10162_v39, 0.0 }
0x1264   :  { %5121 = vadd.xlane.f32.xlu1 %v5120_v30 }
0x12e7   :  { %v5113_v23 = vpop.xlane.xlu0 %5112 }
0x12e8   :  { %10163 = vrcp.f32 %v5113_v23  ;;  %v9680_v23 = vld [vmem:[#allocation7 + $0x14] ss:$8 sps:$4 sm:$0xff]  }
0x12e9   :  { %v5116_v57 = vpop.xlane.xlu1 %5115 }
0x12ea   :  { %10165 = vrcp.f32 %v5116_v57 }
0x12ef   :  { %v5119_v18 = vpop.xlane.xlu0 %5118 }
0x12f0   :  { %10167 = vrcp.f32 %v5119_v18 }
0x12f1   :  { %v5122_v52 = vpop.xlane.xlu1 %5121 }
0x12f2   :  { %v10164_v42 = vpop.eup %10163  ;;  %10169 = vrcp.f32 %v5122_v52  ;;  %v9678_v52 = vld [vmem:[#allocation7 + $0x10] ss:$8 sps:$4 sm:$0xff]  }
0x12f3   :  { %v5127_v19 = vmul.f32 %v10164_v42, %v10156_v20  ;;  %v9683_v42 = vld [vmem:[#allocation7 + $0x24] ss:$8 sps:$4 sm:$0xff]  }
0x12f4   :  { %v10166_v55 = vpop.eup %10165 }
0x12f5   :  { %v5128_v7 = vmul.f32 %v10166_v55, %v10158_v2  ;;  %v5131_v33 = vpack.c.bf16 %v5127_v19, %v5127_v19 }
0x12f7   :  { %8997 = vmatmul.mubr.msk.bf16.vlgmr.msra.gmra.mrb[80].mxu0 %vm1396_vm2, %v5131_v33  ;;  %v5132_v46 = vpack.c.bf16 %v5128_v7, %v5128_v7  ;;  %v9681_v7 = vld [vmem:[#allocation7 + $0x20] ss:$8 sps:$4 sm:$0xff]  }
0x12f8   :  { %9007 = vmatpush3.bf16.msra.mxu0 %v5231_v56  ;;  %9008 = vmatprep.mubr.msk.bf16.mxu0 %vm10470_vm0, %v10469_v11 }
0x12f9   :  { %9003 = vmatmul.mubr.msk.bf16.vlgmr.msra.gmra.mrb[112].mxu1 %vm1396_vm2, %v5132_v46  ;;  %5401 = vmatprep.subr.bf16.mxu0 %v9653_v3  ;;  %v9686_v46 = vld [vmem:[#allocation7 + $0x34] ss:$8 sps:$4 sm:$0xff]  }
0x12fa   :  { %v10168_v8 = vpop.eup %10167  ;;  %9013 = vmatpush3.bf16.msra.mxu1 %v5277_v34  ;;  %9014 = vmatprep.mubr.msk.bf16.mxu1 %vm10470_vm0, %v10469_v11  ;;  %v9662_v11 = vld [vmem:[#allocation7 + $0xb4] ss:$8 sps:$4 sm:$0xff]  }
0x12fb   :  { %v5129_v49 = vmul.f32 %v10168_v8, %v10160_v36  ;;  %v9675_v36 = vld [vmem:[#allocation7] ss:$8 sps:$4 sm:$0xff]  }
0x12fc   :  { %v10170_v43 = vpop.eup %10169 }
0x12fd   :  { %v5130_v40 = vmul.f32 %v10170_v43, %v10162_v39  ;;  %v5133_v14 = vpack.c.bf16 %v5129_v49, %v5129_v49  ;;  %v9684_v49 = vld [vmem:[#allocation7 + $0x30] ss:$8 sps:$4 sm:$0xff]   ;;  %v9689_v43 = vld [vmem:[#allocation7 + $0x44] ss:$8 sps:$4 sm:$0xff]  }
0x12ff   :  { %9009 = vmatmul.mubr.msk.bf16.vlgmr.msra.gmra.mrb[84].mxu0 %vm1396_vm2, %v5133_v14  ;;  %v5134_v1 = vpack.c.bf16 %v5130_v40, %v5130_v40  ;;  %v9692_v40 = vld [vmem:[#allocation7 + $0x54] ss:$8 sps:$4 sm:$0xff]   ;;  %v9690_v14 = vld [vmem:[#allocation7 + $0x50] ss:$8 sps:$4 sm:$0xff]  }
0x1300   :  { %5402 = vmatpush1.bf16.msra.mxu0 %v9651_v6  ;;  %5433 = vmatprep.mubr.bf16.mxu0 %v10471_v26  ;;  %v9687_v6 = vld [vmem:[#allocation7 + $0x40] ss:$8 sps:$4 sm:$0xff]  }
0x1301   :  { %9015 = vmatmul.mubr.msk.bf16.vlgmr.msra.gmra.mrb[116].mxu1 %vm1396_vm2, %v5134_v1  ;;  %5403 = vmatprep.subr.bf16.mxu0 %v9656_v45  ;;  %v9695_v45 = vld [vmem:[#allocation7 + $0x64] ss:$8 sps:$4 sm:$0xff]   ;;  %v9693_v1 = vld [vmem:[#allocation7 + $0x60] ss:$8 sps:$4 sm:$0xff]  }
0x1304   :  { %5404 = vmatpush1.bf16.msra.mxu0 %v9654_v9  ;;  %v9698_v9 = vld [vmem:[#allocation7 + $0x74] ss:$8 sps:$4 sm:$0xff]  }
0x1305   :  { %5405 = vmatprep.subr.bf16.mxu0 %v9659_v4  ;;  %v9696_v4 = vld [vmem:[#allocation7 + $0x70] ss:$8 sps:$4 sm:$0xff]  }
0x1308   :  { %5406 = vmatpush1.bf16.msra.mxu0 %v9657_v31  ;;  %v5587_v31 = vld [vmem:[%s12195_s9] sm:$0x3] }
0x1309   :  { %5407 = vmatprep.subr.bf16.mxu0 %v9662_v11  ;;  %v5592_v11 = vrot.slane %v5587_v31, %v10877_v62 }
0x130c   :  { %5408 = vmatpush1.bf16.msra.mxu0 %v9660_v58  ;;  %v5596_v58 = vrot.slane %v5587_v31, %v10874_v61  ;;  %v9746_v31 = vld [vmem:[#allocation9 + $0xec] ss:$16 sps:$4 sm:$0xff]  }
0x130d   :  { %5409 = vmatprep.subr.bf16.mxu0 %v9665_v16 }
0x1310   :  { %5410 = vmatpush1.bf16.msra.mxu0 %v9663_v28 }
0x1311   :  { %5411 = vmatprep.subr.bf16.mxu0 %v9668_v27 }
0x1314   :  { %5412 = vmatpush1.bf16.msra.mxu0 %v9666_v48 }
0x1315   :  { %5413 = vmatprep.subr.bf16.mxu0 %v9671_v21 }
0x1318   :  { %5414 = vmatpush1.bf16.msra.mxu0 %v9669_v44 }
0x1319   :  { %5415 = vmatprep.subr.bf16.mxu0 %v9674_v29 }
0x131c   :  { %5416 = vmatpush1.bf16.msra.mxu0 %v9672_v53 }
0x131d   :  { %5534 = vmatprep.subr.bf16.mxu0 %v9677_v59 }
0x13ca   :  { %v5175_v20 = vpop.f32.mrb[80].mxu0 }
0x13cb   :  { %v8998_v10 = vpop.f32.mrb[81].mxu0 }
0x13cc   :  { %v5178_v2 = vpop.f32.mrb[82].mxu0  ;;  %v5221_v35 = vpop.f32.mrb[112].mxu1 }
0x13cd   :  { %v5319_v63 = vpack.c.bf16 %v5221_v35, %v5175_v20  ;;  %v8999_v39 = vpop.f32.mrb[83].mxu0  ;;  %v9004_v30 = vpop.f32.mrb[113].mxu1 }
0x13ce   :  { %v5224_v57 = vpop.f32.mrb[114].mxu1  ;;  %v9699_v30 = vld [vmem:[#allocation9] ss:$16 sps:$4 sm:$0xff]  }
0x13cf   :  { %v9005_v18 = vpop.f32.mrb[115].mxu1  ;;  %5434 = vmatmul.mubr.bf16.vlgmr.msra.gmra.mrb[88].mxu0 %v5319_v63  ;;  %v9702_v57 = vld [vmem:[#allocation9 + $0x8] ss:$16 sps:$4 sm:$0xff]  }
0x13d0   :  { %5535 = vmatpush1.bf16.msra.mxu0 %v9675_v36  ;;  %5443 = vmatprep.mubr.bf16.mxu0 %v10471_v26  ;;  %v9707_v18 = vld [vmem:[#allocation9 + $0x24] ss:$16 sps:$4 sm:$0xff]  }
0x13d1   :  { %5536 = vmatprep.subr.bf16.mxu0 %v9680_v23  ;;  %v9701_v23 = vld [vmem:[#allocation9 + $0x4] ss:$16 sps:$4 sm:$0xff]  }
0x13d2   :  { %v5267_v60 = vpop.f32.mrb[84].mxu0  ;;  %6129 = vmatprep.subr.bf16.mxu1 %v9701_v23 }
0x13d3   :  { %v9010_v19 = vpop.f32.mrb[85].mxu0  ;;  %6130 = vmatpush1.bf16.msra.mxu1 %v9699_v30 }
0x13d4   :  { %5537 = vmatpush1.bf16.msra.mxu0 %v9678_v52  ;;  %v5270_v55 = vpop.f32.mrb[86].mxu0  ;;  %v5313_v0 = vpop.f32.mrb[116].mxu1  ;;  %v9710_v52 = vld [vmem:[#allocation9 + $0x2c] ss:$16 sps:$4 sm:$0xff]   ;;  %6131 = vmatprep.subr.bf16.mxu1 %v9707_v18  ;;  %v9711_v19 = vld [vmem:[#allocation9 + $0x40] ss:$16 sps:$4 sm:$0xff]  }
0x13d5   :  { %v5320_v33 = vpack.c.bf16 %v5313_v0, %v5267_v60  ;;  %v9011_v3 = vpop.f32.mrb[87].mxu0  ;;  %v9016_v56 = vpop.f32.mrb[117].mxu1  ;;  %5538 = vmatprep.subr.bf16.mxu0 %v9683_v42  ;;  %v9713_v42 = vld [vmem:[#allocation9 + $0x44] ss:$16 sps:$4 sm:$0xff]   ;;  %v9716_v60 = vld [vmem:[#allocation9 + $0x4c] ss:$16 sps:$4 sm:$0xff]  }
0x13d6   :  { %v5316_v34 = vpop.f32.mrb[118].mxu1  ;;  %v9714_v55 = vld [vmem:[#allocation9 + $0x48] ss:$16 sps:$4 sm:$0xff]   ;;  %v9719_v0 = vld [vmem:[#allocation9 + $0x64] ss:$16 sps:$4 sm:$0xff]  }
0x13d7   :  { %v9017_v8 = vpop.f32.mrb[119].mxu1  ;;  %5444 = vmatmul.mubr.bf16.gmra.mrb[92].mxu0 %v5320_v33  ;;  %v9717_v33 = vld [vmem:[#allocation9 + $0x60] ss:$16 sps:$4 sm:$0xff]   ;;  %v9720_v3 = vld [vmem:[#allocation9 + $0x68] ss:$16 sps:$4 sm:$0xff]  }
0x13d8   :  { %5539 = vmatpush1.bf16.msra.mxu0 %v9681_v7  ;;  %5566 = vmatprep.mubr.bf16.mxu0 %v10471_v26  ;;  %v9722_v7 = vld [vmem:[#allocation9 + $0x6c] ss:$16 sps:$4 sm:$0xff]   ;;  %v9725_v56 = vld [vmem:[#allocation9 + $0x84] ss:$16 sps:$4 sm:$0xff]   ;;  %v9723_v34 = vld [vmem:[#allocation9 + $0x80] ss:$16 sps:$4 sm:$0xff]  }
0x13d9   :  { %5540 = vmatprep.subr.bf16.mxu0 %v9686_v46  ;;  %v9728_v46 = vld [vmem:[#allocation9 + $0x8c] ss:$16 sps:$4 sm:$0xff]   ;;  %v9726_v8 = vld [vmem:[#allocation9 + $0x88] ss:$16 sps:$4 sm:$0xff]  }
0x13dc   :  { %5541 = vmatpush1.bf16.msra.mxu0 %v9684_v49  ;;  %v9731_v49 = vld [vmem:[#allocation9 + $0xa4] ss:$16 sps:$4 sm:$0xff]  }
0x13dd   :  { %5542 = vmatprep.subr.bf16.mxu0 %v9689_v43  ;;  %v9734_v43 = vld [vmem:[#allocation9 + $0xac] ss:$16 sps:$4 sm:$0xff]  }
0x13e0   :  { %5543 = vmatpush1.bf16.msra.mxu0 %v9687_v6  ;;  %v9729_v6 = vld [vmem:[#allocation9 + $0xa0] ss:$16 sps:$4 sm:$0xff]  }
0x13e1   :  { %5544 = vmatprep.subr.bf16.mxu0 %v9692_v40  ;;  %v9732_v40 = vld [vmem:[#allocation9 + $0xa8] ss:$16 sps:$4 sm:$0xff]  }
0x13e4   :  { %5545 = vmatpush1.bf16.msra.mxu0 %v9690_v14  ;;  %v9737_v14 = vld [vmem:[#allocation9 + $0xc4] ss:$16 sps:$4 sm:$0xff]  }
0x13e5   :  { %5546 = vmatprep.subr.bf16.mxu0 %v9695_v45  ;;  %v9740_v45 = vld [vmem:[#allocation9 + $0xcc] ss:$16 sps:$4 sm:$0xff]  }
0x13e8   :  { %5547 = vmatpush1.bf16.msra.mxu0 %v9693_v1  ;;  %v9735_v1 = vld [vmem:[#allocation9 + $0xc0] ss:$16 sps:$4 sm:$0xff]  }
0x13e9   :  { %5548 = vmatprep.subr.bf16.mxu0 %v9698_v9  ;;  %v9738_v9 = vld [vmem:[#allocation9 + $0xc8] ss:$16 sps:$4 sm:$0xff]  }
0x13ec   :  { %5549 = vmatpush1.bf16.msra.mxu0 %v9696_v4  ;;  %v9743_v4 = vld [vmem:[#allocation9 + $0xe4] ss:$16 sps:$4 sm:$0xff]  }
0x13ef   :  { %5567 = vmatmul.mubr.bf16.vlgmr.msra.gmra.mrb[88].mxu0 %v4925_v50 }
0x13f0   :  { %5576 = vmatprep.mubr.bf16.mxu0 %v10471_v26 }
0x13f7   :  { %5577 = vmatmul.mubr.bf16.gmra.mrb[92].mxu0 %v4926_v5 }
0x14c2   :  { %v5568_v16 = vpop.f32.mrb[88].mxu0 }
0x14c3   :  { %v5599_v28 = vadd.f32 %v5592_v11, %v5568_v16  ;;  %v5570_v27 = vpop.f32.mrb[89].mxu0  ;;  %v9749_v16 = vld [vmem:[#allocation9 + $0x104] ss:$16 sps:$4 sm:$0xff]  }
0x14c4   :  { %v5600_v48 = vadd.f32 %v5596_v58, %v5570_v27  ;;  %v5572_v21 = vpop.f32.mrb[90].mxu0  ;;  %v9747_v27 = vld [vmem:[#allocation9 + $0x100] ss:$16 sps:$4 sm:$0xff]  }
0x14c5   :  { %v11791_v44 = vadd.f32 %v5599_v28, %v11558_v24  ;;  %v5601_v47 = vadd.f32 %v5592_v11, %v5572_v21  ;;  %v5574_v32 = vpop.f32.mrb[91].mxu0  ;;  %v9752_v28 = vld [vmem:[#allocation9 + $0x10c] ss:$16 sps:$4 sm:$0xff]   ;;  %v9755_v21 = vld [vmem:[#allocation9 + $0x124] ss:$16 sps:$4 sm:$0xff]  }
0x14c6   :  { %v11794_v26 = vadd.f32 %v5600_v48, %v11554_v41  ;;  %v5602_v50 = vadd.f32 %v5596_v58, %v5574_v32  ;;  %v9750_v48 = vld [vmem:[#allocation9 + $0x108] ss:$16 sps:$4 sm:$0xff]   ;;  %v9753_v32 = vld [vmem:[#allocation9 + $0x120] ss:$16 sps:$4 sm:$0xff]  }
0x14c7   :  { %v11797_v15 = vadd.f32 %v5601_v47, %v11560_v51  ;;  %v9758_v47 = vld [vmem:[#allocation9 + $0x12c] ss:$16 sps:$4 sm:$0xff]  }
0x14c8   :  { %v11800_v25 = vadd.f32 %v5602_v50, %v11556_v13  ;;  %v5617_v5 = vadd.f32 %v11794_v26, %v11791_v44  ;;  %v9756_v50 = vld [vmem:[#allocation9 + $0x128] ss:$16 sps:$4 sm:$0xff]  }
0x14ca   :  { %5618 = vadd.xlane.f32.xlu0 %v5617_v5  ;;  %v5578_v53 = vpop.f32.mrb[92].mxu0  ;;  %v5620_v24 = vadd.f32 %v11800_v25, %v11797_v15 }
0x14cb   :  { %v5603_v29 = vadd.f32 %v5592_v11, %v5578_v53  ;;  %v5580_v59 = vpop.f32.mrb[93].mxu0 }
0x14cc   :  { %v5604_v20 = vadd.f32 %v5596_v58, %v5580_v59  ;;  %5621 = vadd.xlane.f32.xlu1 %v5620_v24  ;;  %v5582_v41 = vpop.f32.mrb[94].mxu0 }
0x14cd   :  { %v11807_v10 = vadd.f32 %v5603_v29, %v11578_v17  ;;  %v5605_v51 = vadd.f32 %v5592_v11, %v5582_v41  ;;  %v5584_v2 = vpop.f32.mrb[95].mxu0  ;;  %v9741_v11 = vld [vmem:[#allocation9 + $0xe0] ss:$16 sps:$4 sm:$0xff]  }
0x14ce   :  { %v11810_v13 = vadd.f32 %v5604_v20, %v11574_v38  ;;  %v5606_v35 = vadd.f32 %v5596_v58, %v5584_v2  ;;  %v9704_v38 = vld [vmem:[#allocation9 + $0xc] ss:$16 sps:$4 sm:$0xff]   ;;  %v9744_v58 = vld [vmem:[#allocation9 + $0xe8] ss:$16 sps:$4 sm:$0xff]  }
0x14cf   :  { %v11813_v36 = vadd.f32 %v5605_v51, %v11580_v37  ;;  %6182 = vmatprep.subr.bf16.mxu0 %v9704_v38  ;;  %v9705_v37 = vld [vmem:[#allocation9 + $0x20] ss:$16 sps:$4 sm:$0xff]  }
0x14d0   :  { %v11816_v63 = vadd.f32 %v5606_v35, %v11576_v22  ;;  %v5623_v39 = vadd.f32 %v11810_v13, %v11807_v10  ;;  %6183 = vmatpush1.bf16.msra.mxu0 %v9702_v57  ;;  %v9708_v22 = vld [vmem:[#allocation9 + $0x28] ss:$16 sps:$4 sm:$0xff]   ;;  %6132 = vmatpush1.bf16.msra.mxu1 %v9705_v37 }
0x14d1   :  { %6184 = vmatprep.subr.bf16.mxu0 %v9710_v52  ;;  %6133 = vmatprep.subr.bf16.mxu1 %v9713_v42 }
0x14d2   :  { %5624 = vadd.xlane.f32.xlu0 %v5623_v39  ;;  %v5626_v17 = vadd.f32 %v11816_v63, %v11813_v36 }
0x14d4   :  { %5627 = vadd.xlane.f32.xlu1 %v5626_v17  ;;  %6185 = vmatpush1.bf16.msra.mxu0 %v9708_v22 }
0x14d5   :  { %6186 = vmatprep.subr.bf16.mxu0 %v9716_v60  ;;  %6134 = vmatpush1.bf16.msra.mxu1 %v9711_v19  ;;  %v9764_v19 = vld [vmem:[#allocation9 + $0x14c] ss:$16 sps:$4 sm:$0xff]  }
0x14d6   :  { %6135 = vmatprep.subr.bf16.mxu1 %v9719_v0  ;;  %v9767_v0 = vld [vmem:[#allocation9 + $0x164] ss:$16 sps:$4 sm:$0xff]  }
0x14d8   :  { %6187 = vmatpush1.bf16.msra.mxu0 %v9714_v55  ;;  %v9762_v55 = vld [vmem:[#allocation9 + $0x148] ss:$16 sps:$4 sm:$0xff]  }
0x14d9   :  { %6188 = vmatprep.subr.bf16.mxu0 %v9722_v7  ;;  %6136 = vmatpush1.bf16.msra.mxu1 %v9717_v33  ;;  %v9770_v7 = vld [vmem:[#allocation9 + $0x16c] ss:$16 sps:$4 sm:$0xff]   ;;  %v9765_v33 = vld [vmem:[#allocation9 + $0x160] ss:$16 sps:$4 sm:$0xff]  }
0x14da   :  { %6137 = vmatprep.subr.bf16.mxu1 %v9725_v56  ;;  %v9771_v56 = vld [vmem:[#allocation9 + $0x180] ss:$16 sps:$4 sm:$0xff]  }
0x14dc   :  { %6189 = vmatpush1.bf16.msra.mxu0 %v9720_v3  ;;  %v9768_v3 = vld [vmem:[#allocation9 + $0x168] ss:$16 sps:$4 sm:$0xff]  }
0x14dd   :  { %6190 = vmatprep.subr.bf16.mxu0 %v9728_v46  ;;  %6138 = vmatpush1.bf16.msra.mxu1 %v9723_v34  ;;  %v9773_v46 = vld [vmem:[#allocation9 + $0x184] ss:$16 sps:$4 sm:$0xff]   ;;  %v9774_v34 = vld [vmem:[#allocation9 + $0x188] ss:$16 sps:$4 sm:$0xff]  }
0x14de   :  { %6139 = vmatprep.subr.bf16.mxu1 %v9731_v49  ;;  %v9779_v49 = vld [vmem:[#allocation9 + $0x1a4] ss:$16 sps:$4 sm:$0xff]  }
0x14e0   :  { %6191 = vmatpush1.bf16.msra.mxu0 %v9726_v8  ;;  %v9776_v8 = vld [vmem:[#allocation9 + $0x18c] ss:$16 sps:$4 sm:$0xff]  }
0x14e1   :  { %6192 = vmatprep.subr.bf16.mxu0 %v9734_v43  ;;  %6140 = vmatpush1.bf16.msra.mxu1 %v9729_v6  ;;  %v9782_v43 = vld [vmem:[#allocation9 + $0x1ac] ss:$16 sps:$4 sm:$0xff]   ;;  %v9777_v6 = vld [vmem:[#allocation9 + $0x1a0] ss:$16 sps:$4 sm:$0xff]  }
0x14e2   :  { %6141 = vmatprep.subr.bf16.mxu1 %v9737_v14  ;;  %v9785_v14 = vld [vmem:[#allocation9 + $0x1c4] ss:$16 sps:$4 sm:$0xff]  }
0x14e4   :  { %6193 = vmatpush1.bf16.msra.mxu0 %v9732_v40  ;;  %v9780_v40 = vld [vmem:[#allocation9 + $0x1a8] ss:$16 sps:$4 sm:$0xff]  }
0x14e5   :  { %6194 = vmatprep.subr.bf16.mxu0 %v9740_v45  ;;  %6142 = vmatpush1.bf16.msra.mxu1 %v9735_v1  ;;  %v9788_v45 = vld [vmem:[#allocation9 + $0x1cc] ss:$16 sps:$4 sm:$0xff]   ;;  %v9783_v1 = vld [vmem:[#allocation9 + $0x1c0] ss:$16 sps:$4 sm:$0xff]  }
0x14e6   :  { %6143 = vmatprep.subr.bf16.mxu1 %v9743_v4  ;;  %v9791_v4 = vld [vmem:[#allocation9 + $0x1e4] ss:$16 sps:$4 sm:$0xff]  }
0x14e8   :  { %6195 = vmatpush1.bf16.msra.mxu0 %v9738_v9  ;;  %v9786_v9 = vld [vmem:[#allocation9 + $0x1c8] ss:$16 sps:$4 sm:$0xff]  }
0x14e9   :  { %6196 = vmatprep.subr.bf16.mxu0 %v9746_v31  ;;  %6144 = vmatpush1.bf16.msra.mxu1 %v9741_v11  ;;  %v9794_v31 = vld [vmem:[#allocation9 + $0x1ec] ss:$16 sps:$4 sm:$0xff]   ;;  %v9789_v11 = vld [vmem:[#allocation9 + $0x1e0] ss:$16 sps:$4 sm:$0xff]  }
0x14ea   :  { %6145 = vmatprep.subr.bf16.mxu1 %v9749_v16  ;;  %v9797_v16 = vld [vmem:[#allocation10 + $0x4] ss:$8 sps:$4 sm:$0xff]  }
0x14ec   :  { %6197 = vmatpush1.bf16.msra.mxu0 %v9744_v58  ;;  %v9792_v58 = vld [vmem:[#allocation9 + $0x1e8] ss:$16 sps:$4 sm:$0xff]  }
0x14ed   :  { %6198 = vmatprep.subr.bf16.mxu0 %v9752_v28  ;;  %6146 = vmatpush1.bf16.msra.mxu1 %v9747_v27 }
0x14ee   :  { %6147 = vmatprep.subr.bf16.mxu1 %v9755_v21 }
0x14f0   :  { %6199 = vmatpush1.bf16.msra.mxu0 %v9750_v48 }
0x14f1   :  { %6200 = vmatprep.subr.bf16.mxu0 %v9758_v47  ;;  %6148 = vmatpush1.bf16.msra.mxu1 %v9753_v32 }
0x14f4   :  { %6201 = vmatpush1.bf16.msra.mxu0 %v9756_v50 }
0x14f5   :  { %6202 = vmatprep.subr.bf16.mxu0 %v9764_v19 }
0x14f8   :  { %6203 = vmatpush1.bf16.msra.mxu0 %v9762_v55 }
0x14f9   :  { %6204 = vmatprep.subr.bf16.mxu0 %v9770_v7 }
0x14fc   :  { %6205 = vmatpush1.bf16.msra.mxu0 %v9768_v3 }
0x14fd   :  { %6206 = vmatprep.subr.bf16.mxu0 %v9776_v8 }
0x1500   :  { %6207 = vmatpush1.bf16.msra.mxu0 %v9774_v34 }
0x1501   :  { %6208 = vmatprep.subr.bf16.mxu0 %v9782_v43 }
0x1504   :  { %6209 = vmatpush1.bf16.msra.mxu0 %v9780_v40  ;;  %v9798_v40 = vld [vmem:[#allocation10 + $0x10] ss:$8 sps:$4 sm:$0xff]  }
0x1505   :  { %6210 = vmatprep.subr.bf16.mxu0 %v9788_v45 }
0x1508   :  { %6211 = vmatpush1.bf16.msra.mxu0 %v9786_v9  ;;  %v9801_v9 = vld [vmem:[#allocation10 + $0x20] ss:$8 sps:$4 sm:$0xff]  }
0x1509   :  { %6212 = vmatprep.subr.bf16.mxu0 %v9794_v31  ;;  %v9804_v31 = vld [vmem:[#allocation10 + $0x30] ss:$8 sps:$4 sm:$0xff]  }
0x150c   :  { %6213 = vmatpush1.bf16.msra.mxu0 %v9792_v58  ;;  %v9807_v58 = vld [vmem:[#allocation10 + $0x40] ss:$8 sps:$4 sm:$0xff]  }
0x1557   :  { %v5619_v5 = vpop.xlane.xlu0 %5618 }
0x1558   :  { %v5629_v53 = vmul.f32 0.00390625, %v5619_v5 }
0x1559   :  { %v5622_v24 = vpop.xlane.xlu1 %5621 }
0x155a   :  { %v11823_v29 = vsub.f32 %v11791_v44, %v5629_v53  ;;  %v11826_v59 = vsub.f32 %v11794_v26, %v5629_v53  ;;  %v5630_v20 = vmul.f32 0.00390625, %v5622_v24 }
0x155c   :  { %v11829_v41 = vsub.f32 %v11797_v15, %v5630_v20  ;;  %v11832_v51 = vsub.f32 %v11800_v25, %v5630_v20  ;;  %v5641_v2 = vmul.f32 %v11823_v29, %v11823_v29  ;;  %v5642_v35 = vmul.f32 %v11826_v59, %v11826_v59 }
0x155e   :  { %v5649_v39 = vadd.f32 %v5642_v35, %v5641_v2  ;;  %v5643_v44 = vmul.f32 %v11829_v41, %v11829_v41  ;;  %v5644_v26 = vmul.f32 %v11832_v51, %v11832_v51  ;;  %v5615_v2 = vld [vmem:[%s12196_s28] sm:$0x3] }
0x155f   :  { %v5625_v17 = vpop.xlane.xlu0 %5624 }
0x1560   :  { %v5631_v30 = vmul.f32 0.00390625, %v5625_v17  ;;  %5650 = vadd.xlane.f32.xlu0 %v5649_v39  ;;  %v5652_v15 = vadd.f32 %v5644_v26, %v5643_v44  ;;  %v5616_v39 = vld [vmem:[%s12197_s1] sm:$0x3]  ;;  %v5685_v44 = vrot.slane %v5615_v2, %v10877_v62  ;;  %v5689_v26 = vrot.slane %v5615_v2, %v10874_v61  ;;  %v9830_v2 = vld [vmem:[#allocation10 + $0xb4] ss:$8 sps:$4 sm:$0xff]  }
0x1561   :  { %v5628_v23 = vpop.xlane.xlu1 %5627 }
0x1562   :  { %v11843_v25 = vsub.f32 %v11807_v10, %v5631_v30  ;;  %v11846_v57 = vsub.f32 %v11810_v13, %v5631_v30  ;;  %v5632_v38 = vmul.f32 0.00390625, %v5628_v23  ;;  %5653 = vadd.xlane.f32.xlu1 %v5652_v15 }
0x1564   :  { %v11849_v18 = vsub.f32 %v11813_v36, %v5632_v38  ;;  %v11852_v52 = vsub.f32 %v11816_v63, %v5632_v38  ;;  %v5645_v37 = vmul.f32 %v11843_v25, %v11843_v25  ;;  %v5646_v22 = vmul.f32 %v11846_v57, %v11846_v57  ;;  %v9761_v36 = vld [vmem:[#allocation9 + $0x144] ss:$16 sps:$4 sm:$0xff]   ;;  %v9759_v63 = vld [vmem:[#allocation9 + $0x140] ss:$16 sps:$4 sm:$0xff]  }
0x1565   :  { %6149 = vmatprep.subr.bf16.mxu1 %v9761_v36  ;;  %v5704_v38 = vrot.slane %v5616_v39, %v10877_v62 }
0x1566   :  { %v5655_v42 = vadd.f32 %v5646_v22, %v5645_v37  ;;  %v5647_v10 = vmul.f32 %v11849_v18, %v11849_v18  ;;  %v5648_v13 = vmul.f32 %v11852_v52, %v11852_v52  ;;  %6150 = vmatpush1.bf16.msra.mxu1 %v9759_v63  ;;  %v5708_v37 = vrot.slane %v5616_v39, %v10874_v61  ;;  %v9831_v39 = vld [vmem:[#allocation10 + $0xc0] ss:$8 sps:$4 sm:$0xff]  }
0x1567   :  { %6151 = vmatprep.subr.bf16.mxu1 %v9767_v0 }
0x1568   :  { %5656 = vadd.xlane.f32.xlu0 %v5655_v42  ;;  %v5658_v60 = vadd.f32 %v5648_v13, %v5647_v10 }
0x156a   :  { %5659 = vadd.xlane.f32.xlu1 %v5658_v60  ;;  %6152 = vmatpush1.bf16.msra.mxu1 %v9765_v33  ;;  %v9795_v33 = vld [vmem:[#allocation10] ss:$8 sps:$4 sm:$0xff]  }
0x156b   :  { %6153 = vmatprep.subr.bf16.mxu1 %v9773_v46 }
0x156e   :  { %6154 = vmatpush1.bf16.msra.mxu1 %v9771_v56  ;;  %v9800_v56 = vld [vmem:[#allocation10 + $0x14] ss:$8 sps:$4 sm:$0xff]  }
0x156f   :  { %6155 = vmatprep.subr.bf16.mxu1 %v9779_v49 }
0x1572   :  { %6156 = vmatpush1.bf16.msra.mxu1 %v9777_v6 }
0x1573   :  { %6157 = vmatprep.subr.bf16.mxu1 %v9785_v14 }
0x1576   :  { %6158 = vmatpush1.bf16.msra.mxu1 %v9783_v1 }
0x1577   :  { %6159 = vmatprep.subr.bf16.mxu1 %v9791_v4  ;;  %v9806_v4 = vld [vmem:[#allocation10 + $0x34] ss:$8 sps:$4 sm:$0xff]  }
0x157a   :  { %6160 = vmatpush1.bf16.msra.mxu1 %v9789_v11  ;;  %v9809_v11 = vld [vmem:[#allocation10 + $0x44] ss:$8 sps:$4 sm:$0xff]  }
0x157b   :  { %6783 = vmatprep.subr.bf16.mxu1 %v9797_v16  ;;  %v9812_v16 = vld [vmem:[#allocation10 + $0x54] ss:$8 sps:$4 sm:$0xff]  }
0x15ed   :  { %v5651_v28 = vpop.xlane.xlu0 %5650 }
0x15ee   :  { %v5661_v27 = vmul.f32 0.00390625, %v5651_v28  ;;  %v9810_v28 = vld [vmem:[#allocation10 + $0x50] ss:$8 sps:$4 sm:$0xff]  }
0x15ef   :  { %v5654_v48 = vpop.xlane.xlu1 %5653 }
0x15f0   :  { %v5665_v21 = vadd.f32 1e-12, %v5661_v27  ;;  %v5662_v47 = vmul.f32 0.00390625, %v5654_v48  ;;  %v9815_v27 = vld [vmem:[#allocation10 + $0x64] ss:$8 sps:$4 sm:$0xff]  }
0x15f1   :  { %v9813_v48 = vld [vmem:[#allocation10 + $0x60] ss:$8 sps:$4 sm:$0xff]  }
0x15f2   :  { %10171 = vrsqrt.f32 %v5665_v21  ;;  %v5666_v32 = vadd.f32 1e-12, %v5662_v47  ;;  %v9818_v21 = vld [vmem:[#allocation10 + $0x74] ss:$8 sps:$4 sm:$0xff]   ;;  %v9816_v47 = vld [vmem:[#allocation10 + $0x70] ss:$8 sps:$4 sm:$0xff]  }
0x15f4   :  { %10173 = vrsqrt.f32 %v5666_v32  ;;  %v9821_v32 = vld [vmem:[#allocation10 + $0x84] ss:$8 sps:$4 sm:$0xff]  }
0x15f5   :  { %v5657_v50 = vpop.xlane.xlu0 %5656 }
0x15f6   :  { %v5663_v5 = vmul.f32 0.00390625, %v5657_v50  ;;  %v9819_v50 = vld [vmem:[#allocation10 + $0x80] ss:$8 sps:$4 sm:$0xff]  }
0x15f7   :  { %v5660_v53 = vpop.xlane.xlu1 %5659 }
0x15f8   :  { %v5667_v24 = vadd.f32 1e-12, %v5663_v5  ;;  %v5664_v20 = vmul.f32 0.00390625, %v5660_v53  ;;  %v9824_v5 = vld [vmem:[#allocation10 + $0x94] ss:$8 sps:$4 sm:$0xff]  }
0x15f9   :  { %v9822_v53 = vld [vmem:[#allocation10 + $0x90] ss:$8 sps:$4 sm:$0xff]  }
0x15fa   :  { %10175 = vrsqrt.f32 %v5667_v24  ;;  %v5668_v35 = vadd.f32 1e-12, %v5664_v20  ;;  %v9827_v24 = vld [vmem:[#allocation10 + $0xa4] ss:$8 sps:$4 sm:$0xff]   ;;  %v9825_v20 = vld [vmem:[#allocation10 + $0xa0] ss:$8 sps:$4 sm:$0xff]  }
0x15fc   :  { %v10172_v17 = vpop.eup %10171  ;;  %10177 = vrsqrt.f32 %v5668_v35  ;;  %v9828_v35 = vld [vmem:[#allocation10 + $0xb0] ss:$8 sps:$4 sm:$0xff]  }
0x15fd   :  { %v5673_v30 = vmul.f32 %v10172_v17, %v11823_v29  ;;  %v5674_v15 = vmul.f32 %v10172_v17, %v11826_v59  ;;  %v9834_v17 = vld [vmem:[#allocation10 + $0xd0] ss:$8 sps:$4 sm:$0xff]  }
0x15fe   :  { %v10174_v23 = vpop.eup %10173 }
0x15ff   :  { %v5675_v22 = vmul.f32 %v10174_v23, %v11829_v41  ;;  %v5676_v42 = vmul.f32 %v10174_v23, %v11832_v51  ;;  %v5693_v10 = vmul.f32 %v5689_v26, %v5674_v15  ;;  %v5692_v13 = vmul.f32 %v5685_v44, %v5673_v30  ;;  %v9839_v30 = vld [vmem:[#allocation10 + $0xe4] ss:$8 sps:$4 sm:$0xff]   ;;  %v9837_v15 = vld [vmem:[#allocation10 + $0xe0] ss:$8 sps:$4 sm:$0xff]   ;;  %v9842_v23 = vld [vmem:[#allocation10 + $0xf4] ss:$8 sps:$4 sm:$0xff]  }
0x1601   :  { %v5695_v60 = vmul.f32 %v5689_v26, %v5676_v42  ;;  %v5694_v36 = vmul.f32 %v5685_v44, %v5675_v22  ;;  %v11872_v19 = vadd.f32 %v5708_v37, %v5693_v10  ;;  %v11876_v29 = vadd.f32 %v5704_v38, %v5692_v13  ;;  %v5787_v22 = vld [vmem:[%s12198_s29] sm:$0xf] }
0x1602   :  { %v11902_v42 = vrot.slane %v5787_v22, %v10877_v62  ;;  %v11905_v10 = vrot.slane %v5787_v22, %v10965_v12  ;;  %v11908_v13 = vrot.slane %v5787_v22, %v10874_v61  ;;  %v11916_v12 = vrot.slane %v5787_v22, %v11065_v54 }
0x1603   :  { %v11874_v63 = vadd.f32 %v5708_v37, %v5695_v60  ;;  %v11878_v59 = vadd.f32 %v5704_v38, %v5694_v36 }
0x1604   :  { %v10176_v55 = vpop.eup %10175 }
0x1605   :  { %v5720_v0 = vpack.c.bf16 %v11874_v63, %v11872_v19  ;;  %v5719_v41 = vpack.c.bf16 %v11878_v59, %v11876_v29  ;;  %v5678_v51 = vmul.f32 %v10176_v55, %v11846_v57  ;;  %v5677_v7 = vmul.f32 %v10176_v55, %v11843_v25  ;;  %v9803_v57 = vld [vmem:[#allocation10 + $0x24] ss:$8 sps:$4 sm:$0xff]  }
0x1606   :  { %v10178_v3 = vpop.eup %10177 }
0x1607   :  { %6161 = vmatprep.mubr.bf16.mxu1 %v5720_v0  ;;  %6214 = vmatprep.mubr.bf16.mxu0 %v5720_v0  ;;  %v5680_v46 = vmul.f32 %v10178_v3, %v11852_v52  ;;  %v5697_v34 = vmul.f32 %v5689_v26, %v5678_v51  ;;  %v5679_v8 = vmul.f32 %v10178_v3, %v11849_v18 }
0x1608   :  { %6162 = vmatmul.mubr.bf16.vlgmr.msra.gmra.mrb[120].mxu1 %v5719_v41  ;;  %6215 = vmatmul.mubr.bf16.vlgmr.msra.gmra.mrb[96].mxu0 %v5719_v41  ;;  %v5696_v49 = vmul.f32 %v5685_v44, %v5677_v7 }
0x1609   :  { %v5699_v43 = vmul.f32 %v5689_v26, %v5680_v46  ;;  %v5698_v6 = vmul.f32 %v5685_v44, %v5679_v8  ;;  %6784 = vmatpush1.bf16.msra.mxu1 %v9795_v33  ;;  %v11888_v25 = vadd.f32 %v5708_v37, %v5697_v34  ;;  %v9833_v44 = vld [vmem:[#allocation10 + $0xc4] ss:$8 sps:$4 sm:$0xff]   ;;  %v9836_v26 = vld [vmem:[#allocation10 + $0xd4] ss:$8 sps:$4 sm:$0xff]  }
0x160a   :  { %6785 = vmatprep.subr.bf16.mxu1 %v9800_v56  ;;  %v11892_v45 = vadd.f32 %v5704_v38, %v5696_v49 }
0x160b   :  { %v11890_v14 = vadd.f32 %v5708_v37, %v5699_v43  ;;  %v11894_v1 = vadd.f32 %v5704_v38, %v5698_v6  ;;  %v9840_v38 = vld [vmem:[#allocation10 + $0xf0] ss:$8 sps:$4 sm:$0xff]   ;;  %v9845_v37 = vld [vmem:[#allocation10 + $0x104] ss:$8 sps:$4 sm:$0xff]  }
0x160d   :  { %v5722_v18 = vpack.c.bf16 %v11890_v14, %v11888_v25  ;;  %v5721_v52 = vpack.c.bf16 %v11894_v1, %v11892_v45  ;;  %6786 = vmatpush1.bf16.msra.mxu1 %v9798_v40 }
0x160e   :  { %6787 = vmatprep.subr.bf16.mxu1 %v9803_v57 }
0x160f   :  { %6171 = vmatprep.mubr.bf16.mxu1 %v5722_v18  ;;  %6224 = vmatprep.mubr.bf16.mxu0 %v5722_v18 }
0x1610   :  { %6172 = vmatmul.mubr.bf16.gmra.mrb[124].mxu1 %v5721_v52  ;;  %6225 = vmatmul.mubr.bf16.gmra.mrb[100].mxu0 %v5721_v52 }
0x1611   :  { %6788 = vmatpush1.bf16.msra.mxu1 %v9801_v9 }
0x1612   :  { %6789 = vmatprep.subr.bf16.mxu1 %v9806_v4 }
0x1615   :  { %6790 = vmatpush1.bf16.msra.mxu1 %v9804_v31 }
0x1616   :  { %6791 = vmatprep.subr.bf16.mxu1 %v9809_v11 }
0x1619   :  { %6792 = vmatpush1.bf16.msra.mxu1 %v9807_v58 }
0x161a   :  { %6793 = vmatprep.subr.bf16.mxu1 %v9812_v16 }
0x161d   :  { %6794 = vmatpush1.bf16.msra.mxu1 %v9810_v28 }
0x161e   :  { %6795 = vmatprep.subr.bf16.mxu1 %v9815_v27 }
0x1621   :  { %6796 = vmatpush1.bf16.msra.mxu1 %v9813_v48 }
0x1622   :  { %6797 = vmatprep.subr.bf16.mxu1 %v9818_v21 }
0x1625   :  { %6798 = vmatpush1.bf16.msra.mxu1 %v9816_v47 }
0x1626   :  { %6799 = vmatprep.subr.bf16.mxu1 %v9821_v32 }
0x1629   :  { %6800 = vmatpush1.bf16.msra.mxu1 %v9819_v50 }
0x162a   :  { %6801 = vmatprep.subr.bf16.mxu1 %v9824_v5 }
0x162d   :  { %6802 = vmatpush1.bf16.msra.mxu1 %v9822_v53 }
0x162e   :  { %6803 = vmatprep.subr.bf16.mxu1 %v9827_v24 }
0x1631   :  { %6804 = vmatpush1.bf16.msra.mxu1 %v9825_v20 }
0x1632   :  { %6805 = vmatprep.subr.bf16.mxu1 %v9830_v2 }
0x1635   :  { %6806 = vmatpush1.bf16.msra.mxu1 %v9828_v35 }
0x1636   :  { %6807 = vmatprep.subr.bf16.mxu1 %v9833_v44 }
0x1639   :  { %6808 = vmatpush1.bf16.msra.mxu1 %v9831_v39 }
0x163a   :  { %6809 = vmatprep.subr.bf16.mxu1 %v9836_v26 }
0x163d   :  { %6810 = vmatpush1.bf16.msra.mxu1 %v9834_v17 }
0x163e   :  { %6811 = vmatprep.subr.bf16.mxu1 %v9839_v30 }
0x1641   :  { %6812 = vmatpush1.bf16.msra.mxu1 %v9837_v15 }
0x1642   :  { %6813 = vmatprep.subr.bf16.mxu1 %v9842_v23 }
0x1645   :  { %6814 = vmatpush1.bf16.msra.mxu1 %v9840_v38 }
0x1646   :  { %6836 = vmatprep.subr.bf16.mxu1 %v9845_v37 }
0x16db   :  { %v6163_v60 = vpop.f32.mrb[120].mxu1  ;;  %v6216_v36 = vpop.f32.mrb[96].mxu0 }
0x16dc   :  { %v6164_v55 = vadd.f32 %v6163_v60, %v11902_v42  ;;  %v6217_v0 = vadd.f32 %v6216_v36, %v11905_v10  ;;  %v6165_v41 = vpop.f32.mrb[121].mxu1  ;;  %v6218_v51 = vpop.f32.mrb[97].mxu0 }
0x16dd   :  { %v11913_v7 = vadd.f32 %v6165_v41, %v11908_v13  ;;  %v6167_v33 = vpop.f32.mrb[122].mxu1  ;;  %v6220_v3 = vpop.f32.mrb[98].mxu0  ;;  %v11927_v54 = vadd.f32 %v6218_v51, %v11916_v12 }
0x16de   :  { %v6251_v56 = vmul.f32 0.044715, %v6164_v55  ;;  %v6253_v46 = vmul.f32 0.044715, %v6217_v0  ;;  %v6168_v34 = vadd.f32 %v6167_v33, %v11902_v42  ;;  %v11920_v8 = vadd.f32 %v6220_v3, %v11905_v10  ;;  %v6169_v49 = vpop.f32.mrb[123].mxu1  ;;  %v6222_v43 = vpop.f32.mrb[99].mxu0 }
0x16df   :  { %v6252_v57 = vmul.f32 0.044715, %v11913_v7  ;;  %v11924_v18 = vadd.f32 %v6169_v49, %v11908_v13  ;;  %v11930_v11 = vmul.f32 0.5, %v6164_v55  ;;  %v11932_v58 = vmul.f32 0.5, %v6217_v0 }
0x16e0   :  { %v6267_v6 = vmul.f32 %v6251_v56, %v6164_v55  ;;  %v6269_v40 = vmul.f32 %v6253_v46, %v6217_v0  ;;  %v6255_v52 = vmul.f32 0.044715, %v6168_v34  ;;  %v6257_v31 = vmul.f32 0.044715, %v11920_v8 }
0x16e1   :  { %v6256_v28 = vmul.f32 0.044715, %v11924_v18  ;;  %v6268_v32 = vmul.f32 %v6252_v57, %v11913_v7  ;;  %v11939_v2 = vadd.f32 %v6222_v43, %v11916_v12  ;;  %v6254_v38 = vmul.f32 0.044715, %v11927_v54 }
0x16e2   :  { %v6283_v9 = vmul.f32 %v6267_v6, %v6164_v55  ;;  %v6285_v4 = vmul.f32 %v6269_v40, %v6217_v0  ;;  %v6271_v16 = vmul.f32 %v6255_v52, %v6168_v34  ;;  %v6273_v50 = vmul.f32 %v6257_v31, %v11920_v8 }
0x16e3   :  { %v6173_v27 = vpop.f32.mrb[124].mxu1  ;;  %v6226_v48 = vpop.f32.mrb[100].mxu0  ;;  %v6272_v20 = vmul.f32 %v6256_v28, %v11924_v18  ;;  %v6284_v36 = vmul.f32 %v6268_v32, %v11913_v7  ;;  %v6258_v33 = vmul.f32 0.044715, %v11939_v2  ;;  %v6239_v31 = vmul.f32 0.5, %v6168_v34 }
0x16e4   :  { %v6299_v21 = vadd.f32 %v6283_v9, %v6164_v55  ;;  %v6301_v47 = vadd.f32 %v6285_v4, %v6217_v0  ;;  %v6175_v5 = vpop.f32.mrb[125].mxu1  ;;  %v6228_v53 = vpop.f32.mrb[101].mxu0  ;;  %v6287_v24 = vmul.f32 %v6271_v16, %v6168_v34  ;;  %v11942_v35 = vadd.f32 %v6173_v27, %v11902_v42 }
0x16e5   :  { %v6177_v39 = vpop.f32.mrb[126].mxu1  ;;  %v6230_v44 = vpop.f32.mrb[102].mxu0  ;;  %v6289_v30 = vmul.f32 %v6273_v50, %v11920_v8  ;;  %v11948_v60 = vadd.f32 %v6226_v48, %v11905_v10  ;;  %v11953_v0 = vadd.f32 %v6175_v5, %v11908_v13  ;;  %v6288_v51 = vmul.f32 %v6272_v20, %v11924_v18 }
0x16e6   :  { %v6315_v26 = vmul.f32 0.7978846, %v6299_v21  ;;  %v6317_v17 = vmul.f32 0.7978846, %v6301_v47  ;;  %v6179_v15 = vpop.f32.mrb[127].mxu1  ;;  %v6232_v23 = vpop.f32.mrb[103].mxu0  ;;  %v6303_v37 = vadd.f32 %v6287_v24, %v6168_v34  ;;  %v11959_v46 = vadd.f32 %v6228_v53, %v11916_v12 }
0x16e7   :  { %v6259_v22 = vmul.f32 0.044715, %v11942_v35  ;;  %v6305_v55 = vadd.f32 %v6289_v30, %v11920_v8  ;;  %v6260_v56 = vmul.f32 0.044715, %v11953_v0  ;;  %v11962_v49 = vadd.f32 %v6177_v39, %v11902_v42 }
0x16e8   :  { %10179 = vtanh.f32 %v6315_v26  ;;  %v6319_v41 = vmul.f32 0.7978846, %v6303_v37  ;;  %v6261_v6 = vmul.f32 0.044715, %v11948_v60  ;;  %v11967_v40 = vadd.f32 %v6230_v44, %v11905_v10 }
0x16e9   :  { %10181 = vtanh.f32 %v6317_v17  ;;  %v6321_v3 = vmul.f32 0.7978846, %v6305_v55  ;;  %v6275_v43 = vmul.f32 %v6259_v22, %v11942_v35  ;;  %v6276_v57 = vmul.f32 %v6260_v56, %v11953_v0 }
0x16ea   :  { %10183 = vtanh.f32 %v6319_v41  ;;  %v6262_v52 = vmul.f32 0.044715, %v11959_v46  ;;  %v6263_v9 = vmul.f32 0.044715, %v11962_v49  ;;  %v6270_v4 = vmul.f32 %v6254_v38, %v11927_v54 }
0x16eb   :  { %10185 = vtanh.f32 %v6321_v3  ;;  %v11974_v42 = vadd.f32 %v6179_v15, %v11908_v13  ;;  %v11977_v16 = vadd.f32 %v6232_v23, %v11916_v12  ;;  %v6241_v28 = vmul.f32 0.5, %v11920_v8 }
0x16ec   :  { %v6274_v10 = vmul.f32 %v6258_v33, %v11939_v2  ;;  %v6292_v27 = vmul.f32 %v6276_v57, %v11953_v0  ;;  %v6279_v48 = vmul.f32 %v6263_v9, %v11962_v49  ;;  %v6277_v21 = vmul.f32 %v6261_v6, %v11948_v60 }
0x16ed   :  { %v6264_v47 = vmul.f32 0.044715, %v11974_v42  ;;  %v6266_v34 = vmul.f32 0.044715, %v11977_v16  ;;  %v6300_v13 = vadd.f32 %v6284_v36, %v11913_v7  ;;  %v6291_v32 = vmul.f32 %v6275_v43, %v11942_v35 }
0x16ee   :  { %v6278_v12 = vmul.f32 %v6262_v52, %v11959_v46  ;;  %v6265_v8 = vmul.f32 0.044715, %v11967_v40  ;;  %v6304_v50 = vadd.f32 %v6288_v51, %v11924_v18  ;;  %v6295_v5 = vmul.f32 %v6279_v48, %v11962_v49 }
0x16ef   :  { %v6280_v53 = vmul.f32 %v6264_v47, %v11974_v42  ;;  %v6282_v24 = vmul.f32 %v6266_v34, %v11977_v16  ;;  %v6316_v20 = vmul.f32 0.7978846, %v6300_v13  ;;  %v6286_v44 = vmul.f32 %v6270_v4, %v11927_v54 }
0x16f0   :  { %v6290_v26 = vmul.f32 %v6274_v10, %v11939_v2  ;;  %v6320_v17 = vmul.f32 0.7978846, %v6304_v50  ;;  %v6308_v30 = vadd.f32 %v6292_v27, %v11953_v0  ;;  %v6293_v23 = vmul.f32 %v6277_v21, %v11948_v60 }
0x16f1   :  { %v6296_v38 = vmul.f32 %v6280_v53, %v11974_v42  ;;  %10187 = vtanh.f32 %v6316_v20  ;;  %v6281_v22 = vmul.f32 %v6265_v8, %v11967_v40  ;;  %v6307_v55 = vadd.f32 %v6291_v32, %v11942_v35 }
0x16f2   :  { %v10180_v39 = vpop.eup %10179  ;;  %10189 = vtanh.f32 %v6320_v17  ;;  %v6324_v36 = vmul.f32 0.7978846, %v6308_v30  ;;  %v6294_v51 = vmul.f32 %v6278_v12, %v11959_v46  ;;  %v6298_v33 = vmul.f32 %v6282_v24, %v11977_v16 }
0x16f3   :  { %v10182_v15 = vpop.eup %10181  ;;  %v6347_v37 = vadd.f32 1.0, %v10180_v39  ;;  %v6312_v3 = vadd.f32 %v6296_v38, %v11974_v42  ;;  %v6311_v56 = vadd.f32 %v6295_v5, %v11962_v49  ;;  %v6323_v52 = vmul.f32 0.7978846, %v6307_v55 }
0x16f4   :  { %v10184_v41 = vpop.eup %10183  ;;  %10191 = vtanh.f32 %v6324_v36  ;;  %v6302_v10 = vadd.f32 %v6286_v44, %v11927_v54  ;;  %v6306_v27 = vadd.f32 %v6290_v26, %v11939_v2  ;;  %v6349_v21 = vadd.f32 1.0, %v10182_v15 }
0x16f5   :  { %v10186_v43 = vpop.eup %10185  ;;  %v6351_v6 = vadd.f32 1.0, %v10184_v41  ;;  %v6363_v57 = vmul.f32 %v6347_v37, %v11930_v11  ;;  %v6328_v9 = vmul.f32 0.7978846, %v6312_v3  ;;  %v6327_v4 = vmul.f32 0.7978846, %v6311_v56 }
0x16f6   :  { %10193 = vtanh.f32 %v6323_v52  ;;  %v6353_v47 = vadd.f32 1.0, %v10186_v43  ;;  %v6297_v34 = vmul.f32 %v6281_v22, %v11967_v40  ;;  %v6318_v13 = vmul.f32 0.7978846, %v6302_v10  ;;  %v9848_v56 = vld [vmem:[#allocation10 + $0x114] ss:$8 sps:$4 sm:$0xff]  }
0x16f7   :  { %v6367_v48 = vmul.f32 %v6351_v6, %v6239_v31  ;;  %10195 = vtanh.f32 %v6328_v9  ;;  %v6322_v32 = vmul.f32 0.7978846, %v6306_v27  ;;  %v12010_v11 = vmul.f32 %v6349_v21, %v11932_v58 }
0x16f8   :  { %10197 = vtanh.f32 %v6327_v4  ;;  %v12012_v8 = vmul.f32 %v6353_v47, %v6241_v28  ;;  %v6310_v50 = vadd.f32 %v6294_v51, %v11959_v46  ;;  %v6314_v31 = vadd.f32 %v6298_v33, %v11977_v16  ;;  %v9843_v33 = vld [vmem:[#allocation10 + $0x100] ss:$8 sps:$4 sm:$0xff]  }
0x16f9   :  { %v6379_v12 = vpack.c.bf16 %v6367_v48, %v6363_v57  ;;  %10199 = vtanh.f32 %v6318_v13  ;;  %v6309_v39 = vadd.f32 %v6293_v23, %v11948_v60  ;;  %v6313_v44 = vadd.f32 %v6297_v34, %v11967_v40  ;;  %v9846_v34 = vld [vmem:[#allocation10 + $0x110] ss:$8 sps:$4 sm:$0xff]  }
0x16fa   :  { %10201 = vtanh.f32 %v6322_v32  ;;  %v6381_v5 = vpack.c.bf16 %v12012_v8, %v12010_v11  ;;  %v6326_v24 = vmul.f32 0.7978846, %v6310_v50  ;;  %v6330_v20 = vmul.f32 0.7978846, %v6314_v31 }
0x16fb   :  { %v10188_v53 = vpop.eup %10187  ;;  %v6236_v28 = vmul.f32 0.5, %v11913_v7  ;;  %v6240_v26 = vmul.f32 0.5, %v11924_v18  ;;  %v6325_v15 = vmul.f32 0.7978846, %v6309_v39  ;;  %v6329_v38 = vmul.f32 0.7978846, %v6313_v44 }
0x16fc   :  { %v10190_v58 = vpop.eup %10189  ;;  %v6348_v17 = vadd.f32 1.0, %v10188_v53  ;;  %10203 = vtanh.f32 %v6326_v24  ;;  %v6244_v18 = vmul.f32 0.5, %v11953_v0  ;;  %v6248_v43 = vmul.f32 0.5, %v11974_v42 }
0x16fd   :  { %v6352_v30 = vadd.f32 1.0, %v10190_v58  ;;  %10205 = vtanh.f32 %v6330_v20  ;;  %v6243_v52 = vmul.f32 0.5, %v11942_v35  ;;  %v6247_v9 = vmul.f32 0.5, %v11962_v49  ;;  %v9851_v35 = vld [vmem:[#allocation10 + $0x124] ss:$8 sps:$4 sm:$0xff]  }
0x16fe   :  { %v10192_v37 = vpop.eup %10191  ;;  %v6364_v22 = vmul.f32 %v6348_v17, %v6236_v28  ;;  %10207 = vtanh.f32 %v6325_v15  ;;  %v6238_v21 = vmul.f32 0.5, %v11927_v54  ;;  %v6242_v42 = vmul.f32 0.5, %v11939_v2  ;;  %v9849_v54 = vld [vmem:[#allocation10 + $0x120] ss:$8 sps:$4 sm:$0xff]   ;;  %v9854_v17 = vld [vmem:[#allocation10 + $0x134] ss:$8 sps:$4 sm:$0xff]  }
0x16ff   :  { %v6368_v36 = vmul.f32 %v6352_v30, %v6240_v26  ;;  %v6356_v41 = vadd.f32 1.0, %v10192_v37  ;;  %10209 = vtanh.f32 %v6329_v38  ;;  %v6246_v58 = vmul.f32 0.5, %v11959_v46 }
0x1700   :  { %v10194_v55 = vpop.eup %10193  ;;  %v6250_v28 = vmul.f32 0.5, %v11977_v16  ;;  %v6245_v30 = vmul.f32 0.5, %v11948_v60  ;;  %v9855_v60 = vld [vmem:[#allocation10 + $0x140] ss:$8 sps:$4 sm:$0xff]  }
0x1701   :  { %v10196_v23 = vpop.eup %10195  ;;  %v6380_v51 = vpack.c.bf16 %v6368_v36, %v6364_v22  ;;  %v6355_v3 = vadd.f32 1.0, %v10194_v55  ;;  %v6372_v27 = vmul.f32 %v6356_v41, %v6244_v18  ;;  %v6249_v22 = vmul.f32 0.5, %v11967_v40  ;;  %v9852_v55 = vld [vmem:[#allocation10 + $0x130] ss:$8 sps:$4 sm:$0xff]   ;;  %v9863_v40 = vld [vmem:[#allocation10 + $0x164] ss:$8 sps:$4 sm:$0xff]  }
0x1702   :  { %v10198_v7 = vpop.eup %10197  ;;  %v6360_v6 = vadd.f32 1.0, %v10196_v23  ;;  %v9857_v23 = vld [vmem:[#allocation10 + $0x144] ss:$8 sps:$4 sm:$0xff]   ;;  %v9864_v18 = vld [vmem:[#allocation10 + $0x170] ss:$8 sps:$4 sm:$0xff]  }
0x1703   :  { %v10200_v57 = vpop.eup %10199  ;;  %6815 = vmatprep.mubr.bf16.mxu1 %v6380_v51  ;;  %v6359_v4 = vadd.f32 1.0, %v10198_v7  ;;  %v6371_v0 = vmul.f32 %v6355_v3, %v6243_v52  ;;  %v9858_v3 = vld [vmem:[#allocation10 + $0x150] ss:$8 sps:$4 sm:$0xff]   ;;  %v9861_v7 = vld [vmem:[#allocation10 + $0x160] ss:$8 sps:$4 sm:$0xff]  }
0x1704   :  { %v10202_v10 = vpop.eup %10201  ;;  %6816 = vmatmul.mubr.bf16.vlgmr.msra.gmra.mrb[128].mxu1 %v6379_v12  ;;  %v6376_v48 = vmul.f32 %v6360_v6, %v6248_v43  ;;  %v6350_v47 = vadd.f32 1.0, %v10200_v57  ;;  %v9869_v43 = vld [vmem:[#allocation10 + $0x184] ss:$8 sps:$4 sm:$0xff]   ;;  %v9867_v6 = vld [vmem:[#allocation10 + $0x180] ss:$8 sps:$4 sm:$0xff]  }
0x1705   :  { %6837 = vmatpush1.bf16.msra.mxu1 %v9843_v33  ;;  %v6375_v13 = vmul.f32 %v6359_v4, %v6247_v9  ;;  %v6354_v32 = vadd.f32 1.0, %v10202_v10  ;;  %v9860_v33 = vld [vmem:[#allocation10 + $0x154] ss:$8 sps:$4 sm:$0xff]   ;;  %v9870_v52 = vld [vmem:[#allocation10 + $0x190] ss:$8 sps:$4 sm:$0xff]  }
0x1706   :  { %6838 = vmatprep.subr.bf16.mxu1 %v9848_v56  ;;  %v6384_v50 = vpack.c.bf16 %v6376_v48, %v6372_v27  ;;  %v10204_v31 = vpop.eup %10203  ;;  %v6366_v53 = vmul.f32 %v6350_v47, %v6238_v21  ;;  %v9866_v56 = vld [vmem:[#allocation10 + $0x174] ss:$8 sps:$4 sm:$0xff]   ;;  %v9875_v9 = vld [vmem:[#allocation10 + $0x1a4] ss:$8 sps:$4 sm:$0xff]   ;;  %v9873_v4 = vld [vmem:[#allocation10 + $0x1a0] ss:$8 sps:$4 sm:$0xff]  }
0x1707   :  { %v6383_v49 = vpack.c.bf16 %v6375_v13, %v6371_v0  ;;  %v6370_v24 = vmul.f32 %v6354_v32, %v6242_v42  ;;  %v10206_v12 = vpop.eup %10205  ;;  %v6358_v20 = vadd.f32 1.0, %v10204_v31  ;;  %v9872_v57 = vld [vmem:[#allocation10 + $0x194] ss:$8 sps:$4 sm:$0xff]   ;;  %v9876_v27 = vld [vmem:[#allocation10 + $0x1b0] ss:$8 sps:$4 sm:$0xff]  }
0x1708   :  { %6825 = vmatprep.mubr.bf16.mxu1 %v6384_v50  ;;  %v10208_v39 = vpop.eup %10207  ;;  %v6362_v2 = vadd.f32 1.0, %v10206_v12  ;;  %v9878_v10 = vld [vmem:[#allocation10 + $0x1b4] ss:$8 sps:$4 sm:$0xff]   ;;  %v9881_v48 = vld [vmem:[#allocation10 + $0x1c4] ss:$8 sps:$4 sm:$0xff]  }
0x1709   :  { %6839 = vmatpush1.bf16.msra.mxu1 %v9846_v34  ;;  %v6382_v44 = vpack.c.bf16 %v6370_v24, %v6366_v53  ;;  %v10210_v26 = vpop.eup %10209  ;;  %v6357_v15 = vadd.f32 1.0, %v10208_v39  ;;  %v12031_v38 = vmul.f32 %v6358_v20, %v6246_v58  ;;  %v9879_v21 = vld [vmem:[#allocation10 + $0x1c0] ss:$8 sps:$4 sm:$0xff]   ;;  %v9884_v47 = vld [vmem:[#allocation10 + $0x1d4] ss:$8 sps:$4 sm:$0xff]  }
0x170a   :  { %6840 = vmatprep.subr.bf16.mxu1 %v9851_v35  ;;  %v6378_v37 = vmul.f32 %v6362_v2, %v6250_v28  ;;  %v6361_v36 = vadd.f32 1.0, %v10210_v26  ;;  %v9882_v34 = vld [vmem:[#allocation10 + $0x1d0] ss:$8 sps:$4 sm:$0xff]   ;;  %v9887_v0 = vld [vmem:[#allocation10 + $0x1e4] ss:$8 sps:$4 sm:$0xff]  }
0x170b   :  { %v6373_v16 = vmul.f32 %v6357_v15, %v6245_v30  ;;  %v9885_v13 = vld [vmem:[#allocation10 + $0x1e0] ss:$8 sps:$4 sm:$0xff]   ;;  %v9890_v42 = vld [vmem:[#allocation10 + $0x1f4] ss:$8 sps:$4 sm:$0xff]   ;;  %v9888_v32 = vld [vmem:[#allocation10 + $0x1f0] ss:$8 sps:$4 sm:$0xff]  }
0x170c   :  { %6826 = vmatmul.mubr.bf16.gmra.mrb[132].mxu1 %v6383_v49  ;;  %v6386_v46 = vpack.c.bf16 %v6378_v37, %v12031_v38  ;;  %v6377_v41 = vmul.f32 %v6361_v36, %v6249_v22  ;;  %v6451_v50 = vld [vmem:[%s12199_s2] sm:$0x3] }
0x170d   :  { %6841 = vmatpush1.bf16.msra.mxu1 %v9849_v54  ;;  %6868 = vmatprep.mubr.bf16.mxu1 %v6382_v44  ;;  %v6456_v35 = vrot.slane %v6451_v50, %v10877_v62  ;;  %v6460_v49 = vrot.slane %v6451_v50, %v10874_v61 }
0x170e   :  { %6842 = vmatprep.subr.bf16.mxu1 %v9854_v17  ;;  %v6385_v51 = vpack.c.bf16 %v6377_v41, %v6373_v16  ;;  %v9891_v16 = vld [vmem:[#allocation12 + $0x100] ss:$8 sps:$4 sm:$0xff]   ;;  %v9893_v41 = vld [vmem:[#allocation12 + $0x104] ss:$8 sps:$4 sm:$0xff]  }
0x170f   :  { %7250 = vmatprep.subr.bf16.mxu0 %v9893_v41 }
0x1710   :  { %7251 = vmatpush1.bf16.msra.mxu0 %v9891_v16 }
0x1711   :  { %6843 = vmatpush1.bf16.msra.mxu1 %v9852_v55 }
0x1712   :  { %6844 = vmatprep.subr.bf16.mxu1 %v9857_v23  ;;  %v9896_v23 = vld [vmem:[#allocation12 + $0x114] ss:$8 sps:$4 sm:$0xff]  }
0x1713   :  { %7252 = vmatprep.subr.bf16.mxu0 %v9896_v23 }
0x1715   :  { %6845 = vmatpush1.bf16.msra.mxu1 %v9855_v60  ;;  %v9899_v60 = vld [vmem:[#allocation12 + $0x124] ss:$8 sps:$4 sm:$0xff]  }
0x1716   :  { %6846 = vmatprep.subr.bf16.mxu1 %v9860_v33  ;;  %v9903_v33 = vld [vmem:[#allocation12 + $0x140] ss:$8 sps:$4 sm:$0xff]  }
0x1719   :  { %6847 = vmatpush1.bf16.msra.mxu1 %v9858_v3  ;;  %v9908_v3 = vld [vmem:[#allocation12 + $0x154] ss:$8 sps:$4 sm:$0xff]  }
0x171a   :  { %6848 = vmatprep.subr.bf16.mxu1 %v9863_v40  ;;  %v9906_v40 = vld [vmem:[#allocation12 + $0x150] ss:$8 sps:$4 sm:$0xff]  }
0x171d   :  { %6849 = vmatpush1.bf16.msra.mxu1 %v9861_v7  ;;  %v9911_v7 = vld [vmem:[#allocation12 + $0x164] ss:$8 sps:$4 sm:$0xff]  }
0x171e   :  { %6850 = vmatprep.subr.bf16.mxu1 %v9866_v56  ;;  %v9909_v56 = vld [vmem:[#allocation12 + $0x160] ss:$8 sps:$4 sm:$0xff]  }
0x1721   :  { %6851 = vmatpush1.bf16.msra.mxu1 %v9864_v18 }
0x1722   :  { %6852 = vmatprep.subr.bf16.mxu1 %v9869_v43 }
0x1725   :  { %6853 = vmatpush1.bf16.msra.mxu1 %v9867_v6 }
0x1726   :  { %6854 = vmatprep.subr.bf16.mxu1 %v9872_v57 }
0x1729   :  { %6855 = vmatpush1.bf16.msra.mxu1 %v9870_v52 }
0x172a   :  { %6856 = vmatprep.subr.bf16.mxu1 %v9875_v9 }
0x172d   :  { %6857 = vmatpush1.bf16.msra.mxu1 %v9873_v4 }
0x172e   :  { %6858 = vmatprep.subr.bf16.mxu1 %v9878_v10 }
0x1731   :  { %6859 = vmatpush1.bf16.msra.mxu1 %v9876_v27 }
0x1732   :  { %6860 = vmatprep.subr.bf16.mxu1 %v9881_v48 }
0x1735   :  { %6861 = vmatpush1.bf16.msra.mxu1 %v9879_v21 }
0x1736   :  { %6862 = vmatprep.subr.bf16.mxu1 %v9884_v47 }
0x1739   :  { %6863 = vmatpush1.bf16.msra.mxu1 %v9882_v34 }
0x173a   :  { %6864 = vmatprep.subr.bf16.mxu1 %v9887_v0 }
0x173d   :  { %6865 = vmatpush1.bf16.msra.mxu1 %v9885_v13 }
0x173e   :  { %6866 = vmatprep.subr.bf16.mxu1 %v9890_v42 }
0x1741   :  { %6867 = vmatpush1.bf16.msra.mxu1 %v9888_v32 }
0x1744   :  { %6869 = vmatmul.mubr.bf16.vlgmr.msra.gmra.mrb[128].mxu1 %v6381_v5 }
0x1745   :  { %6878 = vmatprep.mubr.bf16.mxu1 %v6386_v46 }
0x174c   :  { %6879 = vmatmul.mubr.bf16.gmra.mrb[132].mxu1 %v6385_v51  ;;  %v9894_v51 = vld [vmem:[#allocation12 + $0x110] ss:$8 sps:$4 sm:$0xff]  }
0x174d   :  { %7253 = vmatpush1.bf16.msra.mxu0 %v9894_v51 }
0x174e   :  { %7254 = vmatprep.subr.bf16.mxu0 %v9899_v60 }
0x1817   :  { %v6870_v31 = vpop.f32.mrb[128].mxu1 }
0x1818   :  { %v6872_v53 = vpop.f32.mrb[129].mxu1  ;;  %v9026_v39 = vadd.f32 %v6870_v31, %v6456_v35 }
0x1819   :  { %v6874_v24 = vpop.f32.mrb[130].mxu1  ;;  %v9027_v54 = vadd.f32 %v6872_v53, %v6460_v49 }
0x181a   :  { %v9028_v12 = vadd.f32 %v6874_v24, %v6456_v35  ;;  %v6876_v20 = vpop.f32.mrb[131].mxu1  ;;  %v6889_v8 = vadd.f32 %v9026_v39, %v11876_v29 }
0x181b   :  { %v9029_v44 = vadd.f32 %v6876_v20, %v6460_v49  ;;  %v6890_v5 = vadd.f32 %v9027_v54, %v11872_v19 }
0x181c   :  { %v6891_v58 = vadd.f32 %v9028_v12, %v11878_v59 }
0x181d   :  { %v6892_v11 = vadd.f32 %v9029_v44, %v11874_v63  ;;  %v6899_v36 = vadd.f32 %v6890_v5, %v6889_v8 }
0x181f   :  { %v6880_v28 = vpop.f32.mrb[132].mxu1  ;;  %v6902_v2 = vadd.f32 %v6892_v11, %v6891_v58 }
0x1820   :  { %v6882_v26 = vpop.f32.mrb[133].mxu1  ;;  %v9030_v38 = vadd.f32 %v6880_v28, %v6456_v35  ;;  %v9920_v28 = vld [vmem:[#allocation12 + $0x194] ss:$8 sps:$4 sm:$0xff]  }
0x1821   :  { %v6884_v17 = vpop.f32.mrb[134].mxu1  ;;  %6903 = vadd.xlane.f32.xlu1 %v6902_v2  ;;  %v9031_v37 = vadd.f32 %v6882_v26, %v6460_v49  ;;  %v9918_v2 = vld [vmem:[#allocation12 + $0x190] ss:$8 sps:$4 sm:$0xff]   ;;  %v9923_v26 = vld [vmem:[#allocation12 + $0x1a4] ss:$8 sps:$4 sm:$0xff]  }
0x1822   :  { %v9032_v30 = vadd.f32 %v6884_v17, %v6456_v35  ;;  %v6886_v15 = vpop.f32.mrb[135].mxu1  ;;  %v6893_v63 = vadd.f32 %v9030_v38, %v11892_v45  ;;  %v9900_v45 = vld [vmem:[#allocation12 + $0x130] ss:$8 sps:$4 sm:$0xff]   ;;  %v9921_v17 = vld [vmem:[#allocation12 + $0x1a0] ss:$8 sps:$4 sm:$0xff]  }
0x1823   :  { %v9033_v22 = vadd.f32 %v6886_v15, %v6460_v49  ;;  %v6894_v19 = vadd.f32 %v9031_v37, %v11888_v25  ;;  %v9905_v25 = vld [vmem:[#allocation12 + $0x144] ss:$8 sps:$4 sm:$0xff]   ;;  %v9924_v15 = vld [vmem:[#allocation12 + $0x1b0] ss:$8 sps:$4 sm:$0xff]   ;;  %v9927_v37 = vld [vmem:[#allocation12 + $0x1c0] ss:$8 sps:$4 sm:$0xff]  }
0x1824   :  { %v6895_v55 = vadd.f32 %v9032_v30, %v11894_v1  ;;  %v9897_v1 = vld [vmem:[#allocation12 + $0x120] ss:$8 sps:$4 sm:$0xff]   ;;  %v9926_v30 = vld [vmem:[#allocation12 + $0x1b4] ss:$8 sps:$4 sm:$0xff]   ;;  %v9929_v38 = vld [vmem:[#allocation12 + $0x1c4] ss:$8 sps:$4 sm:$0xff]  }
0x1825   :  { %v6896_v59 = vadd.f32 %v9033_v22, %v11890_v14  ;;  %6900 = vadd.xlane.f32.xlu1 %v6899_v36  ;;  %v6905_v46 = vadd.f32 %v6894_v19, %v6893_v63  ;;  %v9902_v14 = vld [vmem:[#allocation12 + $0x134] ss:$8 sps:$4 sm:$0xff]   ;;  %7255 = vmatpush1.bf16.msra.mxu0 %v9897_v1  ;;  %v9930_v36 = vld [vmem:[#allocation12 + $0x1d0] ss:$8 sps:$4 sm:$0xff]  }
0x1826   :  { %7256 = vmatprep.subr.bf16.mxu0 %v9902_v14  ;;  %v9932_v22 = vld [vmem:[#allocation12 + $0x1d4] ss:$8 sps:$4 sm:$0xff]  }
0x1827   :  { %v6908_v29 = vadd.f32 %v6896_v59, %v6895_v55 }
0x1829   :  { %6909 = vadd.xlane.f32.xlu0 %v6908_v29  ;;  %7257 = vmatpush1.bf16.msra.mxu0 %v9900_v45  ;;  %v9941_v29 = vld [vmem:[#allocation12 + $0x4] ss:$8 sps:$4 sm:$0xff]  }
0x182a   :  { %7258 = vmatprep.subr.bf16.mxu0 %v9905_v25 }
0x182d   :  { %6906 = vadd.xlane.f32.xlu0 %v6905_v46  ;;  %7259 = vmatpush1.bf16.msra.mxu0 %v9903_v33  ;;  %v6897_v33 = vld [vmem:[%s12200_s30] sm:$0x3] }
0x182e   :  { %7260 = vmatprep.subr.bf16.mxu0 %v9908_v3 }
0x1831   :  { %7261 = vmatpush1.bf16.msra.mxu0 %v9906_v40 }
0x1832   :  { %7262 = vmatprep.subr.bf16.mxu0 %v9911_v7 }
0x1835   :  { %7263 = vmatpush1.bf16.msra.mxu0 %v9909_v56  ;;  %v6967_v56 = vrot.slane %v6897_v33, %v10877_v62 }
0x18ae   :  { %v6904_v18 = vpop.xlane.xlu1 %6903 }
0x18af   :  { %v6912_v43 = vmul.f32 0.00390625, %v6904_v18  ;;  %v6898_v18 = vld [vmem:[%s12201_s7] sm:$0x3] }
0x18b1   :  { %v12049_v6 = vsub.f32 %v6891_v58, %v6912_v43  ;;  %v12051_v57 = vsub.f32 %v6892_v11, %v6912_v43  ;;  %v9914_v58 = vld [vmem:[#allocation12 + $0x174] ss:$8 sps:$4 sm:$0xff]   ;;  %v9912_v11 = vld [vmem:[#allocation12 + $0x170] ss:$8 sps:$4 sm:$0xff]  }
0x18b2   :  { %v6901_v52 = vpop.xlane.xlu1 %6900  ;;  %7264 = vmatprep.subr.bf16.mxu0 %v9914_v58 }
0x18b3   :  { %v6911_v9 = vmul.f32 0.00390625, %v6901_v52  ;;  %v6925_v4 = vmul.f32 %v12049_v6, %v12049_v6  ;;  %v6926_v10 = vmul.f32 %v12051_v57, %v12051_v57  ;;  %7265 = vmatpush1.bf16.msra.mxu0 %v9912_v11 }
0x18b5   :  { %v12057_v27 = vsub.f32 %v6889_v8, %v6911_v9  ;;  %v12059_v48 = vsub.f32 %v6890_v5, %v6911_v9  ;;  %v6934_v21 = vadd.f32 %v6926_v10, %v6925_v4  ;;  %v9917_v8 = vld [vmem:[#allocation12 + $0x184] ss:$8 sps:$4 sm:$0xff]   ;;  %v9915_v5 = vld [vmem:[#allocation12 + $0x180] ss:$8 sps:$4 sm:$0xff]   ;;  %v6971_v9 = vrot.slane %v6897_v33, %v10874_v61 }
0x18b6   :  { %v6910_v47 = vpop.xlane.xlu0 %6909  ;;  %7266 = vmatprep.subr.bf16.mxu0 %v9917_v8  ;;  %v6986_v10 = vrot.slane %v6898_v18, %v10877_v62 }
0x18b7   :  { %v6914_v34 = vmul.f32 0.00390625, %v6910_v47  ;;  %6935 = vadd.xlane.f32.xlu1 %v6934_v21  ;;  %v6923_v0 = vmul.f32 %v12057_v27, %v12057_v27  ;;  %v6924_v13 = vmul.f32 %v12059_v48, %v12059_v48  ;;  %7267 = vmatpush1.bf16.msra.mxu0 %v9915_v5 }
0x18b8   :  { %7268 = vmatprep.subr.bf16.mxu0 %v9920_v28 }
0x18b9   :  { %v12065_v42 = vsub.f32 %v6895_v55, %v6914_v34  ;;  %v12067_v32 = vsub.f32 %v6896_v59, %v6914_v34  ;;  %v6931_v50 = vadd.f32 %v6924_v13, %v6923_v0  ;;  %v9935_v55 = vld [vmem:[#allocation12 + $0x1e4] ss:$8 sps:$4 sm:$0xff]   ;;  %v9933_v59 = vld [vmem:[#allocation12 + $0x1e0] ss:$8 sps:$4 sm:$0xff]   ;;  %v6990_v13 = vrot.slane %v6898_v18, %v10874_v61 }
0x18ba   :  { %v6907_v35 = vpop.xlane.xlu0 %6906  ;;  %v9945_v18 = vld [vmem:[#allocation12 + $0x20] ss:$8 sps:$4 sm:$0xff]  }
0x18bb   :  { %v6913_v31 = vmul.f32 0.00390625, %v6907_v35  ;;  %6932 = vadd.xlane.f32.xlu1 %v6931_v50  ;;  %v6929_v49 = vmul.f32 %v12065_v42, %v12065_v42  ;;  %v6930_v53 = vmul.f32 %v12067_v32, %v12067_v32  ;;  %7269 = vmatpush1.bf16.msra.mxu0 %v9918_v2 }
0x18bc   :  { %7270 = vmatprep.subr.bf16.mxu0 %v9923_v26 }
0x18bd   :  { %v12073_v24 = vsub.f32 %v6893_v63, %v6913_v31  ;;  %v12075_v12 = vsub.f32 %v6894_v19, %v6913_v31  ;;  %v6940_v20 = vadd.f32 %v6930_v53, %v6929_v49  ;;  %v9938_v63 = vld [vmem:[#allocation12 + $0x1f4] ss:$8 sps:$4 sm:$0xff]   ;;  %v9936_v19 = vld [vmem:[#allocation12 + $0x1f0] ss:$8 sps:$4 sm:$0xff]  }
0x18bf   :  { %6941 = vadd.xlane.f32.xlu0 %v6940_v20  ;;  %v6927_v39 = vmul.f32 %v12073_v24, %v12073_v24  ;;  %v6928_v54 = vmul.f32 %v12075_v12, %v12075_v12  ;;  %7271 = vmatpush1.bf16.msra.mxu0 %v9921_v17 }
0x18c0   :  { %7272 = vmatprep.subr.bf16.mxu0 %v9926_v30 }
0x18c1   :  { %v6937_v44 = vadd.f32 %v6928_v54, %v6927_v39 }
0x18c3   :  { %6938 = vadd.xlane.f32.xlu0 %v6937_v44  ;;  %7273 = vmatpush1.bf16.msra.mxu0 %v9924_v15 }
0x18c4   :  { %7274 = vmatprep.subr.bf16.mxu0 %v9929_v38 }
0x18c7   :  { %7275 = vmatpush1.bf16.msra.mxu0 %v9927_v37 }
0x18c8   :  { %7276 = vmatprep.subr.bf16.mxu0 %v9932_v22 }
0x18cb   :  { %7277 = vmatpush1.bf16.msra.mxu0 %v9930_v36 }
0x18cc   :  { %7278 = vmatprep.subr.bf16.mxu0 %v9935_v55 }
0x18cf   :  { %7279 = vmatpush1.bf16.msra.mxu0 %v9933_v59 }
0x18d0   :  { %7280 = vmatprep.subr.bf16.mxu0 %v9938_v63 }
0x18d3   :  { %7281 = vmatpush1.bf16.msra.mxu0 %v9936_v19 }
0x18d4   :  { %7467 = vmatprep.subr.bf16.mxu0 %v9941_v29 }
0x1944   :  { %v6936_v46 = vpop.xlane.xlu1 %6935 }
0x1945   :  { %v6944_v16 = vmul.f32 0.00390625, %v6936_v46 }
0x1947   :  { %v6948_v41 = vadd.f32 1e-12, %v6944_v16 }
0x1948   :  { %v6933_v23 = vpop.xlane.xlu1 %6932 }
0x1949   :  { %10211 = vrsqrt.f32 %v6948_v41  ;;  %v6943_v51 = vmul.f32 0.00390625, %v6933_v23  ;;  %v9939_v23 = vld [vmem:[#allocation12] ss:$8 sps:$4 sm:$0xff]  }
0x194b   :  { %v6947_v60 = vadd.f32 1e-12, %v6943_v51 }
0x194c   :  { %v6942_v1 = vpop.xlane.xlu0 %6941 }
0x194d   :  { %10213 = vrsqrt.f32 %v6947_v60  ;;  %v6946_v14 = vmul.f32 0.00390625, %v6942_v1  ;;  %v9944_v60 = vld [vmem:[#allocation12 + $0x14] ss:$8 sps:$4 sm:$0xff]  }
0x194f   :  { %v6950_v45 = vadd.f32 1e-12, %v6946_v14 }
0x1950   :  { %v6939_v25 = vpop.xlane.xlu0 %6938 }
0x1951   :  { %10215 = vrsqrt.f32 %v6950_v45  ;;  %v6945_v3 = vmul.f32 0.00390625, %v6939_v25 }
0x1953   :  { %v10212_v40 = vpop.eup %10211  ;;  %v6949_v7 = vadd.f32 1e-12, %v6945_v3 }
0x1954   :  { %v6957_v43 = vmul.f32 %v10212_v40, %v12049_v6  ;;  %v6958_v52 = vmul.f32 %v10212_v40, %v12051_v57  ;;  %v9942_v40 = vld [vmem:[#allocation12 + $0x10] ss:$8 sps:$4 sm:$0xff]  }
0x1955   :  { %10217 = vrsqrt.f32 %v6949_v7 }
0x1956   :  { %v6976_v47 = vmul.f32 %v6967_v56, %v6957_v43  ;;  %v6977_v0 = vmul.f32 %v6971_v9, %v6958_v52  ;;  %v9950_v43 = vld [vmem:[#allocation12 + $0x34] ss:$8 sps:$4 sm:$0xff]   ;;  %v9948_v52 = vld [vmem:[#allocation12 + $0x30] ss:$8 sps:$4 sm:$0xff]  }
0x1957   :  { %v10214_v4 = vpop.eup %10213 }
0x1958   :  { %v6955_v21 = vmul.f32 %v10214_v4, %v12057_v27  ;;  %v6956_v34 = vmul.f32 %v10214_v4, %v12059_v48  ;;  %v6995_v31 = vadd.f32 %v6986_v10, %v6976_v47  ;;  %v6996_v49 = vadd.f32 %v6990_v13, %v6977_v0  ;;  %v9951_v4 = vld [vmem:[#allocation12 + $0x40] ss:$8 sps:$4 sm:$0xff]   ;;  %v9959_v47 = vld [vmem:[#allocation12 + $0x64] ss:$8 sps:$4 sm:$0xff]   ;;  %v9962_v0 = vld [vmem:[#allocation12 + $0x74] ss:$8 sps:$4 sm:$0xff]  }
0x195a   :  { %v6974_v50 = vmul.f32 %v6967_v56, %v6955_v21  ;;  %v6975_v53 = vmul.f32 %v6971_v9, %v6956_v34  ;;  %v7069_v8 = vpack.c.bf16 %v6995_v31, %v6995_v31  ;;  %v7070_v5 = vpack.c.bf16 %v6996_v49, %v6996_v49  ;;  %v9954_v21 = vld [vmem:[#allocation12 + $0x50] ss:$8 sps:$4 sm:$0xff]   ;;  %v9957_v34 = vld [vmem:[#allocation12 + $0x60] ss:$8 sps:$4 sm:$0xff]   ;;  %v9971_v31 = vld [vmem:[#allocation12 + $0xa4] ss:$8 sps:$4 sm:$0xff]  }
0x195b   :  { %v10216_v35 = vpop.eup %10215  ;;  %v9969_v49 = vld [vmem:[#allocation12 + $0xa0] ss:$8 sps:$4 sm:$0xff]  }
0x195c   :  { %v6961_v6 = vmul.f32 %v10216_v35, %v12065_v42  ;;  %v6962_v57 = vmul.f32 %v10216_v35, %v12067_v32  ;;  %v6993_v20 = vadd.f32 %v6986_v10, %v6974_v50  ;;  %v6994_v28 = vadd.f32 %v6990_v13, %v6975_v53  ;;  %v9965_v50 = vld [vmem:[#allocation12 + $0x84] ss:$8 sps:$4 sm:$0xff]   ;;  %v9963_v35 = vld [vmem:[#allocation12 + $0x80] ss:$8 sps:$4 sm:$0xff]   ;;  %v9974_v53 = vld [vmem:[#allocation12 + $0xb4] ss:$8 sps:$4 sm:$0xff]  }
0x195d   :  { %v7078_v37 = vunpack.c.l.b16 %v7070_v5  ;;  %v7077_v22 = vunpack.c.l.b16 %v7069_v8  ;;  %v9984_v8 = vld [vmem:[#allocation12 + $0xf0] ss:$8 sps:$4 sm:$0xff]  }
0x195e   :  { %v6980_v39 = vmul.f32 %v6967_v56, %v6961_v6  ;;  %v6981_v54 = vmul.f32 %v6971_v9, %v6962_v57  ;;  %v7066_v36 = vpack.c.bf16 %v6994_v28, %v6994_v28  ;;  %v7065_v55 = vpack.c.bf16 %v6993_v20, %v6993_v20  ;;  %v9968_v6 = vld [vmem:[#allocation12 + $0x94] ss:$8 sps:$4 sm:$0xff]   ;;  %v9966_v57 = vld [vmem:[#allocation12 + $0x90] ss:$8 sps:$4 sm:$0xff]  }
0x195f   :  { %v10218_v44 = vpop.eup %10217  ;;  %v9972_v20 = vld [vmem:[#allocation12 + $0xb0] ss:$8 sps:$4 sm:$0xff]  }
0x1960   :  { %v6999_v27 = vadd.f32 %v6986_v10, %v6980_v39  ;;  %v6959_v58 = vmul.f32 %v10218_v44, %v12073_v24  ;;  %v6960_v48 = vmul.f32 %v10218_v44, %v12075_v12  ;;  %v7000_v11 = vadd.f32 %v6990_v13, %v6981_v54  ;;  %v9977_v39 = vld [vmem:[#allocation12 + $0xc4] ss:$8 sps:$4 sm:$0xff]   ;;  %v9975_v54 = vld [vmem:[#allocation12 + $0xc0] ss:$8 sps:$4 sm:$0xff]   ;;  %v9980_v44 = vld [vmem:[#allocation12 + $0xd4] ss:$8 sps:$4 sm:$0xff]  }
0x1961   :  { %v7296_v1 = vunpack.c.l.b16 %v7066_v36  ;;  %v7295_v45 = vunpack.c.l.b16 %v7065_v55 }
0x1962   :  { %v7071_v2 = vpack.c.bf16 %v6999_v27, %v6999_v27  ;;  %v6978_v42 = vmul.f32 %v6967_v56, %v6959_v58  ;;  %v7072_v26 = vpack.c.bf16 %v7000_v11, %v7000_v11  ;;  %v6979_v32 = vmul.f32 %v6971_v9, %v6960_v48  ;;  %v9947_v56 = vld [vmem:[#allocation12 + $0x24] ss:$8 sps:$4 sm:$0xff]   ;;  %v9978_v27 = vld [vmem:[#allocation12 + $0xd0] ss:$8 sps:$4 sm:$0xff]   ;;  %v9981_v48 = vld [vmem:[#allocation12 + $0xe0] ss:$8 sps:$4 sm:$0xff]  }
0x1963   :  { %v9953_v9 = vld [vmem:[#allocation12 + $0x44] ss:$8 sps:$4 sm:$0xff]   ;;  %v9986_v11 = vld [vmem:[#allocation12 + $0xf4] ss:$8 sps:$4 sm:$0xff]  }
0x1964   :  { %v7080_v17 = vunpack.c.l.b16 %v7072_v26  ;;  %v7079_v30 = vunpack.c.l.b16 %v7071_v2  ;;  %v6998_v15 = vadd.f32 %v6990_v13, %v6979_v32  ;;  %v6997_v38 = vadd.f32 %v6986_v10, %v6978_v42  ;;  %v9956_v10 = vld [vmem:[#allocation12 + $0x54] ss:$8 sps:$4 sm:$0xff]   ;;  %v9960_v13 = vld [vmem:[#allocation12 + $0x70] ss:$8 sps:$4 sm:$0xff]   ;;  %v9983_v58 = vld [vmem:[#allocation12 + $0xe4] ss:$8 sps:$4 sm:$0xff]  }
0x1965   :  { %v7508_v32 = vld [vmem:[%s12202_s10] sm:$0x3] }
0x1966   :  { %v7084_v24 = vrot.slane %v7080_v17, 7  ;;  %v7081_v59 = vrot.slane %v7079_v30, 7  ;;  %v7068_v12 = vpack.c.bf16 %v6998_v15, %v6998_v15  ;;  %v7067_v63 = vpack.c.bf16 %v6997_v38, %v6997_v38 }
0x1967   :  { %v7513_v17 = vrot.slane %v7508_v32, %v10877_v62  ;;  %v7517_v15 = vrot.slane %v7508_v32, %v10874_v61 }
0x1968   :  { %v7085_v19 = vsel %vm7082_vm3, %v7084_v24, %v7078_v37  ;;  %v7083_v29 = vsel %vm7082_vm3, %v7081_v59, %v7077_v22  ;;  %v7298_v46 = vunpack.c.l.b16 %v7068_v12  ;;  %v7297_v16 = vunpack.c.l.b16 %v7067_v63 }
0x1969   :  { %v7087_v41 = vpack.c.b16 %v7085_v19, %v7085_v19  ;;  %v7086_v51 = vpack.c.b16 %v7083_v29, %v7083_v29 }
0x196a   :  { %v7301_v14 = vrot.slane %v7298_v46, 7  ;;  %v7299_v25 = vrot.slane %v7297_v16, 7  ;;  %v9987_v16 = vld [vmem:[%s12203_s11] ss:$8 sps:$4 sm:$0xff]  }
0x196b   :  { %7282 = vmatprep.mubr.bf16.mxu0 %v7087_v41  ;;  %v9989_v41 = vld [vmem:[%s12203_s11 + $0x4] ss:$8 sps:$4 sm:$0xff]  }
0x196c   :  { %7283 = vmatmul.mubr.bf16.vlgmr.msra.gmra.mrb[104].mxu0 %v7086_v51  ;;  %v7302_v33 = vsel %vm7082_vm3, %v7301_v14, %v7296_v1  ;;  %v12099_v3 = vsel %vm7082_vm3, %v7299_v25, %v7295_v45  ;;  %7779 = vmatprep.subr.bf16.mxu1 %v9989_v41  ;;  %v9990_v51 = vld [vmem:[%s12203_s11 + $0x10] ss:$8 sps:$4 sm:$0xff]   ;;  %v9993_v1 = vld [vmem:[%s12203_s11 + $0x20] ss:$8 sps:$4 sm:$0xff]   ;;  %v9998_v14 = vld [vmem:[%s12203_s11 + $0x34] ss:$8 sps:$4 sm:$0xff]  }
0x196d   :  { %7468 = vmatpush1.bf16.msra.mxu0 %v9939_v23  ;;  %v7304_v7 = vpack.c.b16 %v7302_v33, %v7302_v33  ;;  %v7303_v5 = vpack.c.b16 %v12099_v3, %v12099_v3  ;;  %v9992_v23 = vld [vmem:[%s12203_s11 + $0x14] ss:$8 sps:$4 sm:$0xff]   ;;  %7780 = vmatpush1.bf16.msra.mxu1 %v9987_v16  ;;  %v9996_v45 = vld [vmem:[%s12203_s11 + $0x30] ss:$8 sps:$4 sm:$0xff]   ;;  %v10001_v25 = vld [vmem:[%s12203_s11 + $0x44] ss:$8 sps:$4 sm:$0xff]  }
0x196e   :  { %7469 = vmatprep.subr.bf16.mxu0 %v9944_v60  ;;  %7781 = vmatprep.subr.bf16.mxu1 %v9992_v23  ;;  %v9995_v60 = vld [vmem:[%s12203_s11 + $0x24] ss:$8 sps:$4 sm:$0xff]   ;;  %v9999_v33 = vld [vmem:[%s12203_s11 + $0x40] ss:$8 sps:$4 sm:$0xff]   ;;  %v10004_v3 = vld [vmem:[%s12203_s11 + $0x54] ss:$8 sps:$4 sm:$0xff]  }
0x196f   :  { %7499 = vmatprep.mubr.bf16.mxu0 %v7304_v7  ;;  %v10007_v7 = vld [vmem:[%s12203_s11 + $0x64] ss:$8 sps:$4 sm:$0xff]  }
0x1971   :  { %7470 = vmatpush1.bf16.msra.mxu0 %v9942_v40  ;;  %7782 = vmatpush1.bf16.msra.mxu1 %v9990_v51  ;;  %v10002_v40 = vld [vmem:[%s12203_s11 + $0x50] ss:$8 sps:$4 sm:$0xff]  }
0x1972   :  { %7471 = vmatprep.subr.bf16.mxu0 %v9947_v56  ;;  %7783 = vmatprep.subr.bf16.mxu1 %v9995_v60  ;;  %v10005_v56 = vld [vmem:[%s12203_s11 + $0x60] ss:$8 sps:$4 sm:$0xff]  }
0x1975   :  { %7472 = vmatpush1.bf16.msra.mxu0 %v9945_v18  ;;  %7784 = vmatpush1.bf16.msra.mxu1 %v9993_v1  ;;  %v10010_v18 = vld [vmem:[%s12203_s11 + $0x74] ss:$8 sps:$4 sm:$0xff]  }
0x1976   :  { %7473 = vmatprep.subr.bf16.mxu0 %v9950_v43  ;;  %7785 = vmatprep.subr.bf16.mxu1 %v9998_v14  ;;  %v10008_v43 = vld [vmem:[%s12203_s11 + $0x70] ss:$8 sps:$4 sm:$0xff]  }
0x1979   :  { %7474 = vmatpush1.bf16.msra.mxu0 %v9948_v52  ;;  %7786 = vmatpush1.bf16.msra.mxu1 %v9996_v45  ;;  %v10013_v52 = vld [vmem:[%s12203_s11 + $0x84] ss:$8 sps:$4 sm:$0xff]  }
0x197a   :  { %7475 = vmatprep.subr.bf16.mxu0 %v9953_v9  ;;  %7787 = vmatprep.subr.bf16.mxu1 %v10001_v25  ;;  %v10011_v9 = vld [vmem:[%s12203_s11 + $0x80] ss:$8 sps:$4 sm:$0xff]  }
0x197d   :  { %7476 = vmatpush1.bf16.msra.mxu0 %v9951_v4  ;;  %7788 = vmatpush1.bf16.msra.mxu1 %v9999_v33  ;;  %v10016_v4 = vld [vmem:[%s12203_s11 + $0x94] ss:$8 sps:$4 sm:$0xff]  }
0x197e   :  { %7477 = vmatprep.subr.bf16.mxu0 %v9956_v10  ;;  %7789 = vmatprep.subr.bf16.mxu1 %v10004_v3  ;;  %v10014_v10 = vld [vmem:[%s12203_s11 + $0x90] ss:$8 sps:$4 sm:$0xff]  }
0x1981   :  { %7478 = vmatpush1.bf16.msra.mxu0 %v9954_v21  ;;  %7790 = vmatpush1.bf16.msra.mxu1 %v10002_v40  ;;  %v10035_v40 = vld [vmem:[#allocation13 + $0x40] sm:$0xff]  }
0x1982   :  { %7479 = vmatprep.subr.bf16.mxu0 %v9959_v47  ;;  %7791 = vmatprep.subr.bf16.mxu1 %v10007_v7  ;;  %v10036_v7 = vld [vmem:[#allocation13] sm:$0xff]  }
0x1985   :  { %7480 = vmatpush1.bf16.msra.mxu0 %v9957_v34  ;;  %7792 = vmatpush1.bf16.msra.mxu1 %v10005_v56  ;;  %v10037_v56 = vld [vmem:[#allocation13 + $0x48] sm:$0xff]  }
0x1986   :  { %7481 = vmatprep.subr.bf16.mxu0 %v9962_v0  ;;  %7793 = vmatprep.subr.bf16.mxu1 %v10010_v18  ;;  %v10038_v18 = vld [vmem:[#allocation13 + $0x8] sm:$0xff]  }
0x1989   :  { %7482 = vmatpush1.bf16.msra.mxu0 %v9960_v13  ;;  %7794 = vmatpush1.bf16.msra.mxu1 %v10008_v43 }
0x198a   :  { %7483 = vmatprep.subr.bf16.mxu0 %v9965_v50  ;;  %7795 = vmatprep.subr.bf16.mxu1 %v10013_v52 }
0x198d   :  { %7484 = vmatpush1.bf16.msra.mxu0 %v9963_v35  ;;  %7796 = vmatpush1.bf16.msra.mxu1 %v10011_v9 }
0x198e   :  { %7485 = vmatprep.subr.bf16.mxu0 %v9968_v6  ;;  %7797 = vmatprep.subr.bf16.mxu1 %v10016_v4 }
0x1991   :  { %7486 = vmatpush1.bf16.msra.mxu0 %v9966_v57  ;;  %7798 = vmatpush1.bf16.msra.mxu1 %v10014_v10 }
0x1992   :  { %7487 = vmatprep.subr.bf16.mxu0 %v9971_v31  ;;  %v10019_v31 = vld [vmem:[%s12203_s11 + $0xa4] ss:$8 sps:$4 sm:$0xff]  }
0x1993   :  { %7799 = vmatprep.subr.bf16.mxu1 %v10019_v31  ;;  %v10044_v31 = vld [vmem:[#allocation13 + $0x20] sm:$0xff]  }
0x1995   :  { %7488 = vmatpush1.bf16.msra.mxu0 %v9969_v49  ;;  %v10017_v49 = vld [vmem:[%s12203_s11 + $0xa0] ss:$8 sps:$4 sm:$0xff]  }
0x1996   :  { %7489 = vmatprep.subr.bf16.mxu0 %v9974_v53  ;;  %7800 = vmatpush1.bf16.msra.mxu1 %v10017_v49  ;;  %v10022_v53 = vld [vmem:[%s12203_s11 + $0xb4] ss:$8 sps:$4 sm:$0xff]   ;;  %v10045_v49 = vld [vmem:[#allocation13 + $0x68] sm:$0xff]  }
0x1997   :  { %7801 = vmatprep.subr.bf16.mxu1 %v10022_v53  ;;  %v10046_v53 = vld [vmem:[#allocation13 + $0x28] sm:$0xff]  }
0x1999   :  { %7490 = vmatpush1.bf16.msra.mxu0 %v9972_v20  ;;  %v10020_v20 = vld [vmem:[%s12203_s11 + $0xb0] ss:$8 sps:$4 sm:$0xff]  }
0x199a   :  { %7491 = vmatprep.subr.bf16.mxu0 %v9977_v39  ;;  %v10025_v39 = vld [vmem:[%s12203_s11 + $0xc4] ss:$8 sps:$4 sm:$0xff]   ;;  %7802 = vmatpush1.bf16.msra.mxu1 %v10020_v20  ;;  %v10047_v20 = vld [vmem:[#allocation13 + $0x70] sm:$0xff]  }
0x199b   :  { %7803 = vmatprep.subr.bf16.mxu1 %v10025_v39  ;;  %v10048_v39 = vld [vmem:[#allocation13 + $0x30] sm:$0xff]  }
0x199d   :  { %7492 = vmatpush1.bf16.msra.mxu0 %v9975_v54  ;;  %v10023_v54 = vld [vmem:[%s12203_s11 + $0xc0] ss:$8 sps:$4 sm:$0xff]  }
0x199e   :  { %7493 = vmatprep.subr.bf16.mxu0 %v9980_v44  ;;  %v10028_v44 = vld [vmem:[%s12203_s11 + $0xd4] ss:$8 sps:$4 sm:$0xff]   ;;  %7804 = vmatpush1.bf16.msra.mxu1 %v10023_v54 }
0x199f   :  { %7805 = vmatprep.subr.bf16.mxu1 %v10028_v44  ;;  %v10049_v54 = vld [vmem:[#allocation13 + $0x78] sm:$0xff]  }
0x19a0   :  { %v10050_v44 = vld [vmem:[#allocation13 + $0x38] sm:$0xff]  }
0x19a1   :  { %7494 = vmatpush1.bf16.msra.mxu0 %v9978_v27  ;;  %v10026_v27 = vld [vmem:[%s12203_s11 + $0xd0] ss:$8 sps:$4 sm:$0xff]  }
0x19a2   :  { %7495 = vmatprep.subr.bf16.mxu0 %v9983_v58  ;;  %v10031_v58 = vld [vmem:[%s12203_s11 + $0xe4] ss:$8 sps:$4 sm:$0xff]   ;;  %7806 = vmatpush1.bf16.msra.mxu1 %v10026_v27 }
0x19a3   :  { %7807 = vmatprep.subr.bf16.mxu1 %v10031_v58 }
0x19a5   :  { %7496 = vmatpush1.bf16.msra.mxu0 %v9981_v48  ;;  %v10029_v48 = vld [vmem:[%s12203_s11 + $0xe0] ss:$8 sps:$4 sm:$0xff]  }
0x19a6   :  { %7497 = vmatprep.subr.bf16.mxu0 %v9986_v11  ;;  %v10034_v11 = vld [vmem:[%s12203_s11 + $0xf4] ss:$8 sps:$4 sm:$0xff]   ;;  %7808 = vmatpush1.bf16.msra.mxu1 %v10029_v48 }
0x19a7   :  { %7809 = vmatprep.subr.bf16.mxu1 %v10034_v11  ;;  %v7822_v11 = vld [vmem:[%s12207_s12] sm:$0x3] }
0x19a9   :  { %7498 = vmatpush1.bf16.msra.mxu0 %v9984_v8  ;;  %v10032_v8 = vld [vmem:[%s12203_s11 + $0xf0] ss:$8 sps:$4 sm:$0xff]  }
0x19aa   :  { %7810 = vmatpush1.bf16.msra.mxu1 %v10032_v8  ;;  %8804 = vmatprep.subr.bf16.mxu0 %v10035_v40  ;;  %v7823_v8 = vld [vmem:[%s10655_s20] sm:$0x3] }
0x19ac   :  { %7500 = vmatmul.mubr.bf16.vlgmr.msra.gmra.mrb[108].mxu0 %v7303_v5 }
0x19ad   :  { %8805 = vmatpush3.bf16.msra.mxu0 %v10036_v7 }
0x19ae   :  { %8806 = vmatprep.subr.bf16.mxu0 %v10037_v56 }
0x19b1   :  { %8807 = vmatpush3.bf16.msra.mxu0 %v10038_v18 }
0x1a3f   :  { %v7284_v28 = vpop.f32.mrb[104].mxu0 }
0x1a40   :  { %v7286_v2 = vpop.f32.mrb[105].mxu0 }
0x1a41   :  { %v7288_v42 = vpop.f32.mrb[106].mxu0 }
0x1a42   :  { %v7289_v26 = vpop.f32.mrb[107].mxu0  ;;  %v7524_v42 = vld [vmem:[%s12204_s27] sm:$0x3] }
0x1a43   :  { %v7525_v26 = vld [vmem:[%s12205_s15] sm:$0x3]  ;;  %v7551_v32 = vrot.slane %v7524_v42, %v10877_v62 }
0x1a7f   :  { %v7501_v30 = vpop.f32.mrb[108].mxu0 }
0x1a80   :  { %v7502_v38 = vadd.f32 %v7501_v30, %v7284_v28  ;;  %v7503_v37 = vpop.f32.mrb[109].mxu0 }
0x1a81   :  { %v7504_v22 = vadd.f32 %v7503_v37, %v7286_v2  ;;  %v7505_v36 = vpop.f32.mrb[110].mxu0  ;;  %v7564_v37 = vrot.slane %v7525_v26, %v10877_v62 }
0x1a82   :  { %v7520_v55 = vadd.f32 %v7513_v17, %v7502_v38  ;;  %v7506_v24 = vpop.f32.mrb[111].mxu0  ;;  %v7555_v17 = vrot.slane %v7524_v42, %v10874_v61 }
0x1a83   :  { %v7521_v59 = vadd.f32 %v7517_v15, %v7504_v22  ;;  %v7568_v22 = vrot.slane %v7525_v26, %v10874_v61 }
0x1a84   :  { %v7522_v12 = vmax.f32 %v7520_v55, 0.0 }
0x1a85   :  { %v7523_v63 = vmax.f32 %v7521_v59, 0.0 }
0x1a86   :  { %v7527_v19 = vsel %vm7526_vm4, %v7522_v12, 0.0 }
0x1a87   :  { %v7528_v29 = vsel %vm7526_vm4, %v7523_v63, 0.0 }
0x1a88   :  { %v7529_v46 = vadd.f32 %v7528_v29, %v7527_v19  ;;  %v7607_v19 = vld [vmem:[%s12206_s16] sm:$0x3] }
0x1a89   :  { %v7612_v29 = vrot.slane %v7607_v19, %v10877_v62 }
0x1a8a   :  { %7530 = vadd.xlane.f32.xlu0 %v7529_v46  ;;  %v7616_v46 = vrot.slane %v7607_v19, %v10874_v61 }
0x1b17   :  { %v7531_v21 = vpop.xlane.xlu0 %7530 }
0x1b18   :  { %v7532_v47 = vmul.f32 0.00390625, %v7531_v21 }
0x1b1a   :  { %v7533_v34 = vsub.f32 %v7522_v12, %v7532_v47  ;;  %v7534_v0 = vsub.f32 %v7523_v63, %v7532_v47 }
0x1b1c   :  { %v7535_v13 = vmul.f32 %v7533_v34, %v7533_v34  ;;  %v7536_v50 = vmul.f32 %v7534_v0, %v7534_v0 }
0x1b1e   :  { %v7537_v35 = vsel %vm7526_vm4, %v7535_v13, 0.0  ;;  %v7538_v6 = vsel %vm7526_vm4, %v7536_v50, 0.0  ;;  %v10039_v13 = vld [vmem:[#allocation13 + $0x50] sm:$0xff]  }
0x1b1f   :  { %v7539_v57 = vadd.f32 %v7538_v6, %v7537_v35  ;;  %v10040_v50 = vld [vmem:[#allocation13 + $0x10] sm:$0xff]   ;;  %8808 = vmatprep.subr.bf16.mxu0 %v10039_v13  ;;  %v10041_v35 = vld [vmem:[#allocation13 + $0x58] sm:$0xff]  }
0x1b20   :  { %8809 = vmatpush3.bf16.msra.mxu0 %v10040_v50  ;;  %v10042_v6 = vld [vmem:[#allocation13 + $0x18] sm:$0xff]  }
0x1b21   :  { %7540 = vadd.xlane.f32.xlu1 %v7539_v57  ;;  %8810 = vmatprep.subr.bf16.mxu0 %v10041_v35  ;;  %v10043_v57 = vld [vmem:[#allocation13 + $0x60] sm:$0xff]  }
0x1b24   :  { %8811 = vmatpush3.bf16.msra.mxu0 %v10042_v6 }
0x1b25   :  { %8812 = vmatprep.subr.bf16.mxu0 %v10043_v57 }
0x1b28   :  { %8813 = vmatpush3.bf16.msra.mxu0 %v10044_v31 }
0x1b29   :  { %8814 = vmatprep.subr.bf16.mxu0 %v10045_v49 }
0x1b2c   :  { %8815 = vmatpush3.bf16.msra.mxu0 %v10046_v53 }
0x1b2d   :  { %8816 = vmatprep.subr.bf16.mxu0 %v10047_v20 }
0x1b30   :  { %8817 = vmatpush3.bf16.msra.mxu0 %v10048_v39 }
0x1b31   :  { %8818 = vmatprep.subr.bf16.mxu0 %v10049_v54 }
0x1b34   :  { %8819 = vmatpush3.bf16.msra.mxu0 %v10050_v44 }
0x1bae   :  { %v7541_v5 = vpop.xlane.xlu1 %7540 }
0x1baf   :  { %v7542_v28 = vmul.f32 0.00390625, %v7541_v5  ;;  %v7848_v5 = vrot.slane %v7822_v11, %v10877_v62 }
0x1bb1   :  { %v7543_v2 = vadd.f32 1e-05, %v7542_v28  ;;  %v7852_v28 = vrot.slane %v7822_v11, %v10874_v61 }
0x1bb3   :  { %10219 = vrsqrt.f32 %v7543_v2 }
0x1bbd   :  { %v10220_v30 = vpop.eup %10219 }
0x1bbe   :  { %v7545_v15 = vmul.f32 %v10220_v30, %v7533_v34  ;;  %v7546_v38 = vmul.f32 %v10220_v30, %v7534_v0 }
0x1bc0   :  { %v7558_v36 = vmul.f32 %v7551_v32, %v7545_v15  ;;  %v7559_v55 = vmul.f32 %v7555_v17, %v7546_v38  ;;  %v7861_v32 = vrot.slane %v7823_v8, %v10877_v62  ;;  %v7865_v17 = vrot.slane %v7823_v8, %v10874_v61 }
0x1bc2   :  { %v7571_v24 = vadd.f32 %v7564_v37, %v7558_v36  ;;  %v7572_v59 = vadd.f32 %v7568_v22, %v7559_v55 }
0x1bc4   :  { %v7573_v12 = vpack.c.bf16 %v7571_v24, %v7571_v24  ;;  %v7574_v63 = vpack.c.bf16 %v7572_v59, %v7572_v59  ;;  %v8723_v24 = vld [vmem:[%s10665_s4] ss:$0 sm:$0xff] }
0x1bc6   :  { %7811 = vmatprep.mubr.bf16.mxu1 %v7574_v63 }
0x1bc7   :  { %7812 = vmatmul.mubr.bf16.vlgmr.msra.gmra.mrb[136].mxu1 %v7573_v12 }
0x1c9a   :  { %v7813_v16 = vpop.f32.mrb[136].mxu1 }
0x1c9b   :  { %v7814_v41 = vadd.f32 %v7813_v16, %v7612_v29  ;;  %v7815_v23 = vpop.f32.mrb[137].mxu1 }
0x1c9c   :  { %v7816_v51 = vadd.f32 %v7815_v23, %v7616_v46  ;;  %v7817_v60 = vpop.f32.mrb[138].mxu1 }
0x1c9d   :  { %v7820_v1 = vmax.f32 %v7814_v41, 0.0  ;;  %v7818_v14 = vpop.f32.mrb[139].mxu1 }
0x1c9e   :  { %v7821_v45 = vmax.f32 %v7816_v51, 0.0 }
0x1c9f   :  { %v7824_v25 = vsel %vm7526_vm4, %v7820_v1, 0.0 }
0x1ca0   :  { %v7825_v33 = vsel %vm7526_vm4, %v7821_v45, 0.0 }
0x1ca1   :  { %v7826_v3 = vadd.f32 %v7825_v33, %v7824_v25 }
0x1ca3   :  { %7827 = vadd.xlane.f32.xlu0 %v7826_v3 }
0x1d30   :  { %v7828_v43 = vpop.xlane.xlu0 %7827 }
0x1d31   :  { %v7829_v52 = vmul.f32 0.00390625, %v7828_v43 }
0x1d33   :  { %v7830_v9 = vsub.f32 %v7820_v1, %v7829_v52  ;;  %v7831_v4 = vsub.f32 %v7821_v45, %v7829_v52 }
0x1d35   :  { %v7832_v10 = vmul.f32 %v7830_v9, %v7830_v9  ;;  %v7833_v21 = vmul.f32 %v7831_v4, %v7831_v4 }
0x1d37   :  { %v7834_v47 = vsel %vm7526_vm4, %v7832_v10, 0.0  ;;  %v7835_v34 = vsel %vm7526_vm4, %v7833_v21, 0.0 }
0x1d38   :  { %v7836_v0 = vadd.f32 %v7835_v34, %v7834_v47 }
0x1d3a   :  { %7837 = vadd.xlane.f32.xlu1 %v7836_v0 }
0x1dc7   :  { %v7838_v27 = vpop.xlane.xlu1 %7837 }
0x1dc8   :  { %v7839_v58 = vmul.f32 0.00390625, %v7838_v27 }
0x1dca   :  { %v7840_v48 = vadd.f32 1e-05, %v7839_v58 }
0x1dcc   :  { %10221 = vrsqrt.f32 %v7840_v48 }
0x1dd6   :  { %v10222_v2 = vpop.eup %10221 }
0x1dd7   :  { %v7842_v42 = vmul.f32 %v10222_v2, %v7830_v9  ;;  %v7843_v26 = vmul.f32 %v10222_v2, %v7831_v4 }
0x1dd9   :  { %v7856_v30 = vmul.f32 %v7852_v28, %v7843_v26  ;;  %v7855_v15 = vmul.f32 %v7848_v5, %v7842_v42 }
0x1ddb   :  { %v7869_v38 = vadd.f32 %v7865_v17, %v7856_v30  ;;  %v7868_v37 = vadd.f32 %v7861_v32, %v7855_v15 }
0x1ddd   :  { %v7871_v22 = vpack.c.bf16 %v7869_v38, %v7869_v38  ;;  %v7870_v36 = vpack.c.bf16 %v7868_v37, %v7868_v37 }
0x1ddf   :  { %8039 = vmatprep.mubr.bf16.mxu0 %v7871_v22 }
0x1de0   :  { %8040 = vmatmul.mubr.bf16.vlgmr.msra.gmra.mrb[112].mxu0 %v7870_v36 }
0x1eb3   :  { %v8820_v55 = vpop.f32.mrb[112].mxu0 }
0x1eb4   :  { %v8821_v59 = vpop.f32.mrb[113].mxu0 }
0x1eb5   :  { %v8822_v12 = vadd.f32 %v8821_v59, %v8820_v55  ;;  %v8823_v63 = vpop.f32.mrb[114].mxu0 }
0x1eb6   :  { %v8824_v19 = vpop.f32.mrb[115].mxu0 }
0x1eb7   :  { %v8042_v29 = vadd.f32 %v8822_v12, %v8723_v24 }
0x1eb9   :  { %8047 = vst [vmem:[%s10670_s14] sm:$0x3] %v8042_v29 }
0x1eba   :  { %8052 = vsyncpa [#allocation3], 1 }
0x1ebb   :  { %8053 = vsyncpa [#allocation5], 1 }
0x1ebc   :  { %8054 = vsyncpa [#allocation8], 1 }
0x1ebd   :  { %8055 = vsyncpa [#allocation11], 1 }
0x1ebe   :  { %8056 = vsyncpa [#allocation14], 1 }

</bundles_post_ra>
